<compile_context>
chip_gen: v7x
topology: tpu7x:2x2x1
jax: 0.10.0
libtpu: 0.0.40
codegen_flags: <defaults>
</compile_context>

<pallas_src>
import functools

import jax
import jax.numpy as jnp
from jax.experimental import pallas as pl
from jax.experimental.pallas import tpu as pltpu


# ----------------------------------------------------------------------------
# Generic fused linear:  out = x @ w + b   (bf16 operands, f32 accumulation)
# ----------------------------------------------------------------------------

def _linear_kernel(x_ref, w_ref, b_ref, o_ref):
    o_ref[...] = (jnp.dot(x_ref[...], w_ref[...],
                          preferred_element_type=jnp.float32) + b_ref[...])


def linear_pallas(x, w, b):
    """x:(M,K) @ w:(K,N) + b:(N,).  Pads M->mult of 8, N->mult of 128 so the store
    is lane-dense; slices the result back outside.  K must already be 128-friendly."""
    M, K = x.shape
    N = w.shape[1]
    Mp = ((M + 7) // 8) * 8
    Np = ((N + 127) // 128) * 128
    x_p = jnp.pad(x, ((0, Mp - M), (0, 0))).astype(jnp.bfloat16)
    w_p = jnp.pad(w, ((0, 0), (0, Np - N))).astype(jnp.bfloat16)
    b_p = jnp.pad(b, (0, Np - N)).reshape(1, Np).astype(jnp.float32)
    out = pl.pallas_call(
        _linear_kernel,
        out_shape=jax.ShapeDtypeStruct((Mp, Np), jnp.float32),
        grid=(1,),
        in_specs=[
            pl.BlockSpec((Mp, K), lambda i: (0, 0)),
            pl.BlockSpec((K, Np), lambda i: (0, 0)),
            pl.BlockSpec((1, Np), lambda i: (0, 0)),
        ],
        out_specs=pl.BlockSpec((Mp, Np), lambda i: (0, 0)),
        compiler_params=pltpu.CompilerParams(dimension_semantics=("arbitrary",)),
    )(x_p, w_p, b_p)
    return out[:M, :N]


# ----------------------------------------------------------------------------
# conv1 (im2col matmul) + BN + ReLU + ConstantPad + MaxPool(8), fused.
# Zero padding before the pool is exact because it follows a ReLU (values >= 0).
# ----------------------------------------------------------------------------

def conv1_pool(patches, w, scale, shift, *, pool_k, pool_pad):
    """patches:(N,Lc,KC) bf16, w:(KC,Cout) bf16 -> pooled (N,Lpool,Cout) bf16."""
    N, Lc, KC = patches.shape
    Cout = w.shape[1]
    Lpool = (Lc + pool_pad[0] + pool_pad[1]) // pool_k

    def kernel(p_ref, w_ref, s_ref, b_ref, o_ref):
        y = jnp.dot(p_ref[0], w_ref[...], preferred_element_type=jnp.float32)
        y = jnp.maximum(y * s_ref[...] + b_ref[...], 0.0)          # (Lc, Cout) f32
        parts = []
        if pool_pad[0]:
            parts.append(jnp.zeros((pool_pad[0], Cout), jnp.float32))
        parts.append(y)
        if pool_pad[1]:
            parts.append(jnp.zeros((pool_pad[1], Cout), jnp.float32))
        y = jnp.concatenate(parts, axis=0)[:Lpool * pool_k]
        pooled = jnp.max(y.reshape(Lpool, pool_k, Cout), axis=1)
        o_ref[0] = pooled.astype(o_ref.dtype)

    return pl.pallas_call(
        kernel,
        out_shape=jax.ShapeDtypeStruct((N, Lpool, Cout), jnp.bfloat16),
        grid=(N,),
        in_specs=[
            pl.BlockSpec((1, Lc, KC), lambda i: (i, 0, 0)),
            pl.BlockSpec((KC, Cout), lambda i: (0, 0)),
            pl.BlockSpec((1, Cout), lambda i: (0, 0)),
            pl.BlockSpec((1, Cout), lambda i: (0, 0)),
        ],
        out_specs=pl.BlockSpec((1, Lpool, Cout), lambda i: (i, 0, 0)),
        compiler_params=pltpu.CompilerParams(dimension_semantics=("parallel",)),
    )(patches, w, scale, shift)


# ----------------------------------------------------------------------------
# conv2 + conv3 + conv4 (each pad+conv+BN+ReLU) + pad + MaxPool(4), all fused.
# No HBM im2col: each conv is an accumulation of K shifted-slice matmuls.
# ----------------------------------------------------------------------------

def conv234_pool(x, w2, s2, b2, w3, s3, b3, w4, s4, b4, *,
                 conv_pad, pool_k, pool_pad):
    """x:(N,Lp,Cin) bf16 (already padded for conv2); w*: (K,Cin,Cout) bf16.
    Returns pooled activations (N, Lpool, Cout) bf16."""
    N, Lp, Cin = x.shape
    K, _, Cout = w2.shape
    Lc = Lp - K + 1                                   # stride-1 conv output length
    Lpool = (Lc + pool_pad[0] + pool_pad[1]) // pool_k
    padl, padr = conv_pad

    def kernel(x_ref, w2_ref, s2_ref, b2_ref, w3_ref, s3_ref, b3_ref,
               w4_ref, s4_ref, b4_ref, o_ref):

        def conv(xp, w_ref, s_ref, b_ref):            # xp: (Lp, Cin) bf16
            acc = jnp.zeros((Lc, Cout), jnp.float32)
            for k in range(K):                        # unrolled tap accumulation
                acc += jnp.dot(xp[k:k + Lc, :], w_ref[k],
                               preferred_element_type=jnp.float32)
            return jnp.maximum(acc * s_ref[...] + b_ref[...], 0.0)

        def repad(y):                                 # conv padding between blocks
            zl = jnp.zeros((padl, Cout), jnp.float32)
            zr = jnp.zeros((padr, Cout), jnp.float32)
            return jnp.concatenate([zl, y, zr], axis=0).astype(jnp.bfloat16)

        y = conv(x_ref[0], w2_ref, s2_ref, b2_ref)
        y = conv(repad(y), w3_ref, s3_ref, b3_ref)
        y = conv(repad(y), w4_ref, s4_ref, b4_ref)

        parts = []
        if pool_pad[0]:
            parts.append(jnp.zeros((pool_pad[0], Cout), jnp.float32))
        parts.append(y)
        if pool_pad[1]:
            parts.append(jnp.zeros((pool_pad[1], Cout), jnp.float32))
        y = jnp.concatenate(parts, axis=0)[:Lpool * pool_k]
        o_ref[0] = jnp.max(y.reshape(Lpool, pool_k, Cout), axis=1).astype(o_ref.dtype)

    wspec = pl.BlockSpec((K, Cin, Cout), lambda i: (0, 0, 0))
    vspec = pl.BlockSpec((1, Cout), lambda i: (0, 0))
    return pl.pallas_call(
        kernel,
        out_shape=jax.ShapeDtypeStruct((N, Lpool, Cout), jnp.bfloat16),
        grid=(N,),
        in_specs=[pl.BlockSpec((1, Lp, Cin), lambda i: (i, 0, 0)),
                  wspec, vspec, vspec, wspec, vspec, vspec, wspec, vspec, vspec],
        out_specs=pl.BlockSpec((1, Lpool, Cout), lambda i: (i, 0, 0)),
        compiler_params=pltpu.CompilerParams(dimension_semantics=("parallel",)),
    )(x, w2, s2, b2, w3, s3, b3, w4, s4, b4)


# ----------------------------------------------------------------------------
# LSTM recurrence (input projection hoisted out), gridded over time.
# ----------------------------------------------------------------------------

def _lstm_kernel(gx_ref, whh_ref, h_ref, h_scr, c_scr):
    t = pl.program_id(0)

    @pl.when(t == 0)
    def _():
        h_scr[...] = jnp.zeros_like(h_scr)
        c_scr[...] = jnp.zeros_like(c_scr)

    H = h_scr.shape[1]
    gates = gx_ref[0] + jnp.dot(h_scr[...].astype(jnp.bfloat16), whh_ref[...],
                                preferred_element_type=jnp.float32)
    # PyTorch LSTM gate ordering: input, forget, cell(g), output.
    i_g = jax.nn.sigmoid(gates[:, 0 * H:1 * H])
    f_g = jax.nn.sigmoid(gates[:, 1 * H:2 * H])
    g_g = jnp.tanh(gates[:, 2 * H:3 * H])
    o_g = jax.nn.sigmoid(gates[:, 3 * H:4 * H])
    c_new = f_g * c_scr[...] + i_g * g_g
    h_new = o_g * jnp.tanh(c_new)
    c_scr[...] = c_new
    h_scr[...] = h_new
    h_ref[0] = h_new                                   # lane-dense (B, 128) store


def lstm_pallas(gates_x, w_hh_t):
    """gates_x: (T, B, 4H) f32 precomputed x@W_ih + b;  w_hh_t: (H, 4H) bf16.
    Returns all hidden states (T, B, H) f32.  Time axis must stay sequential."""
    T, B, G = gates_x.shape
    H = w_hh_t.shape[0]
    return pl.pallas_call(
        _lstm_kernel,
        out_shape=jax.ShapeDtypeStruct((T, B, H), jnp.float32),
        grid=(T,),
        in_specs=[
            pl.BlockSpec((1, B, G), lambda t: (t, 0, 0)),
            pl.BlockSpec((H, G), lambda t: (0, 0)),
        ],
        out_specs=pl.BlockSpec((1, B, H), lambda t: (t, 0, 0)),
        scratch_shapes=[pltpu.VMEM((B, H), jnp.float32),
                        pltpu.VMEM((B, H), jnp.float32)],
        compiler_params=pltpu.CompilerParams(dimension_semantics=("arbitrary",)),
    )(gates_x, w_hh_t)


# ----------------------------------------------------------------------------
# Parameters (BN folded into scale/shift; module uses BatchNorm eps = 1e-3)
# ----------------------------------------------------------------------------

def fold_bn(gamma, beta, mean, var, eps=1e-3):
    scale = gamma / jnp.sqrt(var + eps)
    shift = beta - mean * scale
    return (scale.reshape(1, -1).astype(jnp.float32),
            shift.reshape(1, -1).astype(jnp.float32))


def init_params(key, cfg):
    sf, cin = cfg["sf"], cfg["in_channels"]
    H, C = cfg["n_rnn_units"], cfg["n_classes"]
    fs = int(sf / 2.0)
    ki = iter(jax.random.split(key, 32))
    p = {}

    def bn(nf):
        gamma = 1.0 + 0.1 * jax.random.normal(next(ki), (nf,), jnp.float32)
        beta = 0.1 * jax.random.normal(next(ki), (nf,), jnp.float32)
        mean = 0.1 * jax.random.normal(next(ki), (nf,), jnp.float32)
        var = 1.0 + 0.1 * jax.random.uniform(next(ki), (nf,), jnp.float32)
        return fold_bn(gamma, beta, mean, var)

    # conv1: (Cout,Cin,K) -> (K*Cin, Cout), contraction zero-padded to a mult of 64.
    w1 = jax.random.normal(next(ki), (128, cin, fs), jnp.float32) / jnp.sqrt(cin * fs)
    w1 = jnp.transpose(w1, (2, 1, 0)).reshape(fs * cin, 128)
    kc_pad = ((fs * cin + 63) // 64) * 64
    p["conv1_w"] = jnp.pad(w1, ((0, kc_pad - fs * cin), (0, 0))).astype(jnp.bfloat16)
    p["bn1"] = bn(128)

    # conv2..4: (Cout,Cin,K) -> (K, Cin, Cout) bf16 (tap-indexed inside the kernel).
    for i in (2, 3, 4):
        w = jax.random.normal(next(ki), (128, 128, 8), jnp.float32) / jnp.sqrt(128 * 8)
        p[f"conv{i}_w"] = jnp.transpose(w, (2, 1, 0)).astype(jnp.bfloat16)
        p[f"bn{i}"] = bn(128)

    w_ih = jax.random.normal(next(ki), (4 * H, 2048), jnp.float32) / jnp.sqrt(2048.0)
    w_hh = jax.random.normal(next(ki), (4 * H, H), jnp.float32) / jnp.sqrt(float(H))
    b_ih = 0.01 * jax.random.normal(next(ki), (4 * H,), jnp.float32)
    b_hh = 0.01 * jax.random.normal(next(ki), (4 * H,), jnp.float32)
    p["w_ih_t"] = jnp.transpose(w_ih)                       # (2048, 4H)
    p["b_gates"] = b_ih + b_hh
    p["w_hh_t"] = jnp.transpose(w_hh).astype(jnp.bfloat16)  # (H, 4H)
    w_clf = jax.random.normal(next(ki), (C, H), jnp.float32) / jnp.sqrt(float(H))
    p["w_clf_t"] = jnp.transpose(w_clf)                     # (H, C)
    p["b_clf"] = 0.01 * jax.random.normal(next(ki), (C,), jnp.float32)
    return p


# ----------------------------------------------------------------------------
# Full forward pass
# ----------------------------------------------------------------------------

def net_forward(x, params, cfg):
    # x: (batch, seq, in_channels, insamp), same convention as the PyTorch module.
    B, S, Cin, L = x.shape
    sf = cfg["sf"]
    K1 = int(sf / 2.0)
    stride1 = int(sf / 16.0)
    N = B * S

    # --- conv1 block: channels-last, slice-based im2col (no gather), bf16 ---
    h = jnp.transpose(x.reshape(N, Cin, L), (0, 2, 1))            # (N, L, Cin)
    h = jnp.pad(h, ((0, 0), (22, 22), (0, 0)))
    Lp1 = L + 44
    Lc1 = (Lp1 - K1) // stride1 + 1
    span = stride1 * (Lc1 - 1) + 1
    cols = [h[:, k:k + span:stride1, :] for k in range(K1)]       # K static slices
    patches = jnp.stack(cols, axis=2).reshape(N, Lc1, K1 * Cin)   # [k, cin] ordering
    KC = params["conv1_w"].shape[0]
    patches = jnp.pad(patches, ((0, 0), (0, 0), (0, KC - K1 * Cin)))
    patches = patches.astype(jnp.bfloat16)

    h = conv1_pool(patches, params["conv1_w"], *params["bn1"],
                   pool_k=8, pool_pad=(2, 2))                     # (N, 63, 128) bf16
    # Dropout(p=0.5): identity at inference.

    # --- conv2..4 + max_pool2, fused (per-sample grid, taps accumulated in-kernel) ---
    h = jnp.pad(h, ((0, 0), (3, 4), (0, 0)))                      # conv2 padding
    h = conv234_pool(h,
                     params["conv2_w"], *params["bn2"],
                     params["conv3_w"], *params["bn3"],
                     params["conv4_w"], *params["bn4"],
                     conv_pad=(3, 4), pool_k=4, pool_pad=(0, 1))  # (N, 16, 128) bf16

    # Flatten in PyTorch's (N, C, L) ordering, then Dropout (identity).
    feat = jnp.transpose(h, (0, 2, 1)).reshape(N, -1)             # (N, 2048)
    assert feat.shape[-1] == 2048, feat.shape

    # --- LSTM: input projection hoisted out of the recurrence (one MXU matmul) ---
    H = params["w_hh_t"].shape[0]
    gates_x = linear_pallas(feat, params["w_ih_t"], params["b_gates"])  # (N, 4H)
    gates_x = gates_x.reshape(B, S, 4 * H).transpose(1, 0, 2)           # (T, B, 4H)
    h_seq = lstm_pallas(gates_x, params["w_hh_t"])                      # (T, B, H)
    # rnn dropout: identity at inference.

    # --- classifier head: one lane-dense matmul over all timesteps ---
    h_flat = jnp.transpose(h_seq, (1, 0, 2)).reshape(B * S, H)
    y = linear_pallas(h_flat, params["w_clf_t"], params["b_clf"])       # (B*S, n_cls)
    return y.reshape(B, S, -1)


if __name__ == "__main__":
    cfg = dict(sf=100, in_channels=1, n_rnn_units=128, n_classes=5)
    B, S = 2, 3
    insamp = 30 * cfg["sf"]   # 3000 samples -> flattened CNN feature = 2048 (LSTM input)

    key = jax.random.PRNGKey(0)
    kx, kp = jax.random.split(key)
    x = jax.random.normal(kx, (B, S, cfg["in_channels"], insamp), jnp.float32)
    params = init_params(kp, cfg)

    fwd = jax.jit(functools.partial(net_forward, cfg=cfg))
    y = jax.block_until_ready(fwd(x, params))
    assert y.shape == (B, S, cfg["n_classes"]), y.shape
    assert bool(jnp.all(jnp.isfinite(y)))
    print("KERNEL_OK")
</pallas_src>

<mosaic_0001>
module attributes {stable_mosaic.version = 11 : i64} {
  func.func @kernel(%arg0: i32, %arg1: memref<1x500x64xbf16, #tpu.memory_space<vmem>>, %arg2: memref<64x128xbf16, #tpu.memory_space<vmem>>, %arg3: memref<1x128xf32, #tpu.memory_space<vmem>>, %arg4: memref<1x128xf32, #tpu.memory_space<vmem>>, %arg5: memref<1x63x128xbf16, #tpu.memory_space<vmem>>) attributes {dimension_semantics = [#tpu.dimension_semantics<parallel>], iteration_bounds = array<i64: 6>, scalar_prefetch = 0 : i64, scratch_operands = 0 : i64, tpu.core_type = #tpu.core_type<tc>, window_params = [{transform_indices = @transform_0, window_bounds = array<i64: 1, 500, 64>}, {pipeline_mode = #tpu.pipeline_mode<synchronous>, transform_indices = @transform_1, window_bounds = array<i64: 64, 128>}, {pipeline_mode = #tpu.pipeline_mode<synchronous>, transform_indices = @transform_2, window_bounds = array<i64: 1, 128>}, {pipeline_mode = #tpu.pipeline_mode<synchronous>, transform_indices = @transform_3, window_bounds = array<i64: 1, 128>}, {transform_indices = @transform_4, window_bounds = array<i64: 1, 63, 128>}]} {
    %c0 = arith.constant 0 : index
    %c0_0 = arith.constant 0 : index
    %c0_1 = arith.constant 0 : index
    %0 = vector.load %arg1[%c0, %c0_0, %c0_1] : memref<1x500x64xbf16, #tpu.memory_space<vmem>>, vector<1x500x64xbf16>
    %1 = vector.shape_cast %0 : vector<1x500x64xbf16> to vector<500x64xbf16>
    %c0_2 = arith.constant 0 : index
    %c0_3 = arith.constant 0 : index
    %2 = vector.load %arg2[%c0_2, %c0_3] : memref<64x128xbf16, #tpu.memory_space<vmem>>, vector<64x128xbf16>
    %cst = arith.constant dense<0.000000e+00> : vector<500x128xf32>
    %3 = tpu.matmul %1, %2, %cst {dimension_numbers = #tpu.dot_dimension_numbers<[1], [0], [0], [1], [0, 0, 1, 1], [], []>} : vector<500x64xbf16>, vector<64x128xbf16>, vector<500x128xf32> -> vector<500x128xf32>
    %c0_4 = arith.constant 0 : index
    %c0_5 = arith.constant 0 : index
    %4 = vector.load %arg3[%c0_4, %c0_5] : memref<1x128xf32, #tpu.memory_space<vmem>>, vector<1x128xf32>
    %5 = vector.broadcast %4 : vector<1x128xf32> to vector<500x128xf32>
    %6 = arith.mulf %3, %5 : vector<500x128xf32>
    %c0_6 = arith.constant 0 : index
    %c0_7 = arith.constant 0 : index
    %7 = vector.load %arg4[%c0_6, %c0_7] : memref<1x128xf32, #tpu.memory_space<vmem>>, vector<1x128xf32>
    %8 = vector.broadcast %7 : vector<1x128xf32> to vector<500x128xf32>
    %9 = arith.addf %6, %8 : vector<500x128xf32>
    %cst_8 = arith.constant 0.000000e+00 : f32
    %10 = vector.broadcast %cst_8 : f32 to vector<500x128xf32>
    %11 = arith.maximumf %9, %10 : vector<500x128xf32>
    %cst_9 = arith.constant 0.000000e+00 : f32
    %12 = vector.broadcast %cst_9 : f32 to vector<2x128xf32>
    %cst_10 = arith.constant 0.000000e+00 : f32
    %13 = vector.broadcast %cst_10 : f32 to vector<2x128xf32>
    %14 = tpu.concatenate %12, %11, %13 in 0 : vector<2x128xf32>, vector<500x128xf32>, vector<2x128xf32> -> vector<504x128xf32>
    %15 = vector.shape_cast %14 : vector<504x128xf32> to vector<63x8x128xf32>
    %cst_11 = arith.constant dense<0xFF800000> : vector<63x128xf32>
    %16 = vector.multi_reduction <maximumf>, %15, %cst_11 [1] : vector<63x8x128xf32> to vector<63x128xf32>
    %17 = arith.truncf %16 : vector<63x128xf32> to vector<63x128xbf16>
    %c0_12 = arith.constant 0 : index
    %c0_13 = arith.constant 0 : index
    %c0_14 = arith.constant 0 : index
    %18 = vector.load %arg5[%c0_12, %c0_13, %c0_14] : memref<1x63x128xbf16, #tpu.memory_space<vmem>>, vector<1x63x128xbf16>
    %19 = vector.shape_cast %18 : vector<1x63x128xbf16> to vector<63x128xbf16>
    %20 = vector.shape_cast %17 : vector<63x128xbf16> to vector<1x63x128xbf16>
    tpu.vector_store %arg5[%c0_12, %c0_13, %c0_14], %20 {strides = array<i32>} : memref<1x63x128xbf16, #tpu.memory_space<vmem>>, vector<1x63x128xbf16>,
    return
  }
  func.func @transform_0(%arg0: i32) -> (i32, i32, i32) {
    %c0_i32 = arith.constant 0 : i32
    %c0_i32_0 = arith.constant 0 : i32
    %c0_i32_1 = arith.constant 0 : i32
    return %arg0, %c0_i32, %c0_i32_0 : i32, i32, i32
  }
  func.func @transform_1(%arg0: i32) -> (i32, i32) {
    %c0_i32 = arith.constant 0 : i32
    %c0_i32_0 = arith.constant 0 : i32
    %c0_i32_1 = arith.constant 0 : i32
    return %c0_i32, %c0_i32_0 : i32, i32
  }
  func.func @transform_2(%arg0: i32) -> (i32, i32) {
    %c0_i32 = arith.constant 0 : i32
    %c0_i32_0 = arith.constant 0 : i32
    %c0_i32_1 = arith.constant 0 : i32
    return %c0_i32, %c0_i32_0 : i32, i32
  }
  func.func @transform_3(%arg0: i32) -> (i32, i32) {
    %c0_i32 = arith.constant 0 : i32
    %c0_i32_0 = arith.constant 0 : i32
    %c0_i32_1 = arith.constant 0 : i32
    return %c0_i32, %c0_i32_0 : i32, i32
  }
  func.func @transform_4(%arg0: i32) -> (i32, i32, i32) {
    %c0_i32 = arith.constant 0 : i32
    %c0_i32_0 = arith.constant 0 : i32
    %c0_i32_1 = arith.constant 0 : i32
    return %arg0, %c0_i32, %c0_i32_0 : i32, i32, i32
  }
}

module attributes {stable_mosaic.version = 11 : i64} {
  func.func @kernel(%arg0: i32, %arg1: memref<1x70x128xbf16, #tpu.memory_space<vmem>>, %arg2: memref<8x128x128xbf16, #tpu.memory_space<vmem>>, %arg3: memref<1x128xf32, #tpu.memory_space<vmem>>, %arg4: memref<1x128xf32, #tpu.memory_space<vmem>>, %arg5: memref<8x128x128xbf16, #tpu.memory_space<vmem>>, %arg6: memref<1x128xf32, #tpu.memory_space<vmem>>, %arg7: memref<1x128xf32, #tpu.memory_space<vmem>>, %arg8: memref<8x128x128xbf16, #tpu.memory_space<vmem>>, %arg9: memref<1x128xf32, #tpu.memory_space<vmem>>, %arg10: memref<1x128xf32, #tpu.memory_space<vmem>>, %arg11: memref<1x16x128xbf16, #tpu.memory_space<vmem>>) attributes {dimension_semantics = [#tpu.dimension_semantics<parallel>], iteration_bounds = array<i64: 6>, scalar_prefetch = 0 : i64, scratch_operands = 0 : i64, tpu.core_type = #tpu.core_type<tc>, window_params = [{transform_indices = @transform_0, window_bounds = array<i64: 1, 70, 128>}, {pipeline_mode = #tpu.pipeline_mode<synchronous>, transform_indices = @transform_1, window_bounds = array<i64: 8, 128, 128>}, {pipeline_mode = #tpu.pipeline_mode<synchronous>, transform_indices = @transform_2, window_bounds = array<i64: 1, 128>}, {pipeline_mode = #tpu.pipeline_mode<synchronous>, transform_indices = @transform_3, window_bounds = array<i64: 1, 128>}, {pipeline_mode = #tpu.pipeline_mode<synchronous>, transform_indices = @transform_4, window_bounds = array<i64: 8, 128, 128>}, {pipeline_mode = #tpu.pipeline_mode<synchronous>, transform_indices = @transform_5, window_bounds = array<i64: 1, 128>}, {pipeline_mode = #tpu.pipeline_mode<synchronous>, transform_indices = @transform_6, window_bounds = array<i64: 1, 128>}, {pipeline_mode = #tpu.pipeline_mode<synchronous>, transform_indices = @transform_7, window_bounds = array<i64: 8, 128, 128>}, {pipeline_mode = #tpu.pipeline_mode<synchronous>, transform_indices = @transform_8, window_bounds = array<i64: 1, 128>}, {pipeline_mode = #tpu.pipeline_mode<synchronous>, transform_indices = @transform_9, window_bounds = array<i64: 1, 128>}, {transform_indices = @transform_10, window_bounds = array<i64: 1, 16, 128>}]} {
    %c0 = arith.constant 0 : index
    %c0_0 = arith.constant 0 : index
    %c0_1 = arith.constant 0 : index
    %0 = vector.load %arg1[%c0, %c0_0, %c0_1] : memref<1x70x128xbf16, #tpu.memory_space<vmem>>, vector<1x70x128xbf16>
    %1 = vector.shape_cast %0 : vector<1x70x128xbf16> to vector<70x128xbf16>
    %cst = arith.constant 0.000000e+00 : f32
    %2 = vector.broadcast %cst : f32 to vector<63x128xf32>
    %3 = vector.extract_strided_slice %1 {offsets = [0, 0], sizes = [63, 128], strides = [1, 1]} : vector<70x128xbf16> to vector<63x128xbf16>
    %c0_2 = arith.constant 0 : index
    %c0_3 = arith.constant 0 : index
    %c0_4 = arith.constant 0 : index
    %4 = vector.load %arg2[%c0_2, %c0_3, %c0_4] : memref<8x128x128xbf16, #tpu.memory_space<vmem>>, vector<1x128x128xbf16>
    %5 = vector.shape_cast %4 : vector<1x128x128xbf16> to vector<128x128xbf16>
    %cst_5 = arith.constant dense<0.000000e+00> : vector<63x128xf32>
    %6 = tpu.matmul %3, %5, %cst_5 {dimension_numbers = #tpu.dot_dimension_numbers<[1], [0], [0], [1], [0, 0, 1, 1], [], []>} : vector<63x128xbf16>, vector<128x128xbf16>, vector<63x128xf32> -> vector<63x128xf32>
    %7 = arith.addf %2, %6 : vector<63x128xf32>
    %8 = vector.extract_strided_slice %1 {offsets = [1, 0], sizes = [63, 128], strides = [1, 1]} : vector<70x128xbf16> to vector<63x128xbf16>
    %c1 = arith.constant 1 : index
    %c0_6 = arith.constant 0 : index
    %c0_7 = arith.constant 0 : index
    %9 = vector.load %arg2[%c1, %c0_6, %c0_7] : memref<8x128x128xbf16, #tpu.memory_space<vmem>>, vector<1x128x128xbf16>
    %10 = vector.shape_cast %9 : vector<1x128x128xbf16> to vector<128x128xbf16>
    %cst_8 = arith.constant dense<0.000000e+00> : vector<63x128xf32>
    %11 = tpu.matmul %8, %10, %cst_8 {dimension_numbers = #tpu.dot_dimension_numbers<[1], [0], [0], [1], [0, 0, 1, 1], [], []>} : vector<63x128xbf16>, vector<128x128xbf16>, vector<63x128xf32> -> vector<63x128xf32>
    %12 = arith.addf %7, %11 : vector<63x128xf32>
    %13 = vector.extract_strided_slice %1 {offsets = [2, 0], sizes = [63, 128], strides = [1, 1]} : vector<70x128xbf16> to vector<63x128xbf16>
    %c2 = arith.constant 2 : index
    %c0_9 = arith.constant 0 : index
    %c0_10 = arith.constant 0 : index
    %14 = vector.load %arg2[%c2, %c0_9, %c0_10] : memref<8x128x128xbf16, #tpu.memory_space<vmem>>, vector<1x128x128xbf16>
    %15 = vector.shape_cast %14 : vector<1x128x128xbf16> to vector<128x128xbf16>
    %cst_11 = arith.constant dense<0.000000e+00> : vector<63x128xf32>
    %16 = tpu.matmul %13, %15, %cst_11 {dimension_numbers = #tpu.dot_dimension_numbers<[1], [0], [0], [1], [0, 0, 1, 1], [], []>} : vector<63x128xbf16>, vector<128x128xbf16>, vector<63x128xf32> -> vector<63x128xf32>
    %17 = arith.addf %12, %16 : vector<63x128xf32>
    %18 = vector.extract_strided_slice %1 {offsets = [3, 0], sizes = [63, 128], strides = [1, 1]} : vector<70x128xbf16> to vector<63x128xbf16>
    %c3 = arith.constant 3 : index
    %c0_12 = arith.constant 0 : index
    %c0_13 = arith.constant 0 : index
    %19 = vector.load %arg2[%c3, %c0_12, %c0_13] : memref<8x128x128xbf16, #tpu.memory_space<vmem>>, vector<1x128x128xbf16>
    %20 = vector.shape_cast %19 : vector<1x128x128xbf16> to vector<128x128xbf16>
    %cst_14 = arith.constant dense<0.000000e+00> : vector<63x128xf32>
    %21 = tpu.matmul %18, %20, %cst_14 {dimension_numbers = #tpu.dot_dimension_numbers<[1], [0], [0], [1], [0, 0, 1, 1], [], []>} : vector<63x128xbf16>, vector<128x128xbf16>, vector<63x128xf32> -> vector<63x128xf32>
    %22 = arith.addf %17, %21 : vector<63x128xf32>
    %23 = vector.extract_strided_slice %1 {offsets = [4, 0], sizes = [63, 128], strides = [1, 1]} : vector<70x128xbf16> to vector<63x128xbf16>
    %c4 = arith.constant 4 : index
    %c0_15 = arith.constant 0 : index
    %c0_16 = arith.constant 0 : index
    %24 = vector.load %arg2[%c4, %c0_15, %c0_16] : memref<8x128x128xbf16, #tpu.memory_space<vmem>>, vector<1x128x128xbf16>
    %25 = vector.shape_cast %24 : vector<1x128x128xbf16> to vector<128x128xbf16>
    %cst_17 = arith.constant dense<0.000000e+00> : vector<63x128xf32>
    %26 = tpu.matmul %23, %25, %cst_17 {dimension_numbers = #tpu.dot_dimension_numbers<[1], [0], [0], [1], [0, 0, 1, 1], [], []>} : vector<63x128xbf16>, vector<128x128xbf16>, vector<63x128xf32> -> vector<63x128xf32>
    %27 = arith.addf %22, %26 : vector<63x128xf32>
    %28 = vector.extract_strided_slice %1 {offsets = [5, 0], sizes = [63, 128], strides = [1, 1]} : vector<70x128xbf16> to vector<63x128xbf16>
    %c5 = arith.constant 5 : index
    %c0_18 = arith.constant 0 : index
    %c0_19 = arith.constant 0 : index
    %29 = vector.load %arg2[%c5, %c0_18, %c0_19] : memref<8x128x128xbf16, #tpu.memory_space<vmem>>, vector<1x128x128xbf16>
    %30 = vector.shape_cast %29 : vector<1x128x128xbf16> to vector<128x128xbf16>
    %cst_20 = arith.constant dense<0.000000e+00> : vector<63x128xf32>
    %31 = tpu.matmul %28, %30, %cst_20 {dimension_numbers = #tpu.dot_dimension_numbers<[1], [0], [0], [1], [0, 0, 1, 1], [], []>} : vector<63x128xbf16>, vector<128x128xbf16>, vector<63x128xf32> -> vector<63x128xf32>
    %32 = arith.addf %27, %31 : vector<63x128xf32>
    %33 = vector.extract_strided_slice %1 {offsets = [6, 0], sizes = [63, 128], strides = [1, 1]} : vector<70x128xbf16> to vector<63x128xbf16>
    %c6 = arith.constant 6 : index
    %c0_21 = arith.constant 0 : index
    %c0_22 = arith.constant 0 : index
    %34 = vector.load %arg2[%c6, %c0_21, %c0_22] : memref<8x128x128xbf16, #tpu.memory_space<vmem>>, vector<1x128x128xbf16>
    %35 = vector.shape_cast %34 : vector<1x128x128xbf16> to vector<128x128xbf16>
    %cst_23 = arith.constant dense<0.000000e+00> : vector<63x128xf32>
    %36 = tpu.matmul %33, %35, %cst_23 {dimension_numbers = #tpu.dot_dimension_numbers<[1], [0], [0], [1], [0, 0, 1, 1], [], []>} : vector<63x128xbf16>, vector<128x128xbf16>, vector<63x128xf32> -> vector<63x128xf32>
    %37 = arith.addf %32, %36 : vector<63x128xf32>
    %38 = vector.extract_strided_slice %1 {offsets = [7, 0], sizes = [63, 128], strides = [1, 1]} : vector<70x128xbf16> to vector<63x128xbf16>
    %c7 = arith.constant 7 : index
    %c0_24 = arith.constant 0 : index
    %c0_25 = arith.constant 0 : index
    %39 = vector.load %arg2[%c7, %c0_24, %c0_25] : memref<8x128x128xbf16, #tpu.memory_space<vmem>>, vector<1x128x128xbf16>
    %40 = vector.shape_cast %39 : vector<1x128x128xbf16> to vector<128x128xbf16>
    %cst_26 = arith.constant dense<0.000000e+00> : vector<63x128xf32>
    %41 = tpu.matmul %38, %40, %cst_26 {dimension_numbers = #tpu.dot_dimension_numbers<[1], [0], [0], [1], [0, 0, 1, 1], [], []>} : vector<63x128xbf16>, vector<128x128xbf16>, vector<63x128xf32> -> vector<63x128xf32>
    %42 = arith.addf %37, %41 : vector<63x128xf32>
    %c0_27 = arith.constant 0 : index
    %c0_28 = arith.constant 0 : index
    %43 = vector.load %arg3[%c0_27, %c0_28] : memref<1x128xf32, #tpu.memory_space<vmem>>, vector<1x128xf32>
    %44 = vector.broadcast %43 : vector<1x128xf32> to vector<63x128xf32>
    %45 = arith.mulf %42, %44 : vector<63x128xf32>
    %c0_29 = arith.constant 0 : index
    %c0_30 = arith.constant 0 : index
    %46 = vector.load %arg4[%c0_29, %c0_30] : memref<1x128xf32, #tpu.memory_space<vmem>>, vector<1x128xf32>
    %47 = vector.broadcast %46 : vector<1x128xf32> to vector<63x128xf32>
    %48 = arith.addf %45, %47 : vector<63x128xf32>
    %cst_31 = arith.constant 0.000000e+00 : f32
    %49 = vector.broadcast %cst_31 : f32 to vector<63x128xf32>
    %50 = arith.maximumf %48, %49 : vector<63x128xf32>
    %cst_32 = arith.constant 0.000000e+00 : f32
    %51 = vector.broadcast %cst_32 : f32 to vector<3x128xf32>
    %cst_33 = arith.constant 0.000000e+00 : f32
    %52 = vector.broadcast %cst_33 : f32 to vector<4x128xf32>
    %53 = tpu.concatenate %51, %50, %52 in 0 : vector<3x128xf32>, vector<63x128xf32>, vector<4x128xf32> -> vector<70x128xf32>
    %54 = arith.truncf %53 : vector<70x128xf32> to vector<70x128xbf16>
    %cst_34 = arith.constant 0.000000e+00 : f32
    %55 = vector.broadcast %cst_34 : f32 to vector<63x128xf32>
    %56 = vector.extract_strided_slice %54 {offsets = [0, 0], sizes = [63, 128], strides = [1, 1]} : vector<70x128xbf16> to vector<63x128xbf16>
    %c0_35 = arith.constant 0 : index
    %c0_36 = arith.constant 0 : index
    %c0_37 = arith.constant 0 : index
    %57 = vector.load %arg5[%c0_35, %c0_36, %c0_37] : memref<8x128x128xbf16, #tpu.memory_space<vmem>>, vector<1x128x128xbf16>
    %58 = vector.shape_cast %57 : vector<1x128x128xbf16> to vector<128x128xbf16>
    %cst_38 = arith.constant dense<0.000000e+00> : vector<63x128xf32>
    %59 = tpu.matmul %56, %58, %cst_38 {dimension_numbers = #tpu.dot_dimension_numbers<[1], [0], [0], [1], [0, 0, 1, 1], [], []>} : vector<63x128xbf16>, vector<128x128xbf16>, vector<63x128xf32> -> vector<63x128xf32>
    %60 = arith.addf %55, %59 : vector<63x128xf32>
    %61 = vector.extract_strided_slice %54 {offsets = [1, 0], sizes = [63, 128], strides = [1, 1]} : vector<70x128xbf16> to vector<63x128xbf16>
    %c1_39 = arith.constant 1 : index
    %c0_40 = arith.constant 0 : index
    %c0_41 = arith.constant 0 : index
    %62 = vector.load %arg5[%c1_39, %c0_40, %c0_41] : memref<8x128x128xbf16, #tpu.memory_space<vmem>>, vector<1x128x128xbf16>
    %63 = vector.shape_cast %62 : vector<1x128x128xbf16> to vector<128x128xbf16>
    %cst_42 = arith.constant dense<0.000000e+00> : vector<63x128xf32>
    %64 = tpu.matmul %61, %63, %cst_42 {dimension_numbers = #tpu.dot_dimension_numbers<[1], [0], [0], [1], [0, 0, 1, 1], [], []>} : vector<63x128xbf16>, vector<128x128xbf16>, vector<63x128xf32> -> vector<63x128xf32>
    %65 = arith.addf %60, %64 : vector<63x128xf32>
    %66 = vector.extract_strided_slice %54 {offsets = [2, 0], sizes = [63, 128], strides = [1, 1]} : vector<70x128xbf16> to vector<63x128xbf16>
    %c2_43 = arith.constant 2 : index
    %c0_44 = arith.constant 0 : index
    %c0_45 = arith.constant 0 : index
    %67 = vector.load %arg5[%c2_43, %c0_44, %c0_45] : memref<8x128x128xbf16, #tpu.memory_space<vmem>>, vector<1x128x128xbf16>
    %68 = vector.shape_cast %67 : vector<1x128x128xbf16> to vector<128x128xbf16>
    %cst_46 = arith.constant dense<0.000000e+00> : vector<63x128xf32>
    %69 = tpu.matmul %66, %68, %cst_46 {dimension_numbers = #tpu.dot_dimension_numbers<[1], [0], [0], [1], [0, 0, 1, 1], [], []>} : vector<63x128xbf16>, vector<128x128xbf16>, vector<63x128xf32> -> vector<63x128xf32>
    %70 = arith.addf %65, %69 : vector<63x128xf32>
    %71 = vector.extract_strided_slice %54 {offsets = [3, 0], sizes = [63, 128], strides = [1, 1]} : vector<70x128xbf16> to vector<63x128xbf16>
    %c3_47 = arith.constant 3 : index
    %c0_48 = arith.constant 0 : index
    %c0_49 = arith.constant 0 : index
    %72 = vector.load %arg5[%c3_47, %c0_48, %c0_49] : memref<8x128x128xbf16, #tpu.memory_space<vmem>>, vector<1x128x128xbf16>
    %73 = vector.shape_cast %72 : vector<1x128x128xbf16> to vector<128x128xbf16>
    %cst_50 = arith.constant dense<0.000000e+00> : vector<63x128xf32>
    %74 = tpu.matmul %71, %73, %cst_50 {dimension_numbers = #tpu.dot_dimension_numbers<[1], [0], [0], [1], [0, 0, 1, 1], [], []>} : vector<63x128xbf16>, vector<128x128xbf16>, vector<63x128xf32> -> vector<63x128xf32>
    %75 = arith.addf %70, %74 : vector<63x128xf32>
    %76 = vector.extract_strided_slice %54 {offsets = [4, 0], sizes = [63, 128], strides = [1, 1]} : vector<70x128xbf16> to vector<63x128xbf16>
    %c4_51 = arith.constant 4 : index
    %c0_52 = arith.constant 0 : index
    %c0_53 = arith.constant 0 : index
    %77 = vector.load %arg5[%c4_51, %c0_52, %c0_53] : memref<8x128x128xbf16, #tpu.memory_space<vmem>>, vector<1x128x128xbf16>
    %78 = vector.shape_cast %77 : vector<1x128x128xbf16> to vector<128x128xbf16>
    %cst_54 = arith.constant dense<0.000000e+00> : vector<63x128xf32>
    %79 = tpu.matmul %76, %78, %cst_54 {dimension_numbers = #tpu.dot_dimension_numbers<[1], [0], [0], [1], [0, 0, 1, 1], [], []>} : vector<63x128xbf16>, vector<128x128xbf16>, vector<63x128xf32> -> vector<63x128xf32>
    %80 = arith.addf %75, %79 : vector<63x128xf32>
    %81 = vector.extract_strided_slice %54 {offsets = [5, 0], sizes = [63, 128], strides = [1, 1]} : vector<70x128xbf16> to vector<63x128xbf16>
    %c5_55 = arith.constant 5 : index
    %c0_56 = arith.constant 0 : index
    %c0_57 = arith.constant 0 : index
    %82 = vector.load %arg5[%c5_55, %c0_56, %c0_57] : memref<8x128x128xbf16, #tpu.memory_space<vmem>>, vector<1x128x128xbf16>
    %83 = vector.shape_cast %82 : vector<1x128x128xbf16> to vector<128x128xbf16>
    %cst_58 = arith.constant dense<0.000000e+00> : vector<63x128xf32>
    %84 = tpu.matmul %81, %83, %cst_58 {dimension_numbers = #tpu.dot_dimension_numbers<[1], [0], [0], [1], [0, 0, 1, 1], [], []>} : vector<63x128xbf16>, vector<128x128xbf16>, vector<63x128xf32> -> vector<63x128xf32>
    %85 = arith.addf %80, %84 : vector<63x128xf32>
    %86 = vector.extract_strided_slice %54 {offsets = [6, 0], sizes = [63, 128], strides = [1, 1]} : vector<70x128xbf16> to vector<63x128xbf16>
    %c6_59 = arith.constant 6 : index
    %c0_60 = arith.constant 0 : index
    %c0_61 = arith.constant 0 : index
    %87 = vector.load %arg5[%c6_59, %c0_60, %c0_61] : memref<8x128x128xbf16, #tpu.memory_space<vmem>>, vector<1x128x128xbf16>
    %88 = vector.shape_cast %87 : vector<1x128x128xbf16> to vector<128x128xbf16>
    %cst_62 = arith.constant dense<0.000000e+00> : vector<63x128xf32>
    %89 = tpu.matmul %86, %88, %cst_62 {dimension_numbers = #tpu.dot_dimension_numbers<[1], [0], [0], [1], [0, 0, 1, 1], [], []>} : vector<63x128xbf16>, vector<128x128xbf16>, vector<63x128xf32> -> vector<63x128xf32>
    %90 = arith.addf %85, %89 : vector<63x128xf32>
    %91 = vector.extract_strided_slice %54 {offsets = [7, 0], sizes = [63, 128], strides = [1, 1]} : vector<70x128xbf16> to vector<63x128xbf16>
    %c7_63 = arith.constant 7 : index
    %c0_64 = arith.constant 0 : index
    %c0_65 = arith.constant 0 : index
    %92 = vector.load %arg5[%c7_63, %c0_64, %c0_65] : memref<8x128x128xbf16, #tpu.memory_space<vmem>>, vector<1x128x128xbf16>
    %93 = vector.shape_cast %92 : vector<1x128x128xbf16> to vector<128x128xbf16>
    %cst_66 = arith.constant dense<0.000000e+00> : vector<63x128xf32>
    %94 = tpu.matmul %91, %93, %cst_66 {dimension_numbers = #tpu.dot_dimension_numbers<[1], [0], [0], [1], [0, 0, 1, 1], [], []>} : vector<63x128xbf16>, vector<128x128xbf16>, vector<63x128xf32> -> vector<63x128xf32>
    %95 = arith.addf %90, %94 : vector<63x128xf32>
    %c0_67 = arith.constant 0 : index
    %c0_68 = arith.constant 0 : index
    %96 = vector.load %arg6[%c0_67, %c0_68] : memref<1x128xf32, #tpu.memory_space<vmem>>, vector<1x128xf32>
    %97 = vector.broadcast %96 : vector<1x128xf32> to vector<63x128xf32>
    %98 = arith.mulf %95, %97 : vector<63x128xf32>
    %c0_69 = arith.constant 0 : index
    %c0_70 = arith.constant 0 : index
    %99 = vector.load %arg7[%c0_69, %c0_70] : memref<1x128xf32, #tpu.memory_space<vmem>>, vector<1x128xf32>
    %100 = vector.broadcast %99 : vector<1x128xf32> to vector<63x128xf32>
    %101 = arith.addf %98, %100 : vector<63x128xf32>
    %cst_71 = arith.constant 0.000000e+00 : f32
    %102 = vector.broadcast %cst_71 : f32 to vector<63x128xf32>
    %103 = arith.maximumf %101, %102 : vector<63x128xf32>
    %cst_72 = arith.constant 0.000000e+00 : f32
    %104 = vector.broadcast %cst_72 : f32 to vector<3x128xf32>
    %cst_73 = arith.constant 0.000000e+00 : f32
    %105 = vector.broadcast %cst_73 : f32 to vector<4x128xf32>
    %106 = tpu.concatenate %104, %103, %105 in 0 : vector<3x128xf32>, vector<63x128xf32>, vector<4x128xf32> -> vector<70x128xf32>
    %107 = arith.truncf %106 : vector<70x128xf32> to vector<70x128xbf16>
    %cst_74 = arith.constant 0.000000e+00 : f32
    %108 = vector.broadcast %cst_74 : f32 to vector<63x128xf32>
    %109 = vector.extract_strided_slice %107 {offsets = [0, 0], sizes = [63, 128], strides = [1, 1]} : vector<70x128xbf16> to vector<63x128xbf16>
    %c0_75 = arith.constant 0 : index
    %c0_76 = arith.constant 0 : index
    %c0_77 = arith.constant 0 : index
    %110 = vector.load %arg8[%c0_75, %c0_76, %c0_77] : memref<8x128x128xbf16, #tpu.memory_space<vmem>>, vector<1x128x128xbf16>
    %111 = vector.shape_cast %110 : vector<1x128x128xbf16> to vector<128x128xbf16>
    %cst_78 = arith.constant dense<0.000000e+00> : vector<63x128xf32>
    %112 = tpu.matmul %109, %111, %cst_78 {dimension_numbers = #tpu.dot_dimension_numbers<[1], [0], [0], [1], [0, 0, 1, 1], [], []>} : vector<63x128xbf16>, vector<128x128xbf16>, vector<63x128xf32> -> vector<63x128xf32>
    %113 = arith.addf %108, %112 : vector<63x128xf32>
    %114 = vector.extract_strided_slice %107 {offsets = [1, 0], sizes = [63, 128], strides = [1, 1]} : vector<70x128xbf16> to vector<63x128xbf16>
    %c1_79 = arith.constant 1 : index
    %c0_80 = arith.constant 0 : index
    %c0_81 = arith.constant 0 : index
    %115 = vector.load %arg8[%c1_79, %c0_80, %c0_81] : memref<8x128x128xbf16, #tpu.memory_space<vmem>>, vector<1x128x128xbf16>
    %116 = vector.shape_cast %115 : vector<1x128x128xbf16> to vector<128x128xbf16>
    %cst_82 = arith.constant dense<0.000000e+00> : vector<63x128xf32>
    %117 = tpu.matmul %114, %116, %cst_82 {dimension_numbers = #tpu.dot_dimension_numbers<[1], [0], [0], [1], [0, 0, 1, 1], [], []>} : vector<63x128xbf16>, vector<128x128xbf16>, vector<63x128xf32> -> vector<63x128xf32>
    %118 = arith.addf %113, %117 : vector<63x128xf32>
    %119 = vector.extract_strided_slice %107 {offsets = [2, 0], sizes = [63, 128], strides = [1, 1]} : vector<70x128xbf16> to vector<63x128xbf16>
    %c2_83 = arith.constant 2 : index
    %c0_84 = arith.constant 0 : index
    %c0_85 = arith.constant 0 : index
    %120 = vector.load %arg8[%c2_83, %c0_84, %c0_85] : memref<8x128x128xbf16, #tpu.memory_space<vmem>>, vector<1x128x128xbf16>
    %121 = vector.shape_cast %120 : vector<1x128x128xbf16> to vector<128x128xbf16>
    %cst_86 = arith.constant dense<0.000000e+00> : vector<63x128xf32>
    %122 = tpu.matmul %119, %121, %cst_86 {dimension_numbers = #tpu.dot_dimension_numbers<[1], [0], [0], [1], [0, 0, 1, 1], [], []>} : vector<63x128xbf16>, vector<128x128xbf16>, vector<63x128xf32> -> vector<63x128xf32>
    %123 = arith.addf %118, %122 : vector<63x128xf32>
    %124 = vector.extract_strided_slice %107 {offsets = [3, 0], sizes = [63, 128], strides = [1, 1]} : vector<70x128xbf16> to vector<63x128xbf16>
    %c3_87 = arith.constant 3 : index
    %c0_88 = arith.constant 0 : index
    %c0_89 = arith.constant 0 : index
    %125 = vector.load %arg8[%c3_87, %c0_88, %c0_89] : memref<8x128x128xbf16, #tpu.memory_space<vmem>>, vector<1x128x128xbf16>
    %126 = vector.shape_cast %125 : vector<1x128x128xbf16> to vector<128x128xbf16>
    %cst_90 = arith.constant dense<0.000000e+00> : vector<63x128xf32>
    %127 = tpu.matmul %124, %126, %cst_90 {dimension_numbers = #tpu.dot_dimension_numbers<[1], [0], [0], [1], [0, 0, 1, 1], [], []>} : vector<63x128xbf16>, vector<128x128xbf16>, vector<63x128xf32> -> vector<63x128xf32>
    %128 = arith.addf %123, %127 : vector<63x128xf32>
    %129 = vector.extract_strided_slice %107 {offsets = [4, 0], sizes = [63, 128], strides = [1, 1]} : vector<70x128xbf16> to vector<63x128xbf16>
    %c4_91 = arith.constant 4 : index
    %c0_92 = arith.constant 0 : index
    %c0_93 = arith.constant 0 : index
    %130 = vector.load %arg8[%c4_91, %c0_92, %c0_93] : memref<8x128x128xbf16, #tpu.memory_space<vmem>>, vector<1x128x128xbf16>
    %131 = vector.shape_cast %130 : vector<1x128x128xbf16> to vector<128x128xbf16>
    %cst_94 = arith.constant dense<0.000000e+00> : vector<63x128xf32>
    %132 = tpu.matmul %129, %131, %cst_94 {dimension_numbers = #tpu.dot_dimension_numbers<[1], [0], [0], [1], [0, 0, 1, 1], [], []>} : vector<63x128xbf16>, vector<128x128xbf16>, vector<63x128xf32> -> vector<63x128xf32>
    %133 = arith.addf %128, %132 : vector<63x128xf32>
    %134 = vector.extract_strided_slice %107 {offsets = [5, 0], sizes = [63, 128], strides = [1, 1]} : vector<70x128xbf16> to vector<63x128xbf16>
    %c5_95 = arith.constant 5 : index
    %c0_96 = arith.constant 0 : index
    %c0_97 = arith.constant 0 : index
    %135 = vector.load %arg8[%c5_95, %c0_96, %c0_97] : memref<8x128x128xbf16, #tpu.memory_space<vmem>>, vector<1x128x128xbf16>
    %136 = vector.shape_cast %135 : vector<1x128x128xbf16> to vector<128x128xbf16>
    %cst_98 = arith.constant dense<0.000000e+00> : vector<63x128xf32>
    %137 = tpu.matmul %134, %136, %cst_98 {dimension_numbers = #tpu.dot_dimension_numbers<[1], [0], [0], [1], [0, 0, 1, 1], [], []>} : vector<63x128xbf16>, vector<128x128xbf16>, vector<63x128xf32> -> vector<63x128xf32>
    %138 = arith.addf %133, %137 : vector<63x128xf32>
    %139 = vector.extract_strided_slice %107 {offsets = [6, 0], sizes = [63, 128], strides = [1, 1]} : vector<70x128xbf16> to vector<63x128xbf16>
    %c6_99 = arith.constant 6 : index
    %c0_100 = arith.constant 0 : index
    %c0_101 = arith.constant 0 : index
    %140 = vector.load %arg8[%c6_99, %c0_100, %c0_101] : memref<8x128x128xbf16, #tpu.memory_space<vmem>>, vector<1x128x128xbf16>
    %141 = vector.shape_cast %140 : vector<1x128x128xbf16> to vector<128x128xbf16>
    %cst_102 = arith.constant dense<0.000000e+00> : vector<63x128xf32>
    %142 = tpu.matmul %139, %141, %cst_102 {dimension_numbers = #tpu.dot_dimension_numbers<[1], [0], [0], [1], [0, 0, 1, 1], [], []>} : vector<63x128xbf16>, vector<128x128xbf16>, vector<63x128xf32> -> vector<63x128xf32>
    %143 = arith.addf %138, %142 : vector<63x128xf32>
    %144 = vector.extract_strided_slice %107 {offsets = [7, 0], sizes = [63, 128], strides = [1, 1]} : vector<70x128xbf16> to vector<63x128xbf16>
    %c7_103 = arith.constant 7 : index
    %c0_104 = arith.constant 0 : index
    %c0_105 = arith.constant 0 : index
    %145 = vector.load %arg8[%c7_103, %c0_104, %c0_105] : memref<8x128x128xbf16, #tpu.memory_space<vmem>>, vector<1x128x128xbf16>
    %146 = vector.shape_cast %145 : vector<1x128x128xbf16> to vector<128x128xbf16>
    %cst_106 = arith.constant dense<0.000000e+00> : vector<63x128xf32>
    %147 = tpu.matmul %144, %146, %cst_106 {dimension_numbers = #tpu.dot_dimension_numbers<[1], [0], [0], [1], [0, 0, 1, 1], [], []>} : vector<63x128xbf16>, vector<128x128xbf16>, vector<63x128xf32> -> vector<63x128xf32>
    %148 = arith.addf %143, %147 : vector<63x128xf32>
    %c0_107 = arith.constant 0 : index
    %c0_108 = arith.constant 0 : index
    %149 = vector.load %arg9[%c0_107, %c0_108] : memref<1x128xf32, #tpu.memory_space<vmem>>, vector<1x128xf32>
    %150 = vector.broadcast %149 : vector<1x128xf32> to vector<63x128xf32>
    %151 = arith.mulf %148, %150 : vector<63x128xf32>
    %c0_109 = arith.constant 0 : index
    %c0_110 = arith.constant 0 : index
    %152 = vector.load %arg10[%c0_109, %c0_110] : memref<1x128xf32, #tpu.memory_space<vmem>>, vector<1x128xf32>
    %153 = vector.broadcast %152 : vector<1x128xf32> to vector<63x128xf32>
    %154 = arith.addf %151, %153 : vector<63x128xf32>
    %cst_111 = arith.constant 0.000000e+00 : f32
    %155 = vector.broadcast %cst_111 : f32 to vector<63x128xf32>
    %156 = arith.maximumf %154, %155 : vector<63x128xf32>
    %cst_112 = arith.constant 0.000000e+00 : f32
    %157 = vector.broadcast %cst_112 : f32 to vector<1x128xf32>
    %158 = tpu.concatenate %156, %157 in 0 : vector<63x128xf32>, vector<1x128xf32> -> vector<64x128xf32>
    %159 = vector.shape_cast %158 : vector<64x128xf32> to vector<16x4x128xf32>
    %cst_113 = arith.constant dense<0xFF800000> : vector<16x128xf32>
    %160 = vector.multi_reduction <maximumf>, %159, %cst_113 [1] : vector<16x4x128xf32> to vector<16x128xf32>
    %161 = arith.truncf %160 : vector<16x128xf32> to vector<16x128xbf16>
    %c0_114 = arith.constant 0 : index
    %c0_115 = arith.constant 0 : index
    %c0_116 = arith.constant 0 : index
    %162 = vector.load %arg11[%c0_114, %c0_115, %c0_116] : memref<1x16x128xbf16, #tpu.memory_space<vmem>>, vector<1x16x128xbf16>
    %163 = vector.shape_cast %162 : vector<1x16x128xbf16> to vector<16x128xbf16>
    %164 = vector.shape_cast %161 : vector<16x128xbf16> to vector<1x16x128xbf16>
    tpu.vector_store %arg11[%c0_114, %c0_115, %c0_116], %164 {strides = array<i32>} : memref<1x16x128xbf16, #tpu.memory_space<vmem>>, vector<1x16x128xbf16>,
    return
  }
  func.func @transform_0(%arg0: i32) -> (i32, i32, i32) {
    %c0_i32 = arith.constant 0 : i32
    %c0_i32_0 = arith.constant 0 : i32
    %c0_i32_1 = arith.constant 0 : i32
    return %arg0, %c0_i32, %c0_i32_0 : i32, i32, i32
  }
  func.func @transform_1(%arg0: i32) -> (i32, i32, i32) {
    %c0_i32 = arith.constant 0 : i32
    %c0_i32_0 = arith.constant 0 : i32
    %c0_i32_1 = arith.constant 0 : i32
    %c0_i32_2 = arith.constant 0 : i32
    return %c0_i32, %c0_i32_0, %c0_i32_1 : i32, i32, i32
  }
  func.func @transform_2(%arg0: i32) -> (i32, i32) {
    %c0_i32 = arith.constant 0 : i32
    %c0_i32_0 = arith.constant 0 : i32
    %c0_i32_1 = arith.constant 0 : i32
    return %c0_i32, %c0_i32_0 : i32, i32
  }
  func.func @transform_3(%arg0: i32) -> (i32, i32) {
    %c0_i32 = arith.constant 0 : i32
    %c0_i32_0 = arith.constant 0 : i32
    %c0_i32_1 = arith.constant 0 : i32
    return %c0_i32, %c0_i32_0 : i32, i32
  }
  func.func @transform_4(%arg0: i32) -> (i32, i32, i32) {
    %c0_i32 = arith.constant 0 : i32
    %c0_i32_0 = arith.constant 0 : i32
    %c0_i32_1 = arith.constant 0 : i32
    %c0_i32_2 = arith.constant 0 : i32
    return %c0_i32, %c0_i32_0, %c0_i32_1 : i32, i32, i32
  }
  func.func @transform_5(%arg0: i32) -> (i32, i32) {
    %c0_i32 = arith.constant 0 : i32
    %c0_i32_0 = arith.constant 0 : i32
    %c0_i32_1 = arith.constant 0 : i32
    return %c0_i32, %c0_i32_0 : i32, i32
  }
  func.func @transform_6(%arg0: i32) -> (i32, i32) {
    %c0_i32 = arith.constant 0 : i32
    %c0_i32_0 = arith.constant 0 : i32
    %c0_i32_1 = arith.constant 0 : i32
    return %c0_i32, %c0_i32_0 : i32, i32
  }
  func.func @transform_7(%arg0: i32) -> (i32, i32, i32) {
    %c0_i32 = arith.constant 0 : i32
    %c0_i32_0 = arith.constant 0 : i32
    %c0_i32_1 = arith.constant 0 : i32
    %c0_i32_2 = arith.constant 0 : i32
    return %c0_i32, %c0_i32_0, %c0_i32_1 : i32, i32, i32
  }
  func.func @transform_8(%arg0: i32) -> (i32, i32) {
    %c0_i32 = arith.constant 0 : i32
    %c0_i32_0 = arith.constant 0 : i32
    %c0_i32_1 = arith.constant 0 : i32
    return %c0_i32, %c0_i32_0 : i32, i32
  }
  func.func @transform_9(%arg0: i32) -> (i32, i32) {
    %c0_i32 = arith.constant 0 : i32
    %c0_i32_0 = arith.constant 0 : i32
    %c0_i32_1 = arith.constant 0 : i32
    return %c0_i32, %c0_i32_0 : i32, i32
  }
  func.func @transform_10(%arg0: i32) -> (i32, i32, i32) {
    %c0_i32 = arith.constant 0 : i32
    %c0_i32_0 = arith.constant 0 : i32
    %c0_i32_1 = arith.constant 0 : i32
    return %arg0, %c0_i32, %c0_i32_0 : i32, i32, i32
  }
}

module attributes {stable_mosaic.version = 11 : i64} {
  func.func @_linear_kernel(%arg0: i32, %arg1: memref<8x2048xbf16, #tpu.memory_space<vmem>>, %arg2: memref<2048x512xbf16, #tpu.memory_space<vmem>>, %arg3: memref<1x512xf32, #tpu.memory_space<vmem>>, %arg4: memref<8x512xf32, #tpu.memory_space<vmem>>) attributes {dimension_semantics = [#tpu.dimension_semantics<arbitrary>], iteration_bounds = array<i64: 1>, scalar_prefetch = 0 : i64, scratch_operands = 0 : i64, tpu.core_type = #tpu.core_type<tc>, window_params = [{pipeline_mode = #tpu.pipeline_mode<synchronous>, transform_indices = @transform_0, window_bounds = array<i64: 8, 2048>}, {pipeline_mode = #tpu.pipeline_mode<synchronous>, transform_indices = @transform_1, window_bounds = array<i64: 2048, 512>}, {pipeline_mode = #tpu.pipeline_mode<synchronous>, transform_indices = @transform_2, window_bounds = array<i64: 1, 512>}, {pipeline_mode = #tpu.pipeline_mode<synchronous>, transform_indices = @transform_3, window_bounds = array<i64: 8, 512>}]} {
    %c0 = arith.constant 0 : index
    %c0_0 = arith.constant 0 : index
    %0 = vector.load %arg1[%c0, %c0_0] : memref<8x2048xbf16, #tpu.memory_space<vmem>>, vector<8x2048xbf16>
    %c0_1 = arith.constant 0 : index
    %c0_2 = arith.constant 0 : index
    %1 = vector.load %arg2[%c0_1, %c0_2] : memref<2048x512xbf16, #tpu.memory_space<vmem>>, vector<2048x512xbf16>
    %cst = arith.constant dense<0.000000e+00> : vector<8x512xf32>
    %2 = tpu.matmul %0, %1, %cst {dimension_numbers = #tpu.dot_dimension_numbers<[1], [0], [0], [1], [0, 0, 1, 1], [], []>} : vector<8x2048xbf16>, vector<2048x512xbf16>, vector<8x512xf32> -> vector<8x512xf32>
    %c0_3 = arith.constant 0 : index
    %c0_4 = arith.constant 0 : index
    %3 = vector.load %arg3[%c0_3, %c0_4] : memref<1x512xf32, #tpu.memory_space<vmem>>, vector<1x512xf32>
    %4 = vector.broadcast %3 : vector<1x512xf32> to vector<8x512xf32>
    %5 = arith.addf %2, %4 : vector<8x512xf32>
    %c0_5 = arith.constant 0 : index
    %c0_6 = arith.constant 0 : index
    %6 = vector.load %arg4[%c0_5, %c0_6] : memref<8x512xf32, #tpu.memory_space<vmem>>, vector<8x512xf32>
    tpu.vector_store %arg4[%c0_5, %c0_6], %5 {strides = array<i32>} : memref<8x512xf32, #tpu.memory_space<vmem>>, vector<8x512xf32>,
    return
  }
  func.func @transform_0(%arg0: i32) -> (i32, i32) {
    %c0_i32 = arith.constant 0 : i32
    %c0_i32_0 = arith.constant 0 : i32
    %c0_i32_1 = arith.constant 0 : i32
    return %c0_i32, %c0_i32_0 : i32, i32
  }
  func.func @transform_1(%arg0: i32) -> (i32, i32) {
    %c0_i32 = arith.constant 0 : i32
    %c0_i32_0 = arith.constant 0 : i32
    %c0_i32_1 = arith.constant 0 : i32
    return %c0_i32, %c0_i32_0 : i32, i32
  }
  func.func @transform_2(%arg0: i32) -> (i32, i32) {
    %c0_i32 = arith.constant 0 : i32
    %c0_i32_0 = arith.constant 0 : i32
    %c0_i32_1 = arith.constant 0 : i32
    return %c0_i32, %c0_i32_0 : i32, i32
  }
  func.func @transform_3(%arg0: i32) -> (i32, i32) {
    %c0_i32 = arith.constant 0 : i32
    %c0_i32_0 = arith.constant 0 : i32
    %c0_i32_1 = arith.constant 0 : i32
    return %c0_i32, %c0_i32_0 : i32, i32
  }
}

module attributes {stable_mosaic.version = 11 : i64} {
  func.func @_lstm_kernel(%arg0: i32, %arg1: memref<1x2x512xf32, #tpu.memory_space<vmem>>, %arg2: memref<128x512xbf16, #tpu.memory_space<vmem>>, %arg3: memref<1x2x128xf32, #tpu.memory_space<vmem>>, %arg4: memref<2x128xf32, #tpu.memory_space<vmem>>, %arg5: memref<2x128xf32, #tpu.memory_space<vmem>>) attributes {dimension_semantics = [#tpu.dimension_semantics<arbitrary>], iteration_bounds = array<i64: 3>, scalar_prefetch = 0 : i64, scratch_operands = 2 : i64, tpu.core_type = #tpu.core_type<tc>, window_params = [{transform_indices = @transform_0, window_bounds = array<i64: 1, 2, 512>}, {pipeline_mode = #tpu.pipeline_mode<synchronous>, transform_indices = @transform_1, window_bounds = array<i64: 128, 512>}, {transform_indices = @transform_2, window_bounds = array<i64: 1, 2, 128>}]} {
    %c0_i32 = arith.constant 0 : i32
    %0 = arith.cmpi eq, %arg0, %c0_i32 : i32
    %1 = arith.extui %0 : i1 to i32
    %c0_i32_0 = arith.constant 0 : i32
    %2 = arith.cmpi ne, %1, %c0_i32_0 : i32
    scf.if %2 {
      %cst_19 = arith.constant 0.000000e+00 : f32
      %41 = vector.broadcast %cst_19 : f32 to vector<2x128xf32>
      %c0_20 = arith.constant 0 : index
      %c0_21 = arith.constant 0 : index
      %42 = vector.load %arg4[%c0_20, %c0_21] : memref<2x128xf32, #tpu.memory_space<vmem>>, vector<2x128xf32>
      tpu.vector_store %arg4[%c0_20, %c0_21], %41 {strides = array<i32>} : memref<2x128xf32, #tpu.memory_space<vmem>>, vector<2x128xf32>,
      %cst_22 = arith.constant 0.000000e+00 : f32
      %43 = vector.broadcast %cst_22 : f32 to vector<2x128xf32>
      %c0_23 = arith.constant 0 : index
      %c0_24 = arith.constant 0 : index
      %44 = vector.load %arg5[%c0_23, %c0_24] : memref<2x128xf32, #tpu.memory_space<vmem>>, vector<2x128xf32>
      tpu.vector_store %arg5[%c0_23, %c0_24], %43 {strides = array<i32>} : memref<2x128xf32, #tpu.memory_space<vmem>>, vector<2x128xf32>,
    } else {
    }
    %c0 = arith.constant 0 : index
    %c0_1 = arith.constant 0 : index
    %c0_2 = arith.constant 0 : index
    %3 = vector.load %arg1[%c0, %c0_1, %c0_2] : memref<1x2x512xf32, #tpu.memory_space<vmem>>, vector<1x2x512xf32>
    %4 = vector.shape_cast %3 : vector<1x2x512xf32> to vector<2x512xf32>
    %c0_3 = arith.constant 0 : index
    %c0_4 = arith.constant 0 : index
    %5 = vector.load %arg4[%c0_3, %c0_4] : memref<2x128xf32, #tpu.memory_space<vmem>>, vector<2x128xf32>
    %6 = arith.truncf %5 : vector<2x128xf32> to vector<2x128xbf16>
    %c0_5 = arith.constant 0 : index
    %c0_6 = arith.constant 0 : index
    %7 = vector.load %arg2[%c0_5, %c0_6] : memref<128x512xbf16, #tpu.memory_space<vmem>>, vector<128x512xbf16>
    %cst = arith.constant dense<0.000000e+00> : vector<2x512xf32>
    %8 = tpu.matmul %6, %7, %cst {dimension_numbers = #tpu.dot_dimension_numbers<[1], [0], [0], [1], [0, 0, 1, 1], [], []>} : vector<2x128xbf16>, vector<128x512xbf16>, vector<2x512xf32> -> vector<2x512xf32>
    %9 = arith.addf %4, %8 : vector<2x512xf32>
    %10 = vector.extract_strided_slice %9 {offsets = [0, 0], sizes = [2, 128], strides = [1, 1]} : vector<2x512xf32> to vector<2x128xf32>
    %11 = arith.negf %10 : vector<2x128xf32>
    %12 = math.exp %11 : vector<2x128xf32>
    %cst_7 = arith.constant 1.000000e+00 : f32
    %13 = vector.broadcast %cst_7 : f32 to vector<2x128xf32>
    %14 = arith.addf %13, %12 : vector<2x128xf32>
    %15 = arith.divf %13, %14 : vector<2x128xf32>
    %16 = vector.extract_strided_slice %9 {offsets = [0, 128], sizes = [2, 128], strides = [1, 1]} : vector<2x512xf32> to vector<2x128xf32>
    %17 = arith.negf %16 : vector<2x128xf32>
    %18 = math.exp %17 : vector<2x128xf32>
    %cst_8 = arith.constant 1.000000e+00 : f32
    %19 = vector.broadcast %cst_8 : f32 to vector<2x128xf32>
    %20 = arith.addf %19, %18 : vector<2x128xf32>
    %21 = arith.divf %19, %20 : vector<2x128xf32>
    %22 = vector.extract_strided_slice %9 {offsets = [0, 256], sizes = [2, 128], strides = [1, 1]} : vector<2x512xf32> to vector<2x128xf32>
    %23 = math.tanh %22 : vector<2x128xf32>
    %24 = vector.extract_strided_slice %9 {offsets = [0, 384], sizes = [2, 128], strides = [1, 1]} : vector<2x512xf32> to vector<2x128xf32>
    %25 = arith.negf %24 : vector<2x128xf32>
    %26 = math.exp %25 : vector<2x128xf32>
    %cst_9 = arith.constant 1.000000e+00 : f32
    %27 = vector.broadcast %cst_9 : f32 to vector<2x128xf32>
    %28 = arith.addf %27, %26 : vector<2x128xf32>
    %29 = arith.divf %27, %28 : vector<2x128xf32>
    %c0_10 = arith.constant 0 : index
    %c0_11 = arith.constant 0 : index
    %30 = vector.load %arg5[%c0_10, %c0_11] : memref<2x128xf32, #tpu.memory_space<vmem>>, vector<2x128xf32>
    %31 = arith.mulf %21, %30 : vector<2x128xf32>
    %32 = arith.mulf %15, %23 : vector<2x128xf32>
    %33 = arith.addf %31, %32 : vector<2x128xf32>
    %34 = math.tanh %33 : vector<2x128xf32>
    %35 = arith.mulf %29, %34 : vector<2x128xf32>
    %c0_12 = arith.constant 0 : index
    %c0_13 = arith.constant 0 : index
    %36 = vector.load %arg5[%c0_12, %c0_13] : memref<2x128xf32, #tpu.memory_space<vmem>>, vector<2x128xf32>
    tpu.vector_store %arg5[%c0_12, %c0_13], %33 {strides = array<i32>} : memref<2x128xf32, #tpu.memory_space<vmem>>, vector<2x128xf32>,
    %c0_14 = arith.constant 0 : index
    %c0_15 = arith.constant 0 : index
    %37 = vector.load %arg4[%c0_14, %c0_15] : memref<2x128xf32, #tpu.memory_space<vmem>>, vector<2x128xf32>
    tpu.vector_store %arg4[%c0_14, %c0_15], %35 {strides = array<i32>} : memref<2x128xf32, #tpu.memory_space<vmem>>, vector<2x128xf32>,
    %c0_16 = arith.constant 0 : index
    %c0_17 = arith.constant 0 : index
    %c0_18 = arith.constant 0 : index
    %38 = vector.load %arg3[%c0_16, %c0_17, %c0_18] : memref<1x2x128xf32, #tpu.memory_space<vmem>>, vector<1x2x128xf32>
    %39 = vector.shape_cast %38 : vector<1x2x128xf32> to vector<2x128xf32>
    %40 = vector.shape_cast %35 : vector<2x128xf32> to vector<1x2x128xf32>
    tpu.vector_store %arg3[%c0_16, %c0_17, %c0_18], %40 {strides = array<i32>} : memref<1x2x128xf32, #tpu.memory_space<vmem>>, vector<1x2x128xf32>,
    return
  }
  func.func @transform_0(%arg0: i32) -> (i32, i32, i32) {
    %c0_i32 = arith.constant 0 : i32
    %c0_i32_0 = arith.constant 0 : i32
    %c0_i32_1 = arith.constant 0 : i32
    return %arg0, %c0_i32, %c0_i32_0 : i32, i32, i32
  }
  func.func @transform_1(%arg0: i32) -> (i32, i32) {
    %c0_i32 = arith.constant 0 : i32
    %c0_i32_0 = arith.constant 0 : i32
    %c0_i32_1 = arith.constant 0 : i32
    return %c0_i32, %c0_i32_0 : i32, i32
  }
  func.func @transform_2(%arg0: i32) -> (i32, i32, i32) {
    %c0_i32 = arith.constant 0 : i32
    %c0_i32_0 = arith.constant 0 : i32
    %c0_i32_1 = arith.constant 0 : i32
    return %arg0, %c0_i32, %c0_i32_0 : i32, i32, i32
  }
}

module attributes {stable_mosaic.version = 11 : i64} {
  func.func @_linear_kernel(%arg0: i32, %arg1: memref<8x128xbf16, #tpu.memory_space<vmem>>, %arg2: memref<128x128xbf16, #tpu.memory_space<vmem>>, %arg3: memref<1x128xf32, #tpu.memory_space<vmem>>, %arg4: memref<8x128xf32, #tpu.memory_space<vmem>>) attributes {dimension_semantics = [#tpu.dimension_semantics<arbitrary>], iteration_bounds = array<i64: 1>, scalar_prefetch = 0 : i64, scratch_operands = 0 : i64, tpu.core_type = #tpu.core_type<tc>, window_params = [{pipeline_mode = #tpu.pipeline_mode<synchronous>, transform_indices = @transform_0, window_bounds = array<i64: 8, 128>}, {pipeline_mode = #tpu.pipeline_mode<synchronous>, transform_indices = @transform_1, window_bounds = array<i64: 128, 128>}, {pipeline_mode = #tpu.pipeline_mode<synchronous>, transform_indices = @transform_2, window_bounds = array<i64: 1, 128>}, {pipeline_mode = #tpu.pipeline_mode<synchronous>, transform_indices = @transform_3, window_bounds = array<i64: 8, 128>}]} {
    %c0 = arith.constant 0 : index
    %c0_0 = arith.constant 0 : index
    %0 = vector.load %arg1[%c0, %c0_0] : memref<8x128xbf16, #tpu.memory_space<vmem>>, vector<8x128xbf16>
    %c0_1 = arith.constant 0 : index
    %c0_2 = arith.constant 0 : index
    %1 = vector.load %arg2[%c0_1, %c0_2] : memref<128x128xbf16, #tpu.memory_space<vmem>>, vector<128x128xbf16>
    %cst = arith.constant dense<0.000000e+00> : vector<8x128xf32>
    %2 = tpu.matmul %0, %1, %cst {dimension_numbers = #tpu.dot_dimension_numbers<[1], [0], [0], [1], [0, 0, 1, 1], [], []>} : vector<8x128xbf16>, vector<128x128xbf16>, vector<8x128xf32> -> vector<8x128xf32>
    %c0_3 = arith.constant 0 : index
    %c0_4 = arith.constant 0 : index
    %3 = vector.load %arg3[%c0_3, %c0_4] : memref<1x128xf32, #tpu.memory_space<vmem>>, vector<1x128xf32>
    %4 = vector.broadcast %3 : vector<1x128xf32> to vector<8x128xf32>
    %5 = arith.addf %2, %4 : vector<8x128xf32>
    %c0_5 = arith.constant 0 : index
    %c0_6 = arith.constant 0 : index
    %6 = vector.load %arg4[%c0_5, %c0_6] : memref<8x128xf32, #tpu.memory_space<vmem>>, vector<8x128xf32>
    tpu.vector_store %arg4[%c0_5, %c0_6], %5 {strides = array<i32>} : memref<8x128xf32, #tpu.memory_space<vmem>>, vector<8x128xf32>,
    return
  }
  func.func @transform_0(%arg0: i32) -> (i32, i32) {
    %c0_i32 = arith.constant 0 : i32
    %c0_i32_0 = arith.constant 0 : i32
    %c0_i32_1 = arith.constant 0 : i32
    return %c0_i32, %c0_i32_0 : i32, i32
  }
  func.func @transform_1(%arg0: i32) -> (i32, i32) {
    %c0_i32 = arith.constant 0 : i32
    %c0_i32_0 = arith.constant 0 : i32
    %c0_i32_1 = arith.constant 0 : i32
    return %c0_i32, %c0_i32_0 : i32, i32
  }
  func.func @transform_2(%arg0: i32) -> (i32, i32) {
    %c0_i32 = arith.constant 0 : i32
    %c0_i32_0 = arith.constant 0 : i32
    %c0_i32_1 = arith.constant 0 : i32
    return %c0_i32, %c0_i32_0 : i32, i32
  }
  func.func @transform_3(%arg0: i32) -> (i32, i32) {
    %c0_i32 = arith.constant 0 : i32
    %c0_i32_0 = arith.constant 0 : i32
    %c0_i32_1 = arith.constant 0 : i32
    return %c0_i32, %c0_i32_0 : i32, i32
  }
}

</mosaic_0001>

<bundles_post_ra>
// kernel: net_forward.5
= control target key start
LH: loop header
LB: loop body
LE: loop exit
PB: predicated region body
PF: predicated region fallthrough
CT: control target
= control target key end

     0   :  { %s2537_s15 = smov 0   ;;  %s3275_s0 = inlined_call_operand.vmem [shape: bf16[6,500,64], index: 0, kind: input, shape index: {}]   ;;  %s3276_s1 = inlined_call_operand.vmem [shape: bf16[64,128], index: 1, kind: input, shape index: {}]   ;;  %s3277_s2 = inlined_call_operand.vmem [shape: f32[1,128], index: 2, kind: input, shape index: {}]   ;;  %s3278_s3 = inlined_call_operand.vmem [shape: f32[1,128], index: 3, kind: input, shape index: {}]   ;;  %s3279_s4 = inlined_call_operand.vmem [shape: bf16[6,63,128], index: 4, kind: output, shape index: {}]  }
   0x1 LB: > { %s2134_s16 = sadd.s32 4294967295, %s2510_s15   ;;  %p2138_p0 = scmp.ge.s32.totalorder %s2510_s15, 1  ;;  %s2510_s15 = sphi %s2537_s15, %s14_s15  }
   0x2   : > { %p162_p1 = scmp.lt.s32.totalorder %s2510_s15, 7 }
   0x4   : > { %p163_p2 = pnand %p2138_p0, %p162_p1 }
   0x6   : > { %166 = sbr.rel (%p163_p2) target bundleno = 476 (0x1dc), region = 36 }
   0xd   : > { %v2466_v0 = vld [vmem:[%s3276_s1] sm:$0xff]   ;;  %p188_p3 = scmp.lt.s32.totalorder %s2134_s16, 5  ;;  %v2467_v1 = vld [vmem:[%s3276_s1 + $0x8] sm:$0xff]   ;;  %v2468_v2 = vld [vmem:[%s3276_s1 + $0x10] sm:$0xff]   ;;  %vm452_vm0 = vcmask 523264   ;;  %vm1103_vm1 = vcmask 1041408  }
   0xe   : > { %2377 = vmatprep.subr.bf16.mxu0 %v2466_v0  ;;  %2449 = vmatprep.subr.bf16.mxu1 %v2466_v0  ;;  %v2469_v3 = vld [vmem:[%s3276_s1 + $0x18] sm:$0xff]   ;;  %v2632_v36 = vld [vmem:[%s3277_s2] ss:$0 sm:$0xff]  ;;  %vm1988_vm2 = vcmask 1041409   ;;  %vm1990_vm3 = vcmask 1042434   ;;  %vm1992_vm4 = vcmask 1043459  }
   0xf   : > { %s3332_s16 = smov (!%p188_p3, %s2134_s16), 5  ;;  %2378 = vmatpush3.bf16.msra.mxu0 %v2466_v0  ;;  %2453 = vmatpush3.bf16.msra.mxu1 %v2466_v0  ;;  %v2637_v38 = vld [vmem:[%s3278_s3] ss:$0 sm:$0xff]  ;;  %vm1994_vm5 = vcmask 1044484   ;;  %vm1996_vm6 = vcmask 1045509   ;;  %vm1998_vm7 = vcmask 1046534  }
  0x10   : > { %2379 = vmatprep.subr.bf16.mxu0 %v2467_v1  ;;  %2450 = vmatprep.subr.bf16.mxu1 %v2467_v1  ;;  %s2457_s23 = smul.u32 252, %s3332_s16  ;;  %vm2000_vm8 = vcmask 1047559   ;;  %s2277_s7 = sshll.u32 %s3332_s16, 5  ;;  %vm1293_vm9 = vcmask 1045504   ;;  %vm2073_vm10 = vcmask 1043456  }
  0x11   : > { %s2860_s10 = scalar_lea.vmem %s3279_s4, %s2277_s7  ;;  %vm2074_vm11 = vsmask.f32 3328 }
  0x12   : > { %s2563_s28 = scalar_lea.vmem %s3275_s0, %s2457_s23  ;;  %vm2075_vm12 = vmand %vm2073_vm10, %vm2074_vm11 }
  0x13   : > { %2380 = vmatpush3.bf16.msra.mxu0 %v2467_v1  ;;  %2454 = vmatpush3.bf16.msra.mxu1 %v2467_v1  ;;  %v2470_v4 = vld [vmem:[%s2563_s28] sm:$0xff]   ;;  %v2472_v6 = vld [vmem:[%s2563_s28 + $0x8] sm:$0xff]   ;;  %v2474_v8 = vld [vmem:[%s2563_s28 + $0x10] sm:$0xff]  }
  0x14   : > { %2381 = vmatprep.subr.bf16.mxu0 %v2468_v2  ;;  %2451 = vmatprep.subr.bf16.mxu1 %v2468_v2  ;;  %v2471_v5 = vld [vmem:[%s2563_s28 + $0x80] sm:$0xff]   ;;  %v2473_v7 = vld [vmem:[%s2563_s28 + $0x88] sm:$0xff]   ;;  %v2475_v9 = vld [vmem:[%s2563_s28 + $0x90] sm:$0xff]  }
  0x15   : > { %2385 = vmatprep.mubr.msk.bf16.mxu0 %vm452_vm0, %v2470_v4  ;;  %2417 = vmatprep.mubr.msk.bf16.mxu1 %vm452_vm0, %v2471_v5  ;;  %v2476_v10 = vld [vmem:[%s2563_s28 + $0x18] sm:$0xff]   ;;  %v2478_v12 = vld [vmem:[%s2563_s28 + $0x20] sm:$0xff]   ;;  %v2480_v14 = vld [vmem:[%s2563_s28 + $0x28] sm:$0xff]  }
  0x16   : > { %v2477_v11 = vld [vmem:[%s2563_s28 + $0x98] sm:$0xff]   ;;  %v2479_v13 = vld [vmem:[%s2563_s28 + $0xa0] sm:$0xff]   ;;  %v2481_v15 = vld [vmem:[%s2563_s28 + $0xa8] sm:$0xff]  }
  0x17   : > { %2382 = vmatpush3.bf16.msra.mxu0 %v2468_v2  ;;  %2455 = vmatpush3.bf16.msra.mxu1 %v2468_v2  ;;  %v2482_v16 = vld [vmem:[%s2563_s28 + $0x30] sm:$0xff]   ;;  %v2484_v18 = vld [vmem:[%s2563_s28 + $0x38] sm:$0xff]   ;;  %v2486_v20 = vld [vmem:[%s2563_s28 + $0x40] sm:$0xff]  }
  0x18   : > { %2383 = vmatprep.subr.bf16.mxu0 %v2469_v3  ;;  %2452 = vmatprep.subr.bf16.mxu1 %v2469_v3  ;;  %v2483_v17 = vld [vmem:[%s2563_s28 + $0xb0] sm:$0xff]   ;;  %v2485_v19 = vld [vmem:[%s2563_s28 + $0xb8] sm:$0xff]   ;;  %v2487_v21 = vld [vmem:[%s2563_s28 + $0xc0] sm:$0xff]  }
  0x19   : > { %v2488_v22 = vld [vmem:[%s2563_s28 + $0x48] sm:$0xff]   ;;  %v2490_v24 = vld [vmem:[%s2563_s28 + $0x50] sm:$0xff]   ;;  %v2492_v26 = vld [vmem:[%s2563_s28 + $0x58] sm:$0xff]  }
  0x1a   : > { %v2489_v23 = vld [vmem:[%s2563_s28 + $0xc8] sm:$0xff]   ;;  %v2491_v25 = vld [vmem:[%s2563_s28 + $0xd0] sm:$0xff]   ;;  %v2493_v27 = vld [vmem:[%s2563_s28 + $0xd8] sm:$0xff]  }
  0x1b   : > { %2384 = vmatpush3.bf16.msra.mxu0 %v2469_v3  ;;  %2456 = vmatpush3.bf16.msra.mxu1 %v2469_v3  ;;  %v2494_v28 = vld [vmem:[%s2563_s28 + $0x60] sm:$0xff]   ;;  %v2496_v30 = vld [vmem:[%s2563_s28 + $0x68] sm:$0xff]   ;;  %v2498_v32 = vld [vmem:[%s2563_s28 + $0x70] sm:$0xff]  }
  0x1c   : > { %v2495_v29 = vld [vmem:[%s2563_s28 + $0xe0] sm:$0xff]   ;;  %v2497_v31 = vld [vmem:[%s2563_s28 + $0xe8] sm:$0xff]   ;;  %v2499_v33 = vld [vmem:[%s2563_s28 + $0xf0] sm:$0xff]  }
  0x1d   : > { %v2500_v34 = vld [vmem:[%s2563_s28 + $0x78] sm:$0xff]  }
  0x1e   : > { %2386 = vmatmul.mubr.msk.bf16.vlgmr.msra.gmra.mrb[0].mxu0 %vm452_vm0, %v2472_v6  ;;  %2418 = vmatmul.mubr.msk.bf16.vlgmr.msra.gmra.mrb[0].mxu1 %vm452_vm0, %v2473_v7  ;;  %v2501_v35 = vld [vmem:[%s2563_s28 + $0xf8] ss:$0 sps:$4 sm:$0x33]  }
  0x1f   : > { %2389 = vmatprep.mubr.msk.bf16.mxu0 %vm452_vm0, %v2474_v8  ;;  %2421 = vmatprep.mubr.msk.bf16.mxu1 %vm452_vm0, %v2475_v9 }
  0x26   : > { %2390 = vmatmul.mubr.msk.bf16.gmra.mrb[4].mxu0 %vm452_vm0, %v2476_v10  ;;  %2422 = vmatmul.mubr.msk.bf16.gmra.mrb[4].mxu1 %vm452_vm0, %v2477_v11 }
  0x27   : > { %2393 = vmatprep.mubr.msk.bf16.mxu0 %vm452_vm0, %v2478_v12  ;;  %2425 = vmatprep.mubr.msk.bf16.mxu1 %vm452_vm0, %v2479_v13 }
  0x2e   : > { %2394 = vmatmul.mubr.msk.bf16.gmra.mrb[8].mxu0 %vm452_vm0, %v2480_v14  ;;  %2426 = vmatmul.mubr.msk.bf16.gmra.mrb[8].mxu1 %vm452_vm0, %v2481_v15 }
  0x2f   : > { %2397 = vmatprep.mubr.msk.bf16.mxu0 %vm452_vm0, %v2482_v16  ;;  %2429 = vmatprep.mubr.msk.bf16.mxu1 %vm452_vm0, %v2483_v17 }
  0x36   : > { %2398 = vmatmul.mubr.msk.bf16.gmra.mrb[12].mxu0 %vm452_vm0, %v2484_v18  ;;  %2430 = vmatmul.mubr.msk.bf16.gmra.mrb[12].mxu1 %vm452_vm0, %v2485_v19 }
  0x37   : > { %2401 = vmatprep.mubr.msk.bf16.mxu0 %vm452_vm0, %v2486_v20  ;;  %2433 = vmatprep.mubr.msk.bf16.mxu1 %vm452_vm0, %v2487_v21 }
  0x3e   : > { %2402 = vmatmul.mubr.msk.bf16.gmra.mrb[16].mxu0 %vm452_vm0, %v2488_v22  ;;  %2434 = vmatmul.mubr.msk.bf16.gmra.mrb[16].mxu1 %vm452_vm0, %v2489_v23 }
  0x3f   : > { %2405 = vmatprep.mubr.msk.bf16.mxu0 %vm452_vm0, %v2490_v24  ;;  %2437 = vmatprep.mubr.msk.bf16.mxu1 %vm452_vm0, %v2491_v25 }
  0x46   : > { %2406 = vmatmul.mubr.msk.bf16.gmra.mrb[20].mxu0 %vm452_vm0, %v2492_v26  ;;  %2438 = vmatmul.mubr.msk.bf16.gmra.mrb[20].mxu1 %vm452_vm0, %v2493_v27 }
  0x47   : > { %2409 = vmatprep.mubr.msk.bf16.mxu0 %vm452_vm0, %v2494_v28  ;;  %2441 = vmatprep.mubr.msk.bf16.mxu1 %vm452_vm0, %v2495_v29 }
  0x4e   : > { %2410 = vmatmul.mubr.msk.bf16.gmra.mrb[24].mxu0 %vm452_vm0, %v2496_v30  ;;  %2442 = vmatmul.mubr.msk.bf16.gmra.mrb[24].mxu1 %vm452_vm0, %v2497_v31 }
  0x4f   : > { %2413 = vmatprep.mubr.msk.bf16.mxu0 %vm452_vm0, %v2498_v32  ;;  %2445 = vmatprep.mubr.msk.bf16.mxu1 %vm452_vm0, %v2499_v33 }
  0x56   : > { %2414 = vmatmul.mubr.msk.bf16.gmra.mrb[28].mxu0 %vm452_vm0, %v2500_v34  ;;  %2446 = vmatmul.mubr.msk.bf16.gmra.mrb[28].mxu1 %vm452_vm0, %v2501_v35 }
  0xf1   : > { %v2387_v37 = vpop.f32.mrb[0].mxu0  ;;  %v2419_v39 = vpop.f32.mrb[0].mxu1 }
  0xf2   : > { %v846_v40 = vmul.f32 %v2387_v37, %v2632_v36  ;;  %v878_v41 = vmul.f32 %v2419_v39, %v2632_v36  ;;  %v583_v42 = vpop.f32.mrb[1].mxu0  ;;  %v711_v43 = vpop.f32.mrb[1].mxu1 }
  0xf3   : > { %v844_v44 = vmul.f32 %v2632_v36, %v583_v42  ;;  %v876_v45 = vmul.f32 %v2632_v36, %v711_v43  ;;  %v2388_v46 = vpop.f32.mrb[2].mxu0  ;;  %v2420_v47 = vpop.f32.mrb[2].mxu1 }
  0xf4   : > { %v916_v48 = vadd.f32 %v2637_v38, %v846_v40  ;;  %v948_v49 = vadd.f32 %v2637_v38, %v878_v41  ;;  %v847_v50 = vmul.f32 %v2388_v46, %v2632_v36  ;;  %v879_v51 = vmul.f32 %v2420_v47, %v2632_v36  ;;  %v586_v52 = vpop.f32.mrb[3].mxu0  ;;  %v714_v53 = vpop.f32.mrb[3].mxu1 }
  0xf5   : > { %v914_v54 = vadd.f32 %v2637_v38, %v844_v44  ;;  %v946_v55 = vadd.f32 %v2637_v38, %v876_v45  ;;  %v845_v56 = vmul.f32 %v2632_v36, %v586_v52  ;;  %v877_v57 = vmul.f32 %v2632_v36, %v714_v53 }
  0xf6   : > { %v979_v58 = vmax.f32 %v916_v48, 0.0  ;;  %v1011_v59 = vmax.f32 %v948_v49, 0.0  ;;  %v917_v60 = vadd.f32 %v2637_v38, %v847_v50  ;;  %v949_v61 = vadd.f32 %v2637_v38, %v879_v51 }
  0xf7   : > { %v977_v62 = vmax.f32 %v914_v54, 0.0  ;;  %v1009_v63 = vmax.f32 %v946_v55, 0.0  ;;  %v915_v0 = vadd.f32 %v2637_v38, %v845_v56  ;;  %v947_v1 = vadd.f32 %v2637_v38, %v877_v57 }
  0xf8   : > { %v1171_v2 = vrot.slane %v1011_v59, 6  ;;  %v980_v3 = vmax.f32 %v917_v60, 0.0  ;;  %v1012_v4 = vmax.f32 %v949_v61, 0.0  ;;  %v1107_v10 = vrot.slane %v979_v58, 6 }
  0xf9   : > { %v1104_v5 = vrot.slane %v977_v62, 6  ;;  %v978_v6 = vmax.f32 %v915_v0, 0.0  ;;  %v1010_v7 = vmax.f32 %v947_v1, 0.0  ;;  %v2391_v8 = vpop.f32.mrb[4].mxu0  ;;  %v2423_v9 = vpop.f32.mrb[4].mxu1  ;;  %v2655_v11 = vrot.slane %v1009_v63, 6 }
  0xfa   : > { %v2657_v12 = vrot.slane %v980_v3, 6  ;;  %v2659_v13 = vrot.slane %v1012_v4, 6  ;;  %v599_v14 = vpop.f32.mrb[5].mxu0  ;;  %v2661_v15 = vpop.f32.mrb[5].mxu1  ;;  %v850_v24 = vmul.f32 %v2391_v8, %v2632_v36  ;;  %v882_v60 = vmul.f32 %v2423_v9, %v2632_v36 }
  0xfb   : > { %3287 = vst [vmem:[#allocation2_spill] sm:$0xff] %v2655_v11  ;;  %v1292_v16 = vsel %vm1103_vm1, 0.0, %v1104_v5  ;;  %v1105_v17 = vrot.slane %v978_v6, 6  ;;  %v1169_v18 = vrot.slane %v1010_v7, 6  ;;  %v2664_v19 = vpop.f32.mrb[6].mxu0  ;;  %v2666_v20 = vpop.f32.mrb[6].mxu1  ;;  %v848_v6 = vmul.f32 %v2632_v36, %v599_v14 }
  0xfc   : > { %v1295_v21 = vrot.slane %v1292_v16, 4  ;;  %v1110_v22 = vsel %vm1103_vm1, %v1107_v10, %v2657_v12  ;;  %v1174_v23 = vsel %vm1103_vm1, %v1171_v2, %v2659_v13  ;;  %v2673_v25 = vpop.f32.mrb[7].mxu0  ;;  %v2675_v26 = vpop.f32.mrb[7].mxu1  ;;  %v920_v48 = vadd.f32 %v2637_v38, %v850_v24 }
  0xfd   : > { %v1313_v27 = vrot.slane %v1110_v22, 4  ;;  %v1505_v28 = vrot.slane %v1174_v23, 4  ;;  %v1106_v29 = vsel %vm1103_vm1, %v1104_v5, %v1105_v17  ;;  %v1108_v30 = vsel %vm1103_vm1, %v1105_v17, %v1107_v10 }
  0xfe   : > { %v1296_v31 = vmax.f32 %v1292_v16, %v1295_v21  ;;  %v1301_v32 = vrot.slane %v1106_v29, 4  ;;  %v1307_v33 = vrot.slane %v1108_v30, 4  ;;  %v1170_v34 = vsel %vm1103_vm1, %v2655_v11, %v1169_v18 }
  0xff   : > { %v1314_v35 = vmax.f32 %v1110_v22, %v1313_v27  ;;  %v1506_v37 = vmax.f32 %v1174_v23, %v1505_v28  ;;  %v1172_v39 = vsel %vm1103_vm1, %v1169_v18, %v1171_v2  ;;  %v1493_v40 = vrot.slane %v1170_v34, 4 }
 0x100   : > { %v1297_v41 = vrot.slane %v1296_v31, 2  ;;  %v1302_v42 = vmax.f32 %v1106_v29, %v1301_v32  ;;  %v1308_v43 = vmax.f32 %v1108_v30, %v1307_v33  ;;  %v1499_v44 = vrot.slane %v1172_v39, 4 }
 0x101   : > { %v1315_v45 = vrot.slane %v1314_v35, 2  ;;  %v1507_v46 = vrot.slane %v1506_v37, 2  ;;  %v1494_v47 = vmax.f32 %v1170_v34, %v1493_v40  ;;  %v2683_v49 = vpop.f32.mrb[8].mxu0  ;;  %v2685_v50 = vpop.f32.mrb[8].mxu1  ;;  %v983_v16 = vmax.f32 %v920_v48, 0.0 }
 0x102   : > { %v1298_v51 = vmax.f32 %v1296_v31, %v1297_v41  ;;  %v1303_v52 = vrot.slane %v1302_v42, 2  ;;  %v1309_v53 = vrot.slane %v1308_v43, 2  ;;  %v1500_v54 = vmax.f32 %v1172_v39, %v1499_v44  ;;  %v2687_v55 = vpop.f32.mrb[9].mxu0  ;;  %v2689_v56 = vpop.f32.mrb[9].mxu1 }
 0x103   : > { %v1316_v57 = vmax.f32 %v1314_v35, %v1315_v45  ;;  %v1508_v58 = vmax.f32 %v1506_v37, %v1507_v46  ;;  %v1495_v59 = vrot.slane %v1494_v47, 2  ;;  %v2692_v61 = vpop.f32.mrb[10].mxu0  ;;  %v2694_v62 = vpop.f32.mrb[10].mxu1  ;;  %v952_v21 = vadd.f32 %v2637_v38, %v882_v60 }
 0x104   : > { %v1299_v63 = vrot.slane %v1298_v51, 1  ;;  %v1304_v0 = vmax.f32 %v1302_v42, %v1303_v52  ;;  %v1310_v1 = vmax.f32 %v1308_v43, %v1309_v53  ;;  %v2696_v2 = vpop.f32.mrb[11].mxu0  ;;  %v2698_v3 = vpop.f32.mrb[11].mxu1  ;;  %v1501_v5 = vrot.slane %v1500_v54, 2 }
 0x105   : > { %v1317_v4 = vrot.slane %v1316_v57, 1  ;;  %v1509_v17 = vrot.slane %v1508_v58, 1  ;;  %v1496_v18 = vmax.f32 %v1494_v47, %v1495_v59  ;;  %v2706_v32 = vrot.slane %v983_v16, 6 }
 0x106   : > { %v1300_v7 = vmax.f32 %v1298_v51, %v1299_v63  ;;  %v1305_v8 = vrot.slane %v1304_v0, 1  ;;  %v1311_v10 = vrot.slane %v1310_v1, 1  ;;  %v1502_v27 = vmax.f32 %v1500_v54, %v1501_v5 }
 0x107   : > { %v1318_v9 = vmax.f32 %v1316_v57, %v1317_v4  ;;  %v2712_v35 = vmax.f32 %v1508_v58, %v1509_v17  ;;  %v1497_v37 = vrot.slane %v1496_v18, 1  ;;  %v1015_v39 = vmax.f32 %v952_v21, 0.0 }
 0x108   : > { %v2278_v22 = vpack.c.bf16 %v1300_v7, %v1300_v7  ;;  %v1306_v23 = vmax.f32 %v1304_v0, %v1305_v8  ;;  %v1312_v24 = vmax.f32 %v1310_v1, %v1311_v10  ;;  %v918_v40 = vadd.f32 %v2637_v38, %v848_v6 }
 0x109   : > { %v2702_v28 = vpop.f32.mrb[12].mxu0  ;;  %v2704_v29 = vpop.f32.mrb[12].mxu1  ;;  %v2281_v14 = vpack.c.bf16 %v1318_v9, %v1318_v9  ;;  %v880_v46 = vmul.f32 %v2632_v36, %v2661_v15  ;;  %v1503_v51 = vrot.slane %v1502_v27, 1  ;;  %v851_v53 = vmul.f32 %v2664_v19, %v2632_v36 }
 0x10a   : > { %v2279_v30 = vpack.c.bf16 %v1306_v23, %v1306_v23  ;;  %v2280_v31 = vpack.c.bf16 %v1312_v24, %v1312_v24  ;;  %v2708_v33 = vpop.f32.mrb[13].mxu0  ;;  %v2710_v34 = vpop.f32.mrb[13].mxu1  ;;  %v1925_v43 = vunpack.c.l.b16 %v2278_v22  ;;  %v981_v52 = vmax.f32 %v918_v40, 0.0 }
 0x10b   : > { %v2715_v41 = vpop.f32.mrb[14].mxu0  ;;  %v2717_v42 = vpop.f32.mrb[14].mxu1  ;;  %v883_v54 = vmul.f32 %v2666_v20, %v2632_v36  ;;  %v1928_v57 = vunpack.c.l.b16 %v2281_v14  ;;  %v950_v59 = vadd.f32 %v2637_v38, %v880_v46  ;;  %v849_v15 = vmul.f32 %v2632_v36, %v2673_v25 }
 0x10c   : > { %v1926_v44 = vunpack.c.l.b16 %v2279_v30  ;;  %v1927_v45 = vunpack.c.l.b16 %v2280_v31  ;;  %v2721_v47 = vpop.f32.mrb[15].mxu0  ;;  %v2723_v48 = vpop.f32.mrb[15].mxu1  ;;  %v1111_v63 = vrot.slane %v981_v52, 6  ;;  %v921_v0 = vadd.f32 %v2637_v38, %v851_v53 }
 0x10d   : > { %v953_v1 = vadd.f32 %v2637_v38, %v883_v54  ;;  %v1013_v4 = vmax.f32 %v950_v59, 0.0  ;;  %v919_v20 = vadd.f32 %v2637_v38, %v849_v15  ;;  %v881_v5 = vmul.f32 %v2632_v36, %v2675_v26 }
 0x10e   : > { %v1989_v58 = vsel %vm1988_vm2, %v1926_v44, %v1925_v43  ;;  %v1179_v6 = vrot.slane %v1015_v39, 6  ;;  %v1112_v25 = vsel %vm1103_vm1, %v2657_v12, %v1111_v63  ;;  %v984_v7 = vmax.f32 %v921_v0, 0.0 }
 0x10f   : > { %v1991_v60 = vsel %vm1990_vm3, %v1927_v45, %v1989_v58  ;;  %v1016_v8 = vmax.f32 %v953_v1, 0.0  ;;  %v1319_v9 = vrot.slane %v1112_v25, 4  ;;  %v1175_v17 = vrot.slane %v1013_v4, 6 }
 0x110   : > { %v2737_v19 = vsel %vm1992_vm4, %v1928_v57, %v1991_v60  ;;  %v982_v21 = vmax.f32 %v919_v20, 0.0  ;;  %v951_v22 = vadd.f32 %v2637_v38, %v881_v5  ;;  %v2753_v26 = vmax.f32 %v1496_v18, %v1497_v37 }
 0x111   : > { %v2744_v10 = vpop.f32.mrb[16].mxu0  ;;  %v2746_v16 = vpop.f32.mrb[16].mxu1  ;;  %v2755_v14 = vmax.f32 %v1502_v27, %v1503_v51  ;;  %v2757_v12 = vrot.slane %v984_v7, 6  ;;  %v2759_v30 = vrot.slane %v1016_v8, 6  ;;  %v1320_v40 = vmax.f32 %v1112_v25, %v1319_v9 }
 0x112   : > { %v2749_v23 = vpop.f32.mrb[17].mxu0  ;;  %v2751_v24 = vpop.f32.mrb[17].mxu1  ;;  %v1176_v43 = vsel %vm1103_vm1, %v2659_v13, %v1175_v17  ;;  %v1113_v44 = vrot.slane %v982_v21, 6  ;;  %v1014_v45 = vmax.f32 %v951_v22, 0.0  ;;  %v854_v52 = vmul.f32 %v2683_v49, %v2632_v36 }
 0x113   : > { %v2761_v31 = vpop.f32.mrb[18].mxu0  ;;  %v2763_v39 = vpop.f32.mrb[18].mxu1  ;;  %v1511_v27 = vrot.slane %v1176_v43, 4  ;;  %v1118_v37 = vsel %vm1103_vm1, %v2706_v32, %v2757_v12  ;;  %v1182_v51 = vsel %vm1103_vm1, %v1179_v6, %v2759_v30  ;;  %v1321_v53 = vrot.slane %v1320_v40, 2 }
 0x114   : > { %v2767_v46 = vpop.f32.mrb[19].mxu0  ;;  %v2769_v18 = vpop.f32.mrb[19].mxu1  ;;  %v1337_v54 = vrot.slane %v1118_v37, 4  ;;  %v1529_v13 = vrot.slane %v1182_v51, 4  ;;  %v1114_v57 = vsel %vm1103_vm1, %v1111_v63, %v1113_v44  ;;  %v1116_v59 = vsel %vm1103_vm1, %v1113_v44, %v2706_v32 }
 0x115   : > { %v1512_v58 = vmax.f32 %v1176_v43, %v1511_v27  ;;  %v1325_v15 = vrot.slane %v1114_v57, 4  ;;  %v1177_v60 = vrot.slane %v1014_v45, 6  ;;  %v1322_v0 = vmax.f32 %v1320_v40, %v1321_v53 }
 0x116   : > { %v1338_v1 = vmax.f32 %v1118_v37, %v1337_v54  ;;  %v1530_v4 = vmax.f32 %v1182_v51, %v1529_v13  ;;  %v1331_v20 = vrot.slane %v1116_v59, 4 }
 0x117   : > { %v1513_v5 = vrot.slane %v1512_v58, 2  ;;  %v1326_v25 = vmax.f32 %v1114_v57, %v1325_v15  ;;  %v1178_v49 = vsel %vm1103_vm1, %v1175_v17, %v1177_v60  ;;  %v1180_v7 = vsel %vm1103_vm1, %v1177_v60, %v1179_v6 }
 0x118   : > { %v1323_v9 = vrot.slane %v1322_v0, 1  ;;  %v1339_v21 = vrot.slane %v1338_v1, 2  ;;  %v1531_v22 = vrot.slane %v1530_v4, 2  ;;  %v1332_v32 = vmax.f32 %v1116_v59, %v1331_v20 }
 0x119   : > { %v2783_v8 = vpop.f32.mrb[20].mxu0  ;;  %v2785_v63 = vpop.f32.mrb[20].mxu1  ;;  %v1514_v44 = vmax.f32 %v1512_v58, %v1513_v5  ;;  %v1327_v45 = vrot.slane %v1326_v25, 2  ;;  %v1517_v27 = vrot.slane %v1178_v49, 4  ;;  %v1523_v37 = vrot.slane %v1180_v7, 4 }
 0x11a   : > { %v2787_v43 = vpop.f32.mrb[21].mxu0  ;;  %v2789_v40 = vpop.f32.mrb[21].mxu1  ;;  %v1324_v6 = vmax.f32 %v1322_v0, %v1323_v9  ;;  %v1340_v53 = vmax.f32 %v1338_v1, %v1339_v21  ;;  %v1532_v54 = vmax.f32 %v1530_v4, %v1531_v22  ;;  %v1333_v13 = vrot.slane %v1332_v32, 2 }
 0x11b   : > { %v2791_v51 = vpop.f32.mrb[22].mxu0  ;;  %v2793_v17 = vpop.f32.mrb[22].mxu1  ;;  %v2313_v15 = vpack.c.bf16 %v2712_v35, %v2712_v35  ;;  %v1515_v58 = vrot.slane %v1514_v44, 1  ;;  %v1328_v60 = vmax.f32 %v1326_v25, %v1327_v45  ;;  %v1518_v20 = vmax.f32 %v1178_v49, %v1517_v27 }
 0x11c   : > { %3288 = vst [vmem:[#allocation3_spill] sm:$0xff] %v2793_v17  ;;  %v2795_v57 = vpop.f32.mrb[23].mxu0  ;;  %v2797_v59 = vpop.f32.mrb[23].mxu1  ;;  %v2311_v5 = vpack.c.bf16 %v2753_v26, %v2753_v26  ;;  %v2282_v11 = vpack.c.bf16 %v1324_v6, %v1324_v6  ;;  %v1341_v0 = vrot.slane %v1340_v53, 1  ;;  %v1334_v1 = vmax.f32 %v1332_v32, %v1333_v13 }
 0x11d   : > { %3289 = vst [vmem:[#allocation4_spill] sm:$0xff] %v2795_v57  ;;  %3290 = vst [vmem:[#allocation5_spill] sm:$0xff] %v2797_v59  ;;  %v2312_v4 = vpack.c.bf16 %v2755_v14, %v2755_v14  ;;  %v1329_v9 = vrot.slane %v1328_v60, 1  ;;  %v1524_v21 = vmax.f32 %v1180_v7, %v1523_v37  ;;  %v924_v22 = vadd.f32 %v2637_v38, %v854_v52 }
 0x11e   : > { %v1929_v59 = vunpack.c.l.b16 %v2282_v11  ;;  %v1342_v57 = vmax.f32 %v1340_v53, %v1341_v0  ;;  %v1533_v35 = vrot.slane %v1532_v54, 1  ;;  %v1335_v17 = vrot.slane %v1334_v1, 1 }
 0x11f   : > { %v2806_v25 = vmax.f32 %v1514_v44, %v1515_v58  ;;  %v1330_v49 = vmax.f32 %v1328_v60, %v1329_v9  ;;  %v1519_v45 = vrot.slane %v1518_v20, 2  ;;  %v886_v26 = vmul.f32 %v2685_v50, %v2632_v36 }
 0x120   : > { %v2814_v14 = vunpack.c.l.b16 %v2313_v15  ;;  %v1995_v52 = vsel %vm1994_vm5, %v1929_v59, %v2737_v19  ;;  %v1336_v11 = vmax.f32 %v1334_v1, %v1335_v17  ;;  %v2822_v37 = vunpack.c.l.b16 %v2311_v5 }
 0x121   : > { %3291 = vst [vmem:[#allocation6_spill] sm:$0xff] %v2806_v25  ;;  %v2810_v27 = vpop.f32.mrb[24].mxu0  ;;  %v2812_v32 = vpop.f32.mrb[24].mxu1  ;;  %v2285_v6 = vpack.c.bf16 %v1342_v57, %v1342_v57  ;;  %v2283_v50 = vpack.c.bf16 %v1330_v49, %v1330_v49  ;;  %v1525_v53 = vrot.slane %v1524_v21, 2  ;;  %v2828_v15 = vunpack.c.l.b16 %v2312_v4 }
 0x122   : > { %3292 = vst [vmem:[#allocation7_spill] sm:$0xff] %v2814_v14  ;;  %v2818_v7 = vpop.f32.mrb[25].mxu0  ;;  %v2820_v44 = vpop.f32.mrb[25].mxu1  ;;  %3293 = vst [vmem:[#allocation8_spill] sm:$0xff] %v2822_v37  ;;  %v2830_v60 = vmax.f32 %v1532_v54, %v1533_v35  ;;  %v2284_v19 = vpack.c.bf16 %v1336_v11, %v1336_v11  ;;  %v987_v17 = vmax.f32 %v924_v22, 0.0  ;;  %v2838_v1 = vmax.f32 %v1518_v20, %v1519_v45 }
 0x123   : > { %v2824_v13 = vpop.f32.mrb[26].mxu0  ;;  %v2826_v58 = vpop.f32.mrb[26].mxu1  ;;  %3295 = vst [vmem:[#allocation10_spill] sm:$0xff] %v2828_v15  ;;  %v1930_v57 = vunpack.c.l.b16 %v2283_v50  ;;  %v956_v9 = vadd.f32 %v2637_v38, %v886_v26  ;;  %v852_v54 = vmul.f32 %v2632_v36, %v2687_v55  ;;  %v884_v4 = vmul.f32 %v2632_v36, %v2689_v56 }
 0x124   : > { %3294 = vst [vmem:[#allocation9_spill] sm:$0xff] %v2826_v58  ;;  %3296 = vst [vmem:[#allocation11_spill] sm:$0xff] %v2830_v60  ;;  %v2832_v59 = vpop.f32.mrb[27].mxu0  ;;  %v2834_v0 = vpop.f32.mrb[27].mxu1  ;;  %v1931_v49 = vunpack.c.l.b16 %v2284_v19  ;;  %v855_v22 = vmul.f32 %v2692_v61, %v2632_v36  ;;  %v1932_v35 = vunpack.c.l.b16 %v2285_v6  ;;  %v2849_v5 = vmax.f32 %v1524_v21, %v1525_v53 }
 0x125   : > { %3297 = vst [vmem:[#allocation12_spill] sm:$0xff] %v2832_v59  ;;  %3298 = vst [vmem:[#allocation13_spill] sm:$0xff] %v2834_v0  ;;  %v1997_v11 = vsel %vm1996_vm6, %v1930_v57, %v1995_v52  ;;  %v1019_v20 = vmax.f32 %v956_v9, 0.0  ;;  %v922_v26 = vadd.f32 %v2637_v38, %v852_v54  ;;  %v954_v50 = vadd.f32 %v2637_v38, %v884_v4 }
 0x126   : > { %3299 = vst [vmem:[#allocation14_spill] sm:$0xff] %v2838_v1  ;;  %3300 = vst [vmem:[#allocation15_spill] sm:$0xff] %v2849_v5  ;;  %v1999_v45 = vsel %vm1998_vm7, %v1931_v49, %v1997_v11  ;;  %v925_v55 = vadd.f32 %v2637_v38, %v855_v22  ;;  %v1123_v21 = vrot.slane %v987_v17, 6  ;;  %v887_v4 = vmul.f32 %v2694_v62, %v2632_v36 }
 0x127   : > { %v2001_v61 = vsel %vm2000_vm8, %v1932_v35, %v1999_v45  ;;  %v1187_v52 = vrot.slane %v1019_v20, 6  ;;  %v985_v57 = vmax.f32 %v922_v26, 0.0  ;;  %v1017_v9 = vmax.f32 %v954_v50, 0.0 }
 0x128   : > { %v2050_v19 = vpack.c.b16 %v2001_v61, %v2001_v61  ;;  %v988_v49 = vmax.f32 %v925_v55, 0.0  ;;  %v853_v22 = vmul.f32 %v2632_v36, %v2696_v2  ;;  %v885_v17 = vmul.f32 %v2632_v36, %v2698_v3 }
 0x129   : > { %v2863_v6 = vpop.f32.mrb[28].mxu0  ;;  %v2865_v53 = vpop.f32.mrb[28].mxu1  ;;  %v858_v35 = vmul.f32 %v2702_v28, %v2632_v36  ;;  %v1119_v11 = vrot.slane %v985_v57, 6  ;;  %v1183_v20 = vrot.slane %v1017_v9, 6  ;;  %v890_v26 = vmul.f32 %v2704_v29, %v2632_v36 }
 0x12a   : > { %3301 = vst [vmem:[#allocation16_spill] sm:$0xff] %v2863_v6  ;;  %3302 = vst [vmem:[#allocation17_spill] sm:$0xff] %v2865_v53  ;;  %v2867_v54 = vpop.f32.mrb[29].mxu0  ;;  %v2878_v45 = vrot.slane %v988_v49, 6  ;;  %v2882_v50 = vpop.f32.mrb[29].mxu1  ;;  %v957_v62 = vadd.f32 %v2637_v38, %v887_v4  ;;  %v923_v2 = vadd.f32 %v2637_v38, %v853_v22  ;;  %v955_v55 = vadd.f32 %v2637_v38, %v885_v17 }
 0x12b   : > { %3303 = vst [vmem:[#allocation18_spill] sm:$0xff] %v2867_v54  ;;  %2066 = vst [vmem:[%s2860_s10] sm:$0xf] %v2050_v19  ;;  %v928_v3 = vadd.f32 %v2637_v38, %v858_v35  ;;  %v2888_v61 = vpop.f32.mrb[30].mxu0  ;;  %v2448_v28 = vpop.f32.mrb[30].mxu1  ;;  %v1120_v19 = vsel %vm1103_vm1, %v2757_v12, %v1119_v11  ;;  %v1184_v57 = vsel %vm1103_vm1, %v2759_v30, %v1183_v20 }
 0x12c   : > { %3304 = vst [vmem:[#allocation19_spill] sm:$0xff] %v2882_v50  ;;  %3305 = vst [vmem:[#allocation20_spill] sm:$0xff] %v2888_v61  ;;  %v1126_v29 = vsel %vm1103_vm1, %v1123_v21, %v2878_v45  ;;  %v960_v9 = vadd.f32 %v2637_v38, %v890_v26  ;;  %v1343_v49 = vrot.slane %v1120_v19, 4  ;;  %v1535_v4 = vrot.slane %v1184_v57, 4  ;;  %v2897_v56 = vpop.f32.mrb[31].mxu0 }
 0x12d   : > { %v1361_v22 = vrot.slane %v1126_v29, 4  ;;  %v1020_v17 = vmax.f32 %v957_v62, 0.0  ;;  %3306 = vst [vmem:[#allocation21_spill] sm:$0xff] %v2897_v56  ;;  %v986_v35 = vmax.f32 %v923_v2, 0.0  ;;  %v1018_v60 = vmax.f32 %v955_v55, 0.0 }
 0x12e   : > { %v991_v28 = vmax.f32 %v928_v3, 0.0  ;;  %v1023_v14 = vmax.f32 %v960_v9, 0.0  ;;  %v1344_v15 = vmax.f32 %v1120_v19, %v1343_v49  ;;  %v1536_v12 = vmax.f32 %v1184_v57, %v1535_v4  ;;  %v2910_v4 = vpop.f32.mrb[31].mxu1 }
 0x12f   : > { %v1362_v37 = vmax.f32 %v1126_v29, %v1361_v22  ;;  %v2899_v25 = vrot.slane %v1020_v17, 6  ;;  %v1121_v30 = vrot.slane %v986_v35, 6  ;;  %v1185_v61 = vrot.slane %v1018_v60, 6  ;;  %3307 = vst [vmem:[#allocation22_spill] sm:$0xff] %v2910_v4 }
 0x130   : > { %v2901_v50 = vrot.slane %v991_v28, 6  ;;  %v2903_v26 = vrot.slane %v1023_v14, 6  ;;  %v1345_v54 = vrot.slane %v1344_v15, 2  ;;  %v1537_v5 = vrot.slane %v1536_v12, 2 }
 0x131   : > { %v1363_v62 = vrot.slane %v1362_v37, 2  ;;  %v1190_v2 = vsel %vm1103_vm1, %v1187_v52, %v2899_v25  ;;  %v1122_v3 = vsel %vm1103_vm1, %v1119_v11, %v1121_v30  ;;  %v1124_v19 = vsel %vm1103_vm1, %v1121_v30, %v1123_v21 }
 0x132   : > { %v1553_v55 = vrot.slane %v1190_v2, 4  ;;  %v1186_v57 = vsel %vm1103_vm1, %v1183_v20, %v1185_v61  ;;  %v1346_v29 = vmax.f32 %v1344_v15, %v1345_v54  ;;  %v1538_v9 = vmax.f32 %v1536_v12, %v1537_v5 }
 0x133   : > { %v1364_v60 = vmax.f32 %v1362_v37, %v1363_v62  ;;  %v1349_v49 = vrot.slane %v1122_v3, 4  ;;  %v1355_v22 = vrot.slane %v1124_v19, 4  ;;  %v1188_v17 = vsel %vm1103_vm1, %v1185_v61, %v1187_v52 }
 0x134   : > { %v1554_v14 = vmax.f32 %v1190_v2, %v1553_v55  ;;  %v1541_v35 = vrot.slane %v1186_v57, 4  ;;  %v1347_v28 = vrot.slane %v1346_v29, 1  ;;  %v1539_v56 = vrot.slane %v1538_v9, 1 }
 0x135   : > { %v1365_v1 = vrot.slane %v1364_v60, 1  ;;  %v1350_v53 = vmax.f32 %v1122_v3, %v1349_v49  ;;  %v1356_v6 = vmax.f32 %v1124_v19, %v1355_v22  ;;  %v1547_v30 = vrot.slane %v1188_v17, 4 }
 0x136   : > { %v1555_v11 = vrot.slane %v1554_v14, 2  ;;  %v1542_v21 = vmax.f32 %v1186_v57, %v1541_v35  ;;  %v1348_v20 = vmax.f32 %v1346_v29, %v1347_v28  ;;  %v1540_v15 = vmax.f32 %v1538_v9, %v1539_v56 }
 0x137   : > { %v1366_v5 = vmax.f32 %v1364_v60, %v1365_v1  ;;  %v1351_v37 = vrot.slane %v1350_v53, 2  ;;  %v1357_v12 = vrot.slane %v1356_v6, 2  ;;  %v1548_v2 = vmax.f32 %v1188_v17, %v1547_v30 }
 0x138   : > { %v1556_v54 = vmax.f32 %v1554_v14, %v1555_v11  ;;  %v1543_v62 = vrot.slane %v1542_v21, 2  ;;  %v2286_v55 = vpack.c.bf16 %v1348_v20, %v1348_v20  ;;  %v2318_v4 = vpack.c.bf16 %v1540_v15, %v1540_v15 }
 0x139   : > { %v2289_v52 = vpack.c.bf16 %v1366_v5, %v1366_v5  ;;  %v1352_v61 = vmax.f32 %v1350_v53, %v1351_v37  ;;  %v1358_v59 = vmax.f32 %v1356_v6, %v1357_v12  ;;  %v1549_v3 = vrot.slane %v1548_v2, 2 }
 0x13a   : > { %v1557_v0 = vrot.slane %v1556_v54, 1  ;;  %v1544_v58 = vmax.f32 %v1542_v21, %v1543_v62  ;;  %v1933_v49 = vunpack.c.l.b16 %v2286_v55  ;;  %v1965_v19 = vunpack.c.l.b16 %v2318_v4 }
 0x13b   : > { %v1936_v57 = vunpack.c.l.b16 %v2289_v52  ;;  %v1353_v22 = vrot.slane %v1352_v61, 1  ;;  %v1359_v56 = vrot.slane %v1358_v59, 1  ;;  %v1550_v9 = vmax.f32 %v1548_v2, %v1549_v3 }
 0x13c   : > { %v1558_v29 = vmax.f32 %v1556_v54, %v1557_v0  ;;  %v1545_v1 = vrot.slane %v1544_v58, 1  ;;  %v856_v14 = vmul.f32 %v2632_v36, %v2708_v33  ;;  %v888_v17 = vmul.f32 %v2632_v36, %v2710_v34 }
 0x13d   : > { %v1354_v60 = vmax.f32 %v1352_v61, %v1353_v22  ;;  %v859_v6 = vmul.f32 %v2715_v41, %v2632_v36  ;;  %v1360_v35 = vmax.f32 %v1358_v59, %v1359_v56  ;;  %v1551_v4 = vrot.slane %v1550_v9, 1 }
 0x13e   : > { %v2321_v53 = vpack.c.bf16 %v1558_v29, %v1558_v29  ;;  %v1546_v28 = vmax.f32 %v1544_v58, %v1545_v1  ;;  %v926_v0 = vadd.f32 %v2637_v38, %v856_v14  ;;  %v958_v21 = vadd.f32 %v2637_v38, %v888_v17 }
 0x13f   : > { %v2287_v11 = vpack.c.bf16 %v1354_v60, %v1354_v60  ;;  %v929_v30 = vadd.f32 %v2637_v38, %v859_v6  ;;  %v2288_v15 = vpack.c.bf16 %v1360_v35, %v1360_v35  ;;  %v1552_v33 = vmax.f32 %v1550_v9, %v1551_v4 }
 0x140   : > { %v1968_v20 = vunpack.c.l.b16 %v2321_v53  ;;  %v2319_v5 = vpack.c.bf16 %v1546_v28, %v1546_v28  ;;  %v989_v34 = vmax.f32 %v926_v0, 0.0  ;;  %v1021_v54 = vmax.f32 %v958_v21, 0.0 }
 0x141   : > { %v1934_v37 = vunpack.c.l.b16 %v2287_v11  ;;  %v992_v12 = vmax.f32 %v929_v30, 0.0  ;;  %v1935_v41 = vunpack.c.l.b16 %v2288_v15  ;;  %v2320_v62 = vpack.c.bf16 %v1552_v33, %v1552_v33 }
 0x142   : > { %v1966_v59 = vunpack.c.l.b16 %v2319_v5  ;;  %v891_v58 = vmul.f32 %v2717_v42, %v2632_v36  ;;  %v1127_v55 = vrot.slane %v989_v34, 6  ;;  %v1191_v52 = vrot.slane %v1021_v54, 6 }
 0x143   : > { %v2002_v2 = vsel %vm1988_vm2, %v1934_v37, %v1933_v49  ;;  %v2925_v61 = vrot.slane %v992_v12, 6  ;;  %v1967_v22 = vunpack.c.l.b16 %v2320_v62  ;;  %v862_v4 = vmul.f32 %v2744_v10, %v2632_v36 }
 0x144   : > { %v2003_v3 = vsel %vm1990_vm3, %v1935_v41, %v2002_v2  ;;  %v2030_v29 = vsel %vm1988_vm2, %v1966_v59, %v1965_v19  ;;  %v961_v56 = vadd.f32 %v2637_v38, %v891_v58  ;;  %v1128_v1 = vsel %vm1103_vm1, %v2878_v45, %v1127_v55 }
 0x145   : > { %v2933_v9 = vsel %vm1992_vm4, %v1936_v57, %v2003_v3  ;;  %v1192_v42 = vsel %vm1103_vm1, %v2899_v25, %v1191_v52  ;;  %v1134_v49 = vsel %vm1103_vm1, %v2901_v50, %v2925_v61  ;;  %v2031_v60 = vsel %vm1990_vm3, %v1967_v22, %v2030_v29 }
 0x146   : > { %v1367_v14 = vrot.slane %v1128_v1, 4  ;;  %v1559_v17 = vrot.slane %v1192_v42, 4  ;;  %v1385_v19 = vrot.slane %v1134_v49, 4  ;;  %v2032_v6 = vsel %vm1992_vm4, %v1968_v20, %v2031_v60 }
 0x147   : > { %v1024_v53 = vmax.f32 %v961_v56, 0.0  ;;  %v857_v45 = vmul.f32 %v2632_v36, %v2721_v47  ;;  %v889_v57 = vmul.f32 %v2632_v36, %v2723_v48  ;;  %v894_v30 = vmul.f32 %v2746_v16, %v2632_v36 }
 0x148   : > { %v1368_v35 = vmax.f32 %v1128_v1, %v1367_v14  ;;  %v1560_v25 = vmax.f32 %v1192_v42, %v1559_v17  ;;  %v1386_v28 = vmax.f32 %v1134_v49, %v1385_v19  ;;  %v932_v48 = vadd.f32 %v2637_v38, %v862_v4 }
 0x149   : > { %v2948_v11 = vrot.slane %v1024_v53, 6  ;;  %v927_v0 = vadd.f32 %v2637_v38, %v857_v45  ;;  %v959_v21 = vadd.f32 %v2637_v38, %v889_v57  ;;  %v964_v37 = vadd.f32 %v2637_v38, %v894_v30 }
 0x14a   : > { %v1369_v20 = vrot.slane %v1368_v35, 2  ;;  %v1561_v47 = vrot.slane %v1560_v25, 2  ;;  %v1387_v15 = vrot.slane %v1386_v28, 2  ;;  %v995_v16 = vmax.f32 %v932_v48, 0.0 }
 0x14b   : > { %v1198_v33 = vsel %vm1103_vm1, %v2903_v26, %v2948_v11  ;;  %v990_v5 = vmax.f32 %v927_v0, 0.0  ;;  %v1022_v10 = vmax.f32 %v959_v21, 0.0  ;;  %v1027_v58 = vmax.f32 %v964_v37, 0.0 }
 0x14c   : > { %v1370_v34 = vmax.f32 %v1368_v35, %v1369_v20  ;;  %v1562_v54 = vmax.f32 %v1560_v25, %v1561_v47  ;;  %v1388_v12 = vmax.f32 %v1386_v28, %v1387_v15  ;;  %v1577_v41 = vrot.slane %v1198_v33, 4 }
 0x14d   : > { %v1129_v62 = vrot.slane %v990_v5, 6  ;;  %v1193_v59 = vrot.slane %v1022_v10, 6 }
 0x14e   : > { %v1371_v2 = vrot.slane %v1370_v34, 1  ;;  %v1563_v3 = vrot.slane %v1562_v54, 1  ;;  %v1389_v22 = vrot.slane %v1388_v12, 1  ;;  %v1578_v29 = vmax.f32 %v1198_v33, %v1577_v41 }
 0x14f   : > { %v1130_v56 = vsel %vm1103_vm1, %v1127_v55, %v1129_v62  ;;  %v1132_v1 = vsel %vm1103_vm1, %v1129_v62, %v2901_v50  ;;  %v1194_v42 = vsel %vm1103_vm1, %v1191_v52, %v1193_v59  ;;  %v1196_v49 = vsel %vm1103_vm1, %v1193_v59, %v2903_v26 }
 0x150   : > { %v1372_v60 = vmax.f32 %v1370_v34, %v1371_v2  ;;  %v1564_v14 = vmax.f32 %v1562_v54, %v1563_v3  ;;  %v1390_v17 = vmax.f32 %v1388_v12, %v1389_v22  ;;  %v1579_v19 = vrot.slane %v1578_v29, 2 }
 0x151   : > { %v1373_v53 = vrot.slane %v1130_v56, 4  ;;  %v1379_v45 = vrot.slane %v1132_v1, 4  ;;  %v1565_v57 = vrot.slane %v1194_v42, 4  ;;  %v1571_v35 = vrot.slane %v1196_v49, 4 }
 0x152   : > { %v2290_v25 = vpack.c.bf16 %v1372_v60, %v1372_v60  ;;  %v2322_v28 = vpack.c.bf16 %v1564_v14, %v1564_v14  ;;  %v2293_v4 = vpack.c.bf16 %v1390_v17, %v1390_v17  ;;  %v1580_v55 = vmax.f32 %v1578_v29, %v1579_v19 }
 0x153   : > { %v1374_v0 = vmax.f32 %v1130_v56, %v1373_v53  ;;  %v1380_v21 = vmax.f32 %v1132_v1, %v1379_v45  ;;  %v1566_v50 = vmax.f32 %v1194_v42, %v1565_v57  ;;  %v1572_v30 = vmax.f32 %v1196_v49, %v1571_v35 }
 0x154   : > { %v1937_v52 = vunpack.c.l.b16 %v2290_v25  ;;  %v1969_v20 = vunpack.c.l.b16 %v2322_v28  ;;  %v1940_v47 = vunpack.c.l.b16 %v2293_v4  ;;  %v1581_v26 = vrot.slane %v1580_v55, 1 }
 0x155   : > { %v1375_v15 = vrot.slane %v1374_v0, 2  ;;  %v1381_v48 = vrot.slane %v1380_v21, 2  ;;  %v1567_v33 = vrot.slane %v1566_v50, 2  ;;  %v1573_v5 = vrot.slane %v1572_v30, 2 }
 0x156   : > { %v2005_v10 = vsel %vm1994_vm5, %v1937_v52, %v2933_v9  ;;  %v2033_v37 = vsel %vm1994_vm5, %v1969_v20, %v2032_v6  ;;  %v1582_v34 = vmax.f32 %v1580_v55, %v1581_v26  ;;  %v2968_v54 = vrot.slane %v995_v16, 6 }
 0x157   : > { %v1376_v12 = vmax.f32 %v1374_v0, %v1375_v15  ;;  %v1382_v41 = vmax.f32 %v1380_v21, %v1381_v48  ;;  %v1568_v62 = vmax.f32 %v1566_v50, %v1567_v33  ;;  %v1574_v59 = vmax.f32 %v1572_v30, %v1573_v5 }
 0x158   : > { %v2325_v2 = vpack.c.bf16 %v1582_v34, %v1582_v34  ;;  %v2970_v3 = vrot.slane %v1027_v58, 6  ;;  %v860_v22 = vmul.f32 %v2632_v36, %v2749_v23  ;;  %v892_v29 = vmul.f32 %v2632_v36, %v2751_v24 }
 0x159   : > { %v1377_v56 = vrot.slane %v1376_v12, 1  ;;  %v1383_v9 = vrot.slane %v1382_v41, 1  ;;  %v1569_v1 = vrot.slane %v1568_v62, 1  ;;  %v1575_v6 = vrot.slane %v1574_v59, 1 }
 0x15a   : > { %v1972_v42 = vunpack.c.l.b16 %v2325_v2  ;;  %v930_v16 = vadd.f32 %v2637_v38, %v860_v22  ;;  %v962_v49 = vadd.f32 %v2637_v38, %v892_v29  ;;  %v863_v60 = vmul.f32 %v2761_v31, %v2632_v36 }
 0x15b   : > { %v1378_v58 = vmax.f32 %v1376_v12, %v1377_v56  ;;  %v1384_v14 = vmax.f32 %v1382_v41, %v1383_v9  ;;  %v1570_v17 = vmax.f32 %v1568_v62, %v1569_v1  ;;  %v1576_v19 = vmax.f32 %v1574_v59, %v1575_v6  ;;  %v3013_v1 = vld [vmem:[%s3277_s2] ss:$0 sm:$0xff] }
 0x15c   : > { %v993_v23 = vmax.f32 %v930_v16, 0.0  ;;  %v1025_v53 = vmax.f32 %v962_v49, 0.0  ;;  %v933_v24 = vadd.f32 %v2637_v38, %v863_v60  ;;  %v895_v45 = vmul.f32 %v2763_v39, %v2632_v36 }
 0x15d   : > { %v2291_v57 = vpack.c.bf16 %v1378_v58, %v1378_v58  ;;  %v2292_v35 = vpack.c.bf16 %v1384_v14, %v1384_v14  ;;  %v2323_v25 = vpack.c.bf16 %v1570_v17, %v1570_v17  ;;  %v2324_v28 = vpack.c.bf16 %v1576_v19, %v1576_v19  ;;  %v3028_v17 = vld [vmem:[%s3278_s3] ss:$0 sm:$0xff] }
 0x15e   : > { %v2983_v4 = vrot.slane %v993_v23, 6  ;;  %v2985_v55 = vrot.slane %v1025_v53, 6  ;;  %v996_v31 = vmax.f32 %v933_v24, 0.0  ;;  %v965_v0 = vadd.f32 %v2637_v38, %v895_v45 }
 0x15f   : > { %v1938_v21 = vunpack.c.l.b16 %v2291_v57  ;;  %v1939_v50 = vunpack.c.l.b16 %v2292_v35  ;;  %v1970_v30 = vunpack.c.l.b16 %v2323_v25  ;;  %v1971_v52 = vunpack.c.l.b16 %v2324_v28 }
 0x160   : > { %v1136_v20 = vsel %vm1103_vm1, %v2925_v61, %v2983_v4  ;;  %v1200_v36 = vsel %vm1103_vm1, %v2948_v11, %v2985_v55  ;;  %v2994_v39 = vrot.slane %v996_v31, 6  ;;  %v1028_v26 = vmax.f32 %v965_v0, 0.0 }
 0x161   : > { %v2006_v15 = vsel %vm1996_vm6, %v1938_v21, %v2005_v10  ;;  %v2034_v48 = vsel %vm1996_vm6, %v1970_v30, %v2033_v37  ;;  %v1391_v38 = vrot.slane %v1136_v20, 4  ;;  %v1583_v33 = vrot.slane %v1200_v36, 4 }
 0x162   : > { %v2007_v5 = vsel %vm1998_vm7, %v1939_v50, %v2006_v15  ;;  %v2035_v34 = vsel %vm1998_vm7, %v1971_v52, %v2034_v48  ;;  %v1142_v61 = vsel %vm1103_vm1, %v2968_v54, %v2994_v39  ;;  %v3003_v11 = vrot.slane %v1028_v26, 6 }
 0x163   : > { %v2008_v12 = vsel %vm2000_vm8, %v1940_v47, %v2007_v5  ;;  %v2036_v10 = vsel %vm2000_vm8, %v1972_v42, %v2035_v34  ;;  %v1392_v41 = vmax.f32 %v1136_v20, %v1391_v38  ;;  %v1584_v37 = vmax.f32 %v1200_v36, %v1583_v33 }
 0x164   : > { %v2051_v62 = vpack.c.b16 %v2008_v12, %v2008_v12  ;;  %v2055_v59 = vpack.c.b16 %v2036_v10, %v2036_v10  ;;  %v1409_v2 = vrot.slane %v1142_v61, 4  ;;  %v1206_v22 = vsel %vm1103_vm1, %v2970_v3, %v3003_v11 }
 0x165   : > { %v1393_v29 = vrot.slane %v1392_v41, 2  ;;  %v1585_v56 = vrot.slane %v1584_v37, 2  ;;  %v1601_v9 = vrot.slane %v1206_v22, 4  ;;  %v861_v47 = vmul.f32 %v3013_v1, %v2767_v46 }
 0x166   : > { %2067 = vst [vmem:[%s2860_s10 + $0x4] sm:$0xf] %v2051_v62  ;;  %2071 = vst [vmem:[%s2860_s10 + $0x14] sm:$0xf] %v2055_v59  ;;  %v1410_v6 = vmax.f32 %v1142_v61, %v1409_v2  ;;  %v893_v42 = vmul.f32 %v3013_v1, %v2769_v18  ;;  %v866_v16 = vmul.f32 %v3013_v1, %v2783_v8 }
 0x167   : > { %v898_v49 = vmul.f32 %v3013_v1, %v2785_v63  ;;  %v1394_v60 = vmax.f32 %v1392_v41, %v1393_v29  ;;  %v1586_v58 = vmax.f32 %v1584_v37, %v1585_v56  ;;  %v1602_v14 = vmax.f32 %v1206_v22, %v1601_v9 }
 0x168   : > { %v931_v46 = vadd.f32 %v3028_v17, %v861_v47  ;;  %v1411_v19 = vrot.slane %v1410_v6, 2  ;;  %v963_v23 = vadd.f32 %v3028_v17, %v893_v42  ;;  %v936_v18 = vadd.f32 %v3028_v17, %v866_v16 }
 0x169   : > { %v968_v8 = vadd.f32 %v3028_v17, %v898_v49  ;;  %v1395_v53 = vrot.slane %v1394_v60, 1  ;;  %v1587_v24 = vrot.slane %v1586_v58, 1  ;;  %v1603_v63 = vrot.slane %v1602_v14, 2 }
 0x16a   : > { %v994_v45 = vmax.f32 %v931_v46, 0.0  ;;  %v1412_v57 = vmax.f32 %v1410_v6, %v1411_v19  ;;  %v1026_v35 = vmax.f32 %v963_v23, 0.0  ;;  %v999_v25 = vmax.f32 %v936_v18, 0.0  ;;  %v3308_v18 = vld [vmem:[#allocation3_spill] sm:$0xff] }
 0x16b   : > { %v1031_v28 = vmax.f32 %v968_v8, 0.0  ;;  %v1396_v31 = vmax.f32 %v1394_v60, %v1395_v53  ;;  %v1588_v0 = vmax.f32 %v1586_v58, %v1587_v24  ;;  %v1604_v21 = vmax.f32 %v1602_v14, %v1603_v63 }
 0x16c   : > { %v1137_v50 = vrot.slane %v994_v45, 6  ;;  %v1413_v30 = vrot.slane %v1412_v57, 1  ;;  %v1201_v52 = vrot.slane %v1026_v35, 6  ;;  %v3034_v20 = vrot.slane %v999_v25, 6 }
 0x16d   : > { %v3036_v36 = vrot.slane %v1031_v28, 6  ;;  %v2294_v26 = vpack.c.bf16 %v1396_v31, %v1396_v31  ;;  %v2326_v15 = vpack.c.bf16 %v1588_v0, %v1588_v0  ;;  %v1605_v48 = vrot.slane %v1604_v21, 1 }
 0x16e   : > { %v1138_v38 = vsel %vm1103_vm1, %v2983_v4, %v1137_v50  ;;  %v1414_v33 = vmax.f32 %v1412_v57, %v1413_v30  ;;  %v1140_v5 = vsel %vm1103_vm1, %v1137_v50, %v2968_v54  ;;  %v1202_v61 = vsel %vm1103_vm1, %v2985_v55, %v1201_v52 }
 0x16f   : > { %v1397_v34 = vrot.slane %v1138_v38, 4  ;;  %v1941_v12 = vunpack.c.l.b16 %v2294_v26  ;;  %v3044_v10 = vunpack.c.l.b16 %v2326_v15  ;;  %v1606_v41 = vmax.f32 %v1604_v21, %v1605_v48 }
 0x170   : > { %v1403_v37 = vrot.slane %v1140_v5, 4  ;;  %v2297_v62 = vpack.c.bf16 %v1414_v33, %v1414_v33  ;;  %v1204_v2 = vsel %vm1103_vm1, %v1201_v52, %v2970_v3  ;;  %v1589_v22 = vrot.slane %v1202_v61, 4 }
 0x171   : > { %v1398_v59 = vmax.f32 %v1138_v38, %v1397_v34  ;;  %v2329_v4 = vpack.c.bf16 %v1606_v41, %v1606_v41  ;;  %v1595_v56 = vrot.slane %v1204_v2, 4  ;;  %v864_v54 = vmul.f32 %v3013_v1, %v2787_v43 }
 0x172   : > { %v1404_v29 = vmax.f32 %v1140_v5, %v1403_v37  ;;  %v1944_v9 = vunpack.c.l.b16 %v2297_v62  ;;  %v1590_v55 = vmax.f32 %v1202_v61, %v1589_v22  ;;  %v896_v6 = vmul.f32 %v3013_v1, %v2789_v40 }
 0x173   : > { %v1399_v47 = vrot.slane %v1398_v59, 2  ;;  %v1976_v42 = vunpack.c.l.b16 %v2329_v4  ;;  %v1596_v49 = vmax.f32 %v1204_v2, %v1595_v56  ;;  %v934_v60 = vadd.f32 %v3028_v17, %v864_v54 }
 0x174   : > { %v1405_v16 = vrot.slane %v1404_v29, 2  ;;  %v1591_v3 = vrot.slane %v1590_v55, 2  ;;  %v966_v14 = vadd.f32 %v3028_v17, %v896_v6  ;;  %v867_v46 = vmul.f32 %v3013_v1, %v2791_v51 }
 0x175   : > { %v1400_v58 = vmax.f32 %v1398_v59, %v1399_v47  ;;  %v1597_v43 = vrot.slane %v1596_v49, 2  ;;  %v997_v23 = vmax.f32 %v934_v60, 0.0  ;;  %v899_v8 = vmul.f32 %v3013_v1, %v3308_v18 }
 0x176   : > { %v1406_v19 = vmax.f32 %v1404_v29, %v1405_v16  ;;  %v1592_v40 = vmax.f32 %v1590_v55, %v1591_v3  ;;  %v1029_v24 = vmax.f32 %v966_v14, 0.0  ;;  %v937_v63 = vadd.f32 %v3028_v17, %v867_v46 }
 0x177   : > { %v1401_v53 = vrot.slane %v1400_v58, 1  ;;  %v1598_v57 = vmax.f32 %v1596_v49, %v1597_v43  ;;  %v3059_v35 = vrot.slane %v997_v23, 6  ;;  %v969_v25 = vadd.f32 %v3028_v17, %v899_v8 }
 0x178   : > { %v1407_v45 = vrot.slane %v1406_v19, 1  ;;  %v1593_v31 = vrot.slane %v1592_v40, 1  ;;  %v3062_v51 = vrot.slane %v1029_v24, 6  ;;  %v1000_v0 = vmax.f32 %v937_v63, 0.0 }
 0x179   : > { %v1402_v28 = vmax.f32 %v1400_v58, %v1401_v53  ;;  %v1599_v50 = vrot.slane %v1598_v57, 1  ;;  %v1144_v30 = vsel %vm1103_vm1, %v2994_v39, %v3059_v35  ;;  %v1032_v52 = vmax.f32 %v969_v25, 0.0  ;;  %v3310_v53 = vld [vmem:[#allocation5_spill] sm:$0xff] }
 0x17a   : > { %v1408_v21 = vmax.f32 %v1406_v19, %v1407_v45  ;;  %v1594_v15 = vmax.f32 %v1592_v40, %v1593_v31  ;;  %v1415_v48 = vrot.slane %v1144_v30, 4  ;;  %v1208_v38 = vsel %vm1103_vm1, %v3003_v11, %v3062_v51  ;;  %v3309_v19 = vld [vmem:[#allocation4_spill] sm:$0xff] }
 0x17b   : > { %v2295_v26 = vpack.c.bf16 %v1402_v28, %v1402_v28  ;;  %v1600_v5 = vmax.f32 %v1598_v57, %v1599_v50  ;;  %v1607_v34 = vrot.slane %v1208_v38, 4  ;;  %v3070_v61 = vrot.slane %v1000_v0, 6 }
 0x17c   : > { %v2296_v33 = vpack.c.bf16 %v1408_v21, %v1408_v21  ;;  %v2327_v37 = vpack.c.bf16 %v1594_v15, %v1594_v15  ;;  %v1416_v62 = vmax.f32 %v1144_v30, %v1415_v48  ;;  %v3072_v59 = vrot.slane %v1032_v52, 6 }
 0x17d   : > { %v1942_v41 = vunpack.c.l.b16 %v2295_v26  ;;  %v2328_v39 = vpack.c.bf16 %v1600_v5, %v1600_v5  ;;  %v1608_v22 = vmax.f32 %v1208_v38, %v1607_v34  ;;  %v1150_v4 = vsel %vm1103_vm1, %v3034_v20, %v3070_v61 }
 0x17e   : > { %v1943_v2 = vunpack.c.l.b16 %v2296_v33  ;;  %v1974_v11 = vunpack.c.l.b16 %v2327_v37  ;;  %v1417_v56 = vrot.slane %v1416_v62, 2  ;;  %v1433_v54 = vrot.slane %v1150_v4, 4 }
 0x17f   : > { %v2009_v29 = vsel %vm1988_vm2, %v1942_v41, %v1941_v12  ;;  %v1975_v55 = vunpack.c.l.b16 %v2328_v39  ;;  %v1609_v6 = vrot.slane %v1608_v22, 2  ;;  %v1214_v16 = vsel %vm1103_vm1, %v3036_v36, %v3072_v59 }
 0x180   : > { %v2010_v47 = vsel %vm1990_vm3, %v1943_v2, %v2009_v29  ;;  %v2037_v49 = vsel %vm1988_vm2, %v1974_v11, %v3044_v10  ;;  %v1418_v60 = vmax.f32 %v1416_v62, %v1417_v56  ;;  %v1434_v3 = vmax.f32 %v1150_v4, %v1433_v54 }
 0x181   : > { %v2011_v58 = vsel %vm1992_vm4, %v1944_v9, %v2010_v47  ;;  %v2038_v12 = vsel %vm1990_vm3, %v1975_v55, %v2037_v49  ;;  %v1610_v14 = vmax.f32 %v1608_v22, %v1609_v6  ;;  %v1625_v46 = vrot.slane %v1214_v16, 4 }
 0x182   : > { %v865_v43 = vmul.f32 %v3013_v1, %v3309_v19  ;;  %v1419_v23 = vrot.slane %v1418_v60, 1  ;;  %v2039_v18 = vsel %vm1992_vm4, %v1976_v42, %v2038_v12  ;;  %v1435_v8 = vrot.slane %v1434_v3, 2 }
 0x183   : > { %v897_v40 = vmul.f32 %v3013_v1, %v3310_v53  ;;  %v1611_v24 = vrot.slane %v1610_v14, 1  ;;  %v1626_v10 = vmax.f32 %v1214_v16, %v1625_v46  ;;  %v870_v9 = vmul.f32 %v3013_v1, %v2810_v27 }
 0x184   : > { %v935_v63 = vadd.f32 %v3028_v17, %v865_v43  ;;  %v1420_v45 = vmax.f32 %v1418_v60, %v1419_v23  ;;  %v1436_v57 = vmax.f32 %v1434_v3, %v1435_v8  ;;  %v902_v28 = vmul.f32 %v3013_v1, %v2812_v32 }
 0x185   : > { %v967_v25 = vadd.f32 %v3028_v17, %v897_v40  ;;  %v1612_v31 = vmax.f32 %v1610_v14, %v1611_v24  ;;  %v1627_v42 = vrot.slane %v1626_v10, 2  ;;  %v940_v21 = vadd.f32 %v3028_v17, %v870_v9 }
 0x186   : > { %v998_v0 = vmax.f32 %v935_v63, 0.0  ;;  %v2298_v50 = vpack.c.bf16 %v1420_v45, %v1420_v45  ;;  %v1437_v30 = vrot.slane %v1436_v57, 1  ;;  %v972_v26 = vadd.f32 %v3028_v17, %v902_v28  ;;  %v3311_v63 = vld [vmem:[#allocation9_spill] sm:$0xff] }
 0x187   : > { %v1030_v52 = vmax.f32 %v967_v25, 0.0  ;;  %v2330_v15 = vpack.c.bf16 %v1612_v31, %v1612_v31  ;;  %v1628_v48 = vmax.f32 %v1626_v10, %v1627_v42  ;;  %v1003_v38 = vmax.f32 %v940_v21, 0.0 }
 0x188   : > { %v1145_v27 = vrot.slane %v998_v0, 6  ;;  %v1945_v33 = vunpack.c.l.b16 %v2298_v50  ;;  %v1438_v5 = vmax.f32 %v1436_v57, %v1437_v30  ;;  %v1035_v41 = vmax.f32 %v972_v26, 0.0 }
 0x189   : > { %v1209_v34 = vrot.slane %v1030_v52, 6  ;;  %v1977_v37 = vunpack.c.l.b16 %v2330_v15  ;;  %v1629_v32 = vrot.slane %v1628_v48, 1  ;;  %v3115_v60 = vrot.slane %v1003_v38, 6 }
 0x18a   : > { %v1146_v62 = vsel %vm1103_vm1, %v3059_v35, %v1145_v27  ;;  %v1148_v2 = vsel %vm1103_vm1, %v1145_v27, %v3034_v20  ;;  %v3104_v39 = vsel %vm1994_vm5, %v1945_v33, %v2011_v58  ;;  %v2301_v22 = vpack.c.bf16 %v1438_v5, %v1438_v5 }
 0x18b   : > { %v1421_v4 = vrot.slane %v1146_v62, 4  ;;  %v1427_v29 = vrot.slane %v1148_v2, 4  ;;  %v3107_v11 = vsel %vm1994_vm5, %v1977_v37, %v2039_v18  ;;  %v1630_v56 = vmax.f32 %v1628_v48, %v1629_v32 }
 0x18c   : > { %v1210_v54 = vsel %vm1103_vm1, %v3062_v51, %v1209_v34  ;;  %v1212_v47 = vsel %vm1103_vm1, %v1209_v34, %v3036_v36  ;;  %v3113_v35 = vunpack.c.l.b16 %v2301_v22  ;;  %v3117_v58 = vrot.slane %v1035_v41, 6 }
 0x18d   : > { %v1422_v55 = vmax.f32 %v1146_v62, %v1421_v4  ;;  %v1428_v20 = vmax.f32 %v1148_v2, %v1427_v29  ;;  %v1613_v6 = vrot.slane %v1210_v54, 4  ;;  %v2333_v16 = vpack.c.bf16 %v1630_v56, %v1630_v56 }
 0x18e   : > { %v1619_v49 = vrot.slane %v1212_v47, 4  ;;  %v868_v51 = vmul.f32 %v3013_v1, %v2818_v7  ;;  %v900_v36 = vmul.f32 %v3013_v1, %v2820_v44  ;;  %v871_v43 = vmul.f32 %v3013_v1, %v2824_v13 }
 0x18f   : > { %v1423_v3 = vrot.slane %v1422_v55, 2  ;;  %v1429_v12 = vrot.slane %v1428_v20, 2  ;;  %v1614_v14 = vmax.f32 %v1210_v54, %v1613_v6  ;;  %v1980_v46 = vunpack.c.l.b16 %v2333_v16 }
 0x190   : > { %v1620_v19 = vmax.f32 %v1212_v47, %v1619_v49  ;;  %v938_v53 = vadd.f32 %v3028_v17, %v868_v51  ;;  %v970_v24 = vadd.f32 %v3028_v17, %v900_v36  ;;  %v941_v10 = vadd.f32 %v3028_v17, %v871_v43 }
 0x191   : > { %v1424_v23 = vmax.f32 %v1422_v55, %v1423_v3  ;;  %v1430_v18 = vmax.f32 %v1428_v20, %v1429_v12  ;;  %v1615_v8 = vrot.slane %v1614_v14, 2  ;;  %v903_v7 = vmul.f32 %v3013_v1, %v3311_v63  ;;  %v3312_v20 = vld [vmem:[#allocation12_spill] sm:$0xff] }
 0x192   : > { %v1621_v40 = vrot.slane %v1620_v19, 2  ;;  %v1001_v44 = vmax.f32 %v938_v53, 0.0  ;;  %v1033_v28 = vmax.f32 %v970_v24, 0.0  ;;  %v1004_v13 = vmax.f32 %v941_v10, 0.0  ;;  %v3313_v10 = vld [vmem:[#allocation13_spill] sm:$0xff] }
 0x193   : > { %v1425_v9 = vrot.slane %v1424_v23, 1  ;;  %v1431_v45 = vrot.slane %v1430_v18, 1  ;;  %v1616_v57 = vmax.f32 %v1614_v14, %v1615_v8  ;;  %v973_v31 = vadd.f32 %v3028_v17, %v903_v7 }
 0x194   : > { %v1622_v25 = vmax.f32 %v1620_v19, %v1621_v40  ;;  %v3131_v50 = vrot.slane %v1001_v44, 6  ;;  %v3133_v52 = vrot.slane %v1033_v28, 6  ;;  %v3135_v26 = vrot.slane %v1004_v13, 6  ;;  %v3315_v13 = vld [vmem:[#allocation17_spill] sm:$0xff] }
 0x195   : > { %v1426_v42 = vmax.f32 %v1424_v23, %v1425_v9  ;;  %v1432_v0 = vmax.f32 %v1430_v18, %v1431_v45  ;;  %v1617_v21 = vrot.slane %v1616_v57, 1  ;;  %v1036_v15 = vmax.f32 %v973_v31, 0.0 }
 0x196   : > { %v1623_v30 = vrot.slane %v1622_v25, 1  ;;  %v1152_v33 = vsel %vm1103_vm1, %v3070_v61, %v3131_v50  ;;  %v1216_v41 = vsel %vm1103_vm1, %v3072_v59, %v3133_v52  ;;  %v1158_v37 = vsel %vm1103_vm1, %v3115_v60, %v3135_v26 }
 0x197   : > { %v2299_v48 = vpack.c.bf16 %v1426_v42, %v1426_v42  ;;  %v2300_v27 = vpack.c.bf16 %v1432_v0, %v1432_v0  ;;  %v1618_v38 = vmax.f32 %v1616_v57, %v1617_v21  ;;  %v1439_v34 = vrot.slane %v1152_v33, 4  ;;  %v3314_v57 = vld [vmem:[#allocation16_spill] sm:$0xff] }
 0x198   : > { %v1624_v5 = vmax.f32 %v1622_v25, %v1623_v30  ;;  %v1631_v22 = vrot.slane %v1216_v41, 4  ;;  %v1457_v56 = vrot.slane %v1158_v37, 4  ;;  %v3146_v54 = vrot.slane %v1036_v15, 6  ;;  %v3316_v15 = vld [vmem:[#allocation14_spill] sm:$0xff] }
 0x199   : > { %v1946_v32 = vunpack.c.l.b16 %v2299_v48  ;;  %v1947_v62 = vunpack.c.l.b16 %v2300_v27  ;;  %v2331_v2 = vpack.c.bf16 %v1618_v38, %v1618_v38  ;;  %v1440_v29 = vmax.f32 %v1152_v33, %v1439_v34 }
 0x19a   : > { %v2332_v4 = vpack.c.bf16 %v1624_v5, %v1624_v5  ;;  %v1632_v55 = vmax.f32 %v1216_v41, %v1631_v22  ;;  %v869_v59 = vmul.f32 %v3013_v1, %v3312_v20  ;;  %v1458_v3 = vmax.f32 %v1158_v37, %v1457_v56 }
 0x19b   : > { %v2013_v61 = vsel %vm1996_vm6, %v1946_v32, %v3104_v39  ;;  %v1978_v47 = vunpack.c.l.b16 %v2331_v2  ;;  %v1441_v49 = vrot.slane %v1440_v29, 2  ;;  %v1222_v39 = vsel %vm1103_vm1, %v3117_v58, %v3146_v54  ;;  %v3317_v32 = vld [vmem:[#allocation15_spill] sm:$0xff] }
 0x19c   : > { %v2014_v6 = vsel %vm1998_vm7, %v1947_v62, %v2013_v61  ;;  %v1979_v16 = vunpack.c.l.b16 %v2332_v4  ;;  %v1633_v51 = vrot.slane %v1632_v55, 2  ;;  %v1459_v23 = vrot.slane %v1458_v3, 2 }
 0x19d   : > { %v2015_v12 = vsel %vm2000_vm8, %v3113_v35, %v2014_v6  ;;  %v2041_v14 = vsel %vm1996_vm6, %v1978_v47, %v3107_v11  ;;  %v1442_v43 = vmax.f32 %v1440_v29, %v1441_v49  ;;  %v1649_v53 = vrot.slane %v1222_v39, 4 }
 0x19e   : > { %v2052_v19 = vpack.c.b16 %v2015_v12, %v2015_v12  ;;  %v2042_v36 = vsel %vm1998_vm7, %v1979_v16, %v2041_v14  ;;  %v1634_v8 = vmax.f32 %v1632_v55, %v1633_v51  ;;  %v939_v35 = vadd.f32 %v3028_v17, %v869_v59 }
 0x19f   : > { %v2043_v18 = vsel %vm2000_vm8, %v1980_v46, %v2042_v36  ;;  %v1443_v11 = vrot.slane %v1442_v43, 1  ;;  %v1460_v24 = vmax.f32 %v1458_v3, %v1459_v23  ;;  %v901_v63 = vmul.f32 %v3013_v1, %v3313_v10  ;;  %v3318_v36 = vld [vmem:[#allocation18_spill] sm:$0xff]  ;;  %v3319_v23 = vld [vmem:[#allocation19_spill] sm:$0xff] }
 0x1a0   : > { %2068 = vst [vmem:[%s2860_s10 + $0x8] sm:$0xf] %v2052_v19  ;;  %v2056_v40 = vpack.c.b16 %v2043_v18, %v2043_v18  ;;  %v1635_v7 = vrot.slane %v1634_v8, 1  ;;  %v1650_v9 = vmax.f32 %v1222_v39, %v1649_v53  ;;  %v1002_v45 = vmax.f32 %v939_v35, 0.0 }
 0x1a1   : > { %v874_v44 = vmul.f32 %v3013_v1, %v3314_v57  ;;  %v1444_v25 = vmax.f32 %v1442_v43, %v1443_v11  ;;  %v1461_v46 = vrot.slane %v1460_v24, 1  ;;  %v971_v28 = vadd.f32 %v3028_v17, %v901_v63 }
 0x1a2   : > { %2072 = vst [vmem:[%s2860_s10 + $0x18] sm:$0xf] %v2056_v40  ;;  %v906_v31 = vmul.f32 %v3013_v1, %v3315_v13  ;;  %v1636_v42 = vmax.f32 %v1634_v8, %v1635_v7  ;;  %v1651_v0 = vrot.slane %v1650_v9, 2  ;;  %v1153_v21 = vrot.slane %v1002_v45, 6 }
 0x1a3   : > { %v944_v30 = vadd.f32 %v3028_v17, %v874_v44  ;;  %v1521_v48 = vrot.slane %v3316_v15, 1  ;;  %v2302_v27 = vpack.c.bf16 %v1444_v25, %v1444_v25  ;;  %v1462_v38 = vmax.f32 %v1460_v24, %v1461_v46  ;;  %v3320_v24 = vld [vmem:[#allocation20_spill] sm:$0xff]  ;;  %v3321_v46 = vld [vmem:[#allocation21_spill] sm:$0xff] }
 0x1a4   : > { %v1034_v33 = vmax.f32 %v971_v28, 0.0  ;;  %v2334_v5 = vpack.c.bf16 %v1636_v42, %v1636_v42  ;;  %v1652_v34 = vmax.f32 %v1650_v9, %v1651_v0  ;;  %v1154_v41 = vsel %vm1103_vm1, %v3131_v50, %v1153_v21 }
 0x1a5   : > { %v1156_v37 = vsel %vm1103_vm1, %v1153_v21, %v3115_v60  ;;  %v1527_v62 = vrot.slane %v3317_v32, 1  ;;  %v2305_v2 = vpack.c.bf16 %v1462_v38, %v1462_v38  ;;  %v1445_v22 = vrot.slane %v1154_v41, 4 }
 0x1a6   : > { %v1451_v4 = vrot.slane %v1156_v37, 4  ;;  %v1653_v29 = vrot.slane %v1652_v34, 1  ;;  %v1217_v56 = vrot.slane %v1034_v33, 6  ;;  %v1007_v61 = vmax.f32 %v944_v30, 0.0 }
 0x1a7   : > { %v3180_v47 = vadd.f32 %v3028_v17, %v906_v31  ;;  %v1949_v55 = vunpack.c.l.b16 %v2302_v27  ;;  %v3182_v20 = vunpack.c.l.b16 %v2334_v5  ;;  %v1446_v59 = vmax.f32 %v1154_v41, %v1445_v22 }
 0x1a8   : > { %v1452_v6 = vmax.f32 %v1156_v37, %v1451_v4  ;;  %v3184_v50 = vunpack.c.l.b16 %v2305_v2  ;;  %v3186_v16 = vmax.f32 %v1652_v34, %v1653_v29  ;;  %v1218_v60 = vsel %vm1103_vm1, %v3133_v52, %v1217_v56 }
 0x1a9   : > { %v1220_v49 = vsel %vm1103_vm1, %v1217_v56, %v3117_v58  ;;  %v1447_v3 = vrot.slane %v1446_v59, 2  ;;  %v1637_v14 = vrot.slane %v1218_v60, 4  ;;  %v3192_v39 = vrot.slane %v1007_v61, 6 }
 0x1aa   : > { %v1453_v12 = vrot.slane %v1452_v6, 2  ;;  %v1643_v51 = vrot.slane %v1220_v49, 4  ;;  %v1039_v19 = vmax.f32 %v3180_v47, 0.0  ;;  %v872_v43 = vmul.f32 %v3013_v1, %v3318_v36 }
 0x1ab   : > { %v904_v18 = vmul.f32 %v3013_v1, %v3319_v23  ;;  %v1448_v8 = vmax.f32 %v1446_v59, %v1447_v3  ;;  %v1638_v52 = vmax.f32 %v1218_v60, %v1637_v14  ;;  %v2337_v58 = vpack.c.bf16 %v3186_v16, %v3186_v16 }
 0x1ac   : > { %v1454_v53 = vmax.f32 %v1452_v6, %v1453_v12  ;;  %v1644_v35 = vmax.f32 %v1220_v49, %v1643_v51  ;;  %v942_v40 = vadd.f32 %v3028_v17, %v872_v43  ;;  %v875_v10 = vmul.f32 %v3013_v1, %v3320_v24  ;;  %v3322_v49 = vld [vmem:[#allocation2_spill] sm:$0xff] }
 0x1ad   : > { %v974_v11 = vadd.f32 %v3028_v17, %v904_v18  ;;  %v1449_v63 = vrot.slane %v1448_v8, 1  ;;  %v1639_v9 = vrot.slane %v1638_v52, 2  ;;  %v873_v28 = vmul.f32 %v3013_v1, %v3321_v46 }
 0x1ae   : > { %v1455_v7 = vrot.slane %v1454_v53, 1  ;;  %v1645_v45 = vrot.slane %v1644_v35, 2  ;;  %v1005_v57 = vmax.f32 %v942_v40, 0.0  ;;  %v945_v25 = vadd.f32 %v3028_v17, %v875_v10 }
 0x1af   : > { %v1037_v44 = vmax.f32 %v974_v11, 0.0  ;;  %v1450_v13 = vmax.f32 %v1448_v8, %v1449_v63  ;;  %v1640_v42 = vmax.f32 %v1638_v52, %v1639_v9  ;;  %v943_v38 = vadd.f32 %v3028_v17, %v873_v28 }
 0x1b0   : > { %v1456_v31 = vmax.f32 %v1454_v53, %v1455_v7  ;;  %v1646_v0 = vmax.f32 %v1644_v35, %v1645_v45  ;;  %v1159_v21 = vrot.slane %v1005_v57, 6  ;;  %v1008_v27 = vmax.f32 %v945_v25, 0.0  ;;  %v3323_v7 = vld [vmem:[#allocation22_spill] sm:$0xff] }
 0x1b1   : > { %v3208_v30 = vrot.slane %v1037_v44, 6  ;;  %v2303_v33 = vpack.c.bf16 %v1450_v13, %v1450_v13  ;;  %v1641_v34 = vrot.slane %v1640_v42, 1  ;;  %v1006_v4 = vmax.f32 %v943_v38, 0.0 }
 0x1b2   : > { %v2304_v5 = vpack.c.bf16 %v1456_v31, %v1456_v31  ;;  %v1647_v41 = vrot.slane %v1646_v0, 1  ;;  %v1160_v37 = vsel %vm1103_vm1, %v3135_v26, %v1159_v21  ;;  %v1165_v22 = vrot.slane %v1008_v27, 6 }
 0x1b3   : > { %v1224_v2 = vsel %vm1103_vm1, %v3146_v54, %v3208_v30  ;;  %v1950_v29 = vunpack.c.l.b16 %v2303_v33  ;;  %v1642_v61 = vmax.f32 %v1640_v42, %v1641_v34  ;;  %v1463_v6 = vrot.slane %v1160_v37, 4 }
 0x1b4   : > { %v1951_v56 = vunpack.c.l.b16 %v2304_v5  ;;  %v1648_v59 = vmax.f32 %v1646_v0, %v1647_v41  ;;  %v1655_v16 = vrot.slane %v1224_v2, 4  ;;  %v1166_v60 = vsel %vm1103_vm1, %v3192_v39, %v1165_v22 }
 0x1b5   : > { %v1168_v3 = vsel %vm1103_vm1, %v1165_v22, %v3322_v49  ;;  %v2016_v26 = vsel %vm1988_vm2, %v1950_v29, %v1949_v55  ;;  %v2335_v12 = vpack.c.bf16 %v1642_v61, %v1642_v61  ;;  %v1481_v51 = vrot.slane %v1166_v60, 4 }
 0x1b6   : > { %v2336_v14 = vpack.c.bf16 %v1648_v59, %v1648_v59  ;;  %v2017_v54 = vsel %vm1990_vm3, %v1951_v56, %v2016_v26  ;;  %v1464_v36 = vmax.f32 %v1160_v37, %v1463_v6  ;;  %v1656_v43 = vmax.f32 %v1224_v2, %v1655_v16 }
 0x1b7   : > { %v1487_v23 = vrot.slane %v1168_v3, 4  ;;  %v1982_v18 = vunpack.c.l.b16 %v2335_v12  ;;  %v2018_v53 = vsel %vm1992_vm4, %v3184_v50, %v2017_v54  ;;  %v1482_v52 = vmax.f32 %v1166_v60, %v1481_v51 }
 0x1b8   : > { %v1983_v8 = vunpack.c.l.b16 %v2336_v14  ;;  %v1465_v35 = vrot.slane %v1464_v36, 2  ;;  %v1657_v40 = vrot.slane %v1656_v43, 2  ;;  %v1161_v24 = vrot.slane %v1006_v4, 6 }
 0x1b9   : > { %v1488_v11 = vmax.f32 %v1168_v3, %v1487_v23  ;;  %v1984_v10 = vunpack.c.l.b16 %v2337_v58  ;;  %v2044_v55 = vsel %vm1988_vm2, %v1982_v18, %v3182_v20  ;;  %v1483_v63 = vrot.slane %v1482_v52, 2  ;;  %v3326_v18 = vld [vmem:[#allocation8_spill] sm:$0xff] }
 0x1ba   : > { %v905_v9 = vmul.f32 %v3013_v1, %v3323_v7  ;;  %v2045_v45 = vsel %vm1990_vm3, %v1983_v8, %v2044_v55  ;;  %v1466_v57 = vmax.f32 %v1464_v36, %v1465_v35  ;;  %v1658_v44 = vmax.f32 %v1656_v43, %v1657_v40  ;;  %v3324_v36 = vld [vmem:[#allocation6_spill] sm:$0xff]  ;;  %v3328_v55 = vld [vmem:[#allocation7_spill] sm:$0xff] }
 0x1bb   : > { %v1489_v25 = vrot.slane %v1488_v11, 2  ;;  %v2046_v50 = vsel %vm1992_vm4, %v1984_v10, %v2045_v45  ;;  %v1484_v46 = vmax.f32 %v1482_v52, %v1483_v63  ;;  %v1162_v28 = vsel %vm1103_vm1, %v1159_v21, %v1161_v24  ;;  %v3327_v40 = vld [vmem:[#allocation10_spill] sm:$0xff] }
 0x1bc   : > { %v1164_v58 = vsel %vm1103_vm1, %v1161_v24, %v3192_v39  ;;  %v1467_v13 = vrot.slane %v1466_v57, 1  ;;  %v1659_v31 = vrot.slane %v1658_v44, 1  ;;  %v1469_v42 = vrot.slane %v1162_v28, 4 }
 0x1bd   : > { %v1490_v20 = vmax.f32 %v1488_v11, %v1489_v25  ;;  %v1522_v1 = vmax.f32 %v3316_v15, %v1521_v48  ;;  %v1528_v0 = vmax.f32 %v3317_v32, %v1527_v62  ;;  %v1475_v27 = vrot.slane %v1164_v58, 4 }
 0x1be   : > { %v975_v38 = vadd.f32 %v3028_v17, %v905_v9  ;;  %v1468_v33 = vmax.f32 %v1466_v57, %v1467_v13  ;;  %v1660_v21 = vmax.f32 %v1658_v44, %v1659_v31  ;;  %v1470_v34 = vmax.f32 %v1162_v28, %v1469_v42 }
 0x1bf   : > { %v1491_v5 = vrot.slane %v1490_v20, 1  ;;  %v1227_v39 = vrot.slane %v1039_v19, 6  ;;  %v1485_v41 = vrot.slane %v1484_v46, 1  ;;  %v1476_v37 = vmax.f32 %v1164_v58, %v1475_v27 }
 0x1c0   : > { %v1038_v2 = vmax.f32 %v975_v38, 0.0  ;;  %v2306_v22 = vpack.c.bf16 %v1468_v33, %v1468_v33  ;;  %v2338_v4 = vpack.c.bf16 %v1660_v21, %v1660_v21  ;;  %v1471_v48 = vrot.slane %v1470_v34, 2 }
 0x1c1   : > { %v1492_v15 = vmax.f32 %v1490_v20, %v1491_v5  ;;  %v2315_v29 = vpack.c.bf16 %v1522_v1, %v1522_v1  ;;  %v1477_v56 = vrot.slane %v1476_v37, 2  ;;  %v1486_v6 = vmax.f32 %v1484_v46, %v1485_v41 }
 0x1c2   : > { %v1225_v32 = vrot.slane %v1038_v2, 6  ;;  %v1953_v62 = vunpack.c.l.b16 %v2306_v22  ;;  %v1985_v17 = vunpack.c.l.b16 %v2338_v4  ;;  %v1472_v59 = vmax.f32 %v1470_v34, %v1471_v48 }
 0x1c3   : > { %v2310_v61 = vpack.c.bf16 %v1492_v15, %v1492_v15  ;;  %v1478_v16 = vmax.f32 %v1476_v37, %v1477_v56  ;;  %v2316_v12 = vpack.c.bf16 %v1528_v0, %v1528_v0  ;;  %v3325_v43 = vpack.c.bf16 %v3324_v36, %v3324_v36 }
 0x1c4   : > { %v1226_v47 = vsel %vm1103_vm1, %v3208_v30, %v1225_v32  ;;  %v1228_v19 = vsel %vm1103_vm1, %v1225_v32, %v1227_v39  ;;  %v2019_v60 = vsel %vm1994_vm5, %v1953_v62, %v2018_v53  ;;  %v2047_v49 = vsel %vm1994_vm5, %v1985_v17, %v2046_v50  ;;  %v3329_v50 = vld [vmem:[#allocation11_spill] sm:$0xff]  ;;  %v2076_v62 = vld [vmem:[%s2860_s10 + $0x1c] sm:$0xf] }
 0x1c5   : > { %v1957_v3 = vunpack.c.l.b16 %v2310_v61  ;;  %v1473_v26 = vrot.slane %v1472_v59, 1  ;;  %v1479_v14 = vrot.slane %v1478_v16, 1  ;;  %v1294_v51 = vsel %vm1293_vm9, %v1228_v19, 0.0 }
 0x1c6   : > { %v1661_v54 = vrot.slane %v1226_v47, 4  ;;  %v1961_v23 = vunpack.c.l.b16 %v3325_v43  ;;  %v1667_v52 = vrot.slane %v1294_v51, 4  ;;  %v1962_v35 = vunpack.c.l.b16 %v2315_v29 }
 0x1c7   : > { %v2023_v8 = vsel %vm1988_vm2, %v3326_v18, %v1957_v3  ;;  %v1474_v30 = vmax.f32 %v1472_v59, %v1473_v26  ;;  %v1480_v11 = vmax.f32 %v1478_v16, %v1479_v14  ;;  %v2309_v10 = vpack.c.bf16 %v1486_v6, %v1486_v6 }
 0x1c8   : > { %v2024_v53 = vsel %vm1990_vm3, %v3327_v40, %v2023_v8  ;;  %v1662_v24 = vmax.f32 %v1226_v47, %v1661_v54  ;;  %v1668_v9 = vmax.f32 %v1294_v51, %v1667_v52  ;;  %v1963_v45 = vunpack.c.l.b16 %v2316_v12 }
 0x1c9   : > { %v2025_v63 = vsel %vm1992_vm4, %v3328_v55, %v2024_v53  ;;  %v2307_v7 = vpack.c.bf16 %v1474_v30, %v1474_v30  ;;  %v2308_v44 = vpack.c.bf16 %v1480_v11, %v1480_v11  ;;  %v3330_v46 = vpack.c.bf16 %v3329_v50, %v3329_v50 }
 0x1ca   : > { %v2026_v57 = vsel %vm1994_vm5, %v1961_v23, %v2025_v63  ;;  %v1663_v25 = vrot.slane %v1662_v24, 2  ;;  %v1669_v31 = vrot.slane %v1668_v9, 2  ;;  %v1956_v0 = vunpack.c.l.b16 %v2309_v10 }
 0x1cb   : > { %v1964_v28 = vunpack.c.l.b16 %v3330_v46  ;;  %v2027_v58 = vsel %vm1996_vm6, %v1962_v35, %v2026_v57  ;;  %v1954_v13 = vunpack.c.l.b16 %v2307_v7  ;;  %v1955_v42 = vunpack.c.l.b16 %v2308_v44 }
 0x1cc   : > { %v2028_v20 = vsel %vm1998_vm7, %v1963_v45, %v2027_v58  ;;  %v1664_v1 = vmax.f32 %v1662_v24, %v1663_v25  ;;  %v1670_v33 = vmax.f32 %v1668_v9, %v1669_v31 }
 0x1cd   : > { %v2029_v27 = vsel %vm2000_vm8, %v1964_v28, %v2028_v20  ;;  %v2020_v38 = vsel %vm1996_vm6, %v1954_v13, %v2019_v60 }
 0x1ce   : > { %v2054_v21 = vpack.c.b16 %v2029_v27, %v2029_v27  ;;  %v2021_v5 = vsel %vm1998_vm7, %v1955_v42, %v2020_v38  ;;  %v1665_v34 = vrot.slane %v1664_v1, 1  ;;  %v1671_v41 = vrot.slane %v1670_v33, 1 }
 0x1cf   : > { %v2022_v39 = vsel %vm2000_vm8, %v1956_v0, %v2021_v5 }
 0x1d0   : > { %2070 = vst [vmem:[%s2860_s10 + $0x10] sm:$0xf] %v2054_v21  ;;  %v2053_v37 = vpack.c.b16 %v2022_v39, %v2022_v39  ;;  %v1666_v2 = vmax.f32 %v1664_v1, %v1665_v34  ;;  %v1672_v22 = vmax.f32 %v1670_v33, %v1671_v41 }
 0x1d2   : > { %2069 = vst [vmem:[%s2860_s10 + $0xc] sm:$0xf] %v2053_v37  ;;  %v2339_v4 = vpack.c.bf16 %v1666_v2, %v1666_v2  ;;  %v2340_v15 = vpack.c.bf16 %v1672_v22, %v1672_v22 }
 0x1d4   : > { %v1986_v48 = vunpack.c.l.b16 %v2339_v4  ;;  %v1987_v29 = vunpack.c.l.b16 %v2340_v15 }
 0x1d6   : > { %v2048_v56 = vsel %vm1996_vm6, %v1986_v48, %v2047_v49 }
 0x1d7   : > { %v2049_v32 = vsel %vm1998_vm7, %v1987_v29, %v2048_v56 }
 0x1d8   : > { %v2057_v17 = vpack.c.b16 %v2049_v32, %v2049_v32 }
 0x1da   : > { %v2077_v61 = vsel %vm2075_vm12, %v2057_v17, %v2076_v62 }
 0x1db   : > { %2078 = vst [vmem:[%s2860_s10 + $0x1c] sm:$0xf] %v2077_v61 }
 0x1dc PF: > { %s14_s15 = sadd.s32 1, %s2510_s15  }
 0x1dd   : > { %p11_p4 = scmp.ge.s32.totalorder %s14_s15, 8  }
 0x1df   :  { %13 = sbr.rel (!%p11_p4) target bundleno = 1 (0x1), region = 66 }

// kernel: net_forward.6
= control target key start
LH: loop header
LB: loop body
LE: loop exit
PB: predicated region body
PF: predicated region fallthrough
CT: control target
= control target key end

     0   :  { %s6507_s13 = smov 0   ;;  %s7836_s0 = inlined_call_operand.vmem [shape: bf16[6,70,128], index: 0, kind: input, shape index: {}]   ;;  %s7837_s1 = inlined_call_operand.vmem [shape: bf16[8,128,128], index: 1, kind: input, shape index: {}]   ;;  %s7838_s2 = inlined_call_operand.vmem [shape: f32[1,128], index: 2, kind: input, shape index: {}]   ;;  %s7839_s3 = inlined_call_operand.vmem [shape: f32[1,128], index: 3, kind: input, shape index: {}]   ;;  %s7840_s4 = inlined_call_operand.vmem [shape: bf16[8,128,128], index: 4, kind: input, shape index: {}]   ;;  %s7841_s5 = inlined_call_operand.vmem [shape: f32[1,128], index: 5, kind: input, shape index: {}]   ;;  %s7842_s6 = inlined_call_operand.vmem [shape: f32[1,128], index: 6, kind: input, shape index: {}]   ;;  %s7843_s7 = inlined_call_operand.vmem [shape: bf16[8,128,128], index: 7, kind: input, shape index: {}]   ;;  %s7844_s8 = inlined_call_operand.vmem [shape: f32[1,128], index: 8, kind: input, shape index: {}]   ;;  %s7845_s9 = inlined_call_operand.vmem [shape: f32[1,128], index: 9, kind: input, shape index: {}]   ;;  %s7846_s10 = inlined_call_operand.vmem [shape: bf16[6,16,128], index: 10, kind: output, shape index: {}]  }
   0x1 LB: > { %s4614_s14 = sadd.s32 4294967295, %s6449_s13   ;;  %p4618_p0 = scmp.ge.s32.totalorder %s6449_s13, 1  ;;  %s6449_s13 = sphi %s6507_s13, %s20_s13  }
   0x2   : > { %p312_p1 = scmp.lt.s32.totalorder %s6449_s13, 7 }
   0x4   : > { %p313_p2 = pnand %p4618_p0, %p312_p1 }
   0x5   : > { %v6246_v0 = vld [vmem:[%s7837_s1 + $0x40] sm:$0xff] (!%p313_p2)   ;;  %v6248_v2 = vld [vmem:[%s7837_s1 + $0x48] sm:$0xff] (!%p313_p2)   ;;  %p350_p3 = scmp.lt.s32.totalorder (!%p313_p2), %s4614_s14, 5  ;;  %v6250_v4 = vld [vmem:[%s7837_s1 + $0x50] sm:$0xff] (!%p313_p2)   ;;  %vm1028_vm0 = vcmask (!%p313_p2), 1045504   ;;  %vm709_vm3 = vcmask (!%p313_p2), 1046528  }
   0x6   : > { %316 = sbr.rel (%p313_p2) target bundleno = 1339 (0x53b), region = 60  ;;  %v6247_v1 = vld [vmem:[%s7837_s1 + $0x100] sm:$0xff] (!%p313_p2)   ;;  %5492 = vmatprep.subr.bf16.mxu1 (!%p313_p2), %v6246_v0  ;;  %v6249_v3 = vld [vmem:[%s7837_s1 + $0x108] sm:$0xff] (!%p313_p2)   ;;  %v6251_v5 = vld [vmem:[%s7837_s1 + $0x110] sm:$0xff] (!%p313_p2)   ;;  %vm423_vm1 = vsmask.f32 (!%p313_p2), 7424 }
   0x7   : > { %5588 = vmatprep.subr.bf16.mxu0 (!%p313_p2), %v6247_v1  ;;  %5493 = vmatpush3.bf16.msra.mxu1 (!%p313_p2), %v6246_v0  ;;  %v6252_v6 = vld [vmem:[%s7837_s1 + $0x58] sm:$0xff] (!%p313_p2)   ;;  %v6254_v8 = vld [vmem:[%s7837_s1 + $0x60] sm:$0xff] (!%p313_p2)   ;;  %v6256_v10 = vld [vmem:[%s7837_s1 + $0x68] sm:$0xff] (!%p313_p2)   ;;  %vm1180_vm2 = vsmask.f32 (!%p313_p2), 5376  ;;  %vm1342_vm4 = vcmask (!%p313_p2), 1044480  }
   0x8   : > { %5589 = vmatpush3.bf16.msra.mxu0 (!%p313_p2), %v6247_v1  ;;  %5494 = vmatprep.subr.bf16.mxu1 (!%p313_p2), %v6248_v2  ;;  %v6253_v7 = vld [vmem:[%s7837_s1 + $0x118] sm:$0xff] (!%p313_p2)   ;;  %v6255_v9 = vld [vmem:[%s7837_s1 + $0x120] sm:$0xff] (!%p313_p2)   ;;  %v6257_v11 = vld [vmem:[%s7837_s1 + $0x128] sm:$0xff] (!%p313_p2)   ;;  %vm861_vm5 = vsmask.f32 (!%p313_p2), 6400  ;;  %vm1685_vm7 = vcmask (!%p313_p2), 1042432  }
   0x9   : > { %5590 = vmatprep.subr.bf16.mxu0 (!%p313_p2), %v6249_v3  ;;  %v6258_v18 = vld [vmem:[%s7837_s1 + $0x70] sm:$0xff] (!%p313_p2)   ;;  %v6260_v28 = vld [vmem:[%s7837_s1 + $0x78] sm:$0xff] (!%p313_p2)   ;;  %v6264_v33 = vld [vmem:[%s7837_s1] sm:$0xff] (!%p313_p2)   ;;  %vm1494_vm6 = vsmask.f32 (!%p313_p2), 4352  ;;  %vm1711_vm8 = vcmask (!%p313_p2), 1041408  }
   0xa   : > { %v6259_v20 = vld [vmem:[%s7837_s1 + $0x130] sm:$0xff] (!%p313_p2)   ;;  %v6261_v29 = vld [vmem:[%s7837_s1 + $0x138] sm:$0xff] (!%p313_p2)   ;;  %v6265_v35 = vld [vmem:[%s7837_s1 + $0x140] sm:$0xff] (!%p313_p2)   ;;  %vm6451_vm10 = vmmov (!%p313_p2), 1   ;;  %vm4339_vm12 = vcmask (!%p313_p2), 1043456   ;;  %vm4532_vm13 = vcmask (!%p313_p2), 1041409  }
   0xb   : > { %5495 = vmatpush3.bf16.msra.mxu1 (!%p313_p2), %v6248_v2  ;;  %v6267_v38 = vld [vmem:[%s7837_s1 + $0x8] sm:$0xff] (!%p313_p2)   ;;  %v6269_v50 = vld [vmem:[%s7837_s1 + $0x10] sm:$0xff] (!%p313_p2)   ;;  %v6271_v56 = vld [vmem:[%s7837_s1 + $0x18] sm:$0xff] (!%p313_p2)   ;;  %vm4534_vm14 = vcmask (!%p313_p2), 1042434   ;;  %vm4536_vm15 = vcmask (!%p313_p2), 1043459  }
   0xc   : > { %5591 = vmatpush3.bf16.msra.mxu0 (!%p313_p2), %v6249_v3  ;;  %5496 = vmatprep.subr.bf16.mxu1 (!%p313_p2), %v6250_v4  ;;  %v6268_v40 = vld [vmem:[%s7837_s1 + $0x148] sm:$0xff] (!%p313_p2)   ;;  %v6270_v52 = vld [vmem:[%s7837_s1 + $0x150] sm:$0xff] (!%p313_p2)   ;;  %v6272_v62 = vld [vmem:[%s7837_s1 + $0x158] sm:$0xff] (!%p313_p2)  }
   0xd   : > { %s7852_s14 = smov (!%p350_p3, %s4614_s14), 5  ;;  %5592 = vmatprep.subr.bf16.mxu0 %v6251_v5  ;;  %v6273_v0 = vld [vmem:[%s7837_s1 + $0x20] sm:$0xff]   ;;  %v6275_v2 = vld [vmem:[%s7837_s1 + $0x28] sm:$0xff]   ;;  %vm7055_vm9 = vmneg %vm1685_vm7 }
   0xe   : > { %s6236_s11 = smul.u32 36, %s7852_s14  ;;  %v6274_v1 = vld [vmem:[%s7837_s1 + $0x160] sm:$0xff]   ;;  %v6276_v3 = vld [vmem:[%s7837_s1 + $0x168] sm:$0xff]   ;;  %vm7081_vm11 = vmpackc.low %vm6451_vm10, %vm7055_vm9  ;;  %s5187_s19 = sshll.u32 %s7852_s14, 3 }
   0xf   : > { %5497 = vmatpush3.bf16.msra.mxu1 %v6250_v4  ;;  %s7818_s14 = scalar_lea.vmem %s7846_s10, %s5187_s19 }
  0x10   : > { %5593 = vmatpush3.bf16.msra.mxu0 %v6251_v5  ;;  %5498 = vmatprep.subr.bf16.mxu1 %v6252_v6  ;;  %s6554_s22 = scalar_lea.vmem %s7836_s0, %s6236_s11 }
  0x11   : > { %5594 = vmatprep.subr.bf16.mxu0 %v6253_v7  ;;  %v6560_v12 = vld [vmem:[%s6554_s22] sm:$0xff]   ;;  %v6563_v13 = vld [vmem:[%s6554_s22 + $0x8] sm:$0xff]   ;;  %v6585_v23 = vld [vmem:[%s6554_s22 + $0x10] sm:$0xff]  }
  0x12   : > { %v6566_v14 = vshrl.u32 %v6560_v12, 16  ;;  %v6569_v15 = vshll.u32 %v6560_v12, 16  ;;  %v6572_v16 = vshll.u32 %v6563_v13, 16  ;;  %v1029_v17 = vrot.slane %v6560_v12, 2  ;;  %v6623_v41 = vld [vmem:[%s6554_s22 + $0x18] sm:$0xff]  }
  0x13   : > { %5499 = vmatpush3.bf16.msra.mxu1 %v6252_v6  ;;  %v1030_v19 = vrot.slane %v6563_v13, 2  ;;  %v6590_v26 = vshrl.u32 %v6563_v13, 16  ;;  %v6593_v27 = vshll.u32 %v6585_v23, 16  ;;  %v1032_v34 = vrot.slane %v6585_v23, 2 }
  0x14   : > { %5595 = vmatpush3.bf16.msra.mxu0 %v6253_v7  ;;  %5500 = vmatprep.subr.bf16.mxu1 %v6254_v8  ;;  %v429_v21 = vrot.slane %v6569_v15, 1  ;;  %v434_v22 = vrot.slane %v6572_v16, 1  ;;  %v6612_v36 = vshrl.u32 %v6585_v23, 16  ;;  %v1181_v42 = vrot.slane %v6566_v14, 2 }
  0x15   : > { %5596 = vmatprep.subr.bf16.mxu0 %v6255_v9  ;;  %v1031_v24 = vsel %vm1028_vm0, %v1029_v17, %v1030_v19  ;;  %v442_v32 = vrot.slane %v6593_v27, 1  ;;  %v1033_v39 = vsel %vm1028_vm0, %v1030_v19, %v1032_v34  ;;  %v1182_v44 = vrot.slane %v6569_v15, 3  ;;  %v6641_v51 = vld [vmem:[%s6554_s22 + $0x20] ss:$0 sps:$4 sm:$0x77]  }
  0x16   : > { %v430_v25 = vor.u32 %v429_v21, %v6566_v14  ;;  %5604 = vmatprep.mubr.bf16.mxu0 %v1031_v24  ;;  %v438_v31 = vor.u32 %v6590_v26, %v434_v22  ;;  %v1184_v45 = vrot.slane %v6590_v26, 2  ;;  %v6630_v46 = vshll.u32 %v6623_v41, 16  ;;  %v6279_v24 = vld [vmem:[%s7837_s1 + $0x170] sm:$0xff]  }
  0x17   : > { %5501 = vmatpush3.bf16.msra.mxu1 %v6254_v8  ;;  %v446_v43 = vor.u32 %v6612_v36, %v442_v32  ;;  %v1034_v47 = vrot.slane %v6623_v41, 2  ;;  %v6634_v48 = vshrl.u32 %v6623_v41, 16  ;;  %v1185_v49 = vrot.slane %v6572_v16, 3 }
  0x18   : > { %5597 = vmatpush3.bf16.msra.mxu0 %v6255_v9  ;;  %5502 = vmatprep.subr.bf16.mxu1 %v6256_v10  ;;  %v435_v30 = vsel %vm423_vm1, %v430_v25, %v434_v22  ;;  %v443_v37 = vsel %vm423_vm1, %v438_v31, %v442_v32  ;;  %v450_v53 = vrot.slane %v6630_v46, 1  ;;  %v1036_v55 = vrot.slane %v6641_v51, 2  ;;  %v6282_v31 = vld [vmem:[%s7837_s1 + $0x178] sm:$0xff]  }
  0x19   : > { %5598 = vmatprep.subr.bf16.mxu0 %v6257_v11  ;;  %5508 = vmatprep.mubr.bf16.mxu1 %v435_v30  ;;  %v1035_v54 = vsel %vm1028_vm0, %v1032_v34, %v1034_v47  ;;  %v1183_v59 = vor.u32 %v1182_v44, %v1181_v42  ;;  %v6654_v60 = vor.u32 %v1185_v49, %v1184_v45  ;;  %v1188_v4 = vrot.slane %v6612_v36, 2 }
  0x1a   : > { %v451_v57 = vsel %vm423_vm1, %v446_v43, %v450_v53  ;;  %v454_v58 = vor.u32 %v6634_v48, %v450_v53  ;;  %v1037_v61 = vsel %vm1028_vm0, %v1034_v47, %v1036_v55  ;;  %v713_v5 = vrot.slane %v6585_v23, 1 }
  0x1b   : > { %5503 = vmatpush3.bf16.msra.mxu1 %v6256_v10  ;;  %v1187_v63 = vsel %vm1180_vm2, %v1183_v59, %v6654_v60  ;;  %v715_v6 = vrot.slane %v6623_v41, 1  ;;  %v1346_v7 = vrot.slane %v6585_v23, 3  ;;  %v1348_v8 = vrot.slane %v6623_v41, 3 }
  0x1c   : > { %5599 = vmatpush3.bf16.msra.mxu0 %v6257_v11  ;;  %5504 = vmatprep.subr.bf16.mxu1 %v6258_v18  ;;  %v1189_v9 = vrot.slane %v6593_v27, 3  ;;  %v717_v11 = vrot.slane %v6641_v51, 1  ;;  %v710_v17 = vrot.slane %v6560_v12, 1  ;;  %v1350_v19 = vrot.slane %v6641_v51, 3 }
  0x1d   : > { %5600 = vmatprep.subr.bf16.mxu0 %v6259_v20  ;;  %v6684_v10 = vsel %vm709_vm3, %v713_v5, %v715_v6  ;;  %v862_v22 = vrot.slane %v6566_v14, 1  ;;  %v865_v30 = vrot.slane %v6590_v26, 1  ;;  %v1192_v34 = vrot.slane %v6634_v48, 2 }
  0x1e   : > { %v6698_v21 = vsel %vm709_vm3, %v715_v6, %v717_v11  ;;  %v6705_v25 = vsel %vm1342_vm4, %v1348_v8, %v1350_v19  ;;  %v6728_v42 = vshll.u32 %v6641_v51, 16  ;;  %v1498_v43 = vrot.slane %v6590_v26, 3 }
  0x1f   : > { %5505 = vmatpush3.bf16.msra.mxu1 %v6258_v18  ;;  %v6691_v18 = vsel %vm1342_vm4, %v1346_v7, %v1348_v8  ;;  %v1193_v44 = vrot.slane %v6630_v46, 3  ;;  %v1499_v45 = vrot.slane %v6572_v16, 4  ;;  %v1190_v47 = vor.u32 %v1189_v9, %v1188_v4  ;;  %v6288_v4 = vld [vmem:[%s7837_s1 + $0x190] sm:$0xff]  }
  0x20   : > { %5601 = vmatpush3.bf16.msra.mxu0 %v6259_v20  ;;  %5506 = vmatprep.subr.bf16.mxu1 %v6260_v28  ;;  %v6278_v20 = vld [vmem:[%s7837_s1 + $0x30] sm:$0xff]   ;;  %v869_v49 = vrot.slane %v6612_v36, 1  ;;  %v870_v26 = vrot.slane %v6593_v27, 2  ;;  %v1502_v53 = vrot.slane %v6612_v36, 3  ;;  %v873_v59 = vrot.slane %v6634_v48, 1  ;;  %v6286_v36 = vld [vmem:[%s7837_s1 + $0x188] sm:$0xff]  }
  0x21   : > { %5602 = vmatprep.subr.bf16.mxu0 %v6261_v29  ;;  %v1344_v6 = vrot.slane %v6563_v13, 3  ;;  %v883_v9 = vrot.slane %v6728_v42, 2 }
  0x22   : > { %v871_v55 = vor.u32 %v870_v26, %v869_v49  ;;  %v6303_v26 = vld [vmem:[%s7837_s1 + $0xd0] sm:$0xff]  }
  0x23   : > { %5507 = vmatpush3.bf16.msra.mxu1 %v6260_v28  ;;  %v863_v28 = vrot.slane %v6569_v15, 2 }
  0x24   : > { %5603 = vmatpush3.bf16.msra.mxu0 %v6261_v29  ;;  %5516 = vmatprep.subr.bf16.mxu1 %v6264_v33  ;;  %v6281_v29 = vld [vmem:[%s7837_s1 + $0x38] sm:$0xff]  }
  0x25   : > { %5612 = vmatprep.subr.bf16.mxu0 %v6265_v35  ;;  %v6715_v32 = vor.u32 %v863_v28, %v862_v22  ;;  %v6290_v28 = vld [vmem:[%s7837_s1 + $0x198] sm:$0xff]  }
  0x26   : > { %5509 = vmatmul.mubr.bf16.vlgmr.msra.gmra.mrb[0].mxu1 %v443_v37  ;;  %v6721_v37 = vshrl.u32 %v6641_v51, 16  ;;  %v1500_v51 = vor.u32 %v1499_v45, %v1498_v43  ;;  %v6296_v43 = vld [vmem:[%s7837_s1 + $0x1b0] sm:$0xff]   ;;  %v6299_v45 = vld [vmem:[%s7837_s1 + $0xc0] sm:$0xff]  }
  0x27   : > { %5517 = vmatpush3.bf16.msra.mxu1 %v6264_v33  ;;  %5605 = vmatmul.mubr.bf16.vlgmr.msra.gmra.mrb[0].mxu0 %v1033_v39  ;;  %v866_v33 = vrot.slane %v6572_v16, 2  ;;  %v1496_v39 = vrot.slane %v6569_v15, 4  ;;  %v6284_v15 = vld [vmem:[%s7837_s1 + $0x180] sm:$0xff]   ;;  %v1194_v16 = vor.u32 %v1193_v44, %v1192_v34  ;;  %v6297_v44 = vld [vmem:[%s7837_s1 + $0xb8] sm:$0xff]  }
  0x28   : > { %5613 = vmatpush3.bf16.msra.mxu0 %v6265_v35  ;;  %5518 = vmatprep.subr.bf16.mxu1 %v6267_v38  ;;  %v1495_v35 = vrot.slane %v6566_v14, 3  ;;  %v880_v8 = vrot.slane %v6721_v37, 1  ;;  %v1510_v19 = vrot.slane %v6721_v37, 3  ;;  %v6291_v34 = vld [vmem:[%s7837_s1 + $0xa0] sm:$0xff]  }
  0x29   : > { %5614 = vmatprep.subr.bf16.mxu0 %v6268_v40  ;;  %5608 = vmatprep.mubr.bf16.mxu0 %v1035_v54  ;;  %v711_v54 = vrot.slane %v6563_v13, 1 }
  0x2a   : > { %5512 = vmatprep.mubr.bf16.mxu1 %v451_v57  ;;  %v1497_v14 = vor.u32 %v1496_v39, %v1495_v35  ;;  %v1191_v57 = vsel %vm1180_vm2, %v6654_v60, %v1190_v47  ;;  %v1506_v60 = vrot.slane %v6634_v48, 3 }
  0x2b   : > { %5519 = vmatpush3.bf16.msra.mxu1 %v6267_v38  ;;  %v867_v38 = vor.u32 %v866_v33, %v865_v30  ;;  %v884_v33 = vor.u32 %v883_v9, %v880_v8  ;;  %v712_v35 = vsel %vm709_vm3, %v710_v17, %v711_v54  ;;  %v6294_v17 = vld [vmem:[%s7837_s1 + $0x1a8] sm:$0xff]   ;;  %v714_v49 = vsel %vm709_vm3, %v711_v54, %v713_v5  ;;  %v6304_v5 = vld [vmem:[%s7837_s1 + $0x1d0] sm:$0xff]   ;;  %v6315_v54 = vld [vmem:[%s7840_s4 + $0x40] sm:$0xff]  }
  0x2c   : > { %5615 = vmatpush3.bf16.msra.mxu0 %v6268_v40  ;;  %5520 = vmatprep.subr.bf16.mxu1 %v6269_v50  ;;  %v6283_v40 = vld [vmem:[%s7837_s1 + $0x80] sm:$0xff]  }
  0x2d   : > { %5616 = vmatprep.subr.bf16.mxu0 %v6270_v52  ;;  %v6778_v22 = vsel %vm861_vm5, %v867_v38, %v871_v55 }
  0x2e   : > { %5513 = vmatmul.mubr.bf16.gmra.mrb[4].mxu1 %v454_v58  ;;  %v6285_v58 = vld [vmem:[%s7837_s1 + $0x88] sm:$0xff]  }
  0x2f   : > { %5521 = vmatpush3.bf16.msra.mxu1 %v6269_v50  ;;  %5609 = vmatmul.mubr.bf16.gmra.mrb[4].mxu0 %v1037_v61  ;;  %v1196_v50 = vrot.slane %v6721_v37, 2 }
  0x30   : > { %5617 = vmatpush3.bf16.msra.mxu0 %v6270_v52  ;;  %5522 = vmatprep.subr.bf16.mxu1 %v6271_v56  ;;  %v1197_v52 = vrot.slane %v6728_v42, 3 }
  0x31   : > { %5618 = vmatprep.subr.bf16.mxu0 %v6272_v62  ;;  %5532 = vmatprep.mubr.bf16.mxu1 %v6560_v12 }
  0x32   : > { %5628 = vmatprep.mubr.bf16.mxu0 %v1187_v63  ;;  %v1343_v63 = vrot.slane %v6560_v12, 3 }
  0x33   : > { %5523 = vmatpush3.bf16.msra.mxu1 %v6271_v56  ;;  %v1503_v56 = vrot.slane %v6593_v27, 4  ;;  %v1198_v27 = vor.u32 %v1197_v52, %v1196_v50  ;;  %v6302_v50 = vld [vmem:[%s7837_s1 + $0x1c8] sm:$0xff]   ;;  %v6312_v52 = vld [vmem:[%s7837_s1 + $0x1f0] sm:$0xff]  }
  0x34   : > { %5619 = vmatpush3.bf16.msra.mxu0 %v6272_v62  ;;  %5524 = vmatprep.subr.bf16.mxu1 %v6273_v0  ;;  %v874_v62 = vrot.slane %v6630_v46, 2  ;;  %v1345_v39 = vsel %vm1342_vm4, %v1343_v63, %v1344_v6 }
  0x35   : > { %5620 = vmatprep.subr.bf16.mxu0 %v6274_v1  ;;  %v1504_v61 = vor.u32 %v1503_v56, %v1502_v53  ;;  %v1199_v11 = vsel %vm1180_vm2, %v1194_v16, %v1198_v27  ;;  %v6313_v53 = vld [vmem:[%s7837_s1 + $0xf8] sm:$0xff]   ;;  %v6317_v56 = vld [vmem:[%s7840_s4 + $0x50] sm:$0xff]  }
  0x37   : > { %5525 = vmatpush3.bf16.msra.mxu1 %v6273_v0  ;;  %v6287_v0 = vld [vmem:[%s7837_s1 + $0x90] sm:$0xff]   ;;  %v6790_v30 = vsel %vm1494_vm6, %v1500_v51, %v1504_v61 }
  0x38   : > { %5621 = vmatpush3.bf16.msra.mxu0 %v6274_v1  ;;  %5526 = vmatprep.subr.bf16.mxu1 %v6275_v2  ;;  %v1195_v1 = vsel %vm1180_vm2, %v1190_v47, %v1194_v16  ;;  %v6301_v47 = vld [vmem:[%s7837_s1 + $0xc8] sm:$0xff]   ;;  %v6314_v16 = vld [vmem:[%s7837_s1 + $0x1f8] sm:$0xff]  }
  0x39   : > { %5622 = vmatprep.subr.bf16.mxu0 %v6276_v3 }
  0x3b   : > { %5527 = vmatpush3.bf16.msra.mxu1 %v6275_v2  ;;  %v875_v2 = vor.u32 %v874_v62, %v873_v59  ;;  %v6320_v59 = vld [vmem:[%s7840_s4 + $0x68] sm:$0xff]   ;;  %v6932_v62 = vld [vmem:[%s7840_s4] sm:$0xff]  }
  0x3c   : > { %5623 = vmatpush3.bf16.msra.mxu0 %v6276_v3  ;;  %5528 = vmatprep.subr.bf16.mxu1 %v6278_v20  ;;  %v1507_v3 = vrot.slane %v6630_v46, 4  ;;  %v6289_v46 = vld [vmem:[%s7837_s1 + $0x98] sm:$0xff]  }
  0x3d   : > { %5624 = vmatprep.subr.bf16.mxu0 %v6279_v24 }
  0x3e   : > { %v1508_v48 = vor.u32 %v1507_v3, %v1506_v60  ;;  %v4803_v60 = vld [vmem:[%s7838_s2] ss:$0 sm:$0xff] }
  0x3f   : > { %5529 = vmatpush3.bf16.msra.mxu1 %v6278_v20  ;;  %v6775_v20 = vsel %vm861_vm5, %v6715_v32, %v867_v38  ;;  %v1511_v32 = vrot.slane %v6728_v42, 4  ;;  %v6292_v38 = vld [vmem:[%s7837_s1 + $0x1a0] sm:$0xff]   ;;  %v6295_v42 = vld [vmem:[%s7837_s1 + $0xb0] sm:$0xff]  }
  0x40   : > { %5625 = vmatpush3.bf16.msra.mxu0 %v6279_v24  ;;  %5530 = vmatprep.subr.bf16.mxu1 %v6281_v29  ;;  %v6781_v24 = vsel %vm861_vm5, %v871_v55, %v875_v2  ;;  %v6316_v55 = vld [vmem:[%s7840_s4 + $0x48] sm:$0xff]  }
  0x41   : > { %5626 = vmatprep.subr.bf16.mxu0 %v6282_v31  ;;  %v1512_v37 = vor.u32 %v1511_v32, %v1510_v19 }
  0x43   : > { %5531 = vmatpush3.bf16.msra.mxu1 %v6281_v29  ;;  %v6787_v29 = vsel %vm1494_vm6, %v1497_v14, %v1500_v51  ;;  %v6815_v12 = vsel %vm1494_vm6, %v1508_v48, %v1512_v37  ;;  %v6298_v14 = vld [vmem:[%s7837_s1 + $0x1b8] sm:$0xff]   ;;  %v1347_v51 = vsel %vm1342_vm4, %v1344_v6, %v1346_v7  ;;  %v6307_v7 = vld [vmem:[%s7837_s1 + $0xe0] sm:$0xff]  }
  0x44   : > { %5627 = vmatpush3.bf16.msra.mxu0 %v6282_v31  ;;  %5540 = vmatprep.subr.bf16.mxu1 %v6283_v40  ;;  %v6793_v31 = vsel %vm1494_vm6, %v1504_v61, %v1508_v48  ;;  %v6322_v61 = vld [vmem:[%s7840_s4 + $0x78] sm:$0xff]  }
  0x45   : > { %5636 = vmatprep.subr.bf16.mxu0 %v6284_v15 }
  0x46   : > { %5533 = vmatmul.mubr.bf16.vlgmr.msra.gmra.mrb[0].mxu1 %v6563_v13  ;;  %v6305_v13 = vld [vmem:[%s7837_s1 + $0xd8] sm:$0xff]  }
  0x47   : > { %5541 = vmatpush3.bf16.msra.mxu1 %v6283_v40  ;;  %5629 = vmatmul.mubr.bf16.vlgmr.msra.gmra.mrb[0].mxu0 %v1191_v57  ;;  %v6812_v40 = vsel %vm861_vm5, %v875_v2, %v884_v33  ;;  %v6318_v57 = vld [vmem:[%s7840_s4 + $0x58] sm:$0xff]  }
  0x48   : > { %5637 = vmatpush3.bf16.msra.mxu0 %v6284_v15  ;;  %5542 = vmatprep.subr.bf16.mxu1 %v6285_v58  ;;  %v6300_v15 = vld [vmem:[%s7837_s1 + $0x1c0] sm:$0xff]  }
  0x49   : > { %5638 = vmatprep.subr.bf16.mxu0 %v6286_v36  ;;  %5536 = vmatprep.mubr.bf16.mxu1 %v6585_v23  ;;  %v6306_v23 = vld [vmem:[%s7837_s1 + $0x1d8] sm:$0xff]  }
  0x4a   : > { %5632 = vmatprep.mubr.bf16.mxu0 %v1195_v1 }
  0x4b   : > { %5543 = vmatpush3.bf16.msra.mxu1 %v6285_v58  ;;  %v6319_v58 = vld [vmem:[%s7840_s4 + $0x60] sm:$0xff]  }
  0x4c   : > { %5639 = vmatpush3.bf16.msra.mxu0 %v6286_v36  ;;  %5544 = vmatprep.subr.bf16.mxu1 %v6287_v0  ;;  %v6321_v36 = vld [vmem:[%s7840_s4 + $0x70] sm:$0xff]  }
  0x4d   : > { %5640 = vmatprep.subr.bf16.mxu0 %v6288_v4 }
  0x4e   : > { %5537 = vmatmul.mubr.bf16.gmra.mrb[4].mxu1 %v6623_v41  ;;  %v6293_v41 = vld [vmem:[%s7837_s1 + $0xa8] sm:$0xff]  }
  0x4f   : > { %5545 = vmatpush3.bf16.msra.mxu1 %v6287_v0  ;;  %5633 = vmatmul.mubr.bf16.gmra.mrb[4].mxu0 %v1199_v11 }
  0x50   : > { %5641 = vmatpush3.bf16.msra.mxu0 %v6288_v4  ;;  %5546 = vmatprep.subr.bf16.mxu1 %v6289_v46  ;;  %v4804_v4 = vld [vmem:[%s7839_s3] ss:$0 sm:$0xff] }
  0x51   : > { %5642 = vmatprep.subr.bf16.mxu0 %v6290_v28  ;;  %5556 = vmatprep.mubr.bf16.mxu1 %v712_v35 }
  0x52   : > { %5652 = vmatprep.mubr.bf16.mxu0 %v1345_v39 }
  0x53   : > { %5547 = vmatpush3.bf16.msra.mxu1 %v6289_v46 }
  0x54   : > { %5643 = vmatpush3.bf16.msra.mxu0 %v6290_v28  ;;  %5548 = vmatprep.subr.bf16.mxu1 %v6291_v34 }
  0x55   : > { %5644 = vmatprep.subr.bf16.mxu0 %v6292_v38 }
  0x57   : > { %5549 = vmatpush3.bf16.msra.mxu1 %v6291_v34 }
  0x58   : > { %5645 = vmatpush3.bf16.msra.mxu0 %v6292_v38  ;;  %5550 = vmatprep.subr.bf16.mxu1 %v6293_v41 }
  0x59   : > { %5646 = vmatprep.subr.bf16.mxu0 %v6294_v17 }
  0x5b   : > { %5551 = vmatpush3.bf16.msra.mxu1 %v6293_v41 }
  0x5c   : > { %5647 = vmatpush3.bf16.msra.mxu0 %v6294_v17  ;;  %5552 = vmatprep.subr.bf16.mxu1 %v6295_v42 }
  0x5d   : > { %5648 = vmatprep.subr.bf16.mxu0 %v6296_v43 }
  0x5f   : > { %5553 = vmatpush3.bf16.msra.mxu1 %v6295_v42 }
  0x60   : > { %5649 = vmatpush3.bf16.msra.mxu0 %v6296_v43  ;;  %5554 = vmatprep.subr.bf16.mxu1 %v6297_v44 }
  0x61   : > { %5650 = vmatprep.subr.bf16.mxu0 %v6298_v14 }
  0x63   : > { %5555 = vmatpush3.bf16.msra.mxu1 %v6297_v44 }
  0x64   : > { %5651 = vmatpush3.bf16.msra.mxu0 %v6298_v14  ;;  %5564 = vmatprep.subr.bf16.mxu1 %v6299_v45 }
  0x65   : > { %5660 = vmatprep.subr.bf16.mxu0 %v6300_v15 }
  0x66   : > { %5557 = vmatmul.mubr.bf16.vlgmr.msra.gmra.mrb[0].mxu1 %v714_v49 }
  0x67   : > { %5565 = vmatpush3.bf16.msra.mxu1 %v6299_v45  ;;  %5653 = vmatmul.mubr.bf16.vlgmr.msra.gmra.mrb[0].mxu0 %v1347_v51 }
  0x68   : > { %5661 = vmatpush3.bf16.msra.mxu0 %v6300_v15  ;;  %5566 = vmatprep.subr.bf16.mxu1 %v6301_v47 }
  0x69   : > { %5662 = vmatprep.subr.bf16.mxu0 %v6302_v50  ;;  %5560 = vmatprep.mubr.bf16.mxu1 %v6684_v10  ;;  %v6308_v10 = vld [vmem:[%s7837_s1 + $0x1e0] sm:$0xff]  }
  0x6a   : > { %5656 = vmatprep.mubr.bf16.mxu0 %v6691_v18  ;;  %v6309_v18 = vld [vmem:[%s7837_s1 + $0xe8] sm:$0xff]  }
  0x6b   : > { %5567 = vmatpush3.bf16.msra.mxu1 %v6301_v47 }
  0x6c   : > { %5663 = vmatpush3.bf16.msra.mxu0 %v6302_v50  ;;  %5568 = vmatprep.subr.bf16.mxu1 %v6303_v26 }
  0x6d   : > { %5664 = vmatprep.subr.bf16.mxu0 %v6304_v5 }
  0x6e   : > { %5561 = vmatmul.mubr.bf16.gmra.mrb[4].mxu1 %v6698_v21  ;;  %v6310_v21 = vld [vmem:[%s7837_s1 + $0x1e8] sm:$0xff]  }
  0x6f   : > { %5569 = vmatpush3.bf16.msra.mxu1 %v6303_v26  ;;  %5657 = vmatmul.mubr.bf16.gmra.mrb[4].mxu0 %v6705_v25  ;;  %v6311_v25 = vld [vmem:[%s7837_s1 + $0xf0] sm:$0xff]  }
  0x70   : > { %5665 = vmatpush3.bf16.msra.mxu0 %v6304_v5  ;;  %5570 = vmatprep.subr.bf16.mxu1 %v6305_v13 }
  0x71   : > { %5666 = vmatprep.subr.bf16.mxu0 %v6306_v23  ;;  %5580 = vmatprep.mubr.bf16.mxu1 %v6775_v20 }
  0x72   : > { %5676 = vmatprep.mubr.bf16.mxu0 %v6787_v29 }
  0x73   : > { %5571 = vmatpush3.bf16.msra.mxu1 %v6305_v13 }
  0x74   : > { %5667 = vmatpush3.bf16.msra.mxu0 %v6306_v23  ;;  %5572 = vmatprep.subr.bf16.mxu1 %v6307_v7 }
  0x75   : > { %5668 = vmatprep.subr.bf16.mxu0 %v6308_v10 }
  0x77   : > { %5573 = vmatpush3.bf16.msra.mxu1 %v6307_v7 }
  0x78   : > { %5669 = vmatpush3.bf16.msra.mxu0 %v6308_v10  ;;  %5574 = vmatprep.subr.bf16.mxu1 %v6309_v18 }
  0x79   : > { %5670 = vmatprep.subr.bf16.mxu0 %v6310_v21 }
  0x7b   : > { %5575 = vmatpush3.bf16.msra.mxu1 %v6309_v18 }
  0x7c   : > { %5671 = vmatpush3.bf16.msra.mxu0 %v6310_v21  ;;  %5576 = vmatprep.subr.bf16.mxu1 %v6311_v25 }
  0x7d   : > { %5672 = vmatprep.subr.bf16.mxu0 %v6312_v52 }
  0x7f   : > { %5577 = vmatpush3.bf16.msra.mxu1 %v6311_v25 }
  0x80   : > { %5673 = vmatpush3.bf16.msra.mxu0 %v6312_v52  ;;  %5578 = vmatprep.subr.bf16.mxu1 %v6313_v53 }
  0x81   : > { %5674 = vmatprep.subr.bf16.mxu0 %v6314_v16 }
  0x83   : > { %5579 = vmatpush3.bf16.msra.mxu1 %v6313_v53 }
  0x84   : > { %5675 = vmatpush3.bf16.msra.mxu0 %v6314_v16  ;;  %5684 = vmatprep.subr.bf16.mxu1 %v6315_v54 }
  0x86   : > { %5581 = vmatmul.mubr.bf16.vlgmr.msra.gmra.mrb[0].mxu1 %v6778_v22 }
  0x87   : > { %5677 = vmatmul.mubr.bf16.vlgmr.msra.gmra.mrb[0].mxu0 %v6790_v30  ;;  %5584 = vmatprep.mubr.bf16.mxu1 %v6781_v24 }
  0x88   : > { %5680 = vmatprep.mubr.bf16.mxu0 %v6793_v31  ;;  %5685 = vmatpush3.bf16.msra.mxu1 %v6315_v54 }
  0x89   : > { %5686 = vmatprep.subr.bf16.mxu1 %v6316_v55 }
  0x8c   : > { %5687 = vmatpush3.bf16.msra.mxu1 %v6316_v55 }
  0x8d   : > { %5688 = vmatprep.subr.bf16.mxu1 %v6317_v56 }
  0x8e   : > { %5585 = vmatmul.mubr.bf16.gmra.mrb[4].mxu1 %v6812_v40 }
  0x8f   : > { %5681 = vmatmul.mubr.bf16.gmra.mrb[4].mxu0 %v6815_v12 }
  0x90   : > { %5689 = vmatpush3.bf16.msra.mxu1 %v6317_v56 }
  0x91   : > { %5690 = vmatprep.subr.bf16.mxu1 %v6318_v57 }
  0x94   : > { %5691 = vmatpush3.bf16.msra.mxu1 %v6318_v57 }
  0x95   : > { %5692 = vmatprep.subr.bf16.mxu1 %v6319_v58 }
  0x98   : > { %5693 = vmatpush3.bf16.msra.mxu1 %v6319_v58 }
  0x99   : > { %5694 = vmatprep.subr.bf16.mxu1 %v6320_v59 }
  0x9c   : > { %5695 = vmatpush3.bf16.msra.mxu1 %v6320_v59 }
  0x9d   : > { %5696 = vmatprep.subr.bf16.mxu1 %v6321_v36 }
  0xa0   : > { %5697 = vmatpush3.bf16.msra.mxu1 %v6321_v36 }
  0xa1   : > { %5698 = vmatprep.subr.bf16.mxu1 %v6322_v61 }
  0xa4   : > { %5699 = vmatpush3.bf16.msra.mxu1 %v6322_v61 }
  0xa5   : > { %5708 = vmatprep.subr.bf16.mxu1 %v6932_v62 }
 0x159   : > { %v5582_v27 = vpop.f32.mrb[0].mxu1 }
 0x15a   : > { %v5678_v63 = vpop.f32.mrb[0].mxu0  ;;  %v972_v0 = vpop.f32.mrb[1].mxu1 }
 0x15b   : > { %v6068_v1 = vadd.f32 %v5678_v63, %v5582_v27  ;;  %v1600_v2 = vpop.f32.mrb[1].mxu0  ;;  %v5583_v3 = vpop.f32.mrb[2].mxu1 }
 0x15c   : > { %v6069_v6 = vadd.f32 %v1600_v2, %v972_v0  ;;  %v5679_v48 = vpop.f32.mrb[2].mxu0  ;;  %v975_v8 = vpop.f32.mrb[3].mxu1 }
 0x15d   : > { %v1648_v9 = vmul.f32 %v6068_v1, %v4803_v60  ;;  %v6070_v46 = vadd.f32 %v5679_v48, %v5583_v3  ;;  %v1603_v11 = vpop.f32.mrb[3].mxu0 }
 0x15e   : > { %v1646_v19 = vmul.f32 %v6069_v6, %v4803_v60  ;;  %v6071_v20 = vadd.f32 %v1603_v11, %v975_v8 }
 0x15f   : > { %v1663_v22 = vadd.f32 %v4804_v4, %v1648_v9  ;;  %v1649_v24 = vmul.f32 %v6070_v46, %v4803_v60 }
 0x160   : > { %v1661_v28 = vadd.f32 %v4804_v4, %v1646_v19  ;;  %v1647_v29 = vmul.f32 %v6071_v20, %v4803_v60 }
 0x161   : > { %v1671_v30 = vmax.f32 %v1663_v22, 0.0  ;;  %v1664_v31 = vadd.f32 %v4804_v4, %v1649_v24  ;;  %v5586_v32 = vpop.f32.mrb[4].mxu1 }
 0x162   : > { %v1669_v33 = vmax.f32 %v1661_v28, 0.0  ;;  %v1662_v34 = vadd.f32 %v4804_v4, %v1647_v29  ;;  %v5682_v35 = vpop.f32.mrb[4].mxu0  ;;  %v988_v37 = vpop.f32.mrb[5].mxu1 }
 0x163   : > { %v1672_v38 = vmax.f32 %v1664_v31, 0.0  ;;  %v6072_v39 = vadd.f32 %v5682_v35, %v5586_v32  ;;  %v1616_v40 = vpop.f32.mrb[5].mxu0  ;;  %v5587_v12 = vpop.f32.mrb[6].mxu1  ;;  %v1689_v14 = vrot.slane %v1671_v30, 5 }
 0x164   : > { %v6941_v41 = vrot.slane %v1669_v33, 5  ;;  %v1670_v17 = vmax.f32 %v1662_v34, 0.0  ;;  %v6073_v42 = vadd.f32 %v1616_v40, %v988_v37  ;;  %v5683_v43 = vpop.f32.mrb[6].mxu0  ;;  %v991_v44 = vpop.f32.mrb[7].mxu1 }
 0x165   : > { %v1691_v45 = vrot.slane %v1672_v38, 5  ;;  %v1652_v15 = vmul.f32 %v6072_v39, %v4803_v60  ;;  %v6074_v47 = vadd.f32 %v5683_v43, %v5587_v12  ;;  %v1619_v49 = vpop.f32.mrb[7].mxu0 }
 0x166   : > { %v1687_v50 = vrot.slane %v1670_v17, 5  ;;  %v1650_v51 = vmul.f32 %v6073_v42, %v4803_v60  ;;  %v6075_v26 = vadd.f32 %v1619_v49, %v991_v44  ;;  %v1710_v5 = vsel %vm1685_vm7, 0.0, %v6941_v41 }
 0x167   : > { %v1692_v13 = vsel %vm1685_vm7, %v1689_v14, %v1691_v45  ;;  %v1667_v23 = vadd.f32 %v4804_v4, %v1652_v15  ;;  %v1653_v7 = vmul.f32 %v6074_v47, %v4803_v60 }
 0x168   : > { %v6948_v10 = vsel %vm1685_vm7, %v6941_v41, %v1687_v50  ;;  %v1690_v18 = vsel %vm1685_vm7, %v1687_v50, %v1689_v14  ;;  %v1665_v21 = vadd.f32 %v4804_v4, %v1650_v51  ;;  %v1651_v25 = vmul.f32 %v6075_v26, %v4803_v60  ;;  %v6324_v50 = vld [vmem:[%s7840_s4 + $0x8] sm:$0xff]  }
 0x169   : > { %v6952_v52 = vpack.c.bf16 %v6948_v10, %v1710_v5  ;;  %v6954_v53 = vpack.c.bf16 %v1692_v13, %v1690_v18  ;;  %v1675_v16 = vmax.f32 %v1667_v23, 0.0  ;;  %v1668_v54 = vadd.f32 %v4804_v4, %v1653_v7 }
 0x16a   : > { %v1673_v55 = vmax.f32 %v1665_v21, 0.0  ;;  %v1666_v56 = vadd.f32 %v4804_v4, %v1651_v25  ;;  %v4839_v57 = vpack.c.bf16 %v6948_v10, %v6941_v41 }
 0x16b   : > { %v1697_v58 = vrot.slane %v1675_v16, 5  ;;  %v1676_v59 = vmax.f32 %v1668_v54, 0.0  ;;  %v6959_v36 = vshrl.u32 %v6952_v52, 16  ;;  %v6962_v61 = vshll.u32 %v6952_v52, 16 }
 0x16c   : > { %v1693_v27 = vrot.slane %v1673_v55, 5  ;;  %v1674_v63 = vmax.f32 %v1666_v56, 0.0  ;;  %v6965_v60 = vshll.u32 %v6954_v53, 16  ;;  %v6968_v0 = vshrl.u32 %v6954_v53, 16 }
 0x16d   : > { %v1699_v1 = vrot.slane %v1676_v59, 5  ;;  %v1756_v2 = vrot.slane %v6962_v61, 1  ;;  %v2034_v3 = vrot.slane %v6952_v52, 1  ;;  %v2035_v4 = vrot.slane %v6954_v53, 1 }
 0x16e   : > { %v1694_v6 = vsel %vm1685_vm7, %v1691_v45, %v1693_v27  ;;  %v1695_v48 = vrot.slane %v1674_v63, 5  ;;  %v1761_v8 = vrot.slane %v6965_v60, 1  ;;  %v2185_v9 = vrot.slane %v6959_v36, 1  ;;  %v6325_v63 = vld [vmem:[%s7840_s4 + $0x10] sm:$0xff]  }
 0x16f   : > { %v1700_v46 = vsel %vm1685_vm7, %v1697_v58, %v1699_v1  ;;  %v1712_v11 = vsel %vm1711_vm8, %v1699_v1, 0.0  ;;  %v1757_v19 = vor.u32 %v1756_v2, %v6959_v36  ;;  %v6980_v20 = vsel %vm709_vm3, %v2034_v3, %v2035_v4 }
 0x170   : > { %v6982_v22 = vpack.c.bf16 %v1712_v11, %v1712_v11  ;;  %v1696_v24 = vsel %vm1685_vm7, %v1693_v27, %v1695_v48  ;;  %v1698_v28 = vsel %vm1685_vm7, %v1695_v48, %v1697_v58  ;;  %v1765_v29 = vor.u32 %v6968_v0, %v1761_v8 }
 0x171   : > { %v6987_v30 = vpack.c.bf16 %v1696_v24, %v1694_v6  ;;  %v6989_v31 = vpack.c.bf16 %v1700_v46, %v1698_v28  ;;  %v1762_v32 = vsel %vm423_vm1, %v1757_v19, %v1761_v8  ;;  %v2186_v33 = vrot.slane %v6962_v61, 2 }
 0x172   : > { %5700 = vmatprep.mubr.bf16.mxu1 %v1762_v32  ;;  %v2041_v34 = vrot.slane %v6982_v22, 1  ;;  %v2188_v35 = vrot.slane %v6968_v0, 1  ;;  %v2189_v37 = vrot.slane %v6965_v60, 2  ;;  %v6997_v38 = vshrl.u32 %v6982_v22, 16 }
 0x173   : > { %v7000_v39 = vshll.u32 %v6987_v30, 16  ;;  %v7003_v40 = vshrl.u32 %v6987_v30, 16  ;;  %v7006_v12 = vshll.u32 %v6989_v31, 16  ;;  %v7009_v17 = vshrl.u32 %v6989_v31, 16 }
 0x174   : > { %v2037_v42 = vrot.slane %v6987_v30, 1  ;;  %v2039_v43 = vrot.slane %v6989_v31, 1  ;;  %v2187_v44 = vor.u32 %v2186_v33, %v2185_v9  ;;  %v2190_v14 = vor.u32 %v2189_v37, %v2188_v35  ;;  %v6326_v35 = vld [vmem:[%s7840_s4 + $0x18] sm:$0xff]  }
 0x175   : > { %v1769_v45 = vrot.slane %v7000_v39, 1  ;;  %v1777_v15 = vrot.slane %v7006_v12, 1  ;;  %v2192_v47 = vrot.slane %v7003_v40, 1  ;;  %v2193_v49 = vrot.slane %v7000_v39, 2 }
 0x176   : > { %v7021_v51 = vsel %vm709_vm3, %v2035_v4, %v2037_v42  ;;  %v7024_v26 = vsel %vm709_vm3, %v2037_v42, %v2039_v43  ;;  %v7027_v5 = vsel %vm709_vm3, %v2039_v43, %v2041_v34  ;;  %v7030_v13 = vsel %vm861_vm5, %v2187_v44, %v2190_v14 }
 0x177   : > { %v1770_v23 = vsel %vm423_vm1, %v1765_v29, %v1769_v45  ;;  %v1773_v7 = vor.u32 %v7003_v40, %v1769_v45  ;;  %v1781_v18 = vor.u32 %v7009_v17, %v1777_v15  ;;  %v2194_v21 = vor.u32 %v2193_v49, %v2192_v47 }
 0x178   : > { %5701 = vmatmul.mubr.bf16.vlgmr.msra.gmra.mrb[8].mxu1 %v1770_v23  ;;  %v2196_v25 = vrot.slane %v7009_v17, 1  ;;  %v2197_v16 = vrot.slane %v7006_v12, 2  ;;  %v2203_v54 = vrot.slane %v6997_v38, 1  ;;  %v7039_v55 = vshll.u32 %v6982_v22, 16 }
 0x179   : > { %5709 = vmatpush3.bf16.msra.mxu1 %v6932_v62  ;;  %v1778_v56 = vsel %vm423_vm1, %v1773_v7, %v1777_v15  ;;  %v7044_v58 = vsel %vm861_vm5, %v2190_v14, %v2194_v21  ;;  %v2351_v59 = vrot.slane %v6952_v52, 2  ;;  %v2352_v27 = vrot.slane %v6954_v53, 2 }
 0x17a   : > { %5704 = vmatprep.mubr.bf16.mxu1 %v1778_v56  ;;  %5710 = vmatprep.subr.bf16.mxu1 %v6324_v50  ;;  %v2198_v1 = vor.u32 %v2197_v16, %v2196_v25  ;;  %v2206_v2 = vrot.slane %v7039_v55, 2  ;;  %v2354_v62 = vrot.slane %v6987_v30, 2  ;;  %v2356_v3 = vrot.slane %v6989_v31, 2 }
 0x17b   : > { %v7060_v6 = vsel %vm1028_vm0, %v2351_v59, %v2352_v27  ;;  %v2358_v48 = vrot.slane %v6982_v22, 2  ;;  %v2502_v8 = vrot.slane %v6959_v36, 2  ;;  %v2503_v9 = vrot.slane %v6962_v61, 3 }
 0x17c   : > { %v7066_v46 = vsel %vm861_vm5, %v2194_v21, %v2198_v1  ;;  %v2207_v11 = vor.u32 %v2206_v2, %v2203_v54  ;;  %v7069_v19 = vsel %vm1028_vm0, %v2352_v27, %v2354_v62  ;;  %v7072_v24 = vsel %vm1028_vm0, %v2354_v62, %v2356_v3 }
 0x17d   : > { %5711 = vmatpush3.bf16.msra.mxu1 %v6324_v50  ;;  %v7075_v28 = vsel %vm1028_vm0, %v2356_v3, %v2358_v48  ;;  %v2504_v29 = vor.u32 %v2503_v9, %v2502_v8  ;;  %v2505_v32 = vrot.slane %v6968_v0, 2  ;;  %v2506_v33 = vrot.slane %v6965_v60, 3 }
 0x17e   : > { %5712 = vmatprep.subr.bf16.mxu1 %v6325_v63  ;;  %v7089_v37 = vsel %vm861_vm5, %v2198_v1, %v2207_v11  ;;  %v2509_v42 = vrot.slane %v7003_v40, 2  ;;  %v2510_v43 = vrot.slane %v7000_v39, 3  ;;  %v2513_v44 = vrot.slane %v7009_v17, 2 }
 0x17f   : > { %v2507_v14 = vor.u32 %v2506_v33, %v2505_v32  ;;  %v2514_v45 = vrot.slane %v7006_v12, 3  ;;  %v2517_v15 = vrot.slane %v6997_v38, 2  ;;  %v2518_v47 = vrot.slane %v7039_v55, 3  ;;  %v6330_v32 = vld [vmem:[%s7840_s4 + $0x38] sm:$0xff]   ;;  %v6331_v33 = vld [vmem:[%s7840_s4 + $0x80] sm:$0xff]  }
 0x180   : > { %5705 = vmatmul.mubr.bf16.gmra.mrb[12].mxu1 %v1781_v18  ;;  %v2511_v49 = vor.u32 %v2510_v43, %v2509_v42  ;;  %v2663_v50 = vrot.slane %v6952_v52, 3  ;;  %v2664_v23 = vrot.slane %v6954_v53, 3  ;;  %v2666_v7 = vrot.slane %v6987_v30, 3  ;;  %v6327_v52 = vld [vmem:[%s7840_s4 + $0x20] sm:$0xff]   ;;  %v6333_v42 = vld [vmem:[%s7840_s4 + $0x90] sm:$0xff]   ;;  %v6334_v43 = vld [vmem:[%s7840_s4 + $0x98] sm:$0xff]  }
 0x181   : > { %5713 = vmatpush3.bf16.msra.mxu1 %v6325_v63  ;;  %5724 = vmatprep.mubr.msk.bf16.mxu1 %vm7081_vm11, %v4839_v57  ;;  %v7106_v21 = vsel %vm1180_vm2, %v2504_v29, %v2507_v14  ;;  %v2515_v25 = vor.u32 %v2514_v45, %v2513_v44  ;;  %v2519_v16 = vor.u32 %v2518_v47, %v2517_v15  ;;  %v2668_v18 = vrot.slane %v6989_v31, 3  ;;  %v6339_v44 = vld [vmem:[%s7840_s4 + $0xc0] sm:$0xff]   ;;  %v6341_v45 = vld [vmem:[%s7840_s4 + $0xd0] sm:$0xff]   ;;  %v6342_v15 = vld [vmem:[%s7840_s4 + $0xd8] sm:$0xff]  }
 0x182   : > { %5714 = vmatprep.subr.bf16.mxu1 %v6326_v35  ;;  %v7113_v54 = vsel %vm1180_vm2, %v2507_v14, %v2511_v49  ;;  %v7116_v41 = vsel %vm1342_vm4, %v2663_v50, %v2664_v23  ;;  %v7119_v10 = vsel %vm1342_vm4, %v2664_v23, %v2666_v7  ;;  %v2670_v57 = vrot.slane %v6982_v22, 3  ;;  %v6340_v14 = vld [vmem:[%s7840_s4 + $0xc8] sm:$0xff]   ;;  %v6347_v47 = vld [vmem:[%s7840_s4 + $0x100] sm:$0xff]   ;;  %v6349_v50 = vld [vmem:[%s7840_s4 + $0x110] sm:$0xff]  }
 0x183   : > { %v7123_v56 = vsel %vm1180_vm2, %v2511_v49, %v2515_v25  ;;  %v7126_v59 = vsel %vm1180_vm2, %v2515_v25, %v2519_v16  ;;  %v7129_v27 = vsel %vm1342_vm4, %v2666_v7, %v2668_v18  ;;  %v2814_v63 = vrot.slane %v6959_v36, 3  ;;  %v6328_v36 = vld [vmem:[%s7840_s4 + $0x28] sm:$0xff]   ;;  %v6350_v23 = vld [vmem:[%s7840_s4 + $0x118] sm:$0xff]   ;;  %v6351_v7 = vld [vmem:[%s7840_s4 + $0x120] sm:$0xff]  }
 0x184   : > { %v7133_v1 = vsel %vm1342_vm4, %v2668_v18, %v2670_v57  ;;  %v2815_v2 = vrot.slane %v6962_v61, 4  ;;  %v2817_v62 = vrot.slane %v6968_v0, 3  ;;  %v2818_v22 = vrot.slane %v6965_v60, 4  ;;  %v6348_v49 = vld [vmem:[%s7840_s4 + $0x108] sm:$0xff]   ;;  %v6354_v25 = vld [vmem:[%s7840_s4 + $0x138] sm:$0xff]   ;;  %v6355_v16 = vld [vmem:[%s7840_s4 + $0x140] sm:$0xff]  }
 0x185   : > { %5715 = vmatpush3.bf16.msra.mxu1 %v6326_v35  ;;  %v2821_v3 = vrot.slane %v7003_v40, 3  ;;  %v2822_v4 = vrot.slane %v7000_v39, 4  ;;  %v2825_v48 = vrot.slane %v7009_v17, 3  ;;  %v2826_v8 = vrot.slane %v7006_v12, 4  ;;  %v6332_v35 = vld [vmem:[%s7840_s4 + $0x88] sm:$0xff]   ;;  %v6358_v57 = vld [vmem:[%s7840_s4 + $0x158] sm:$0xff]  }
 0x186   : > { %5716 = vmatprep.subr.bf16.mxu1 %v6327_v52  ;;  %v2816_v9 = vor.u32 %v2815_v2, %v2814_v63  ;;  %v2819_v61 = vor.u32 %v2818_v22, %v2817_v62  ;;  %v2829_v0 = vrot.slane %v6997_v38, 3  ;;  %v2830_v60 = vrot.slane %v7039_v55, 4  ;;  %v6329_v38 = vld [vmem:[%s7840_s4 + $0x30] sm:$0xff]   ;;  %v6356_v18 = vld [vmem:[%s7840_s4 + $0x148] sm:$0xff]   ;;  %v6363_v63 = vld [vmem:[%s7840_s4 + $0x180] sm:$0xff]  }
 0x187   : > { %v2823_v11 = vor.u32 %v2822_v4, %v2821_v3  ;;  %v2827_v29 = vor.u32 %v2826_v8, %v2825_v48  ;;  %v6364_v2 = vld [vmem:[%s7840_s4 + $0x188] sm:$0xff]   ;;  %v6365_v62 = vld [vmem:[%s7840_s4 + $0x190] sm:$0xff]   ;;  %v6366_v22 = vld [vmem:[%s7840_s4 + $0x198] sm:$0xff]  }
 0x188   : > { %v7148_v40 = vsel %vm1494_vm6, %v2816_v9, %v2819_v61  ;;  %v2831_v39 = vor.u32 %v2830_v60, %v2829_v0  ;;  %v6371_v3 = vld [vmem:[%s7840_s4 + $0x1c0] sm:$0xff]   ;;  %v6372_v4 = vld [vmem:[%s7840_s4 + $0x1c8] sm:$0xff]   ;;  %v6373_v48 = vld [vmem:[%s7840_s4 + $0x1d0] sm:$0xff]  }
 0x189   : > { %5717 = vmatpush3.bf16.msra.mxu1 %v6327_v52  ;;  %v7151_v12 = vsel %vm1494_vm6, %v2819_v61, %v2823_v11  ;;  %v7154_v17 = vsel %vm1494_vm6, %v2823_v11, %v2827_v29  ;;  %v6357_v52 = vld [vmem:[%s7840_s4 + $0x150] sm:$0xff]   ;;  %v6374_v8 = vld [vmem:[%s7840_s4 + $0x1d8] sm:$0xff]   ;;  %v6383_v0 = vld [vmem:[%s7843_s7 + $0x60] sm:$0xff]  }
 0x18a   : > { %5718 = vmatprep.subr.bf16.mxu1 %v6328_v36  ;;  %v7160_v55 = vsel %vm1494_vm6, %v2827_v29, %v2831_v39  ;;  %v6381_v9 = vld [vmem:[%s7843_s7 + $0x50] sm:$0xff]   ;;  %v6382_v61 = vld [vmem:[%s7843_s7 + $0x58] sm:$0xff]   ;;  %v6384_v60 = vld [vmem:[%s7843_s7 + $0x68] sm:$0xff]  }
 0x18b   : > { %v6385_v11 = vld [vmem:[%s7843_s7 + $0x70] sm:$0xff]   ;;  %v6386_v29 = vld [vmem:[%s7843_s7 + $0x78] sm:$0xff]   ;;  %v4985_v39 = vld [vmem:[%s7841_s5] ss:$0 sm:$0xff] }
 0x18d   : > { %5719 = vmatpush3.bf16.msra.mxu1 %v6328_v36  ;;  %v6378_v36 = vld [vmem:[%s7840_s4 + $0x1f8] sm:$0xff]  }
 0x18e   : > { %5720 = vmatprep.subr.bf16.mxu1 %v6329_v38 }
 0x191   : > { %5721 = vmatpush3.bf16.msra.mxu1 %v6329_v38 }
 0x192   : > { %5722 = vmatprep.subr.bf16.mxu1 %v6330_v32 }
 0x195   : > { %5723 = vmatpush3.bf16.msra.mxu1 %v6330_v32 }
 0x196   : > { %5732 = vmatprep.subr.bf16.mxu1 %v6331_v33 }
 0x198   : > { %5725 = vmatmul.mubr.bf16.vlgmr.msra.gmra.mrb[8].mxu1 %v6954_v53  ;;  %v6335_v53 = vld [vmem:[%s7840_s4 + $0xa0] sm:$0xff]  }
 0x199   : > { %5728 = vmatprep.mubr.bf16.mxu1 %v6987_v30  ;;  %5733 = vmatpush3.bf16.msra.mxu1 %v6331_v33  ;;  %v6336_v30 = vld [vmem:[%s7840_s4 + $0xa8] sm:$0xff]  }
 0x19a   : > { %5734 = vmatprep.subr.bf16.mxu1 %v6332_v35 }
 0x19d   : > { %5735 = vmatpush3.bf16.msra.mxu1 %v6332_v35 }
 0x19e   : > { %5736 = vmatprep.subr.bf16.mxu1 %v6333_v42 }
 0x1a0   : > { %5729 = vmatmul.mubr.bf16.gmra.mrb[12].mxu1 %v6989_v31  ;;  %v6337_v31 = vld [vmem:[%s7840_s4 + $0xb0] sm:$0xff]  }
 0x1a1   : > { %5737 = vmatpush3.bf16.msra.mxu1 %v6333_v42  ;;  %5748 = vmatprep.mubr.bf16.mxu1 %v6980_v20  ;;  %v6338_v20 = vld [vmem:[%s7840_s4 + $0xb8] sm:$0xff]  }
 0x1a2   : > { %5738 = vmatprep.subr.bf16.mxu1 %v6334_v43 }
 0x1a5   : > { %5739 = vmatpush3.bf16.msra.mxu1 %v6334_v43 }
 0x1a6   : > { %5740 = vmatprep.subr.bf16.mxu1 %v6335_v53 }
 0x1a9   : > { %5741 = vmatpush3.bf16.msra.mxu1 %v6335_v53 }
 0x1aa   : > { %5742 = vmatprep.subr.bf16.mxu1 %v6336_v30 }
 0x1ad   : > { %5743 = vmatpush3.bf16.msra.mxu1 %v6336_v30 }
 0x1ae   : > { %5744 = vmatprep.subr.bf16.mxu1 %v6337_v31 }
 0x1b1   : > { %5745 = vmatpush3.bf16.msra.mxu1 %v6337_v31 }
 0x1b2   : > { %5746 = vmatprep.subr.bf16.mxu1 %v6338_v20 }
 0x1b5   : > { %5747 = vmatpush3.bf16.msra.mxu1 %v6338_v20 }
 0x1b6   : > { %5756 = vmatprep.subr.bf16.mxu1 %v6339_v44 }
 0x1b8   : > { %5749 = vmatmul.mubr.bf16.vlgmr.msra.gmra.mrb[8].mxu1 %v7021_v51  ;;  %v6343_v51 = vld [vmem:[%s7840_s4 + $0xe0] sm:$0xff]  }
 0x1b9   : > { %5752 = vmatprep.mubr.bf16.mxu1 %v7024_v26  ;;  %5757 = vmatpush3.bf16.msra.mxu1 %v6339_v44  ;;  %v6344_v26 = vld [vmem:[%s7840_s4 + $0xe8] sm:$0xff]  }
 0x1ba   : > { %5758 = vmatprep.subr.bf16.mxu1 %v6340_v14 }
 0x1bd   : > { %5759 = vmatpush3.bf16.msra.mxu1 %v6340_v14 }
 0x1be   : > { %5760 = vmatprep.subr.bf16.mxu1 %v6341_v45 }
 0x1c0   : > { %5753 = vmatmul.mubr.bf16.gmra.mrb[12].mxu1 %v7027_v5  ;;  %v6345_v5 = vld [vmem:[%s7840_s4 + $0xf0] sm:$0xff]  }
 0x1c1   : > { %5761 = vmatpush3.bf16.msra.mxu1 %v6341_v45  ;;  %5772 = vmatprep.mubr.bf16.mxu1 %v7030_v13  ;;  %v6346_v13 = vld [vmem:[%s7840_s4 + $0xf8] sm:$0xff]  }
 0x1c2   : > { %5762 = vmatprep.subr.bf16.mxu1 %v6342_v15 }
 0x1c5   : > { %5763 = vmatpush3.bf16.msra.mxu1 %v6342_v15 }
 0x1c6   : > { %5764 = vmatprep.subr.bf16.mxu1 %v6343_v51 }
 0x1c9   : > { %5765 = vmatpush3.bf16.msra.mxu1 %v6343_v51 }
 0x1ca   : > { %5766 = vmatprep.subr.bf16.mxu1 %v6344_v26 }
 0x1cd   : > { %5767 = vmatpush3.bf16.msra.mxu1 %v6344_v26 }
 0x1ce   : > { %5768 = vmatprep.subr.bf16.mxu1 %v6345_v5 }
 0x1d1   : > { %5769 = vmatpush3.bf16.msra.mxu1 %v6345_v5 }
 0x1d2   : > { %5770 = vmatprep.subr.bf16.mxu1 %v6346_v13 }
 0x1d5   : > { %5771 = vmatpush3.bf16.msra.mxu1 %v6346_v13 }
 0x1d6   : > { %5780 = vmatprep.subr.bf16.mxu1 %v6347_v47 }
 0x1d8   : > { %5773 = vmatmul.mubr.bf16.vlgmr.msra.gmra.mrb[8].mxu1 %v7044_v58  ;;  %v6379_v58 = vld [vmem:[%s7843_s7 + $0x40] sm:$0xff]  }
 0x1d9   : > { %5776 = vmatprep.mubr.bf16.mxu1 %v7066_v46  ;;  %5781 = vmatpush3.bf16.msra.mxu1 %v6347_v47  ;;  %v6380_v46 = vld [vmem:[%s7843_s7 + $0x48] sm:$0xff]  }
 0x1da   : > { %5782 = vmatprep.subr.bf16.mxu1 %v6348_v49  ;;  %5876 = vmatprep.subr.bf16.mxu0 %v6379_v58 }
 0x1db   : > { %5877 = vmatpush3.bf16.msra.mxu0 %v6379_v58 }
 0x1dc   : > { %5878 = vmatprep.subr.bf16.mxu0 %v6380_v46 }
 0x1dd   : > { %5783 = vmatpush3.bf16.msra.mxu1 %v6348_v49 }
 0x1de   : > { %5784 = vmatprep.subr.bf16.mxu1 %v6349_v50 }
 0x1df   : > { %5879 = vmatpush3.bf16.msra.mxu0 %v6380_v46 }
 0x1e0   : > { %5777 = vmatmul.mubr.bf16.gmra.mrb[12].mxu1 %v7089_v37  ;;  %v6352_v37 = vld [vmem:[%s7840_s4 + $0x128] sm:$0xff]   ;;  %5880 = vmatprep.subr.bf16.mxu0 %v6381_v9 }
 0x1e1   : > { %5785 = vmatpush3.bf16.msra.mxu1 %v6349_v50  ;;  %5796 = vmatprep.mubr.bf16.mxu1 %v7060_v6  ;;  %v6353_v6 = vld [vmem:[%s7840_s4 + $0x130] sm:$0xff]  }
 0x1e2   : > { %5786 = vmatprep.subr.bf16.mxu1 %v6350_v23 }
 0x1e3   : > { %5881 = vmatpush3.bf16.msra.mxu0 %v6381_v9 }
 0x1e4   : > { %5882 = vmatprep.subr.bf16.mxu0 %v6382_v61 }
 0x1e5   : > { %5787 = vmatpush3.bf16.msra.mxu1 %v6350_v23 }
 0x1e6   : > { %5788 = vmatprep.subr.bf16.mxu1 %v6351_v7 }
 0x1e7   : > { %5883 = vmatpush3.bf16.msra.mxu0 %v6382_v61 }
 0x1e8   : > { %5884 = vmatprep.subr.bf16.mxu0 %v6383_v0 }
 0x1e9   : > { %5789 = vmatpush3.bf16.msra.mxu1 %v6351_v7 }
 0x1ea   : > { %5790 = vmatprep.subr.bf16.mxu1 %v6352_v37 }
 0x1eb   : > { %5885 = vmatpush3.bf16.msra.mxu0 %v6383_v0 }
 0x1ec   : > { %5886 = vmatprep.subr.bf16.mxu0 %v6384_v60 }
 0x1ed   : > { %5791 = vmatpush3.bf16.msra.mxu1 %v6352_v37 }
 0x1ee   : > { %5792 = vmatprep.subr.bf16.mxu1 %v6353_v6 }
 0x1ef   : > { %5887 = vmatpush3.bf16.msra.mxu0 %v6384_v60 }
 0x1f0   : > { %5888 = vmatprep.subr.bf16.mxu0 %v6385_v11 }
 0x1f1   : > { %5793 = vmatpush3.bf16.msra.mxu1 %v6353_v6 }
 0x1f2   : > { %5794 = vmatprep.subr.bf16.mxu1 %v6354_v25 }
 0x1f3   : > { %5889 = vmatpush3.bf16.msra.mxu0 %v6385_v11 }
 0x1f4   : > { %5890 = vmatprep.subr.bf16.mxu0 %v6386_v29 }
 0x1f5   : > { %5795 = vmatpush3.bf16.msra.mxu1 %v6354_v25 }
 0x1f6   : > { %5804 = vmatprep.subr.bf16.mxu1 %v6355_v16 }
 0x1f7   : > { %5891 = vmatpush3.bf16.msra.mxu0 %v6386_v29 }
 0x1f8   : > { %5797 = vmatmul.mubr.bf16.vlgmr.msra.gmra.mrb[8].mxu1 %v7069_v19  ;;  %v6359_v19 = vld [vmem:[%s7840_s4 + $0x160] sm:$0xff]  }
 0x1f9   : > { %5800 = vmatprep.mubr.bf16.mxu1 %v7072_v24  ;;  %5805 = vmatpush3.bf16.msra.mxu1 %v6355_v16  ;;  %v6360_v24 = vld [vmem:[%s7840_s4 + $0x168] sm:$0xff]  }
 0x1fa   : > { %5806 = vmatprep.subr.bf16.mxu1 %v6356_v18 }
 0x1fd   : > { %5807 = vmatpush3.bf16.msra.mxu1 %v6356_v18 }
 0x1fe   : > { %5808 = vmatprep.subr.bf16.mxu1 %v6357_v52 }
 0x200   : > { %5801 = vmatmul.mubr.bf16.gmra.mrb[12].mxu1 %v7075_v28  ;;  %v6361_v28 = vld [vmem:[%s7840_s4 + $0x170] sm:$0xff]  }
 0x201   : > { %5809 = vmatpush3.bf16.msra.mxu1 %v6357_v52  ;;  %5820 = vmatprep.mubr.bf16.mxu1 %v7106_v21  ;;  %v6362_v21 = vld [vmem:[%s7840_s4 + $0x178] sm:$0xff]  }
 0x202   : > { %5810 = vmatprep.subr.bf16.mxu1 %v6358_v57 }
 0x205   : > { %5811 = vmatpush3.bf16.msra.mxu1 %v6358_v57 }
 0x206   : > { %5812 = vmatprep.subr.bf16.mxu1 %v6359_v19 }
 0x209   : > { %5813 = vmatpush3.bf16.msra.mxu1 %v6359_v19 }
 0x20a   : > { %5814 = vmatprep.subr.bf16.mxu1 %v6360_v24 }
 0x20d   : > { %5815 = vmatpush3.bf16.msra.mxu1 %v6360_v24 }
 0x20e   : > { %5816 = vmatprep.subr.bf16.mxu1 %v6361_v28 }
 0x211   : > { %5817 = vmatpush3.bf16.msra.mxu1 %v6361_v28 }
 0x212   : > { %5818 = vmatprep.subr.bf16.mxu1 %v6362_v21 }
 0x215   : > { %5819 = vmatpush3.bf16.msra.mxu1 %v6362_v21 }
 0x216   : > { %5828 = vmatprep.subr.bf16.mxu1 %v6363_v63 }
 0x218   : > { %5821 = vmatmul.mubr.bf16.vlgmr.msra.gmra.mrb[8].mxu1 %v7113_v54  ;;  %v6367_v54 = vld [vmem:[%s7840_s4 + $0x1a0] sm:$0xff]  }
 0x219   : > { %5824 = vmatprep.mubr.bf16.mxu1 %v7123_v56  ;;  %5829 = vmatpush3.bf16.msra.mxu1 %v6363_v63  ;;  %v6368_v56 = vld [vmem:[%s7840_s4 + $0x1a8] sm:$0xff]  }
 0x21a   : > { %5830 = vmatprep.subr.bf16.mxu1 %v6364_v2 }
 0x21d   : > { %5831 = vmatpush3.bf16.msra.mxu1 %v6364_v2 }
 0x21e   : > { %5832 = vmatprep.subr.bf16.mxu1 %v6365_v62 }
 0x220   : > { %5825 = vmatmul.mubr.bf16.gmra.mrb[12].mxu1 %v7126_v59  ;;  %v6369_v59 = vld [vmem:[%s7840_s4 + $0x1b0] sm:$0xff]  }
 0x221   : > { %5833 = vmatpush3.bf16.msra.mxu1 %v6365_v62  ;;  %5844 = vmatprep.mubr.bf16.mxu1 %v7116_v41  ;;  %v6370_v41 = vld [vmem:[%s7840_s4 + $0x1b8] sm:$0xff]  }
 0x222   : > { %5834 = vmatprep.subr.bf16.mxu1 %v6366_v22 }
 0x225   : > { %5835 = vmatpush3.bf16.msra.mxu1 %v6366_v22 }
 0x226   : > { %5836 = vmatprep.subr.bf16.mxu1 %v6367_v54 }
 0x229   : > { %5837 = vmatpush3.bf16.msra.mxu1 %v6367_v54 }
 0x22a   : > { %5838 = vmatprep.subr.bf16.mxu1 %v6368_v56 }
 0x22d   : > { %5839 = vmatpush3.bf16.msra.mxu1 %v6368_v56 }
 0x22e   : > { %5840 = vmatprep.subr.bf16.mxu1 %v6369_v59 }
 0x231   : > { %5841 = vmatpush3.bf16.msra.mxu1 %v6369_v59 }
 0x232   : > { %5842 = vmatprep.subr.bf16.mxu1 %v6370_v41 }
 0x235   : > { %5843 = vmatpush3.bf16.msra.mxu1 %v6370_v41 }
 0x236   : > { %5852 = vmatprep.subr.bf16.mxu1 %v6371_v3 }
 0x238   : > { %5845 = vmatmul.mubr.bf16.vlgmr.msra.gmra.mrb[8].mxu1 %v7119_v10  ;;  %v6375_v10 = vld [vmem:[%s7840_s4 + $0x1e0] sm:$0xff]  }
 0x239   : > { %5848 = vmatprep.mubr.bf16.mxu1 %v7129_v27  ;;  %5853 = vmatpush3.bf16.msra.mxu1 %v6371_v3  ;;  %v6376_v27 = vld [vmem:[%s7840_s4 + $0x1e8] sm:$0xff]  }
 0x23a   : > { %5854 = vmatprep.subr.bf16.mxu1 %v6372_v4 }
 0x23d   : > { %5855 = vmatpush3.bf16.msra.mxu1 %v6372_v4 }
 0x23e   : > { %5856 = vmatprep.subr.bf16.mxu1 %v6373_v48 }
 0x240   : > { %5849 = vmatmul.mubr.bf16.gmra.mrb[12].mxu1 %v7133_v1  ;;  %v6377_v1 = vld [vmem:[%s7840_s4 + $0x1f0] sm:$0xff]  }
 0x241   : > { %5857 = vmatpush3.bf16.msra.mxu1 %v6373_v48  ;;  %5868 = vmatprep.mubr.bf16.mxu1 %v7148_v40  ;;  %v7363_v40 = vld [vmem:[%s7843_s7] sm:$0xff]  }
 0x242   : > { %5858 = vmatprep.subr.bf16.mxu1 %v6374_v8  ;;  %5900 = vmatprep.subr.bf16.mxu0 %v7363_v40 }
 0x245   : > { %5859 = vmatpush3.bf16.msra.mxu1 %v6374_v8 }
 0x246   : > { %5860 = vmatprep.subr.bf16.mxu1 %v6375_v10 }
 0x249   : > { %5861 = vmatpush3.bf16.msra.mxu1 %v6375_v10 }
 0x24a   : > { %5862 = vmatprep.subr.bf16.mxu1 %v6376_v27 }
 0x24d   : > { %5863 = vmatpush3.bf16.msra.mxu1 %v6376_v27 }
 0x24e   : > { %5864 = vmatprep.subr.bf16.mxu1 %v6377_v1 }
 0x251   : > { %5865 = vmatpush3.bf16.msra.mxu1 %v6377_v1 }
 0x252   : > { %5866 = vmatprep.subr.bf16.mxu1 %v6378_v36 }
 0x255   : > { %5867 = vmatpush3.bf16.msra.mxu1 %v6378_v36 }
 0x258   : > { %5869 = vmatmul.mubr.bf16.vlgmr.msra.gmra.mrb[8].mxu1 %v7151_v12 }
 0x259   : > { %5872 = vmatprep.mubr.bf16.mxu1 %v7154_v17  ;;  %v4986_v17 = vld [vmem:[%s7842_s6] ss:$0 sm:$0xff] }
 0x260   : > { %5873 = vmatmul.mubr.bf16.gmra.mrb[12].mxu1 %v7160_v55 }
 0x32b   : > { %v5870_v12 = vpop.f32.mrb[8].mxu1 }
 0x32c   : > { %v2967_v38 = vmul.f32 %v5870_v12, %v4985_v39  ;;  %v2919_v55 = vpop.f32.mrb[9].mxu1 }
 0x32d   : > { %v2965_v32 = vmul.f32 %v4985_v39, %v2919_v55  ;;  %v5871_v33 = vpop.f32.mrb[10].mxu1 }
 0x32e   : > { %v2982_v35 = vadd.f32 %v4986_v17, %v2967_v38  ;;  %v2968_v42 = vmul.f32 %v5871_v33, %v4985_v39  ;;  %v2922_v43 = vpop.f32.mrb[11].mxu1 }
 0x32f   : > { %v2980_v53 = vadd.f32 %v4986_v17, %v2965_v32  ;;  %v2966_v30 = vmul.f32 %v4985_v39, %v2922_v43 }
 0x330   : > { %v2990_v31 = vmax.f32 %v2982_v35, 0.0  ;;  %v2983_v20 = vadd.f32 %v4986_v17, %v2968_v42 }
 0x331   : > { %v2988_v44 = vmax.f32 %v2980_v53, 0.0  ;;  %v2981_v14 = vadd.f32 %v4986_v17, %v2966_v30 }
 0x332   : > { %v2991_v45 = vmax.f32 %v2983_v20, 0.0  ;;  %v3007_v5 = vrot.slane %v2990_v31, 5 }
 0x333   : > { %v7372_v15 = vrot.slane %v2988_v44, 5  ;;  %v2989_v51 = vmax.f32 %v2981_v14, 0.0  ;;  %v5874_v26 = vpop.f32.mrb[12].mxu1 }
 0x334   : > { %v3009_v13 = vrot.slane %v2991_v45, 5  ;;  %v2971_v47 = vmul.f32 %v5874_v26, %v4985_v39  ;;  %v2935_v49 = vpop.f32.mrb[13].mxu1 }
 0x335   : > { %v3005_v50 = vrot.slane %v2989_v51, 5  ;;  %v2969_v23 = vmul.f32 %v4985_v39, %v2935_v49  ;;  %v5875_v58 = vpop.f32.mrb[14].mxu1  ;;  %v3028_v46 = vsel %vm1685_vm7, 0.0, %v7372_v15 }
 0x336   : > { %v3010_v7 = vsel %vm1685_vm7, %v3007_v5, %v3009_v13  ;;  %v2986_v37 = vadd.f32 %v4986_v17, %v2971_v47  ;;  %v2972_v6 = vmul.f32 %v5875_v58, %v4985_v39  ;;  %v2938_v25 = vpop.f32.mrb[15].mxu1  ;;  %v6388_v58 = vld [vmem:[%s7843_s7 + $0x8] sm:$0xff]  }
 0x337   : > { %v7379_v16 = vsel %vm1685_vm7, %v7372_v15, %v3005_v50  ;;  %v3008_v18 = vsel %vm1685_vm7, %v3005_v50, %v3007_v5  ;;  %v2984_v52 = vadd.f32 %v4986_v17, %v2969_v23  ;;  %v2970_v57 = vmul.f32 %v4985_v39, %v2938_v25 }
 0x338   : > { %v7383_v19 = vpack.c.bf16 %v7379_v16, %v3028_v46  ;;  %v7385_v24 = vpack.c.bf16 %v3010_v7, %v3008_v18  ;;  %v2994_v28 = vmax.f32 %v2986_v37, 0.0  ;;  %v2987_v21 = vadd.f32 %v4986_v17, %v2972_v6 }
 0x339   : > { %v2992_v63 = vmax.f32 %v2984_v52, 0.0  ;;  %v2985_v2 = vadd.f32 %v4986_v17, %v2970_v57  ;;  %v5021_v62 = vpack.c.bf16 %v7379_v16, %v7372_v15 }
 0x33a   : > { %v3015_v22 = vrot.slane %v2994_v28, 5  ;;  %v2995_v54 = vmax.f32 %v2987_v21, 0.0  ;;  %v7390_v56 = vshrl.u32 %v7383_v19, 16  ;;  %v7393_v59 = vshll.u32 %v7383_v19, 16 }
 0x33b   : > { %v3011_v41 = vrot.slane %v2992_v63, 5  ;;  %v2993_v3 = vmax.f32 %v2985_v2, 0.0  ;;  %v7396_v4 = vshll.u32 %v7385_v24, 16  ;;  %v7399_v48 = vshrl.u32 %v7385_v24, 16 }
 0x33c   : > { %v3017_v8 = vrot.slane %v2995_v54, 5  ;;  %v3073_v10 = vrot.slane %v7393_v59, 1  ;;  %v3351_v27 = vrot.slane %v7383_v19, 1  ;;  %v3352_v1 = vrot.slane %v7385_v24, 1 }
 0x33d   : > { %v3012_v36 = vsel %vm1685_vm7, %v3009_v13, %v3011_v41  ;;  %v3013_v9 = vrot.slane %v2993_v3, 5  ;;  %v3078_v61 = vrot.slane %v7396_v4, 1  ;;  %v3502_v0 = vrot.slane %v7390_v56, 1 }
 0x33e   : > { %v3018_v60 = vsel %vm1685_vm7, %v3015_v22, %v3017_v8  ;;  %v3029_v11 = vsel %vm1711_vm8, %v3017_v8, 0.0  ;;  %v3074_v29 = vor.u32 %v3073_v10, %v7390_v56  ;;  %v7411_v39 = vsel %vm709_vm3, %v3351_v27, %v3352_v1  ;;  %v6389_v8 = vld [vmem:[%s7843_s7 + $0x10] sm:$0xff]  }
 0x33f   : > { %v7413_v12 = vpack.c.bf16 %v3029_v11, %v3029_v11  ;;  %v3014_v17 = vsel %vm1685_vm7, %v3011_v41, %v3013_v9  ;;  %v3016_v38 = vsel %vm1685_vm7, %v3013_v9, %v3015_v22  ;;  %v3082_v55 = vor.u32 %v7399_v48, %v3078_v61 }
 0x340   : > { %v7418_v32 = vpack.c.bf16 %v3014_v17, %v3012_v36  ;;  %v7420_v33 = vpack.c.bf16 %v3018_v60, %v3016_v38  ;;  %v3079_v35 = vsel %vm423_vm1, %v3074_v29, %v3078_v61  ;;  %v3503_v42 = vrot.slane %v7393_v59, 2 }
 0x341   : > { %5892 = vmatprep.mubr.bf16.mxu0 %v3079_v35  ;;  %v3358_v43 = vrot.slane %v7413_v12, 1  ;;  %v3505_v53 = vrot.slane %v7399_v48, 1  ;;  %v3506_v30 = vrot.slane %v7396_v4, 2  ;;  %v7428_v31 = vshrl.u32 %v7413_v12, 16 }
 0x342   : > { %v7431_v20 = vshll.u32 %v7418_v32, 16  ;;  %v7434_v44 = vshrl.u32 %v7418_v32, 16  ;;  %v7437_v14 = vshll.u32 %v7420_v33, 16  ;;  %v7440_v45 = vshrl.u32 %v7420_v33, 16 }
 0x343   : > { %v3354_v51 = vrot.slane %v7418_v32, 1  ;;  %v3356_v26 = vrot.slane %v7420_v33, 1  ;;  %v3504_v5 = vor.u32 %v3503_v42, %v3502_v0  ;;  %v3507_v13 = vor.u32 %v3506_v30, %v3505_v53 }
 0x344   : > { %v3086_v47 = vrot.slane %v7431_v20, 1  ;;  %v3094_v49 = vrot.slane %v7437_v14, 1  ;;  %v3509_v50 = vrot.slane %v7434_v44, 1  ;;  %v3510_v23 = vrot.slane %v7431_v20, 2 }
 0x345   : > { %v7452_v46 = vsel %vm709_vm3, %v3352_v1, %v3354_v51  ;;  %v7455_v7 = vsel %vm709_vm3, %v3354_v51, %v3356_v26  ;;  %v7458_v37 = vsel %vm709_vm3, %v3356_v26, %v3358_v43  ;;  %v7461_v6 = vsel %vm861_vm5, %v3504_v5, %v3507_v13  ;;  %v6390_v43 = vld [vmem:[%s7843_s7 + $0x18] sm:$0xff]  }
 0x346   : > { %v3087_v25 = vsel %vm423_vm1, %v3082_v55, %v3086_v47  ;;  %v3090_v18 = vor.u32 %v7434_v44, %v3086_v47  ;;  %v3098_v52 = vor.u32 %v7440_v45, %v3094_v49  ;;  %v3511_v57 = vor.u32 %v3510_v23, %v3509_v50 }
 0x347   : > { %5893 = vmatmul.mubr.bf16.vlgmr.msra.gmra.mrb[8].mxu0 %v3087_v25  ;;  %v3513_v28 = vrot.slane %v7440_v45, 1  ;;  %v3514_v21 = vrot.slane %v7437_v14, 2  ;;  %v3520_v63 = vrot.slane %v7428_v31, 1  ;;  %v7470_v2 = vshll.u32 %v7413_v12, 16 }
 0x348   : > { %5901 = vmatpush3.bf16.msra.mxu0 %v7363_v40  ;;  %v3095_v22 = vsel %vm423_vm1, %v3090_v18, %v3094_v49  ;;  %v7475_v54 = vsel %vm861_vm5, %v3507_v13, %v3511_v57  ;;  %v3668_v41 = vrot.slane %v7383_v19, 2  ;;  %v3669_v3 = vrot.slane %v7385_v24, 2 }
 0x349   : > { %5896 = vmatprep.mubr.bf16.mxu0 %v3095_v22  ;;  %5902 = vmatprep.subr.bf16.mxu0 %v6388_v58  ;;  %v3515_v10 = vor.u32 %v3514_v21, %v3513_v28  ;;  %v3523_v27 = vrot.slane %v7470_v2, 2  ;;  %v3671_v40 = vrot.slane %v7418_v32, 2  ;;  %v3673_v1 = vrot.slane %v7420_v33, 2 }
 0x34a   : > { %v7486_v36 = vsel %vm1028_vm0, %v3668_v41, %v3669_v3  ;;  %v3675_v9 = vrot.slane %v7413_v12, 2  ;;  %v3819_v61 = vrot.slane %v7390_v56, 2  ;;  %v3820_v0 = vrot.slane %v7393_v59, 3 }
 0x34b   : > { %v7492_v60 = vsel %vm861_vm5, %v3511_v57, %v3515_v10  ;;  %v3524_v11 = vor.u32 %v3523_v27, %v3520_v63  ;;  %v7495_v29 = vsel %vm1028_vm0, %v3669_v3, %v3671_v40  ;;  %v7498_v17 = vsel %vm1028_vm0, %v3671_v40, %v3673_v1 }
 0x34c   : > { %5903 = vmatpush3.bf16.msra.mxu0 %v6388_v58  ;;  %v7501_v38 = vsel %vm1028_vm0, %v3673_v1, %v3675_v9  ;;  %v3821_v55 = vor.u32 %v3820_v0, %v3819_v61  ;;  %v3822_v35 = vrot.slane %v7399_v48, 2  ;;  %v3823_v42 = vrot.slane %v7396_v4, 3 }
 0x34d   : > { %5904 = vmatprep.subr.bf16.mxu0 %v6389_v8  ;;  %v7509_v53 = vsel %vm861_vm5, %v3515_v10, %v3524_v11  ;;  %v3826_v30 = vrot.slane %v7434_v44, 2  ;;  %v3827_v51 = vrot.slane %v7431_v20, 3  ;;  %v3830_v26 = vrot.slane %v7440_v45, 2 }
 0x34e   : > { %v3824_v5 = vor.u32 %v3823_v42, %v3822_v35  ;;  %v3831_v13 = vrot.slane %v7437_v14, 3  ;;  %v3834_v47 = vrot.slane %v7428_v31, 2  ;;  %v3835_v49 = vrot.slane %v7470_v2, 3  ;;  %v6395_v35 = vld [vmem:[%s7843_s7 + $0x80] sm:$0xff]   ;;  %v6396_v42 = vld [vmem:[%s7843_s7 + $0x88] sm:$0xff]  }
 0x34f   : > { %5897 = vmatmul.mubr.bf16.gmra.mrb[12].mxu0 %v3098_v52  ;;  %v3828_v50 = vor.u32 %v3827_v51, %v3826_v30  ;;  %v3980_v23 = vrot.slane %v7383_v19, 3  ;;  %v3981_v58 = vrot.slane %v7385_v24, 3  ;;  %v3983_v25 = vrot.slane %v7418_v32, 3  ;;  %v6391_v19 = vld [vmem:[%s7843_s7 + $0x20] sm:$0xff]   ;;  %v6398_v30 = vld [vmem:[%s7843_s7 + $0x98] sm:$0xff]  }
 0x350   : > { %5905 = vmatpush3.bf16.msra.mxu0 %v6389_v8  ;;  %5916 = vmatprep.mubr.msk.bf16.mxu0 %vm7081_vm11, %v5021_v62  ;;  %v7526_v18 = vsel %vm1180_vm2, %v3821_v55, %v3824_v5  ;;  %v3832_v57 = vor.u32 %v3831_v13, %v3830_v26  ;;  %v3836_v28 = vor.u32 %v3835_v49, %v3834_v47  ;;  %v3985_v52 = vrot.slane %v7420_v33, 3  ;;  %v6394_v55 = vld [vmem:[%s7843_s7 + $0x38] sm:$0xff]   ;;  %v6403_v51 = vld [vmem:[%s7843_s7 + $0xc0] sm:$0xff]   ;;  %v6404_v26 = vld [vmem:[%s7843_s7 + $0xc8] sm:$0xff]  }
 0x351   : > { %5906 = vmatprep.subr.bf16.mxu0 %v6390_v43  ;;  %v7533_v21 = vsel %vm1180_vm2, %v3824_v5, %v3828_v50  ;;  %v7536_v15 = vsel %vm1342_vm4, %v3980_v23, %v3981_v58  ;;  %v7539_v34 = vsel %vm1342_vm4, %v3981_v58, %v3983_v25  ;;  %v3987_v16 = vrot.slane %v7413_v12, 3  ;;  %v6405_v5 = vld [vmem:[%s7843_s7 + $0xd0] sm:$0xff]   ;;  %v6406_v13 = vld [vmem:[%s7843_s7 + $0xd8] sm:$0xff]   ;;  %v6411_v47 = vld [vmem:[%s7843_s7 + $0x100] sm:$0xff]  }
 0x352   : > { %v7543_v62 = vsel %vm1180_vm2, %v3828_v50, %v3832_v57  ;;  %v7546_v63 = vsel %vm1180_vm2, %v3832_v57, %v3836_v28  ;;  %v7549_v22 = vsel %vm1342_vm4, %v3983_v25, %v3985_v52  ;;  %v4131_v41 = vrot.slane %v7390_v56, 3  ;;  %v6392_v56 = vld [vmem:[%s7843_s7 + $0x28] sm:$0xff]   ;;  %v6413_v50 = vld [vmem:[%s7843_s7 + $0x110] sm:$0xff]   ;;  %v6414_v23 = vld [vmem:[%s7843_s7 + $0x118] sm:$0xff]  }
 0x353   : > { %v7553_v3 = vsel %vm1342_vm4, %v3985_v52, %v3987_v16  ;;  %v4132_v8 = vrot.slane %v7393_v59, 4  ;;  %v4134_v10 = vrot.slane %v7399_v48, 3  ;;  %v4135_v12 = vrot.slane %v7396_v4, 4  ;;  %v6412_v49 = vld [vmem:[%s7843_s7 + $0x108] sm:$0xff]   ;;  %v6419_v58 = vld [vmem:[%s7843_s7 + $0x140] sm:$0xff]   ;;  %v6421_v57 = vld [vmem:[%s7843_s7 + $0x150] sm:$0xff]  }
 0x354   : > { %5907 = vmatpush3.bf16.msra.mxu0 %v6390_v43  ;;  %v4138_v27 = vrot.slane %v7434_v44, 3  ;;  %v4139_v40 = vrot.slane %v7431_v20, 4  ;;  %v4142_v1 = vrot.slane %v7440_v45, 3  ;;  %v4143_v9 = vrot.slane %v7437_v14, 4  ;;  %v6397_v43 = vld [vmem:[%s7843_s7 + $0x90] sm:$0xff]   ;;  %v6420_v25 = vld [vmem:[%s7843_s7 + $0x148] sm:$0xff]  }
 0x355   : > { %5908 = vmatprep.subr.bf16.mxu0 %v6391_v19  ;;  %v4133_v61 = vor.u32 %v4132_v8, %v4131_v41  ;;  %v4136_v59 = vor.u32 %v4135_v12, %v4134_v10  ;;  %v4146_v48 = vrot.slane %v7428_v31, 3  ;;  %v4147_v4 = vrot.slane %v7470_v2, 4  ;;  %v6393_v31 = vld [vmem:[%s7843_s7 + $0x30] sm:$0xff]   ;;  %v6422_v28 = vld [vmem:[%s7843_s7 + $0x158] sm:$0xff]   ;;  %v6427_v52 = vld [vmem:[%s7843_s7 + $0x180] sm:$0xff]  }
 0x356   : > { %v4140_v0 = vor.u32 %v4139_v40, %v4138_v27  ;;  %v4144_v11 = vor.u32 %v4143_v9, %v4142_v1  ;;  %v6429_v16 = vld [vmem:[%s7843_s7 + $0x190] sm:$0xff]   ;;  %v6430_v41 = vld [vmem:[%s7843_s7 + $0x198] sm:$0xff]   ;;  %v6435_v8 = vld [vmem:[%s7843_s7 + $0x1c0] sm:$0xff]   ;;  %vm4538_vm0 = vcmask 1044484   ;;  %vm4540_vm1 = vcmask 1045509  }
 0x357   : > { %v7568_v44 = vsel %vm1494_vm6, %v4133_v61, %v4136_v59  ;;  %v4148_v20 = vor.u32 %v4147_v4, %v4146_v48  ;;  %v6436_v10 = vld [vmem:[%s7843_s7 + $0x1c8] sm:$0xff]   ;;  %v6437_v12 = vld [vmem:[%s7843_s7 + $0x1d0] sm:$0xff]   ;;  %v6438_v27 = vld [vmem:[%s7843_s7 + $0x1d8] sm:$0xff]   ;;  %vm4542_vm2 = vcmask 1046534   ;;  %vm4544_vm4 = vcmask 1047559  }
 0x358   : > { %5909 = vmatpush3.bf16.msra.mxu0 %v6391_v19  ;;  %v7571_v14 = vsel %vm1494_vm6, %v4136_v59, %v4140_v0  ;;  %v7574_v45 = vsel %vm1494_vm6, %v4140_v0, %v4144_v11  ;;  %v6428_v19 = vld [vmem:[%s7843_s7 + $0x188] sm:$0xff]   ;;  %v6442_v40 = vld [vmem:[%s7843_s7 + $0x1f8] sm:$0xff]   ;;  %v7759_v1 = vld [vmem:[%s7844_s8] ss:$0 sm:$0xff] }
 0x359   : > { %5910 = vmatprep.subr.bf16.mxu0 %v6392_v56  ;;  %v7580_v2 = vsel %vm1494_vm6, %v4144_v11, %v4148_v20 }
 0x35c   : > { %5911 = vmatpush3.bf16.msra.mxu0 %v6392_v56  ;;  %v7764_v56 = vld [vmem:[%s7845_s9] ss:$0 sm:$0xff] }
 0x35d   : > { %5912 = vmatprep.subr.bf16.mxu0 %v6393_v31 }
 0x360   : > { %5913 = vmatpush3.bf16.msra.mxu0 %v6393_v31 }
 0x361   : > { %5914 = vmatprep.subr.bf16.mxu0 %v6394_v55 }
 0x364   : > { %5915 = vmatpush3.bf16.msra.mxu0 %v6394_v55 }
 0x365   : > { %5924 = vmatprep.subr.bf16.mxu0 %v6395_v35 }
 0x367   : > { %5917 = vmatmul.mubr.bf16.vlgmr.msra.gmra.mrb[8].mxu0 %v7385_v24  ;;  %v6399_v24 = vld [vmem:[%s7843_s7 + $0xa0] sm:$0xff]  }
 0x368   : > { %5920 = vmatprep.mubr.bf16.mxu0 %v7418_v32  ;;  %5925 = vmatpush3.bf16.msra.mxu0 %v6395_v35  ;;  %v6400_v32 = vld [vmem:[%s7843_s7 + $0xa8] sm:$0xff]  }
 0x369   : > { %5926 = vmatprep.subr.bf16.mxu0 %v6396_v42 }
 0x36c   : > { %5927 = vmatpush3.bf16.msra.mxu0 %v6396_v42 }
 0x36d   : > { %5928 = vmatprep.subr.bf16.mxu0 %v6397_v43 }
 0x36f   : > { %5921 = vmatmul.mubr.bf16.gmra.mrb[12].mxu0 %v7420_v33  ;;  %v6401_v33 = vld [vmem:[%s7843_s7 + $0xb0] sm:$0xff]  }
 0x370   : > { %5929 = vmatpush3.bf16.msra.mxu0 %v6397_v43  ;;  %5940 = vmatprep.mubr.bf16.mxu0 %v7411_v39  ;;  %v6402_v39 = vld [vmem:[%s7843_s7 + $0xb8] sm:$0xff]  }
 0x371   : > { %5930 = vmatprep.subr.bf16.mxu0 %v6398_v30 }
 0x374   : > { %5931 = vmatpush3.bf16.msra.mxu0 %v6398_v30 }
 0x375   : > { %5932 = vmatprep.subr.bf16.mxu0 %v6399_v24 }
 0x378   : > { %5933 = vmatpush3.bf16.msra.mxu0 %v6399_v24 }
 0x379   : > { %5934 = vmatprep.subr.bf16.mxu0 %v6400_v32 }
 0x37c   : > { %5935 = vmatpush3.bf16.msra.mxu0 %v6400_v32 }
 0x37d   : > { %5936 = vmatprep.subr.bf16.mxu0 %v6401_v33 }
 0x380   : > { %5937 = vmatpush3.bf16.msra.mxu0 %v6401_v33 }
 0x381   : > { %5938 = vmatprep.subr.bf16.mxu0 %v6402_v39 }
 0x384   : > { %5939 = vmatpush3.bf16.msra.mxu0 %v6402_v39 }
 0x385   : > { %5948 = vmatprep.subr.bf16.mxu0 %v6403_v51 }
 0x387   : > { %5941 = vmatmul.mubr.bf16.vlgmr.msra.gmra.mrb[8].mxu0 %v7452_v46  ;;  %v6407_v46 = vld [vmem:[%s7843_s7 + $0xe0] sm:$0xff]  }
 0x388   : > { %5944 = vmatprep.mubr.bf16.mxu0 %v7455_v7  ;;  %5949 = vmatpush3.bf16.msra.mxu0 %v6403_v51  ;;  %v6408_v7 = vld [vmem:[%s7843_s7 + $0xe8] sm:$0xff]  }
 0x389   : > { %5950 = vmatprep.subr.bf16.mxu0 %v6404_v26 }
 0x38c   : > { %5951 = vmatpush3.bf16.msra.mxu0 %v6404_v26 }
 0x38d   : > { %5952 = vmatprep.subr.bf16.mxu0 %v6405_v5 }
 0x38f   : > { %5945 = vmatmul.mubr.bf16.gmra.mrb[12].mxu0 %v7458_v37  ;;  %v6409_v37 = vld [vmem:[%s7843_s7 + $0xf0] sm:$0xff]  }
 0x390   : > { %5953 = vmatpush3.bf16.msra.mxu0 %v6405_v5  ;;  %5964 = vmatprep.mubr.bf16.mxu0 %v7461_v6  ;;  %v6410_v6 = vld [vmem:[%s7843_s7 + $0xf8] sm:$0xff]  }
 0x391   : > { %5954 = vmatprep.subr.bf16.mxu0 %v6406_v13 }
 0x394   : > { %5955 = vmatpush3.bf16.msra.mxu0 %v6406_v13 }
 0x395   : > { %5956 = vmatprep.subr.bf16.mxu0 %v6407_v46 }
 0x398   : > { %5957 = vmatpush3.bf16.msra.mxu0 %v6407_v46 }
 0x399   : > { %5958 = vmatprep.subr.bf16.mxu0 %v6408_v7 }
 0x39c   : > { %5959 = vmatpush3.bf16.msra.mxu0 %v6408_v7 }
 0x39d   : > { %5960 = vmatprep.subr.bf16.mxu0 %v6409_v37 }
 0x3a0   : > { %5961 = vmatpush3.bf16.msra.mxu0 %v6409_v37 }
 0x3a1   : > { %5962 = vmatprep.subr.bf16.mxu0 %v6410_v6 }
 0x3a4   : > { %5963 = vmatpush3.bf16.msra.mxu0 %v6410_v6 }
 0x3a5   : > { %5972 = vmatprep.subr.bf16.mxu0 %v6411_v47 }
 0x3a7   : > { %5965 = vmatmul.mubr.bf16.vlgmr.msra.gmra.mrb[8].mxu0 %v7475_v54  ;;  %v6415_v54 = vld [vmem:[%s7843_s7 + $0x120] sm:$0xff]  }
 0x3a8   : > { %5968 = vmatprep.mubr.bf16.mxu0 %v7492_v60  ;;  %5973 = vmatpush3.bf16.msra.mxu0 %v6411_v47  ;;  %v6416_v60 = vld [vmem:[%s7843_s7 + $0x128] sm:$0xff]  }
 0x3a9   : > { %5974 = vmatprep.subr.bf16.mxu0 %v6412_v49 }
 0x3ac   : > { %5975 = vmatpush3.bf16.msra.mxu0 %v6412_v49 }
 0x3ad   : > { %5976 = vmatprep.subr.bf16.mxu0 %v6413_v50 }
 0x3af   : > { %5969 = vmatmul.mubr.bf16.gmra.mrb[12].mxu0 %v7509_v53  ;;  %v6417_v53 = vld [vmem:[%s7843_s7 + $0x130] sm:$0xff]  }
 0x3b0   : > { %5977 = vmatpush3.bf16.msra.mxu0 %v6413_v50  ;;  %5988 = vmatprep.mubr.bf16.mxu0 %v7486_v36  ;;  %v6418_v36 = vld [vmem:[%s7843_s7 + $0x138] sm:$0xff]  }
 0x3b1   : > { %5978 = vmatprep.subr.bf16.mxu0 %v6414_v23 }
 0x3b4   : > { %5979 = vmatpush3.bf16.msra.mxu0 %v6414_v23 }
 0x3b5   : > { %5980 = vmatprep.subr.bf16.mxu0 %v6415_v54 }
 0x3b8   : > { %5981 = vmatpush3.bf16.msra.mxu0 %v6415_v54 }
 0x3b9   : > { %5982 = vmatprep.subr.bf16.mxu0 %v6416_v60 }
 0x3bc   : > { %5983 = vmatpush3.bf16.msra.mxu0 %v6416_v60 }
 0x3bd   : > { %5984 = vmatprep.subr.bf16.mxu0 %v6417_v53 }
 0x3c0   : > { %5985 = vmatpush3.bf16.msra.mxu0 %v6417_v53 }
 0x3c1   : > { %5986 = vmatprep.subr.bf16.mxu0 %v6418_v36 }
 0x3c4   : > { %5987 = vmatpush3.bf16.msra.mxu0 %v6418_v36 }
 0x3c5   : > { %5996 = vmatprep.subr.bf16.mxu0 %v6419_v58 }
 0x3c7   : > { %5989 = vmatmul.mubr.bf16.vlgmr.msra.gmra.mrb[8].mxu0 %v7495_v29  ;;  %v6423_v29 = vld [vmem:[%s7843_s7 + $0x160] sm:$0xff]  }
 0x3c8   : > { %5992 = vmatprep.mubr.bf16.mxu0 %v7498_v17  ;;  %5997 = vmatpush3.bf16.msra.mxu0 %v6419_v58  ;;  %v6424_v17 = vld [vmem:[%s7843_s7 + $0x168] sm:$0xff]  }
 0x3c9   : > { %5998 = vmatprep.subr.bf16.mxu0 %v6420_v25 }
 0x3cc   : > { %5999 = vmatpush3.bf16.msra.mxu0 %v6420_v25 }
 0x3cd   : > { %6000 = vmatprep.subr.bf16.mxu0 %v6421_v57 }
 0x3cf   : > { %5993 = vmatmul.mubr.bf16.gmra.mrb[12].mxu0 %v7501_v38  ;;  %v6425_v38 = vld [vmem:[%s7843_s7 + $0x170] sm:$0xff]  }
 0x3d0   : > { %6001 = vmatpush3.bf16.msra.mxu0 %v6421_v57  ;;  %6012 = vmatprep.mubr.bf16.mxu0 %v7526_v18  ;;  %v6426_v18 = vld [vmem:[%s7843_s7 + $0x178] sm:$0xff]  }
 0x3d1   : > { %6002 = vmatprep.subr.bf16.mxu0 %v6422_v28 }
 0x3d4   : > { %6003 = vmatpush3.bf16.msra.mxu0 %v6422_v28 }
 0x3d5   : > { %6004 = vmatprep.subr.bf16.mxu0 %v6423_v29 }
 0x3d8   : > { %6005 = vmatpush3.bf16.msra.mxu0 %v6423_v29 }
 0x3d9   : > { %6006 = vmatprep.subr.bf16.mxu0 %v6424_v17 }
 0x3dc   : > { %6007 = vmatpush3.bf16.msra.mxu0 %v6424_v17 }
 0x3dd   : > { %6008 = vmatprep.subr.bf16.mxu0 %v6425_v38 }
 0x3e0   : > { %6009 = vmatpush3.bf16.msra.mxu0 %v6425_v38 }
 0x3e1   : > { %6010 = vmatprep.subr.bf16.mxu0 %v6426_v18 }
 0x3e4   : > { %6011 = vmatpush3.bf16.msra.mxu0 %v6426_v18 }
 0x3e5   : > { %6020 = vmatprep.subr.bf16.mxu0 %v6427_v52 }
 0x3e7   : > { %6013 = vmatmul.mubr.bf16.vlgmr.msra.gmra.mrb[8].mxu0 %v7533_v21  ;;  %v6431_v21 = vld [vmem:[%s7843_s7 + $0x1a0] sm:$0xff]  }
 0x3e8   : > { %6016 = vmatprep.mubr.bf16.mxu0 %v7543_v62  ;;  %6021 = vmatpush3.bf16.msra.mxu0 %v6427_v52  ;;  %v6432_v62 = vld [vmem:[%s7843_s7 + $0x1a8] sm:$0xff]  }
 0x3e9   : > { %6022 = vmatprep.subr.bf16.mxu0 %v6428_v19 }
 0x3ec   : > { %6023 = vmatpush3.bf16.msra.mxu0 %v6428_v19 }
 0x3ed   : > { %6024 = vmatprep.subr.bf16.mxu0 %v6429_v16 }
 0x3ef   : > { %6017 = vmatmul.mubr.bf16.gmra.mrb[12].mxu0 %v7546_v63  ;;  %v6433_v63 = vld [vmem:[%s7843_s7 + $0x1b0] sm:$0xff]  }
 0x3f0   : > { %6025 = vmatpush3.bf16.msra.mxu0 %v6429_v16  ;;  %6036 = vmatprep.mubr.bf16.mxu0 %v7536_v15  ;;  %v6434_v15 = vld [vmem:[%s7843_s7 + $0x1b8] sm:$0xff]  }
 0x3f1   : > { %6026 = vmatprep.subr.bf16.mxu0 %v6430_v41 }
 0x3f4   : > { %6027 = vmatpush3.bf16.msra.mxu0 %v6430_v41 }
 0x3f5   : > { %6028 = vmatprep.subr.bf16.mxu0 %v6431_v21 }
 0x3f8   : > { %6029 = vmatpush3.bf16.msra.mxu0 %v6431_v21 }
 0x3f9   : > { %6030 = vmatprep.subr.bf16.mxu0 %v6432_v62 }
 0x3fc   : > { %6031 = vmatpush3.bf16.msra.mxu0 %v6432_v62 }
 0x3fd   : > { %6032 = vmatprep.subr.bf16.mxu0 %v6433_v63 }
 0x400   : > { %6033 = vmatpush3.bf16.msra.mxu0 %v6433_v63 }
 0x401   : > { %6034 = vmatprep.subr.bf16.mxu0 %v6434_v15 }
 0x404   : > { %6035 = vmatpush3.bf16.msra.mxu0 %v6434_v15 }
 0x405   : > { %6044 = vmatprep.subr.bf16.mxu0 %v6435_v8 }
 0x407   : > { %6037 = vmatmul.mubr.bf16.vlgmr.msra.gmra.mrb[8].mxu0 %v7539_v34  ;;  %v6439_v34 = vld [vmem:[%s7843_s7 + $0x1e0] sm:$0xff]  }
 0x408   : > { %6040 = vmatprep.mubr.bf16.mxu0 %v7549_v22  ;;  %6045 = vmatpush3.bf16.msra.mxu0 %v6435_v8  ;;  %v6440_v22 = vld [vmem:[%s7843_s7 + $0x1e8] sm:$0xff]  }
 0x409   : > { %6046 = vmatprep.subr.bf16.mxu0 %v6436_v10 }
 0x40c   : > { %6047 = vmatpush3.bf16.msra.mxu0 %v6436_v10 }
 0x40d   : > { %6048 = vmatprep.subr.bf16.mxu0 %v6437_v12 }
 0x40f   : > { %6041 = vmatmul.mubr.bf16.gmra.mrb[12].mxu0 %v7553_v3  ;;  %v6441_v3 = vld [vmem:[%s7843_s7 + $0x1f0] sm:$0xff]  }
 0x410   : > { %6049 = vmatpush3.bf16.msra.mxu0 %v6437_v12  ;;  %6060 = vmatprep.mubr.bf16.mxu0 %v7568_v44 }
 0x411   : > { %6050 = vmatprep.subr.bf16.mxu0 %v6438_v27 }
 0x414   : > { %6051 = vmatpush3.bf16.msra.mxu0 %v6438_v27 }
 0x415   : > { %6052 = vmatprep.subr.bf16.mxu0 %v6439_v34 }
 0x418   : > { %6053 = vmatpush3.bf16.msra.mxu0 %v6439_v34 }
 0x419   : > { %6054 = vmatprep.subr.bf16.mxu0 %v6440_v22 }
 0x41c   : > { %6055 = vmatpush3.bf16.msra.mxu0 %v6440_v22 }
 0x41d   : > { %6056 = vmatprep.subr.bf16.mxu0 %v6441_v3 }
 0x420   : > { %6057 = vmatpush3.bf16.msra.mxu0 %v6441_v3 }
 0x421   : > { %6058 = vmatprep.subr.bf16.mxu0 %v6442_v40 }
 0x424   : > { %6059 = vmatpush3.bf16.msra.mxu0 %v6442_v40 }
 0x427   : > { %6061 = vmatmul.mubr.bf16.vlgmr.msra.gmra.mrb[8].mxu0 %v7571_v14 }
 0x428   : > { %6064 = vmatprep.mubr.bf16.mxu0 %v7574_v45 }
 0x42f   : > { %6065 = vmatmul.mubr.bf16.gmra.mrb[12].mxu0 %v7580_v2 }
 0x4fa   : > { %v6062_v9 = vpop.f32.mrb[8].mxu0 }
 0x4fb   : > { %v4284_v61 = vmul.f32 %v6062_v9, %v7759_v1  ;;  %v4236_v59 = vpop.f32.mrb[9].mxu0 }
 0x4fc   : > { %v4282_v48 = vmul.f32 %v7759_v1, %v4236_v59  ;;  %v6063_v4 = vpop.f32.mrb[10].mxu0 }
 0x4fd   : > { %v4299_v0 = vadd.f32 %v7764_v56, %v4284_v61  ;;  %v4285_v11 = vmul.f32 %v6063_v4, %v7759_v1  ;;  %v4239_v44 = vpop.f32.mrb[11].mxu0 }
 0x4fe   : > { %v4297_v20 = vadd.f32 %v7764_v56, %v4282_v48  ;;  %v4283_v14 = vmul.f32 %v7759_v1, %v4239_v44 }
 0x4ff   : > { %v4307_v45 = vmax.f32 %v4299_v0, 0.0  ;;  %v4300_v31 = vadd.f32 %v7764_v56, %v4285_v11 }
 0x500   : > { %v4305_v2 = vmax.f32 %v4297_v20, 0.0  ;;  %v4298_v55 = vadd.f32 %v7764_v56, %v4283_v14 }
 0x501   : > { %v4325_v35 = vcombine.high %v4307_v45, %v4307_v45  ;;  %v4368_v42 = vsel %vm4339_vm12, %v4307_v45, -inf  ;;  %v4308_v43 = vmax.f32 %v4300_v31, 0.0 }
 0x502   : > { %v4369_v30 = vrot.slane %v4368_v42, 4  ;;  %v4323_v24 = vcombine.high %v4305_v2, %v4305_v2  ;;  %v4340_v32 = vsel %vm4339_vm12, %v4305_v2, -inf  ;;  %v4306_v33 = vmax.f32 %v4298_v55, 0.0  ;;  %v7776_v39 = vpop.f32.mrb[12].mxu0 }
 0x503   : > { %v4375_v51 = vsel %vm4339_vm12, %v4325_v35, -inf  ;;  %v4341_v26 = vrot.slane %v4340_v32, 4  ;;  %v4326_v5 = vcombine.high %v4308_v43, %v4308_v43  ;;  %v4382_v13 = vsel %vm4339_vm12, %v4308_v43, -inf  ;;  %v7780_v46 = vpop.f32.mrb[13].mxu0 }
 0x504   : > { %v4370_v7 = vmax.f32 %v4368_v42, %v4369_v30  ;;  %v4376_v37 = vrot.slane %v4375_v51, 4  ;;  %v4347_v6 = vsel %vm4339_vm12, %v4323_v24, -inf  ;;  %v4383_v47 = vrot.slane %v4382_v13, 4  ;;  %v7783_v49 = vpop.f32.mrb[14].mxu0 }
 0x505   : > { %v4342_v50 = vmax.f32 %v4340_v32, %v4341_v26  ;;  %v4348_v23 = vrot.slane %v4347_v6, 4  ;;  %v4389_v54 = vsel %vm4339_vm12, %v4326_v5, -inf  ;;  %v4324_v60 = vcombine.high %v4306_v33, %v4306_v33  ;;  %v7786_v53 = vpop.f32.mrb[15].mxu0 }
 0x506   : > { %v4371_v36 = vrot.slane %v4370_v7, 2  ;;  %v4377_v58 = vmax.f32 %v4375_v51, %v4376_v37  ;;  %v4384_v25 = vmax.f32 %v4382_v13, %v4383_v47  ;;  %v4390_v57 = vrot.slane %v4389_v54, 4 }
 0x507   : > { %v4343_v28 = vrot.slane %v4342_v50, 2  ;;  %v4349_v29 = vmax.f32 %v4347_v6, %v4348_v23  ;;  %v4354_v17 = vsel %vm4339_vm12, %v4306_v33, -inf  ;;  %v4361_v38 = vsel %vm4339_vm12, %v4324_v60, -inf }
 0x508   : > { %v4372_v18 = vmax.f32 %v4370_v7, %v4371_v36  ;;  %v4378_v52 = vrot.slane %v4377_v58, 2  ;;  %v4385_v19 = vrot.slane %v4384_v25, 2  ;;  %v4391_v16 = vmax.f32 %v4389_v54, %v4390_v57 }
 0x509   : > { %v4344_v41 = vmax.f32 %v4342_v50, %v4343_v28  ;;  %v4350_v21 = vrot.slane %v4349_v29, 2  ;;  %v4355_v62 = vrot.slane %v4354_v17, 4  ;;  %v4362_v63 = vrot.slane %v4361_v38, 4 }
 0x50a   : > { %v4373_v15 = vrot.slane %v4372_v18, 1  ;;  %v4379_v8 = vmax.f32 %v4377_v58, %v4378_v52  ;;  %v4386_v10 = vmax.f32 %v4384_v25, %v4385_v19  ;;  %v4392_v12 = vrot.slane %v4391_v16, 2 }
 0x50b   : > { %v4345_v27 = vrot.slane %v4344_v41, 1  ;;  %v4351_v34 = vmax.f32 %v4349_v29, %v4350_v21  ;;  %v4356_v22 = vmax.f32 %v4354_v17, %v4355_v62  ;;  %v4363_v3 = vmax.f32 %v4361_v38, %v4362_v63 }
 0x50c   : > { %v4374_v40 = vmax.f32 %v4372_v18, %v4373_v15  ;;  %v4380_v9 = vrot.slane %v4379_v8, 1  ;;  %v4387_v61 = vrot.slane %v4386_v10, 1  ;;  %v4393_v59 = vmax.f32 %v4391_v16, %v4392_v12 }
 0x50d   : > { %v4346_v48 = vmax.f32 %v4344_v41, %v4345_v27  ;;  %v4352_v4 = vrot.slane %v4351_v34, 1  ;;  %v4357_v0 = vrot.slane %v4356_v22, 2  ;;  %v4364_v11 = vrot.slane %v4363_v3, 2 }
 0x50e   : > { %v4381_v44 = vmax.f32 %v4379_v8, %v4380_v9  ;;  %v5192_v20 = vpack.c.bf16 %v4374_v40, %v4374_v40  ;;  %v4388_v14 = vmax.f32 %v4386_v10, %v4387_v61  ;;  %v4394_v45 = vrot.slane %v4393_v59, 1 }
 0x50f   : > { %v4353_v31 = vmax.f32 %v4351_v34, %v4352_v4  ;;  %v4358_v2 = vmax.f32 %v4356_v22, %v4357_v0  ;;  %v4365_v55 = vmax.f32 %v4363_v3, %v4364_v11  ;;  %v5188_v35 = vpack.c.bf16 %v4346_v48, %v4346_v48 }
 0x510   : > { %v4395_v42 = vmax.f32 %v4393_v59, %v4394_v45  ;;  %v5193_v43 = vpack.c.bf16 %v4381_v44, %v4381_v44  ;;  %v4520_v33 = vunpack.c.l.b16 %v5192_v20  ;;  %v5194_v51 = vpack.c.bf16 %v4388_v14, %v4388_v14 }
 0x511   : > { %v5189_v30 = vpack.c.bf16 %v4353_v31, %v4353_v31  ;;  %v4359_v24 = vrot.slane %v4358_v2, 1  ;;  %v4366_v32 = vrot.slane %v4365_v55, 1  ;;  %v4288_v5 = vmul.f32 %v7776_v39, %v7759_v1 }
 0x512   : > { %v5195_v26 = vpack.c.bf16 %v4395_v42, %v4395_v42  ;;  %v4286_v6 = vmul.f32 %v7759_v1, %v7780_v46  ;;  %v4516_v47 = vunpack.c.l.b16 %v5188_v35  ;;  %v4289_v23 = vmul.f32 %v7783_v49, %v7759_v1 }
 0x513   : > { %v4517_v13 = vunpack.c.l.b16 %v5189_v30  ;;  %v4360_v7 = vmax.f32 %v4358_v2, %v4359_v24  ;;  %v4367_v37 = vmax.f32 %v4365_v55, %v4366_v32  ;;  %v4303_v50 = vadd.f32 %v7764_v56, %v4288_v5 }
 0x514   : > { %v4287_v54 = vmul.f32 %v7759_v1, %v7786_v53  ;;  %v4521_v60 = vunpack.c.l.b16 %v5193_v43  ;;  %v4301_v39 = vadd.f32 %v7764_v56, %v4286_v6  ;;  %v4522_v57 = vunpack.c.l.b16 %v5194_v51 }
 0x515   : > { %v5190_v36 = vpack.c.bf16 %v4360_v7, %v4360_v7  ;;  %v5191_v58 = vpack.c.bf16 %v4367_v37, %v4367_v37  ;;  %v4533_v25 = vsel %vm4532_vm13, %v4517_v13, %v4516_v47  ;;  %v4311_v28 = vmax.f32 %v4303_v50, 0.0 }
 0x516   : > { %v4304_v46 = vadd.f32 %v7764_v56, %v4289_v23  ;;  %v4523_v29 = vunpack.c.l.b16 %v5195_v26  ;;  %v4309_v18 = vmax.f32 %v4301_v39, 0.0  ;;  %v4302_v53 = vadd.f32 %v7764_v56, %v4287_v54 }
 0x517   : > { %v4518_v17 = vunpack.c.l.b16 %v5190_v36  ;;  %v4519_v38 = vunpack.c.l.b16 %v5191_v58  ;;  %v4329_v49 = vcombine.high %v4311_v28, %v4311_v28  ;;  %v4424_v52 = vsel %vm4339_vm12, %v4311_v28, -inf }
 0x518   : > { %v4312_v1 = vmax.f32 %v4304_v46, 0.0  ;;  %v4425_v16 = vrot.slane %v4424_v52, 4  ;;  %v4327_v41 = vcombine.high %v4309_v18, %v4309_v18  ;;  %v4396_v21 = vsel %vm4339_vm12, %v4309_v18, -inf }
 0x519   : > { %v4535_v19 = vsel %vm4534_vm14, %v4518_v17, %v4533_v25  ;;  %v4431_v63 = vsel %vm4339_vm12, %v4329_v49, -inf  ;;  %v4397_v15 = vrot.slane %v4396_v21, 4  ;;  %v4310_v48 = vmax.f32 %v4302_v53, 0.0 }
 0x51a   : > { %v4537_v62 = vsel %vm4536_vm15, %v4519_v38, %v4535_v19  ;;  %v4314_v8 = vsel %vm709_vm3, %v4312_v1, 0.0  ;;  %v4426_v12 = vmax.f32 %v4424_v52, %v4425_v16  ;;  %v4432_v27 = vrot.slane %v4431_v63, 4 }
 0x51b   : > { %v4539_v10 = vsel %vm4538_vm0, %v4520_v33, %v4537_v62  ;;  %v4403_v56 = vsel %vm4339_vm12, %v4327_v41, -inf  ;;  %v4398_v22 = vmax.f32 %v4396_v21, %v4397_v15  ;;  %v4330_v40 = vcombine.high %v4314_v8, %v4314_v8 }
 0x51c   : > { %v4541_v34 = vsel %vm4540_vm1, %v4521_v60, %v4539_v10  ;;  %v4404_v3 = vrot.slane %v4403_v56, 4  ;;  %v4433_v61 = vmax.f32 %v4431_v63, %v4432_v27  ;;  %v4438_v59 = vsel %vm4339_vm12, %v4314_v8, -inf }
 0x51d   : > { %v4543_v9 = vsel %vm4542_vm2, %v4522_v57, %v4541_v34  ;;  %v4399_v0 = vrot.slane %v4398_v22, 2  ;;  %v4439_v44 = vrot.slane %v4438_v59, 4  ;;  %v4427_v14 = vrot.slane %v4426_v12, 2 }
 0x51e   : > { %v4545_v4 = vsel %vm4544_vm4, %v4523_v29, %v4543_v9  ;;  %v4405_v11 = vmax.f32 %v4403_v56, %v4404_v3  ;;  %v4445_v45 = vsel %vm4339_vm12, %v4330_v40, -inf  ;;  %v4434_v42 = vrot.slane %v4433_v61, 2 }
 0x51f   : > { %v4553_v20 = vpack.c.b16 %v4545_v4, %v4545_v4  ;;  %v4400_v31 = vmax.f32 %v4398_v22, %v4399_v0  ;;  %v4440_v55 = vmax.f32 %v4438_v59, %v4439_v44  ;;  %v4446_v35 = vrot.slane %v4445_v45, 4 }
 0x520   : > { %v4406_v2 = vrot.slane %v4405_v11, 2  ;;  %v4328_v43 = vcombine.high %v4310_v48, %v4310_v48  ;;  %v4410_v30 = vsel %vm4339_vm12, %v4310_v48, -inf  ;;  %v4428_v13 = vmax.f32 %v4426_v12, %v4427_v14 }
 0x521   : > { %4557 = vst [vmem:[%s7818_s14] sm:$0xf] %v4553_v20  ;;  %v4401_v24 = vrot.slane %v4400_v31, 1  ;;  %v4441_v33 = vrot.slane %v4440_v55, 2  ;;  %v4447_v51 = vmax.f32 %v4445_v45, %v4446_v35  ;;  %v4411_v26 = vrot.slane %v4410_v30, 4 }
 0x522   : > { %v4407_v32 = vmax.f32 %v4405_v11, %v4406_v2  ;;  %v4417_v5 = vsel %vm4339_vm12, %v4328_v43, -inf  ;;  %v4435_v6 = vmax.f32 %v4433_v61, %v4434_v42  ;;  %v4429_v25 = vrot.slane %v4428_v13, 1 }
 0x523   : > { %v4448_v37 = vrot.slane %v4447_v51, 2  ;;  %v4412_v47 = vmax.f32 %v4410_v30, %v4411_v26  ;;  %v4418_v50 = vrot.slane %v4417_v5, 4  ;;  %v4402_v23 = vmax.f32 %v4400_v31, %v4401_v24 }
 0x524   : > { %v4408_v7 = vrot.slane %v4407_v32, 1  ;;  %v4442_v60 = vmax.f32 %v4440_v55, %v4441_v33  ;;  %v4436_v28 = vrot.slane %v4435_v6, 1  ;;  %v4430_v1 = vmax.f32 %v4428_v13, %v4429_v25 }
 0x525   : > { %v4449_v36 = vmax.f32 %v4447_v51, %v4448_v37  ;;  %v4413_v58 = vrot.slane %v4412_v47, 2  ;;  %v4419_v39 = vmax.f32 %v4417_v5, %v4418_v50  ;;  %v5196_v17 = vpack.c.bf16 %v4402_v23, %v4402_v23 }
 0x526   : > { %v4409_v54 = vmax.f32 %v4407_v32, %v4408_v7  ;;  %v4443_v38 = vrot.slane %v4442_v60, 1  ;;  %v4437_v19 = vmax.f32 %v4435_v6, %v4436_v28  ;;  %v5200_v10 = vpack.c.bf16 %v4430_v1, %v4430_v1 }
 0x527   : > { %v4414_v46 = vmax.f32 %v4412_v47, %v4413_v58  ;;  %v4420_v29 = vrot.slane %v4419_v39, 2  ;;  %v4450_v18 = vrot.slane %v4449_v36, 1  ;;  %v4524_v21 = vunpack.c.l.b16 %v5196_v17 }
 0x528   : > { %v5197_v57 = vpack.c.bf16 %v4409_v54, %v4409_v54  ;;  %v4444_v62 = vmax.f32 %v4442_v60, %v4443_v38  ;;  %v5201_v27 = vpack.c.bf16 %v4437_v19, %v4437_v19  ;;  %v4528_v61 = vunpack.c.l.b16 %v5200_v10 }
 0x529   : > { %v4415_v49 = vrot.slane %v4414_v46, 1  ;;  %v4421_v52 = vmax.f32 %v4419_v39, %v4420_v29  ;;  %v4451_v63 = vmax.f32 %v4449_v36, %v4450_v18 }
 0x52a   : > { %v4525_v53 = vunpack.c.l.b16 %v5197_v57  ;;  %v5202_v22 = vpack.c.bf16 %v4444_v62, %v4444_v62  ;;  %v4529_v59 = vunpack.c.l.b16 %v5201_v27 }
 0x52b   : > { %v4416_v16 = vmax.f32 %v4414_v46, %v4415_v49  ;;  %v4422_v41 = vrot.slane %v4421_v52, 1  ;;  %v5203_v3 = vpack.c.bf16 %v4451_v63, %v4451_v63 }
 0x52c   : > { %v4546_v12 = vsel %vm4532_vm13, %v4525_v53, %v4524_v21  ;;  %v4530_v4 = vunpack.c.l.b16 %v5202_v22 }
 0x52d   : > { %v4423_v15 = vmax.f32 %v4421_v52, %v4422_v41  ;;  %v5198_v8 = vpack.c.bf16 %v4416_v16, %v4416_v16  ;;  %v4531_v11 = vunpack.c.l.b16 %v5203_v3 }
 0x52f   : > { %v5199_v56 = vpack.c.bf16 %v4423_v15, %v4423_v15  ;;  %v4526_v34 = vunpack.c.l.b16 %v5198_v8 }
 0x531   : > { %v4527_v40 = vunpack.c.l.b16 %v5199_v56  ;;  %v4547_v9 = vsel %vm4534_vm14, %v4526_v34, %v4546_v12 }
 0x533   : > { %v4548_v48 = vsel %vm4536_vm15, %v4527_v40, %v4547_v9 }
 0x534   : > { %v4549_v0 = vsel %vm4538_vm0, %v4528_v61, %v4548_v48 }
 0x535   : > { %v4550_v44 = vsel %vm4540_vm1, %v4529_v59, %v4549_v0 }
 0x536   : > { %v4551_v20 = vsel %vm4542_vm2, %v4530_v4, %v4550_v44 }
 0x537   : > { %v4552_v14 = vsel %vm4544_vm4, %v4531_v11, %v4551_v20 }
 0x538   : > { %v4554_v45 = vpack.c.b16 %v4552_v14, %v4552_v14 }
 0x53a   : > { %4558 = vst [vmem:[%s7818_s14 + $0x4] sm:$0xf] %v4554_v45 }
 0x53b PF: > { %s20_s13 = sadd.s32 1, %s6449_s13  }
 0x53c   : > { %p17_p4 = scmp.ge.s32.totalorder %s20_s13, 8  }
 0x53e   :  { %19 = sbr.rel (!%p17_p4) target bundleno = 1 (0x1), region = 111 }

// kernel: net_forward.8
= control target key start
LH: loop header
LB: loop body
LE: loop exit
PB: predicated region body
PF: predicated region fallthrough
CT: control target
= control target key end

     0   :  { %s685_s9 = smov 0   ;;  %s804_s0 = inlined_call_operand.vmem [shape: f32[3,2,512], index: 0, kind: input, shape index: {}]   ;;  %s805_s1 = inlined_call_operand.vmem [shape: bf16[128,512], index: 1, kind: input, shape index: {}]   ;;  %s806_s2 = inlined_call_operand.vmem [shape: f32[3,2,128], index: 2, kind: output, shape index: {}]  }
   0x1 LB: > { %s537_s10 = sadd.s32 4294967295, %s665_s9   ;;  %p541_p0 = scmp.ge.s32.totalorder %s665_s9, 1  ;;  %s665_s9 = sphi %s685_s9, %s12_s9  }
   0x2   : > { %p112_p1 = scmp.lt.s32.totalorder %s665_s9, 4 }
   0x4   : > { %p113_p2 = pnand %p541_p0, %p112_p1 }
   0x5   : > { %p133_p3 = scmp.lt.s32.totalorder (!%p113_p2), %s537_s10, 2  ;;  %p545_p4 = scmp.ne.s32.totalorder (!%p113_p2), %s537_s10, 0 }
   0x6   : > { %116 = sbr.rel (%p113_p2) target bundleno = 322 (0x142), region = 28 }
   0xd   : > { %s134_s11 = scalar_select %p133_p3, %s537_s10, 2 }
   0xe   : > { %146 = sbr.rel (%p545_p4) target bundleno = 21 (0x15), region = 32  ;;  %v667_v0 = vmov (!%p545_p4), 0.0  }
   0xf   : > { %s583_s12 = sshll.u32 %s134_s11, 3  ;;  %s544_s13 = sshll.u32 %s134_s11, 1  ;;  %147 = vst [vmem:[#allocation2] sm:$0x3] (!%p545_p4), %v667_v0  ;;  %148 = vst [vmem:[#allocation3] sm:$0x3] (!%p545_p4), %v667_v0 }
  0x10   : > { %s696_s16 = scalar_lea.vmem %s804_s0, %s583_s12  ;;  %s701_s19 = scalar_lea.vmem %s806_s2, %s544_s13 }
  0x15 PF: > { %v595_v1 = vld [vmem:[%s805_s1 + $0x4] ss:$16 sps:$4 sm:$0xff]   ;;  %v597_v2 = vld [vmem:[%s805_s1 + $0xc] ss:$16 sps:$4 sm:$0xff]   ;;  %v668_v3 = vmov 0   ;;  %v435_v38 = vlaneseq }
  0x16   : > { %376 = vmatprep.mubr.bf16.mxu0 %v668_v3  ;;  %417 = vmatprep.mubr.bf16.mxu1 %v668_v3  ;;  %v599_v4 = vld [vmem:[%s805_s1] ss:$16 sps:$4 sm:$0xff]   ;;  %v600_v5 = vld [vmem:[%s805_s1 + $0x8] ss:$16 sps:$4 sm:$0xff]   ;;  %v601_v6 = vld [vmem:[%s805_s1 + $0x24] ss:$16 sps:$4 sm:$0xff]  }
  0x17   : > { %344 = vmatprep.subr.bf16.mxu0 %v595_v1  ;;  %385 = vmatprep.subr.bf16.mxu1 %v597_v2  ;;  %v603_v7 = vld [vmem:[%s805_s1 + $0x2c] ss:$16 sps:$4 sm:$0xff]   ;;  %v605_v8 = vld [vmem:[%s805_s1 + $0x20] ss:$16 sps:$4 sm:$0xff]   ;;  %v606_v9 = vld [vmem:[%s805_s1 + $0x28] ss:$16 sps:$4 sm:$0xff]  }
  0x18   : > { %345 = vmatpush1.bf16.msra.mxu0 %v599_v4  ;;  %386 = vmatpush1.bf16.msra.mxu1 %v600_v5  ;;  %v607_v10 = vld [vmem:[%s805_s1 + $0x44] ss:$16 sps:$4 sm:$0xff]   ;;  %v609_v11 = vld [vmem:[%s805_s1 + $0x4c] ss:$16 sps:$4 sm:$0xff]   ;;  %v611_v12 = vld [vmem:[%s805_s1 + $0x40] ss:$16 sps:$4 sm:$0xff]  }
  0x19   : > { %346 = vmatprep.subr.bf16.mxu0 %v601_v6  ;;  %387 = vmatprep.subr.bf16.mxu1 %v603_v7  ;;  %v612_v13 = vld [vmem:[%s805_s1 + $0x48] ss:$16 sps:$4 sm:$0xff]   ;;  %v613_v14 = vld [vmem:[%s805_s1 + $0x64] ss:$16 sps:$4 sm:$0xff]   ;;  %v615_v15 = vld [vmem:[%s805_s1 + $0x6c] ss:$16 sps:$4 sm:$0xff]  }
  0x1a   : > { %v617_v16 = vld [vmem:[%s805_s1 + $0x60] ss:$16 sps:$4 sm:$0xff]   ;;  %v618_v17 = vld [vmem:[%s805_s1 + $0x68] ss:$16 sps:$4 sm:$0xff]   ;;  %v619_v18 = vld [vmem:[%s805_s1 + $0x84] ss:$16 sps:$4 sm:$0xff]  }
  0x1b   : > { %v621_v19 = vld [vmem:[%s805_s1 + $0x8c] ss:$16 sps:$4 sm:$0xff]   ;;  %v623_v20 = vld [vmem:[%s805_s1 + $0x80] ss:$16 sps:$4 sm:$0xff]   ;;  %v624_v21 = vld [vmem:[%s805_s1 + $0x88] ss:$16 sps:$4 sm:$0xff]  }
  0x1c   : > { %347 = vmatpush1.bf16.msra.mxu0 %v605_v8  ;;  %388 = vmatpush1.bf16.msra.mxu1 %v606_v9  ;;  %v625_v22 = vld [vmem:[%s805_s1 + $0xa4] ss:$16 sps:$4 sm:$0xff]   ;;  %v627_v23 = vld [vmem:[%s805_s1 + $0xac] ss:$16 sps:$4 sm:$0xff]   ;;  %v629_v24 = vld [vmem:[%s805_s1 + $0xa0] ss:$16 sps:$4 sm:$0xff]  }
  0x1d   : > { %348 = vmatprep.subr.bf16.mxu0 %v607_v10  ;;  %389 = vmatprep.subr.bf16.mxu1 %v609_v11  ;;  %v630_v25 = vld [vmem:[%s805_s1 + $0xa8] ss:$16 sps:$4 sm:$0xff]   ;;  %v631_v26 = vld [vmem:[%s805_s1 + $0xc4] ss:$16 sps:$4 sm:$0xff]   ;;  %v633_v27 = vld [vmem:[%s805_s1 + $0xcc] ss:$16 sps:$4 sm:$0xff]  }
  0x1e   : > { %v635_v28 = vld [vmem:[%s805_s1 + $0xc0] ss:$16 sps:$4 sm:$0xff]   ;;  %v636_v29 = vld [vmem:[%s805_s1 + $0xc8] ss:$16 sps:$4 sm:$0xff]   ;;  %v637_v30 = vld [vmem:[%s805_s1 + $0xe4] ss:$16 sps:$4 sm:$0xff]  }
  0x1f   : > { %v639_v31 = vld [vmem:[%s805_s1 + $0xec] ss:$16 sps:$4 sm:$0xff]   ;;  %v641_v32 = vld [vmem:[%s805_s1 + $0xe0] ss:$16 sps:$4 sm:$0xff]   ;;  %v642_v33 = vld [vmem:[%s805_s1 + $0xe8] ss:$16 sps:$4 sm:$0xff]  }
  0x20   : > { %349 = vmatpush1.bf16.msra.mxu0 %v611_v12  ;;  %390 = vmatpush1.bf16.msra.mxu1 %v612_v13  ;;  %v150_v34 = vld [vmem:[#allocation2] sm:$0x3]  ;;  %v669_v36 = vmov 1983009808   ;;  %v436_v40 = vshrl.u32 %v435_v38, 7 }
  0x21   : > { %350 = vmatprep.subr.bf16.mxu0 %v613_v14  ;;  %391 = vmatprep.subr.bf16.mxu1 %v615_v15  ;;  %v151_v35 = vpack.c.bf16 %v150_v34, %v150_v34  ;;  %v433_v37 = vunpack.c.l.s4 %v669_v36  ;;  %v149_v54 = vld [vmem:[%s696_s16] sm:$0xff] }
  0x22   : > { %v475_v5 = vld [vmem:[#allocation3] sm:$0x3] }
  0x23   : > { %v434_v39 = vunpack.c.0.s8 %v433_v37 }
  0x24   : > { %351 = vmatpush1.bf16.msra.mxu0 %v617_v16  ;;  %392 = vmatpush1.bf16.msra.mxu1 %v618_v17 }
  0x25   : > { %352 = vmatprep.subr.bf16.mxu0 %v619_v18  ;;  %393 = vmatprep.subr.bf16.mxu1 %v621_v19  ;;  %v437_v43 = vsub.s32 %v434_v39, %v436_v40 }
  0x28   : > { %353 = vmatpush1.bf16.msra.mxu0 %v623_v20  ;;  %394 = vmatpush1.bf16.msra.mxu1 %v624_v21 }
  0x29   : > { %354 = vmatprep.subr.bf16.mxu0 %v625_v22  ;;  %395 = vmatprep.subr.bf16.mxu1 %v627_v23 }
  0x2c   : > { %355 = vmatpush1.bf16.msra.mxu0 %v629_v24  ;;  %396 = vmatpush1.bf16.msra.mxu1 %v630_v25 }
  0x2d   : > { %356 = vmatprep.subr.bf16.mxu0 %v631_v26  ;;  %397 = vmatprep.subr.bf16.mxu1 %v633_v27 }
  0x30   : > { %357 = vmatpush1.bf16.msra.mxu0 %v635_v28  ;;  %398 = vmatpush1.bf16.msra.mxu1 %v636_v29 }
  0x31   : > { %358 = vmatprep.subr.bf16.mxu0 %v637_v30  ;;  %399 = vmatprep.subr.bf16.mxu1 %v639_v31 }
  0x34   : > { %359 = vmatpush1.bf16.msra.mxu0 %v641_v32  ;;  %400 = vmatpush1.bf16.msra.mxu1 %v642_v33 }
  0x37   : > { %377 = vmatmul.mubr.bf16.vlgmr.msra.gmra.mrb[0].mxu0 %v151_v35  ;;  %418 = vmatmul.mubr.bf16.vlgmr.msra.gmra.mrb[0].mxu1 %v151_v35 }
 0x10a   : > { %v378_v41 = vpop.f32.mrb[0].mxu0  ;;  %v419_v42 = vpop.f32.mrb[0].mxu1 }
 0x10b   : > { %v380_v44 = vpop.f32.mrb[1].mxu0  ;;  %v421_v45 = vpop.f32.mrb[1].mxu1 }
 0x10c   : > { %v430_v46 = vcombine.low %v378_v41, %v380_v44  ;;  %v431_v47 = vcombine.low %v419_v42, %v421_v45  ;;  %v382_v48 = vpop.f32.mrb[2].mxu0  ;;  %v423_v49 = vpop.f32.mrb[2].mxu1 }
 0x10d   : > { %v383_v50 = vpop.f32.mrb[3].mxu0  ;;  %v424_v51 = vpop.f32.mrb[3].mxu1 }
 0x10e   : > { %v438_v52 = vrot.slane %v430_v46, %v437_v43  ;;  %v445_v53 = vrot.slane %v431_v47, %v437_v43 }
 0x110   : > { %v446_v55 = vcombine.low %v438_v52, %v445_v53 }
 0x112   : > { %v448_v56 = vadd.f32 %v446_v55, %v149_v54 }
 0x114   : > { %v578_v57 = vmul.f32 -1.442695, %v448_v56  ;;  %v456_v58 = vrot.slane %v448_v56, 2  ;;  %v467_v60 = vrot.slane %v448_v56, 6  ;;  %v464_v63 = vrot.slane %v448_v56, 4 }
 0x116   : > { %643 = vpow2.f32 %v578_v57  ;;  %v579_v59 = vmul.f32 -1.442695, %v456_v58  ;;  %v580_v61 = vmul.f32 -1.442695, %v467_v60 }
 0x118   : > { %645 = vpow2.f32 %v579_v59 }
 0x119   : > { %647 = vpow2.f32 %v580_v61 }
 0x120   : > { %v644_v62 = vpop.eup %643 }
 0x121   : > { %v452_v0 = vadd.f32 1.0, %v644_v62 }
 0x122   : > { %v646_v1 = vpop.eup %645 }
 0x123   : > { %649 = vrcp.f32 %v452_v0  ;;  %v461_v2 = vadd.f32 1.0, %v646_v1  ;;  %v648_v3 = vpop.eup %647 }
 0x124   : > { %651 = vtanh.f32 %v464_v63  ;;  %v472_v8 = vadd.f32 1.0, %v648_v3 }
 0x125   : > { %653 = vrcp.f32 %v461_v2 }
 0x126   : > { %655 = vrcp.f32 %v472_v8 }
 0x12d   : > { %v650_v4 = vpop.eup %649 }
 0x12e   : > { %v652_v6 = vpop.eup %651 }
 0x12f   : > { %v654_v7 = vpop.eup %653  ;;  %v477_v10 = vmul.f32 %v652_v6, %v650_v4 }
 0x130   : > { %v476_v9 = vmul.f32 %v654_v7, %v475_v5  ;;  %v656_v12 = vpop.eup %655 }
 0x132   : > { %v478_v11 = vadd.f32 %v477_v10, %v476_v9 }
 0x134   : > { %657 = vtanh.f32 %v478_v11  ;;  %481 = vst [vmem:[#allocation3] sm:$0x3] %v478_v11 }
 0x13e   : > { %v658_v13 = vpop.eup %657 }
 0x13f   : > { %v480_v14 = vmul.f32 %v658_v13, %v656_v12 }
 0x141   : > { %482 = vst [vmem:[#allocation2] sm:$0x3] %v480_v14  ;;  %483 = vst [vmem:[%s701_s19] sm:$0x3] %v480_v14 }
 0x142 PF: > { %s12_s9 = sadd.s32 1, %s665_s9  }
 0x143   : > { %p9_p5 = scmp.ge.s32.totalorder %s12_s9, 5  }
 0x145   :  { %11 = sbr.rel (!%p9_p5) target bundleno = 1 (0x1), region = 62 }

// kernel: net_forward.9
= control target key start
LH: loop header
LB: loop body
LE: loop exit
PB: predicated region body
PF: predicated region fallthrough
CT: control target
= control target key end

     0   :  { %v180_v0 = vmov 0.0   ;;  %vm181_vm0 = vmmov 0   ;;  %s235_s1 = inlined_call_operand.vmem [shape: bf16[128,128], index: 1, kind: input, shape index: {}]   ;;  %s236_s0 = inlined_call_operand.vmem [shape: bf16[8,128], index: 0, kind: input, shape index: {}]   ;;  %s237_s2 = inlined_call_operand.vmem [shape: f32[1,128], index: 2, kind: input, shape index: {}]   ;;  %s238_s3 = inlined_call_operand.vmem [shape: f32[8,128], index: 3, kind: output, shape index: {}]  }
   0x1   :  { %150 = vmatprep.subr.bf16.mxu0 %v180_v0  ;;  %v172_v1 = vld [vmem:[%s235_s1] sm:$0xff]   ;;  %166 = vmatprep.mubr.msk.bf16.mxu0 %vm181_vm0, %v180_v0  ;;  %v173_v2 = vld [vmem:[%s235_s1 + $0x8] sm:$0xff]   ;;  %v174_v3 = vld [vmem:[%s235_s1 + $0x10] sm:$0xff]  }
   0x2   :  { %151 = vmatpush3.bf16.msra.mxu0 %v172_v1  ;;  %v175_v4 = vld [vmem:[%s235_s1 + $0x18] sm:$0xff]   ;;  %v176_v5 = vld [vmem:[%s235_s1 + $0x20] sm:$0xff]   ;;  %v177_v6 = vld [vmem:[%s235_s1 + $0x28] sm:$0xff]  }
   0x3   :  { %152 = vmatprep.subr.bf16.mxu0 %v180_v0  ;;  %v178_v7 = vld [vmem:[%s235_s1 + $0x30] sm:$0xff]   ;;  %v179_v8 = vld [vmem:[%s235_s1 + $0x38] sm:$0xff]   ;;  %v15_v9 = vld [vmem:[%s236_s0] sm:$0xf] }
   0x4   :  { %v132_v10 = vld [vmem:[%s237_s2] ss:$0 sm:$0xff] }
   0x6   :  { %153 = vmatpush3.bf16.msra.mxu0 %v173_v2 }
   0x7   :  { %154 = vmatprep.subr.bf16.mxu0 %v180_v0 }
   0xa   :  { %155 = vmatpush3.bf16.msra.mxu0 %v174_v3 }
   0xb   :  { %156 = vmatprep.subr.bf16.mxu0 %v180_v0 }
   0xe   :  { %157 = vmatpush3.bf16.msra.mxu0 %v175_v4 }
   0xf   :  { %158 = vmatprep.subr.bf16.mxu0 %v180_v0 }
  0x12   :  { %159 = vmatpush3.bf16.msra.mxu0 %v176_v5 }
  0x13   :  { %160 = vmatprep.subr.bf16.mxu0 %v180_v0 }
  0x16   :  { %161 = vmatpush3.bf16.msra.mxu0 %v177_v6 }
  0x17   :  { %162 = vmatprep.subr.bf16.mxu0 %v180_v0 }
  0x1a   :  { %163 = vmatpush3.bf16.msra.mxu0 %v178_v7 }
  0x1b   :  { %164 = vmatprep.subr.bf16.mxu0 %v180_v0 }
  0x1e   :  { %165 = vmatpush3.bf16.msra.mxu0 %v179_v8 }
  0x21   :  { %167 = vmatmul.mubr.bf16.vlgmr.msra.gmra.mrb[0].mxu0 %v15_v9 }
  0xf4   :  { %v121_v11 = vpop.f32.mrb[0].mxu0 }
  0xf5   :  { %v122_v12 = vadd.f32 %v132_v10, %v121_v11  ;;  %v168_v13 = vpop.f32.mrb[1].mxu0 }
  0xf6   :  { %v124_v14 = vpop.f32.mrb[2].mxu0 }
  0xf7   :  { %127 = vst [vmem:[%s238_s3] sm:$0xff] %v122_v12  ;;  %v169_v15 = vpop.f32.mrb[3].mxu0 }

// kernel: net_forward.7
= control target key start
LH: loop header
LB: loop body
LE: loop exit
PB: predicated region body
PF: predicated region fallthrough
CT: control target
= control target key end

     0   :  { %s6845_s1 = inlined_call_operand.vmem [shape: bf16[2048,512], index: 1, kind: input, shape index: {}]   ;;  %s6846_s0 = inlined_call_operand.vmem [shape: bf16[8,2048], index: 0, kind: input, shape index: {}]   ;;  %s6847_s2 = inlined_call_operand.vmem [shape: f32[1,512], index: 2, kind: input, shape index: {}]   ;;  %s6848_s3 = inlined_call_operand.vmem [shape: f32[8,512], index: 3, kind: output, shape index: {}]  }
   0x1   :  { %v4424_v0 = vld [vmem:[%s6845_s1 + $0x4] ss:$16 sps:$4 sm:$0xff]   ;;  %v4426_v1 = vld [vmem:[%s6845_s1 + $0xc] ss:$16 sps:$4 sm:$0xff]   ;;  %v4428_v2 = vld [vmem:[%s6845_s1] ss:$16 sps:$4 sm:$0xff]  }
   0x2   :  { %3172 = vmatprep.subr.bf16.mxu0 %v4424_v0  ;;  %v4429_v3 = vld [vmem:[%s6845_s1 + $0x8] ss:$16 sps:$4 sm:$0xff]   ;;  %3500 = vmatprep.subr.bf16.mxu1 %v4426_v1  ;;  %v4430_v4 = vld [vmem:[%s6845_s1 + $0x24] ss:$16 sps:$4 sm:$0xff]   ;;  %v4432_v5 = vld [vmem:[%s6845_s1 + $0x2c] ss:$16 sps:$4 sm:$0xff]  }
   0x3   :  { %3173 = vmatpush1.bf16.msra.mxu0 %v4428_v2  ;;  %3501 = vmatpush1.bf16.msra.mxu1 %v4429_v3  ;;  %v4434_v6 = vld [vmem:[%s6845_s1 + $0x20] ss:$16 sps:$4 sm:$0xff]   ;;  %v4435_v7 = vld [vmem:[%s6845_s1 + $0x28] ss:$16 sps:$4 sm:$0xff]   ;;  %v4436_v8 = vld [vmem:[%s6845_s1 + $0x44] ss:$16 sps:$4 sm:$0xff]  }
   0x4   :  { %3174 = vmatprep.subr.bf16.mxu0 %v4430_v4  ;;  %3502 = vmatprep.subr.bf16.mxu1 %v4432_v5  ;;  %v4438_v9 = vld [vmem:[%s6845_s1 + $0x4c] ss:$16 sps:$4 sm:$0xff]   ;;  %v4440_v10 = vld [vmem:[%s6845_s1 + $0x40] ss:$16 sps:$4 sm:$0xff]   ;;  %v4441_v11 = vld [vmem:[%s6845_s1 + $0x48] ss:$16 sps:$4 sm:$0xff]  }
   0x5   :  { %v4442_v12 = vld [vmem:[%s6845_s1 + $0x64] ss:$16 sps:$4 sm:$0xff]   ;;  %v4444_v13 = vld [vmem:[%s6845_s1 + $0x6c] ss:$16 sps:$4 sm:$0xff]   ;;  %v4446_v14 = vld [vmem:[%s6845_s1 + $0x60] ss:$16 sps:$4 sm:$0xff]  }
   0x6   :  { %v4447_v15 = vld [vmem:[%s6845_s1 + $0x68] ss:$16 sps:$4 sm:$0xff]   ;;  %v4448_v16 = vld [vmem:[%s6845_s1 + $0x84] ss:$16 sps:$4 sm:$0xff]   ;;  %v4450_v17 = vld [vmem:[%s6845_s1 + $0x8c] ss:$16 sps:$4 sm:$0xff]  }
   0x7   :  { %3175 = vmatpush1.bf16.msra.mxu0 %v4434_v6  ;;  %3503 = vmatpush1.bf16.msra.mxu1 %v4435_v7  ;;  %v4452_v18 = vld [vmem:[%s6845_s1 + $0x80] ss:$16 sps:$4 sm:$0xff]   ;;  %v4453_v19 = vld [vmem:[%s6845_s1 + $0x88] ss:$16 sps:$4 sm:$0xff]   ;;  %v4454_v20 = vld [vmem:[%s6845_s1 + $0xa4] ss:$16 sps:$4 sm:$0xff]  }
   0x8   :  { %3176 = vmatprep.subr.bf16.mxu0 %v4436_v8  ;;  %3504 = vmatprep.subr.bf16.mxu1 %v4438_v9  ;;  %v4456_v21 = vld [vmem:[%s6845_s1 + $0xac] ss:$16 sps:$4 sm:$0xff]   ;;  %v4458_v22 = vld [vmem:[%s6845_s1 + $0xa0] ss:$16 sps:$4 sm:$0xff]   ;;  %v4459_v23 = vld [vmem:[%s6845_s1 + $0xa8] ss:$16 sps:$4 sm:$0xff]  }
   0x9   :  { %v4460_v24 = vld [vmem:[%s6845_s1 + $0xc4] ss:$16 sps:$4 sm:$0xff]   ;;  %v4462_v25 = vld [vmem:[%s6845_s1 + $0xcc] ss:$16 sps:$4 sm:$0xff]   ;;  %v4464_v26 = vld [vmem:[%s6845_s1 + $0xc0] ss:$16 sps:$4 sm:$0xff]  }
   0xa   :  { %v4465_v27 = vld [vmem:[%s6845_s1 + $0xc8] ss:$16 sps:$4 sm:$0xff]   ;;  %v4466_v28 = vld [vmem:[%s6845_s1 + $0xe4] ss:$16 sps:$4 sm:$0xff]   ;;  %v4468_v29 = vld [vmem:[%s6845_s1 + $0xec] ss:$16 sps:$4 sm:$0xff]  }
   0xb   :  { %3177 = vmatpush1.bf16.msra.mxu0 %v4440_v10  ;;  %3505 = vmatpush1.bf16.msra.mxu1 %v4441_v11  ;;  %v4470_v30 = vld [vmem:[%s6845_s1 + $0xe0] ss:$16 sps:$4 sm:$0xff]   ;;  %v4471_v31 = vld [vmem:[%s6845_s1 + $0xe8] ss:$16 sps:$4 sm:$0xff]   ;;  %v4472_v32 = vld [vmem:[%s6845_s1 + $0x104] ss:$16 sps:$4 sm:$0xff]  }
   0xc   :  { %3178 = vmatprep.subr.bf16.mxu0 %v4442_v12  ;;  %3506 = vmatprep.subr.bf16.mxu1 %v4444_v13  ;;  %v4474_v33 = vld [vmem:[%s6845_s1 + $0x10c] ss:$16 sps:$4 sm:$0xff]   ;;  %v4476_v34 = vld [vmem:[%s6845_s1 + $0x100] ss:$16 sps:$4 sm:$0xff]   ;;  %v4477_v35 = vld [vmem:[%s6845_s1 + $0x108] ss:$16 sps:$4 sm:$0xff]  }
   0xd   :  { %v4478_v36 = vld [vmem:[%s6845_s1 + $0x124] ss:$16 sps:$4 sm:$0xff]   ;;  %v4480_v37 = vld [vmem:[%s6845_s1 + $0x12c] ss:$16 sps:$4 sm:$0xff]   ;;  %v4482_v38 = vld [vmem:[%s6845_s1 + $0x120] ss:$16 sps:$4 sm:$0xff]  }
   0xe   :  { %v4483_v39 = vld [vmem:[%s6845_s1 + $0x128] ss:$16 sps:$4 sm:$0xff]   ;;  %v4484_v40 = vld [vmem:[%s6845_s1 + $0x144] ss:$16 sps:$4 sm:$0xff]   ;;  %v4486_v41 = vld [vmem:[%s6845_s1 + $0x14c] ss:$16 sps:$4 sm:$0xff]  }
   0xf   :  { %3179 = vmatpush1.bf16.msra.mxu0 %v4446_v14  ;;  %3507 = vmatpush1.bf16.msra.mxu1 %v4447_v15  ;;  %v4488_v42 = vld [vmem:[%s6845_s1 + $0x140] ss:$16 sps:$4 sm:$0xff]   ;;  %v4489_v43 = vld [vmem:[%s6845_s1 + $0x148] ss:$16 sps:$4 sm:$0xff]   ;;  %v4490_v44 = vld [vmem:[%s6845_s1 + $0x164] ss:$16 sps:$4 sm:$0xff]  }
  0x10   :  { %3180 = vmatprep.subr.bf16.mxu0 %v4448_v16  ;;  %3508 = vmatprep.subr.bf16.mxu1 %v4450_v17  ;;  %v4492_v45 = vld [vmem:[%s6845_s1 + $0x16c] ss:$16 sps:$4 sm:$0xff]   ;;  %v14_v46 = vld [vmem:[%s6846_s0] sm:$0xff]  ;;  %v4495_v49 = vld [vmem:[%s6845_s1 + $0x168] ss:$16 sps:$4 sm:$0xff]  }
  0x11   :  { %v4494_v47 = vld [vmem:[%s6845_s1 + $0x160] ss:$16 sps:$4 sm:$0xff]   ;;  %v3837_v48 = vcombine.high %v14_v46, %v14_v46  ;;  %v4496_v50 = vld [vmem:[%s6845_s1 + $0x184] ss:$16 sps:$4 sm:$0xff]   ;;  %v4498_v51 = vld [vmem:[%s6845_s1 + $0x18c] ss:$16 sps:$4 sm:$0xff]   ;;  %v3836_v4 = vcombine.low %v14_v46, %v14_v46 }
  0x12   :  { %v4500_v52 = vld [vmem:[%s6845_s1 + $0x180] ss:$16 sps:$4 sm:$0xff]   ;;  %v4501_v53 = vld [vmem:[%s6845_s1 + $0x188] ss:$16 sps:$4 sm:$0xff]   ;;  %v4502_v54 = vld [vmem:[%s6845_s1 + $0x1a4] ss:$16 sps:$4 sm:$0xff]  }
  0x13   :  { %3181 = vmatpush1.bf16.msra.mxu0 %v4452_v18  ;;  %3509 = vmatpush1.bf16.msra.mxu1 %v4453_v19  ;;  %v4504_v55 = vld [vmem:[%s6845_s1 + $0x1ac] ss:$16 sps:$4 sm:$0xff]   ;;  %v4506_v56 = vld [vmem:[%s6845_s1 + $0x1a0] ss:$16 sps:$4 sm:$0xff]   ;;  %v4507_v57 = vld [vmem:[%s6845_s1 + $0x1a8] ss:$16 sps:$4 sm:$0xff]  }
  0x14   :  { %3182 = vmatprep.subr.bf16.mxu0 %v4454_v20  ;;  %3510 = vmatprep.subr.bf16.mxu1 %v4456_v21  ;;  %v4508_v58 = vld [vmem:[%s6845_s1 + $0x1c4] ss:$16 sps:$4 sm:$0xff]   ;;  %v4510_v59 = vld [vmem:[%s6845_s1 + $0x1cc] ss:$16 sps:$4 sm:$0xff]   ;;  %v4512_v60 = vld [vmem:[%s6845_s1 + $0x1c0] ss:$16 sps:$4 sm:$0xff]  }
  0x15   :  { %3204 = vmatprep.mubr.bf16.mxu0 %v3837_v48  ;;  %3532 = vmatprep.mubr.bf16.mxu1 %v3837_v48  ;;  %v4513_v61 = vld [vmem:[%s6845_s1 + $0x1c8] ss:$16 sps:$4 sm:$0xff]   ;;  %v4514_v62 = vld [vmem:[%s6845_s1 + $0x1e4] ss:$16 sps:$4 sm:$0xff]   ;;  %v4516_v63 = vld [vmem:[%s6845_s1 + $0x1ec] ss:$16 sps:$4 sm:$0xff]  }
  0x16   :  { %v4518_v0 = vld [vmem:[%s6845_s1 + $0x1e0] ss:$16 sps:$4 sm:$0xff]   ;;  %v4519_v1 = vld [vmem:[%s6845_s1 + $0x1e8] ss:$16 sps:$4 sm:$0xff]   ;;  %v4524_v2 = vld [vmem:[%s6845_s1 + $0x204] ss:$16 sps:$4 sm:$0xff]  }
  0x17   :  { %3183 = vmatpush1.bf16.msra.mxu0 %v4458_v22  ;;  %3511 = vmatpush1.bf16.msra.mxu1 %v4459_v23  ;;  %v4527_v3 = vld [vmem:[%s6845_s1 + $0x20c] ss:$16 sps:$4 sm:$0xff]   ;;  %v4522_v5 = vld [vmem:[%s6845_s1 + $0x200] ss:$16 sps:$4 sm:$0xff]   ;;  %v4525_v6 = vld [vmem:[%s6845_s1 + $0x208] ss:$16 sps:$4 sm:$0xff]  }
  0x18   :  { %3184 = vmatprep.subr.bf16.mxu0 %v4460_v24  ;;  %3512 = vmatprep.subr.bf16.mxu1 %v4462_v25  ;;  %v4530_v7 = vld [vmem:[%s6845_s1 + $0x224] ss:$16 sps:$4 sm:$0xff]   ;;  %v4533_v8 = vld [vmem:[%s6845_s1 + $0x22c] ss:$16 sps:$4 sm:$0xff]   ;;  %v4528_v9 = vld [vmem:[%s6845_s1 + $0x220] ss:$16 sps:$4 sm:$0xff]  }
  0x19   :  { %v4531_v10 = vld [vmem:[%s6845_s1 + $0x228] ss:$16 sps:$4 sm:$0xff]   ;;  %v4536_v11 = vld [vmem:[%s6845_s1 + $0x244] ss:$16 sps:$4 sm:$0xff]   ;;  %v4539_v12 = vld [vmem:[%s6845_s1 + $0x24c] ss:$16 sps:$4 sm:$0xff]  }
  0x1a   :  { %v4534_v13 = vld [vmem:[%s6845_s1 + $0x240] ss:$16 sps:$4 sm:$0xff]   ;;  %v4537_v14 = vld [vmem:[%s6845_s1 + $0x248] ss:$16 sps:$4 sm:$0xff]   ;;  %v4542_v15 = vld [vmem:[%s6845_s1 + $0x264] ss:$16 sps:$4 sm:$0xff]  }
  0x1b   :  { %3185 = vmatpush1.bf16.msra.mxu0 %v4464_v26  ;;  %3513 = vmatpush1.bf16.msra.mxu1 %v4465_v27  ;;  %v4545_v16 = vld [vmem:[%s6845_s1 + $0x26c] ss:$16 sps:$4 sm:$0xff]   ;;  %v4540_v17 = vld [vmem:[%s6845_s1 + $0x260] ss:$16 sps:$4 sm:$0xff]   ;;  %v4543_v18 = vld [vmem:[%s6845_s1 + $0x268] ss:$16 sps:$4 sm:$0xff]  }
  0x1c   :  { %3186 = vmatprep.subr.bf16.mxu0 %v4466_v28  ;;  %3514 = vmatprep.subr.bf16.mxu1 %v4468_v29  ;;  %v4548_v19 = vld [vmem:[%s6845_s1 + $0x284] ss:$16 sps:$4 sm:$0xff]   ;;  %v4551_v20 = vld [vmem:[%s6845_s1 + $0x28c] ss:$16 sps:$4 sm:$0xff]   ;;  %v4546_v21 = vld [vmem:[%s6845_s1 + $0x280] ss:$16 sps:$4 sm:$0xff]  }
  0x1d   :  { %v4549_v22 = vld [vmem:[%s6845_s1 + $0x288] ss:$16 sps:$4 sm:$0xff]   ;;  %v4554_v23 = vld [vmem:[%s6845_s1 + $0x2a4] ss:$16 sps:$4 sm:$0xff]   ;;  %v4557_v24 = vld [vmem:[%s6845_s1 + $0x2ac] ss:$16 sps:$4 sm:$0xff]  }
  0x1e   :  { %v4552_v25 = vld [vmem:[%s6845_s1 + $0x2a0] ss:$16 sps:$4 sm:$0xff]   ;;  %v4555_v26 = vld [vmem:[%s6845_s1 + $0x2a8] ss:$16 sps:$4 sm:$0xff]   ;;  %v4560_v27 = vld [vmem:[%s6845_s1 + $0x2c4] ss:$16 sps:$4 sm:$0xff]  }
  0x1f   :  { %3187 = vmatpush1.bf16.msra.mxu0 %v4470_v30  ;;  %3515 = vmatpush1.bf16.msra.mxu1 %v4471_v31  ;;  %v4563_v28 = vld [vmem:[%s6845_s1 + $0x2cc] ss:$16 sps:$4 sm:$0xff]   ;;  %v4558_v31 = vld [vmem:[%s6845_s1 + $0x2c0] ss:$16 sps:$4 sm:$0xff]   ;;  %v4585_v48 = vld [vmem:[%s6845_s1 + $0x348] ss:$16 sps:$4 sm:$0xff]  }
  0x20   :  { %3188 = vmatprep.subr.bf16.mxu0 %v4472_v32  ;;  %3516 = vmatprep.subr.bf16.mxu1 %v4474_v33  ;;  %v5504_v29 = vld [vmem:[%s6846_s0 + $0x8] sm:$0xff]  ;;  %v4566_v33 = vld [vmem:[%s6845_s1 + $0x2e4] ss:$16 sps:$4 sm:$0xff]  }
  0x21   :  { %v3839_v30 = vcombine.high %v5504_v29, %v5504_v29  ;;  %v4561_v32 = vld [vmem:[%s6845_s1 + $0x2c8] ss:$16 sps:$4 sm:$0xff]   ;;  %v4587_v46 = vld [vmem:[%s6845_s1 + $0x34c] ss:$16 sps:$4 sm:$0xff]  }
  0x23   :  { %3189 = vmatpush1.bf16.msra.mxu0 %v4476_v34  ;;  %3517 = vmatpush1.bf16.msra.mxu1 %v4477_v35  ;;  %v4569_v34 = vld [vmem:[%s6845_s1 + $0x2ec] ss:$16 sps:$4 sm:$0xff]   ;;  %v4564_v35 = vld [vmem:[%s6845_s1 + $0x2e0] ss:$16 sps:$4 sm:$0xff]  }
  0x24   :  { %3190 = vmatprep.subr.bf16.mxu0 %v4478_v36  ;;  %3518 = vmatprep.subr.bf16.mxu1 %v4480_v37  ;;  %v4567_v36 = vld [vmem:[%s6845_s1 + $0x2e8] ss:$16 sps:$4 sm:$0xff]   ;;  %v4572_v37 = vld [vmem:[%s6845_s1 + $0x304] ss:$16 sps:$4 sm:$0xff]  }
  0x27   :  { %3191 = vmatpush1.bf16.msra.mxu0 %v4482_v38  ;;  %3519 = vmatpush1.bf16.msra.mxu1 %v4483_v39  ;;  %v4575_v38 = vld [vmem:[%s6845_s1 + $0x30c] ss:$16 sps:$4 sm:$0xff]   ;;  %v4570_v39 = vld [vmem:[%s6845_s1 + $0x300] ss:$16 sps:$4 sm:$0xff]  }
  0x28   :  { %3192 = vmatprep.subr.bf16.mxu0 %v4484_v40  ;;  %3520 = vmatprep.subr.bf16.mxu1 %v4486_v41  ;;  %v4573_v40 = vld [vmem:[%s6845_s1 + $0x308] ss:$16 sps:$4 sm:$0xff]   ;;  %v4578_v41 = vld [vmem:[%s6845_s1 + $0x324] ss:$16 sps:$4 sm:$0xff]  }
  0x2b   :  { %3193 = vmatpush1.bf16.msra.mxu0 %v4488_v42  ;;  %3521 = vmatpush1.bf16.msra.mxu1 %v4489_v43  ;;  %v4581_v42 = vld [vmem:[%s6845_s1 + $0x32c] ss:$16 sps:$4 sm:$0xff]   ;;  %v4576_v43 = vld [vmem:[%s6845_s1 + $0x320] ss:$16 sps:$4 sm:$0xff]  }
  0x2c   :  { %3194 = vmatprep.subr.bf16.mxu0 %v4490_v44  ;;  %3522 = vmatprep.subr.bf16.mxu1 %v4492_v45  ;;  %v4579_v44 = vld [vmem:[%s6845_s1 + $0x328] ss:$16 sps:$4 sm:$0xff]   ;;  %v4584_v45 = vld [vmem:[%s6845_s1 + $0x344] ss:$16 sps:$4 sm:$0xff]  }
  0x2f   :  { %3195 = vmatpush1.bf16.msra.mxu0 %v4494_v47  ;;  %3523 = vmatpush1.bf16.msra.mxu1 %v4495_v49  ;;  %v4582_v47 = vld [vmem:[%s6845_s1 + $0x340] ss:$16 sps:$4 sm:$0xff]   ;;  %v4590_v49 = vld [vmem:[%s6845_s1 + $0x364] ss:$16 sps:$4 sm:$0xff]  }
  0x30   :  { %3196 = vmatprep.subr.bf16.mxu0 %v4496_v50  ;;  %3524 = vmatprep.subr.bf16.mxu1 %v4498_v51  ;;  %v4593_v50 = vld [vmem:[%s6845_s1 + $0x36c] ss:$16 sps:$4 sm:$0xff]   ;;  %v4588_v51 = vld [vmem:[%s6845_s1 + $0x360] ss:$16 sps:$4 sm:$0xff]  }
  0x33   :  { %3197 = vmatpush1.bf16.msra.mxu0 %v4500_v52  ;;  %3525 = vmatpush1.bf16.msra.mxu1 %v4501_v53  ;;  %v4591_v52 = vld [vmem:[%s6845_s1 + $0x368] ss:$16 sps:$4 sm:$0xff]   ;;  %v4596_v53 = vld [vmem:[%s6845_s1 + $0x384] ss:$16 sps:$4 sm:$0xff]  }
  0x34   :  { %3198 = vmatprep.subr.bf16.mxu0 %v4502_v54  ;;  %3526 = vmatprep.subr.bf16.mxu1 %v4504_v55  ;;  %v4599_v54 = vld [vmem:[%s6845_s1 + $0x38c] ss:$16 sps:$4 sm:$0xff]   ;;  %v4594_v55 = vld [vmem:[%s6845_s1 + $0x380] ss:$16 sps:$4 sm:$0xff]  }
  0x37   :  { %3199 = vmatpush1.bf16.msra.mxu0 %v4506_v56  ;;  %3527 = vmatpush1.bf16.msra.mxu1 %v4507_v57  ;;  %v4597_v56 = vld [vmem:[%s6845_s1 + $0x388] ss:$16 sps:$4 sm:$0xff]   ;;  %v4602_v57 = vld [vmem:[%s6845_s1 + $0x3a4] ss:$16 sps:$4 sm:$0xff]  }
  0x38   :  { %3200 = vmatprep.subr.bf16.mxu0 %v4508_v58  ;;  %3528 = vmatprep.subr.bf16.mxu1 %v4510_v59  ;;  %v4605_v58 = vld [vmem:[%s6845_s1 + $0x3ac] ss:$16 sps:$4 sm:$0xff]   ;;  %v4600_v59 = vld [vmem:[%s6845_s1 + $0x3a0] ss:$16 sps:$4 sm:$0xff]  }
  0x3b   :  { %3201 = vmatpush1.bf16.msra.mxu0 %v4512_v60  ;;  %3529 = vmatpush1.bf16.msra.mxu1 %v4513_v61  ;;  %v4603_v60 = vld [vmem:[%s6845_s1 + $0x3a8] ss:$16 sps:$4 sm:$0xff]   ;;  %v4608_v61 = vld [vmem:[%s6845_s1 + $0x3c4] ss:$16 sps:$4 sm:$0xff]  }
  0x3c   :  { %3202 = vmatprep.subr.bf16.mxu0 %v4514_v62  ;;  %3530 = vmatprep.subr.bf16.mxu1 %v4516_v63  ;;  %v4611_v62 = vld [vmem:[%s6845_s1 + $0x3cc] ss:$16 sps:$4 sm:$0xff]   ;;  %v4606_v63 = vld [vmem:[%s6845_s1 + $0x3c0] ss:$16 sps:$4 sm:$0xff]  }
  0x3f   :  { %3203 = vmatpush1.bf16.msra.mxu0 %v4518_v0  ;;  %3531 = vmatpush1.bf16.msra.mxu1 %v4519_v1  ;;  %v4609_v0 = vld [vmem:[%s6845_s1 + $0x3c8] ss:$16 sps:$4 sm:$0xff]   ;;  %v4614_v1 = vld [vmem:[%s6845_s1 + $0x3e4] ss:$16 sps:$4 sm:$0xff]  }
  0x40   :  { %3213 = vmatprep.subr.bf16.mxu0 %v4524_v2  ;;  %3541 = vmatprep.subr.bf16.mxu1 %v4527_v3  ;;  %v4617_v2 = vld [vmem:[%s6845_s1 + $0x3ec] ss:$16 sps:$4 sm:$0xff]   ;;  %v4612_v3 = vld [vmem:[%s6845_s1 + $0x3e0] ss:$16 sps:$4 sm:$0xff]  }
  0x42   :  { %3205 = vmatmul.mubr.bf16.vlgmr.msra.gmra.mrb[0].mxu0 %v3836_v4  ;;  %3533 = vmatmul.mubr.bf16.vlgmr.msra.gmra.mrb[0].mxu1 %v3836_v4  ;;  %v4615_v4 = vld [vmem:[%s6845_s1 + $0x3e8] ss:$16 sps:$4 sm:$0xff]  }
  0x43   :  { %3214 = vmatpush1.bf16.msra.mxu0 %v4522_v5  ;;  %3542 = vmatpush1.bf16.msra.mxu1 %v4525_v6  ;;  %v4622_v5 = vld [vmem:[%s6845_s1 + $0x404] ss:$16 sps:$4 sm:$0xff]   ;;  %v4625_v6 = vld [vmem:[%s6845_s1 + $0x40c] ss:$16 sps:$4 sm:$0xff]  }
  0x44   :  { %3215 = vmatprep.subr.bf16.mxu0 %v4530_v7  ;;  %3543 = vmatprep.subr.bf16.mxu1 %v4533_v8  ;;  %v3838_v7 = vcombine.low %v5504_v29, %v5504_v29  ;;  %v4620_v8 = vld [vmem:[%s6845_s1 + $0x400] ss:$16 sps:$4 sm:$0xff]   ;;  %v4655_v29 = vld [vmem:[%s6845_s1 + $0x4ac] ss:$16 sps:$4 sm:$0xff]  }
  0x45   :  { %3245 = vmatprep.mubr.bf16.mxu0 %v3839_v30  ;;  %3573 = vmatprep.mubr.bf16.mxu1 %v3839_v30  ;;  %v4650_v30 = vld [vmem:[%s6845_s1 + $0x4a0] ss:$16 sps:$4 sm:$0xff]  }
  0x47   :  { %3216 = vmatpush1.bf16.msra.mxu0 %v4528_v9  ;;  %3544 = vmatpush1.bf16.msra.mxu1 %v4531_v10  ;;  %v4623_v9 = vld [vmem:[%s6845_s1 + $0x408] ss:$16 sps:$4 sm:$0xff]   ;;  %v4628_v10 = vld [vmem:[%s6845_s1 + $0x424] ss:$16 sps:$4 sm:$0xff]  }
  0x48   :  { %3217 = vmatprep.subr.bf16.mxu0 %v4536_v11  ;;  %3545 = vmatprep.subr.bf16.mxu1 %v4539_v12  ;;  %v5642_v11 = vld [vmem:[%s6846_s0 + $0x10] sm:$0xff]  ;;  %v4631_v12 = vld [vmem:[%s6845_s1 + $0x42c] ss:$16 sps:$4 sm:$0xff]  }
  0x4b   :  { %3218 = vmatpush1.bf16.msra.mxu0 %v4534_v13  ;;  %3546 = vmatpush1.bf16.msra.mxu1 %v4537_v14  ;;  %v3841_v13 = vcombine.high %v5642_v11, %v5642_v11  ;;  %v4626_v14 = vld [vmem:[%s6845_s1 + $0x420] ss:$16 sps:$4 sm:$0xff]  }
  0x4c   :  { %3219 = vmatprep.subr.bf16.mxu0 %v4542_v15  ;;  %3547 = vmatprep.subr.bf16.mxu1 %v4545_v16  ;;  %v4629_v15 = vld [vmem:[%s6845_s1 + $0x428] ss:$16 sps:$4 sm:$0xff]   ;;  %v4634_v16 = vld [vmem:[%s6845_s1 + $0x444] ss:$16 sps:$4 sm:$0xff]  }
  0x4f   :  { %3220 = vmatpush1.bf16.msra.mxu0 %v4540_v17  ;;  %3548 = vmatpush1.bf16.msra.mxu1 %v4543_v18  ;;  %v4637_v17 = vld [vmem:[%s6845_s1 + $0x44c] ss:$16 sps:$4 sm:$0xff]   ;;  %v4632_v18 = vld [vmem:[%s6845_s1 + $0x440] ss:$16 sps:$4 sm:$0xff]  }
  0x50   :  { %3221 = vmatprep.subr.bf16.mxu0 %v4548_v19  ;;  %3549 = vmatprep.subr.bf16.mxu1 %v4551_v20  ;;  %v4635_v19 = vld [vmem:[%s6845_s1 + $0x448] ss:$16 sps:$4 sm:$0xff]   ;;  %v4640_v20 = vld [vmem:[%s6845_s1 + $0x464] ss:$16 sps:$4 sm:$0xff]  }
  0x53   :  { %3222 = vmatpush1.bf16.msra.mxu0 %v4546_v21  ;;  %3550 = vmatpush1.bf16.msra.mxu1 %v4549_v22  ;;  %v4643_v21 = vld [vmem:[%s6845_s1 + $0x46c] ss:$16 sps:$4 sm:$0xff]   ;;  %v4638_v22 = vld [vmem:[%s6845_s1 + $0x460] ss:$16 sps:$4 sm:$0xff]  }
  0x54   :  { %3223 = vmatprep.subr.bf16.mxu0 %v4554_v23  ;;  %3551 = vmatprep.subr.bf16.mxu1 %v4557_v24  ;;  %v4641_v23 = vld [vmem:[%s6845_s1 + $0x468] ss:$16 sps:$4 sm:$0xff]   ;;  %v4646_v24 = vld [vmem:[%s6845_s1 + $0x484] ss:$16 sps:$4 sm:$0xff]  }
  0x57   :  { %3224 = vmatpush1.bf16.msra.mxu0 %v4552_v25  ;;  %3552 = vmatpush1.bf16.msra.mxu1 %v4555_v26  ;;  %v4649_v25 = vld [vmem:[%s6845_s1 + $0x48c] ss:$16 sps:$4 sm:$0xff]   ;;  %v4644_v26 = vld [vmem:[%s6845_s1 + $0x480] ss:$16 sps:$4 sm:$0xff]  }
  0x58   :  { %3225 = vmatprep.subr.bf16.mxu0 %v4560_v27  ;;  %3553 = vmatprep.subr.bf16.mxu1 %v4563_v28  ;;  %v4647_v27 = vld [vmem:[%s6845_s1 + $0x488] ss:$16 sps:$4 sm:$0xff]   ;;  %v4652_v28 = vld [vmem:[%s6845_s1 + $0x4a4] ss:$16 sps:$4 sm:$0xff]  }
  0x5b   :  { %3226 = vmatpush1.bf16.msra.mxu0 %v4558_v31  ;;  %3554 = vmatpush1.bf16.msra.mxu1 %v4561_v32  ;;  %v4653_v31 = vld [vmem:[%s6845_s1 + $0x4a8] ss:$16 sps:$4 sm:$0xff]   ;;  %v4658_v32 = vld [vmem:[%s6845_s1 + $0x4c4] ss:$16 sps:$4 sm:$0xff]  }
  0x5c   :  { %3227 = vmatprep.subr.bf16.mxu0 %v4566_v33  ;;  %3555 = vmatprep.subr.bf16.mxu1 %v4569_v34  ;;  %v4661_v33 = vld [vmem:[%s6845_s1 + $0x4cc] ss:$16 sps:$4 sm:$0xff]   ;;  %v4656_v34 = vld [vmem:[%s6845_s1 + $0x4c0] ss:$16 sps:$4 sm:$0xff]  }
  0x5f   :  { %3228 = vmatpush1.bf16.msra.mxu0 %v4564_v35  ;;  %3556 = vmatpush1.bf16.msra.mxu1 %v4567_v36  ;;  %v4659_v35 = vld [vmem:[%s6845_s1 + $0x4c8] ss:$16 sps:$4 sm:$0xff]   ;;  %v4664_v36 = vld [vmem:[%s6845_s1 + $0x4e4] ss:$16 sps:$4 sm:$0xff]  }
  0x60   :  { %3229 = vmatprep.subr.bf16.mxu0 %v4572_v37  ;;  %3557 = vmatprep.subr.bf16.mxu1 %v4575_v38  ;;  %v4667_v37 = vld [vmem:[%s6845_s1 + $0x4ec] ss:$16 sps:$4 sm:$0xff]   ;;  %v4662_v38 = vld [vmem:[%s6845_s1 + $0x4e0] ss:$16 sps:$4 sm:$0xff]  }
  0x63   :  { %3230 = vmatpush1.bf16.msra.mxu0 %v4570_v39  ;;  %3558 = vmatpush1.bf16.msra.mxu1 %v4573_v40  ;;  %v4665_v39 = vld [vmem:[%s6845_s1 + $0x4e8] ss:$16 sps:$4 sm:$0xff]   ;;  %v4670_v40 = vld [vmem:[%s6845_s1 + $0x504] ss:$16 sps:$4 sm:$0xff]  }
  0x64   :  { %3231 = vmatprep.subr.bf16.mxu0 %v4578_v41  ;;  %3559 = vmatprep.subr.bf16.mxu1 %v4581_v42  ;;  %v4673_v41 = vld [vmem:[%s6845_s1 + $0x50c] ss:$16 sps:$4 sm:$0xff]   ;;  %v4668_v42 = vld [vmem:[%s6845_s1 + $0x500] ss:$16 sps:$4 sm:$0xff]  }
  0x67   :  { %3232 = vmatpush1.bf16.msra.mxu0 %v4576_v43  ;;  %3560 = vmatpush1.bf16.msra.mxu1 %v4579_v44  ;;  %v4671_v43 = vld [vmem:[%s6845_s1 + $0x508] ss:$16 sps:$4 sm:$0xff]   ;;  %v4676_v44 = vld [vmem:[%s6845_s1 + $0x524] ss:$16 sps:$4 sm:$0xff]  }
  0x68   :  { %3233 = vmatprep.subr.bf16.mxu0 %v4584_v45  ;;  %3561 = vmatprep.subr.bf16.mxu1 %v4587_v46  ;;  %v4679_v45 = vld [vmem:[%s6845_s1 + $0x52c] ss:$16 sps:$4 sm:$0xff]   ;;  %v4674_v46 = vld [vmem:[%s6845_s1 + $0x520] ss:$16 sps:$4 sm:$0xff]  }
  0x6b   :  { %3234 = vmatpush1.bf16.msra.mxu0 %v4582_v47  ;;  %3562 = vmatpush1.bf16.msra.mxu1 %v4585_v48  ;;  %v4677_v47 = vld [vmem:[%s6845_s1 + $0x528] ss:$16 sps:$4 sm:$0xff]   ;;  %v4682_v48 = vld [vmem:[%s6845_s1 + $0x544] ss:$16 sps:$4 sm:$0xff]  }
  0x6c   :  { %3235 = vmatprep.subr.bf16.mxu0 %v4590_v49  ;;  %3563 = vmatprep.subr.bf16.mxu1 %v4593_v50  ;;  %v4685_v49 = vld [vmem:[%s6845_s1 + $0x54c] ss:$16 sps:$4 sm:$0xff]   ;;  %v4680_v50 = vld [vmem:[%s6845_s1 + $0x540] ss:$16 sps:$4 sm:$0xff]  }
  0x6f   :  { %3236 = vmatpush1.bf16.msra.mxu0 %v4588_v51  ;;  %3564 = vmatpush1.bf16.msra.mxu1 %v4591_v52  ;;  %v4683_v51 = vld [vmem:[%s6845_s1 + $0x548] ss:$16 sps:$4 sm:$0xff]   ;;  %v4688_v52 = vld [vmem:[%s6845_s1 + $0x564] ss:$16 sps:$4 sm:$0xff]  }
  0x70   :  { %3237 = vmatprep.subr.bf16.mxu0 %v4596_v53  ;;  %3565 = vmatprep.subr.bf16.mxu1 %v4599_v54  ;;  %v4691_v53 = vld [vmem:[%s6845_s1 + $0x56c] ss:$16 sps:$4 sm:$0xff]   ;;  %v4686_v54 = vld [vmem:[%s6845_s1 + $0x560] ss:$16 sps:$4 sm:$0xff]  }
  0x73   :  { %3238 = vmatpush1.bf16.msra.mxu0 %v4594_v55  ;;  %3566 = vmatpush1.bf16.msra.mxu1 %v4597_v56  ;;  %v4689_v55 = vld [vmem:[%s6845_s1 + $0x568] ss:$16 sps:$4 sm:$0xff]   ;;  %v4694_v56 = vld [vmem:[%s6845_s1 + $0x584] ss:$16 sps:$4 sm:$0xff]  }
  0x74   :  { %3239 = vmatprep.subr.bf16.mxu0 %v4602_v57  ;;  %3567 = vmatprep.subr.bf16.mxu1 %v4605_v58  ;;  %v4697_v57 = vld [vmem:[%s6845_s1 + $0x58c] ss:$16 sps:$4 sm:$0xff]   ;;  %v4692_v58 = vld [vmem:[%s6845_s1 + $0x580] ss:$16 sps:$4 sm:$0xff]  }
  0x77   :  { %3240 = vmatpush1.bf16.msra.mxu0 %v4600_v59  ;;  %3568 = vmatpush1.bf16.msra.mxu1 %v4603_v60  ;;  %v4695_v59 = vld [vmem:[%s6845_s1 + $0x588] ss:$16 sps:$4 sm:$0xff]   ;;  %v4700_v60 = vld [vmem:[%s6845_s1 + $0x5a4] ss:$16 sps:$4 sm:$0xff]  }
  0x78   :  { %3241 = vmatprep.subr.bf16.mxu0 %v4608_v61  ;;  %3569 = vmatprep.subr.bf16.mxu1 %v4611_v62  ;;  %v4703_v61 = vld [vmem:[%s6845_s1 + $0x5ac] ss:$16 sps:$4 sm:$0xff]   ;;  %v4698_v62 = vld [vmem:[%s6845_s1 + $0x5a0] ss:$16 sps:$4 sm:$0xff]  }
  0x7b   :  { %3242 = vmatpush1.bf16.msra.mxu0 %v4606_v63  ;;  %3570 = vmatpush1.bf16.msra.mxu1 %v4609_v0  ;;  %v4701_v63 = vld [vmem:[%s6845_s1 + $0x5a8] ss:$16 sps:$4 sm:$0xff]   ;;  %v4706_v0 = vld [vmem:[%s6845_s1 + $0x5c4] ss:$16 sps:$4 sm:$0xff]  }
  0x7c   :  { %3243 = vmatprep.subr.bf16.mxu0 %v4614_v1  ;;  %3571 = vmatprep.subr.bf16.mxu1 %v4617_v2  ;;  %v4709_v1 = vld [vmem:[%s6845_s1 + $0x5cc] ss:$16 sps:$4 sm:$0xff]   ;;  %v4704_v2 = vld [vmem:[%s6845_s1 + $0x5c0] ss:$16 sps:$4 sm:$0xff]  }
  0x7f   :  { %3244 = vmatpush1.bf16.msra.mxu0 %v4612_v3  ;;  %3572 = vmatpush1.bf16.msra.mxu1 %v4615_v4  ;;  %v4707_v3 = vld [vmem:[%s6845_s1 + $0x5c8] ss:$16 sps:$4 sm:$0xff]   ;;  %v4712_v4 = vld [vmem:[%s6845_s1 + $0x5e4] ss:$16 sps:$4 sm:$0xff]  }
  0x80   :  { %3254 = vmatprep.subr.bf16.mxu0 %v4622_v5  ;;  %3582 = vmatprep.subr.bf16.mxu1 %v4625_v6  ;;  %v4715_v5 = vld [vmem:[%s6845_s1 + $0x5ec] ss:$16 sps:$4 sm:$0xff]   ;;  %v4710_v6 = vld [vmem:[%s6845_s1 + $0x5e0] ss:$16 sps:$4 sm:$0xff]  }
  0x82   :  { %3246 = vmatmul.mubr.bf16.vlgmr.msra.gmra.mrb[0].mxu0 %v3838_v7  ;;  %3574 = vmatmul.mubr.bf16.vlgmr.msra.gmra.mrb[0].mxu1 %v3838_v7  ;;  %v4713_v7 = vld [vmem:[%s6845_s1 + $0x5e8] ss:$16 sps:$4 sm:$0xff]  }
  0x83   :  { %3255 = vmatpush1.bf16.msra.mxu0 %v4620_v8  ;;  %3583 = vmatpush1.bf16.msra.mxu1 %v4623_v9  ;;  %v4720_v8 = vld [vmem:[%s6845_s1 + $0x604] ss:$16 sps:$4 sm:$0xff]   ;;  %v4723_v9 = vld [vmem:[%s6845_s1 + $0x60c] ss:$16 sps:$4 sm:$0xff]  }
  0x84   :  { %3256 = vmatprep.subr.bf16.mxu0 %v4628_v10  ;;  %3584 = vmatprep.subr.bf16.mxu1 %v4631_v12  ;;  %v4718_v10 = vld [vmem:[%s6845_s1 + $0x600] ss:$16 sps:$4 sm:$0xff]   ;;  %v3840_v12 = vcombine.low %v5642_v11, %v5642_v11  ;;  %v4729_v11 = vld [vmem:[%s6845_s1 + $0x62c] ss:$16 sps:$4 sm:$0xff]  }
  0x85   :  { %3286 = vmatprep.mubr.bf16.mxu0 %v3841_v13  ;;  %3614 = vmatprep.mubr.bf16.mxu1 %v3841_v13  ;;  %v4721_v13 = vld [vmem:[%s6845_s1 + $0x608] ss:$16 sps:$4 sm:$0xff]  }
  0x87   :  { %3257 = vmatpush1.bf16.msra.mxu0 %v4626_v14  ;;  %3585 = vmatpush1.bf16.msra.mxu1 %v4629_v15  ;;  %v5840_v14 = vld [vmem:[%s6846_s0 + $0x18] sm:$0xff]  ;;  %v4726_v15 = vld [vmem:[%s6845_s1 + $0x624] ss:$16 sps:$4 sm:$0xff]  }
  0x88   :  { %3258 = vmatprep.subr.bf16.mxu0 %v4634_v16  ;;  %3586 = vmatprep.subr.bf16.mxu1 %v4637_v17  ;;  %v3843_v16 = vcombine.high %v5840_v14, %v5840_v14  ;;  %v4724_v17 = vld [vmem:[%s6845_s1 + $0x620] ss:$16 sps:$4 sm:$0xff]  }
  0x8b   :  { %3259 = vmatpush1.bf16.msra.mxu0 %v4632_v18  ;;  %3587 = vmatpush1.bf16.msra.mxu1 %v4635_v19  ;;  %v4727_v18 = vld [vmem:[%s6845_s1 + $0x628] ss:$16 sps:$4 sm:$0xff]   ;;  %v4732_v19 = vld [vmem:[%s6845_s1 + $0x644] ss:$16 sps:$4 sm:$0xff]  }
  0x8c   :  { %3260 = vmatprep.subr.bf16.mxu0 %v4640_v20  ;;  %3588 = vmatprep.subr.bf16.mxu1 %v4643_v21  ;;  %v4735_v20 = vld [vmem:[%s6845_s1 + $0x64c] ss:$16 sps:$4 sm:$0xff]   ;;  %v4730_v21 = vld [vmem:[%s6845_s1 + $0x640] ss:$16 sps:$4 sm:$0xff]  }
  0x8f   :  { %3261 = vmatpush1.bf16.msra.mxu0 %v4638_v22  ;;  %3589 = vmatpush1.bf16.msra.mxu1 %v4641_v23  ;;  %v4733_v22 = vld [vmem:[%s6845_s1 + $0x648] ss:$16 sps:$4 sm:$0xff]   ;;  %v4738_v23 = vld [vmem:[%s6845_s1 + $0x664] ss:$16 sps:$4 sm:$0xff]  }
  0x90   :  { %3262 = vmatprep.subr.bf16.mxu0 %v4646_v24  ;;  %3590 = vmatprep.subr.bf16.mxu1 %v4649_v25  ;;  %v4741_v24 = vld [vmem:[%s6845_s1 + $0x66c] ss:$16 sps:$4 sm:$0xff]   ;;  %v4736_v25 = vld [vmem:[%s6845_s1 + $0x660] ss:$16 sps:$4 sm:$0xff]  }
  0x93   :  { %3263 = vmatpush1.bf16.msra.mxu0 %v4644_v26  ;;  %3591 = vmatpush1.bf16.msra.mxu1 %v4647_v27  ;;  %v4739_v26 = vld [vmem:[%s6845_s1 + $0x668] ss:$16 sps:$4 sm:$0xff]   ;;  %v4744_v27 = vld [vmem:[%s6845_s1 + $0x684] ss:$16 sps:$4 sm:$0xff]  }
  0x94   :  { %3264 = vmatprep.subr.bf16.mxu0 %v4652_v28  ;;  %3592 = vmatprep.subr.bf16.mxu1 %v4655_v29  ;;  %v4747_v28 = vld [vmem:[%s6845_s1 + $0x68c] ss:$16 sps:$4 sm:$0xff]   ;;  %v4742_v29 = vld [vmem:[%s6845_s1 + $0x680] ss:$16 sps:$4 sm:$0xff]  }
  0x97   :  { %3265 = vmatpush1.bf16.msra.mxu0 %v4650_v30  ;;  %3593 = vmatpush1.bf16.msra.mxu1 %v4653_v31  ;;  %v4745_v30 = vld [vmem:[%s6845_s1 + $0x688] ss:$16 sps:$4 sm:$0xff]   ;;  %v4750_v31 = vld [vmem:[%s6845_s1 + $0x6a4] ss:$16 sps:$4 sm:$0xff]  }
  0x98   :  { %3266 = vmatprep.subr.bf16.mxu0 %v4658_v32  ;;  %3594 = vmatprep.subr.bf16.mxu1 %v4661_v33  ;;  %v4753_v32 = vld [vmem:[%s6845_s1 + $0x6ac] ss:$16 sps:$4 sm:$0xff]   ;;  %v4748_v33 = vld [vmem:[%s6845_s1 + $0x6a0] ss:$16 sps:$4 sm:$0xff]  }
  0x9b   :  { %3267 = vmatpush1.bf16.msra.mxu0 %v4656_v34  ;;  %3595 = vmatpush1.bf16.msra.mxu1 %v4659_v35  ;;  %v4751_v34 = vld [vmem:[%s6845_s1 + $0x6a8] ss:$16 sps:$4 sm:$0xff]   ;;  %v4756_v35 = vld [vmem:[%s6845_s1 + $0x6c4] ss:$16 sps:$4 sm:$0xff]  }
  0x9c   :  { %3268 = vmatprep.subr.bf16.mxu0 %v4664_v36  ;;  %3596 = vmatprep.subr.bf16.mxu1 %v4667_v37  ;;  %v4759_v36 = vld [vmem:[%s6845_s1 + $0x6cc] ss:$16 sps:$4 sm:$0xff]   ;;  %v4754_v37 = vld [vmem:[%s6845_s1 + $0x6c0] ss:$16 sps:$4 sm:$0xff]  }
  0x9f   :  { %3269 = vmatpush1.bf16.msra.mxu0 %v4662_v38  ;;  %3597 = vmatpush1.bf16.msra.mxu1 %v4665_v39  ;;  %v4757_v38 = vld [vmem:[%s6845_s1 + $0x6c8] ss:$16 sps:$4 sm:$0xff]   ;;  %v4762_v39 = vld [vmem:[%s6845_s1 + $0x6e4] ss:$16 sps:$4 sm:$0xff]  }
  0xa0   :  { %3270 = vmatprep.subr.bf16.mxu0 %v4670_v40  ;;  %3598 = vmatprep.subr.bf16.mxu1 %v4673_v41  ;;  %v4765_v40 = vld [vmem:[%s6845_s1 + $0x6ec] ss:$16 sps:$4 sm:$0xff]   ;;  %v4760_v41 = vld [vmem:[%s6845_s1 + $0x6e0] ss:$16 sps:$4 sm:$0xff]  }
  0xa3   :  { %3271 = vmatpush1.bf16.msra.mxu0 %v4668_v42  ;;  %3599 = vmatpush1.bf16.msra.mxu1 %v4671_v43  ;;  %v4763_v42 = vld [vmem:[%s6845_s1 + $0x6e8] ss:$16 sps:$4 sm:$0xff]   ;;  %v4768_v43 = vld [vmem:[%s6845_s1 + $0x704] ss:$16 sps:$4 sm:$0xff]  }
  0xa4   :  { %3272 = vmatprep.subr.bf16.mxu0 %v4676_v44  ;;  %3600 = vmatprep.subr.bf16.mxu1 %v4679_v45  ;;  %v4771_v44 = vld [vmem:[%s6845_s1 + $0x70c] ss:$16 sps:$4 sm:$0xff]   ;;  %v4766_v45 = vld [vmem:[%s6845_s1 + $0x700] ss:$16 sps:$4 sm:$0xff]  }
  0xa7   :  { %3273 = vmatpush1.bf16.msra.mxu0 %v4674_v46  ;;  %3601 = vmatpush1.bf16.msra.mxu1 %v4677_v47  ;;  %v4769_v46 = vld [vmem:[%s6845_s1 + $0x708] ss:$16 sps:$4 sm:$0xff]   ;;  %v4774_v47 = vld [vmem:[%s6845_s1 + $0x724] ss:$16 sps:$4 sm:$0xff]  }
  0xa8   :  { %3274 = vmatprep.subr.bf16.mxu0 %v4682_v48  ;;  %3602 = vmatprep.subr.bf16.mxu1 %v4685_v49  ;;  %v4777_v48 = vld [vmem:[%s6845_s1 + $0x72c] ss:$16 sps:$4 sm:$0xff]   ;;  %v4772_v49 = vld [vmem:[%s6845_s1 + $0x720] ss:$16 sps:$4 sm:$0xff]  }
  0xab   :  { %3275 = vmatpush1.bf16.msra.mxu0 %v4680_v50  ;;  %3603 = vmatpush1.bf16.msra.mxu1 %v4683_v51  ;;  %v4775_v50 = vld [vmem:[%s6845_s1 + $0x728] ss:$16 sps:$4 sm:$0xff]   ;;  %v4780_v51 = vld [vmem:[%s6845_s1 + $0x744] ss:$16 sps:$4 sm:$0xff]  }
  0xac   :  { %3276 = vmatprep.subr.bf16.mxu0 %v4688_v52  ;;  %3604 = vmatprep.subr.bf16.mxu1 %v4691_v53  ;;  %v4783_v52 = vld [vmem:[%s6845_s1 + $0x74c] ss:$16 sps:$4 sm:$0xff]   ;;  %v4778_v53 = vld [vmem:[%s6845_s1 + $0x740] ss:$16 sps:$4 sm:$0xff]  }
  0xaf   :  { %3277 = vmatpush1.bf16.msra.mxu0 %v4686_v54  ;;  %3605 = vmatpush1.bf16.msra.mxu1 %v4689_v55  ;;  %v4781_v54 = vld [vmem:[%s6845_s1 + $0x748] ss:$16 sps:$4 sm:$0xff]   ;;  %v4786_v55 = vld [vmem:[%s6845_s1 + $0x764] ss:$16 sps:$4 sm:$0xff]  }
  0xb0   :  { %3278 = vmatprep.subr.bf16.mxu0 %v4694_v56  ;;  %3606 = vmatprep.subr.bf16.mxu1 %v4697_v57  ;;  %v4789_v56 = vld [vmem:[%s6845_s1 + $0x76c] ss:$16 sps:$4 sm:$0xff]   ;;  %v4784_v57 = vld [vmem:[%s6845_s1 + $0x760] ss:$16 sps:$4 sm:$0xff]  }
  0xb3   :  { %3279 = vmatpush1.bf16.msra.mxu0 %v4692_v58  ;;  %3607 = vmatpush1.bf16.msra.mxu1 %v4695_v59  ;;  %v4787_v58 = vld [vmem:[%s6845_s1 + $0x768] ss:$16 sps:$4 sm:$0xff]   ;;  %v4792_v59 = vld [vmem:[%s6845_s1 + $0x784] ss:$16 sps:$4 sm:$0xff]  }
  0xb4   :  { %3280 = vmatprep.subr.bf16.mxu0 %v4700_v60  ;;  %3608 = vmatprep.subr.bf16.mxu1 %v4703_v61  ;;  %v4795_v60 = vld [vmem:[%s6845_s1 + $0x78c] ss:$16 sps:$4 sm:$0xff]   ;;  %v4790_v61 = vld [vmem:[%s6845_s1 + $0x780] ss:$16 sps:$4 sm:$0xff]  }
  0xb7   :  { %3281 = vmatpush1.bf16.msra.mxu0 %v4698_v62  ;;  %3609 = vmatpush1.bf16.msra.mxu1 %v4701_v63  ;;  %v4793_v62 = vld [vmem:[%s6845_s1 + $0x788] ss:$16 sps:$4 sm:$0xff]   ;;  %v4798_v63 = vld [vmem:[%s6845_s1 + $0x7a4] ss:$16 sps:$4 sm:$0xff]  }
  0xb8   :  { %3282 = vmatprep.subr.bf16.mxu0 %v4706_v0  ;;  %3610 = vmatprep.subr.bf16.mxu1 %v4709_v1  ;;  %v4801_v0 = vld [vmem:[%s6845_s1 + $0x7ac] ss:$16 sps:$4 sm:$0xff]   ;;  %v4796_v1 = vld [vmem:[%s6845_s1 + $0x7a0] ss:$16 sps:$4 sm:$0xff]  }
  0xbb   :  { %3283 = vmatpush1.bf16.msra.mxu0 %v4704_v2  ;;  %3611 = vmatpush1.bf16.msra.mxu1 %v4707_v3  ;;  %v4799_v2 = vld [vmem:[%s6845_s1 + $0x7a8] ss:$16 sps:$4 sm:$0xff]   ;;  %v4804_v3 = vld [vmem:[%s6845_s1 + $0x7c4] ss:$16 sps:$4 sm:$0xff]  }
  0xbc   :  { %3284 = vmatprep.subr.bf16.mxu0 %v4712_v4  ;;  %3612 = vmatprep.subr.bf16.mxu1 %v4715_v5  ;;  %v4807_v4 = vld [vmem:[%s6845_s1 + $0x7cc] ss:$16 sps:$4 sm:$0xff]   ;;  %v4802_v5 = vld [vmem:[%s6845_s1 + $0x7c0] ss:$16 sps:$4 sm:$0xff]  }
  0xbf   :  { %3285 = vmatpush1.bf16.msra.mxu0 %v4710_v6  ;;  %3613 = vmatpush1.bf16.msra.mxu1 %v4713_v7  ;;  %v4805_v6 = vld [vmem:[%s6845_s1 + $0x7c8] ss:$16 sps:$4 sm:$0xff]   ;;  %v4810_v7 = vld [vmem:[%s6845_s1 + $0x7e4] ss:$16 sps:$4 sm:$0xff]  }
  0xc0   :  { %3295 = vmatprep.subr.bf16.mxu0 %v4720_v8  ;;  %3623 = vmatprep.subr.bf16.mxu1 %v4723_v9  ;;  %v4813_v8 = vld [vmem:[%s6845_s1 + $0x7ec] ss:$16 sps:$4 sm:$0xff]   ;;  %v4808_v9 = vld [vmem:[%s6845_s1 + $0x7e0] ss:$16 sps:$4 sm:$0xff]  }
  0xc2   :  { %3287 = vmatmul.mubr.bf16.vlgmr.msra.gmra.mrb[0].mxu0 %v3840_v12  ;;  %3615 = vmatmul.mubr.bf16.vlgmr.msra.gmra.mrb[0].mxu1 %v3840_v12  ;;  %v4818_v12 = vld [vmem:[%s6845_s1 + $0x804] ss:$16 sps:$4 sm:$0xff]  }
  0xc3   :  { %3296 = vmatpush1.bf16.msra.mxu0 %v4718_v10  ;;  %3624 = vmatpush1.bf16.msra.mxu1 %v4721_v13  ;;  %v4811_v10 = vld [vmem:[%s6845_s1 + $0x7e8] ss:$16 sps:$4 sm:$0xff]   ;;  %v4821_v13 = vld [vmem:[%s6845_s1 + $0x80c] ss:$16 sps:$4 sm:$0xff]  }
  0xc4   :  { %3297 = vmatprep.subr.bf16.mxu0 %v4726_v15  ;;  %3625 = vmatprep.subr.bf16.mxu1 %v4729_v11  ;;  %v4816_v15 = vld [vmem:[%s6845_s1 + $0x800] ss:$16 sps:$4 sm:$0xff]   ;;  %v3842_v11 = vcombine.low %v5840_v14, %v5840_v14  ;;  %v4827_v14 = vld [vmem:[%s6845_s1 + $0x82c] ss:$16 sps:$4 sm:$0xff]  }
  0xc5   :  { %3327 = vmatprep.mubr.bf16.mxu0 %v3843_v16  ;;  %3655 = vmatprep.mubr.bf16.mxu1 %v3843_v16  ;;  %v6038_v16 = vld [vmem:[%s6846_s0 + $0x20] sm:$0xff] }
  0xc7   :  { %3298 = vmatpush1.bf16.msra.mxu0 %v4724_v17  ;;  %3626 = vmatpush1.bf16.msra.mxu1 %v4727_v18  ;;  %v4819_v17 = vld [vmem:[%s6845_s1 + $0x808] ss:$16 sps:$4 sm:$0xff]   ;;  %v4824_v18 = vld [vmem:[%s6845_s1 + $0x824] ss:$16 sps:$4 sm:$0xff]  }
  0xc8   :  { %3299 = vmatprep.subr.bf16.mxu0 %v4732_v19  ;;  %3627 = vmatprep.subr.bf16.mxu1 %v4735_v20  ;;  %v3845_v19 = vcombine.high %v6038_v16, %v6038_v16  ;;  %v4822_v20 = vld [vmem:[%s6845_s1 + $0x820] ss:$16 sps:$4 sm:$0xff]  }
  0xcb   :  { %3300 = vmatpush1.bf16.msra.mxu0 %v4730_v21  ;;  %3628 = vmatpush1.bf16.msra.mxu1 %v4733_v22  ;;  %v4825_v21 = vld [vmem:[%s6845_s1 + $0x828] ss:$16 sps:$4 sm:$0xff]   ;;  %v4830_v22 = vld [vmem:[%s6845_s1 + $0x844] ss:$16 sps:$4 sm:$0xff]  }
  0xcc   :  { %3301 = vmatprep.subr.bf16.mxu0 %v4738_v23  ;;  %3629 = vmatprep.subr.bf16.mxu1 %v4741_v24  ;;  %v4833_v23 = vld [vmem:[%s6845_s1 + $0x84c] ss:$16 sps:$4 sm:$0xff]   ;;  %v4828_v24 = vld [vmem:[%s6845_s1 + $0x840] ss:$16 sps:$4 sm:$0xff]  }
  0xcf   :  { %3302 = vmatpush1.bf16.msra.mxu0 %v4736_v25  ;;  %3630 = vmatpush1.bf16.msra.mxu1 %v4739_v26  ;;  %v4831_v25 = vld [vmem:[%s6845_s1 + $0x848] ss:$16 sps:$4 sm:$0xff]   ;;  %v4836_v26 = vld [vmem:[%s6845_s1 + $0x864] ss:$16 sps:$4 sm:$0xff]  }
  0xd0   :  { %3303 = vmatprep.subr.bf16.mxu0 %v4744_v27  ;;  %3631 = vmatprep.subr.bf16.mxu1 %v4747_v28  ;;  %v4839_v27 = vld [vmem:[%s6845_s1 + $0x86c] ss:$16 sps:$4 sm:$0xff]   ;;  %v4834_v28 = vld [vmem:[%s6845_s1 + $0x860] ss:$16 sps:$4 sm:$0xff]  }
  0xd3   :  { %3304 = vmatpush1.bf16.msra.mxu0 %v4742_v29  ;;  %3632 = vmatpush1.bf16.msra.mxu1 %v4745_v30  ;;  %v4837_v29 = vld [vmem:[%s6845_s1 + $0x868] ss:$16 sps:$4 sm:$0xff]   ;;  %v4842_v30 = vld [vmem:[%s6845_s1 + $0x884] ss:$16 sps:$4 sm:$0xff]  }
  0xd4   :  { %3305 = vmatprep.subr.bf16.mxu0 %v4750_v31  ;;  %3633 = vmatprep.subr.bf16.mxu1 %v4753_v32  ;;  %v4845_v31 = vld [vmem:[%s6845_s1 + $0x88c] ss:$16 sps:$4 sm:$0xff]   ;;  %v4840_v32 = vld [vmem:[%s6845_s1 + $0x880] ss:$16 sps:$4 sm:$0xff]  }
  0xd7   :  { %3306 = vmatpush1.bf16.msra.mxu0 %v4748_v33  ;;  %3634 = vmatpush1.bf16.msra.mxu1 %v4751_v34  ;;  %v4843_v33 = vld [vmem:[%s6845_s1 + $0x888] ss:$16 sps:$4 sm:$0xff]   ;;  %v4848_v34 = vld [vmem:[%s6845_s1 + $0x8a4] ss:$16 sps:$4 sm:$0xff]  }
  0xd8   :  { %3307 = vmatprep.subr.bf16.mxu0 %v4756_v35  ;;  %3635 = vmatprep.subr.bf16.mxu1 %v4759_v36  ;;  %v4851_v35 = vld [vmem:[%s6845_s1 + $0x8ac] ss:$16 sps:$4 sm:$0xff]   ;;  %v4846_v36 = vld [vmem:[%s6845_s1 + $0x8a0] ss:$16 sps:$4 sm:$0xff]  }
  0xdb   :  { %3308 = vmatpush1.bf16.msra.mxu0 %v4754_v37  ;;  %3636 = vmatpush1.bf16.msra.mxu1 %v4757_v38  ;;  %v4849_v37 = vld [vmem:[%s6845_s1 + $0x8a8] ss:$16 sps:$4 sm:$0xff]   ;;  %v4854_v38 = vld [vmem:[%s6845_s1 + $0x8c4] ss:$16 sps:$4 sm:$0xff]  }
  0xdc   :  { %3309 = vmatprep.subr.bf16.mxu0 %v4762_v39  ;;  %3637 = vmatprep.subr.bf16.mxu1 %v4765_v40  ;;  %v4857_v39 = vld [vmem:[%s6845_s1 + $0x8cc] ss:$16 sps:$4 sm:$0xff]   ;;  %v4852_v40 = vld [vmem:[%s6845_s1 + $0x8c0] ss:$16 sps:$4 sm:$0xff]  }
  0xdf   :  { %3310 = vmatpush1.bf16.msra.mxu0 %v4760_v41  ;;  %3638 = vmatpush1.bf16.msra.mxu1 %v4763_v42  ;;  %v4855_v41 = vld [vmem:[%s6845_s1 + $0x8c8] ss:$16 sps:$4 sm:$0xff]   ;;  %v4860_v42 = vld [vmem:[%s6845_s1 + $0x8e4] ss:$16 sps:$4 sm:$0xff]  }
  0xe0   :  { %3311 = vmatprep.subr.bf16.mxu0 %v4768_v43  ;;  %3639 = vmatprep.subr.bf16.mxu1 %v4771_v44  ;;  %v4863_v43 = vld [vmem:[%s6845_s1 + $0x8ec] ss:$16 sps:$4 sm:$0xff]   ;;  %v4858_v44 = vld [vmem:[%s6845_s1 + $0x8e0] ss:$16 sps:$4 sm:$0xff]  }
  0xe3   :  { %3312 = vmatpush1.bf16.msra.mxu0 %v4766_v45  ;;  %3640 = vmatpush1.bf16.msra.mxu1 %v4769_v46  ;;  %v4861_v45 = vld [vmem:[%s6845_s1 + $0x8e8] ss:$16 sps:$4 sm:$0xff]   ;;  %v4866_v46 = vld [vmem:[%s6845_s1 + $0x904] ss:$16 sps:$4 sm:$0xff]  }
  0xe4   :  { %3313 = vmatprep.subr.bf16.mxu0 %v4774_v47  ;;  %3641 = vmatprep.subr.bf16.mxu1 %v4777_v48  ;;  %v4869_v47 = vld [vmem:[%s6845_s1 + $0x90c] ss:$16 sps:$4 sm:$0xff]   ;;  %v4864_v48 = vld [vmem:[%s6845_s1 + $0x900] ss:$16 sps:$4 sm:$0xff]  }
  0xe7   :  { %3314 = vmatpush1.bf16.msra.mxu0 %v4772_v49  ;;  %3642 = vmatpush1.bf16.msra.mxu1 %v4775_v50  ;;  %v4867_v49 = vld [vmem:[%s6845_s1 + $0x908] ss:$16 sps:$4 sm:$0xff]   ;;  %v4872_v50 = vld [vmem:[%s6845_s1 + $0x924] ss:$16 sps:$4 sm:$0xff]  }
  0xe8   :  { %3315 = vmatprep.subr.bf16.mxu0 %v4780_v51  ;;  %3643 = vmatprep.subr.bf16.mxu1 %v4783_v52  ;;  %v4875_v51 = vld [vmem:[%s6845_s1 + $0x92c] ss:$16 sps:$4 sm:$0xff]   ;;  %v4870_v52 = vld [vmem:[%s6845_s1 + $0x920] ss:$16 sps:$4 sm:$0xff]  }
  0xeb   :  { %3316 = vmatpush1.bf16.msra.mxu0 %v4778_v53  ;;  %3644 = vmatpush1.bf16.msra.mxu1 %v4781_v54  ;;  %v4873_v53 = vld [vmem:[%s6845_s1 + $0x928] ss:$16 sps:$4 sm:$0xff]   ;;  %v4878_v54 = vld [vmem:[%s6845_s1 + $0x944] ss:$16 sps:$4 sm:$0xff]  }
  0xec   :  { %3317 = vmatprep.subr.bf16.mxu0 %v4786_v55  ;;  %3645 = vmatprep.subr.bf16.mxu1 %v4789_v56  ;;  %v4881_v55 = vld [vmem:[%s6845_s1 + $0x94c] ss:$16 sps:$4 sm:$0xff]   ;;  %v4876_v56 = vld [vmem:[%s6845_s1 + $0x940] ss:$16 sps:$4 sm:$0xff]  }
  0xef   :  { %3318 = vmatpush1.bf16.msra.mxu0 %v4784_v57  ;;  %3646 = vmatpush1.bf16.msra.mxu1 %v4787_v58  ;;  %v4879_v57 = vld [vmem:[%s6845_s1 + $0x948] ss:$16 sps:$4 sm:$0xff]   ;;  %v4884_v58 = vld [vmem:[%s6845_s1 + $0x964] ss:$16 sps:$4 sm:$0xff]  }
  0xf0   :  { %3319 = vmatprep.subr.bf16.mxu0 %v4792_v59  ;;  %3647 = vmatprep.subr.bf16.mxu1 %v4795_v60  ;;  %v4887_v59 = vld [vmem:[%s6845_s1 + $0x96c] ss:$16 sps:$4 sm:$0xff]   ;;  %v4882_v60 = vld [vmem:[%s6845_s1 + $0x960] ss:$16 sps:$4 sm:$0xff]  }
  0xf3   :  { %3320 = vmatpush1.bf16.msra.mxu0 %v4790_v61  ;;  %3648 = vmatpush1.bf16.msra.mxu1 %v4793_v62  ;;  %v4885_v61 = vld [vmem:[%s6845_s1 + $0x968] ss:$16 sps:$4 sm:$0xff]   ;;  %v4890_v62 = vld [vmem:[%s6845_s1 + $0x984] ss:$16 sps:$4 sm:$0xff]  }
  0xf4   :  { %3321 = vmatprep.subr.bf16.mxu0 %v4798_v63  ;;  %3649 = vmatprep.subr.bf16.mxu1 %v4801_v0  ;;  %v4893_v63 = vld [vmem:[%s6845_s1 + $0x98c] ss:$16 sps:$4 sm:$0xff]   ;;  %v4888_v0 = vld [vmem:[%s6845_s1 + $0x980] ss:$16 sps:$4 sm:$0xff]  }
  0xf7   :  { %3322 = vmatpush1.bf16.msra.mxu0 %v4796_v1  ;;  %3650 = vmatpush1.bf16.msra.mxu1 %v4799_v2  ;;  %v4891_v1 = vld [vmem:[%s6845_s1 + $0x988] ss:$16 sps:$4 sm:$0xff]   ;;  %v4896_v2 = vld [vmem:[%s6845_s1 + $0x9a4] ss:$16 sps:$4 sm:$0xff]  }
  0xf8   :  { %3323 = vmatprep.subr.bf16.mxu0 %v4804_v3  ;;  %3651 = vmatprep.subr.bf16.mxu1 %v4807_v4  ;;  %v4899_v3 = vld [vmem:[%s6845_s1 + $0x9ac] ss:$16 sps:$4 sm:$0xff]   ;;  %v4894_v4 = vld [vmem:[%s6845_s1 + $0x9a0] ss:$16 sps:$4 sm:$0xff]  }
  0xfb   :  { %3324 = vmatpush1.bf16.msra.mxu0 %v4802_v5  ;;  %3652 = vmatpush1.bf16.msra.mxu1 %v4805_v6  ;;  %v4897_v5 = vld [vmem:[%s6845_s1 + $0x9a8] ss:$16 sps:$4 sm:$0xff]   ;;  %v4902_v6 = vld [vmem:[%s6845_s1 + $0x9c4] ss:$16 sps:$4 sm:$0xff]  }
  0xfc   :  { %3325 = vmatprep.subr.bf16.mxu0 %v4810_v7  ;;  %3653 = vmatprep.subr.bf16.mxu1 %v4813_v8  ;;  %v4905_v7 = vld [vmem:[%s6845_s1 + $0x9cc] ss:$16 sps:$4 sm:$0xff]   ;;  %v4900_v8 = vld [vmem:[%s6845_s1 + $0x9c0] ss:$16 sps:$4 sm:$0xff]  }
  0xff   :  { %3326 = vmatpush1.bf16.msra.mxu0 %v4808_v9  ;;  %3654 = vmatpush1.bf16.msra.mxu1 %v4811_v10  ;;  %v4903_v9 = vld [vmem:[%s6845_s1 + $0x9c8] ss:$16 sps:$4 sm:$0xff]   ;;  %v4908_v10 = vld [vmem:[%s6845_s1 + $0x9e4] ss:$16 sps:$4 sm:$0xff]  }
 0x100   :  { %3336 = vmatprep.subr.bf16.mxu0 %v4818_v12  ;;  %3664 = vmatprep.subr.bf16.mxu1 %v4821_v13  ;;  %v4911_v12 = vld [vmem:[%s6845_s1 + $0x9ec] ss:$16 sps:$4 sm:$0xff]   ;;  %v4906_v13 = vld [vmem:[%s6845_s1 + $0x9e0] ss:$16 sps:$4 sm:$0xff]  }
 0x102   :  { %3328 = vmatmul.mubr.bf16.vlgmr.msra.gmra.mrb[0].mxu0 %v3842_v11  ;;  %3656 = vmatmul.mubr.bf16.vlgmr.msra.gmra.mrb[0].mxu1 %v3842_v11  ;;  %v4916_v11 = vld [vmem:[%s6845_s1 + $0xa04] ss:$16 sps:$4 sm:$0xff]  }
 0x103   :  { %3337 = vmatpush1.bf16.msra.mxu0 %v4816_v15  ;;  %3665 = vmatpush1.bf16.msra.mxu1 %v4819_v17  ;;  %v4909_v15 = vld [vmem:[%s6845_s1 + $0x9e8] ss:$16 sps:$4 sm:$0xff]   ;;  %v4919_v17 = vld [vmem:[%s6845_s1 + $0xa0c] ss:$16 sps:$4 sm:$0xff]  }
 0x104   :  { %3338 = vmatprep.subr.bf16.mxu0 %v4824_v18  ;;  %3666 = vmatprep.subr.bf16.mxu1 %v4827_v14  ;;  %v6234_v18 = vld [vmem:[%s6846_s0 + $0x28] sm:$0xff]  ;;  %v3844_v14 = vcombine.low %v6038_v16, %v6038_v16 }
 0x105   :  { %3368 = vmatprep.mubr.bf16.mxu0 %v3845_v19  ;;  %3696 = vmatprep.mubr.bf16.mxu1 %v3845_v19  ;;  %v4914_v19 = vld [vmem:[%s6845_s1 + $0xa00] ss:$16 sps:$4 sm:$0xff]   ;;  %v4925_v16 = vld [vmem:[%s6845_s1 + $0xa2c] ss:$16 sps:$4 sm:$0xff]  }
 0x107   :  { %3339 = vmatpush1.bf16.msra.mxu0 %v4822_v20  ;;  %3667 = vmatpush1.bf16.msra.mxu1 %v4825_v21  ;;  %v4917_v20 = vld [vmem:[%s6845_s1 + $0xa08] ss:$16 sps:$4 sm:$0xff]   ;;  %v4922_v21 = vld [vmem:[%s6845_s1 + $0xa24] ss:$16 sps:$4 sm:$0xff]  }
 0x108   :  { %3340 = vmatprep.subr.bf16.mxu0 %v4830_v22  ;;  %3668 = vmatprep.subr.bf16.mxu1 %v4833_v23  ;;  %v3847_v22 = vcombine.high %v6234_v18, %v6234_v18  ;;  %v4920_v23 = vld [vmem:[%s6845_s1 + $0xa20] ss:$16 sps:$4 sm:$0xff]  }
 0x10b   :  { %3341 = vmatpush1.bf16.msra.mxu0 %v4828_v24  ;;  %3669 = vmatpush1.bf16.msra.mxu1 %v4831_v25  ;;  %v4923_v24 = vld [vmem:[%s6845_s1 + $0xa28] ss:$16 sps:$4 sm:$0xff]   ;;  %v4928_v25 = vld [vmem:[%s6845_s1 + $0xa44] ss:$16 sps:$4 sm:$0xff]  }
 0x10c   :  { %3342 = vmatprep.subr.bf16.mxu0 %v4836_v26  ;;  %3670 = vmatprep.subr.bf16.mxu1 %v4839_v27  ;;  %v4931_v26 = vld [vmem:[%s6845_s1 + $0xa4c] ss:$16 sps:$4 sm:$0xff]   ;;  %v4926_v27 = vld [vmem:[%s6845_s1 + $0xa40] ss:$16 sps:$4 sm:$0xff]  }
 0x10f   :  { %3343 = vmatpush1.bf16.msra.mxu0 %v4834_v28  ;;  %3671 = vmatpush1.bf16.msra.mxu1 %v4837_v29  ;;  %v4929_v28 = vld [vmem:[%s6845_s1 + $0xa48] ss:$16 sps:$4 sm:$0xff]   ;;  %v4934_v29 = vld [vmem:[%s6845_s1 + $0xa64] ss:$16 sps:$4 sm:$0xff]  }
 0x110   :  { %3344 = vmatprep.subr.bf16.mxu0 %v4842_v30  ;;  %3672 = vmatprep.subr.bf16.mxu1 %v4845_v31  ;;  %v4937_v30 = vld [vmem:[%s6845_s1 + $0xa6c] ss:$16 sps:$4 sm:$0xff]   ;;  %v4932_v31 = vld [vmem:[%s6845_s1 + $0xa60] ss:$16 sps:$4 sm:$0xff]  }
 0x113   :  { %3345 = vmatpush1.bf16.msra.mxu0 %v4840_v32  ;;  %3673 = vmatpush1.bf16.msra.mxu1 %v4843_v33  ;;  %v4935_v32 = vld [vmem:[%s6845_s1 + $0xa68] ss:$16 sps:$4 sm:$0xff]   ;;  %v4940_v33 = vld [vmem:[%s6845_s1 + $0xa84] ss:$16 sps:$4 sm:$0xff]  }
 0x114   :  { %3346 = vmatprep.subr.bf16.mxu0 %v4848_v34  ;;  %3674 = vmatprep.subr.bf16.mxu1 %v4851_v35  ;;  %v4943_v34 = vld [vmem:[%s6845_s1 + $0xa8c] ss:$16 sps:$4 sm:$0xff]   ;;  %v4938_v35 = vld [vmem:[%s6845_s1 + $0xa80] ss:$16 sps:$4 sm:$0xff]  }
 0x117   :  { %3347 = vmatpush1.bf16.msra.mxu0 %v4846_v36  ;;  %3675 = vmatpush1.bf16.msra.mxu1 %v4849_v37  ;;  %v4941_v36 = vld [vmem:[%s6845_s1 + $0xa88] ss:$16 sps:$4 sm:$0xff]   ;;  %v4946_v37 = vld [vmem:[%s6845_s1 + $0xaa4] ss:$16 sps:$4 sm:$0xff]  }
 0x118   :  { %3348 = vmatprep.subr.bf16.mxu0 %v4854_v38  ;;  %3676 = vmatprep.subr.bf16.mxu1 %v4857_v39  ;;  %v4949_v38 = vld [vmem:[%s6845_s1 + $0xaac] ss:$16 sps:$4 sm:$0xff]   ;;  %v4944_v39 = vld [vmem:[%s6845_s1 + $0xaa0] ss:$16 sps:$4 sm:$0xff]  }
 0x11b   :  { %3349 = vmatpush1.bf16.msra.mxu0 %v4852_v40  ;;  %3677 = vmatpush1.bf16.msra.mxu1 %v4855_v41  ;;  %v4947_v40 = vld [vmem:[%s6845_s1 + $0xaa8] ss:$16 sps:$4 sm:$0xff]   ;;  %v4952_v41 = vld [vmem:[%s6845_s1 + $0xac4] ss:$16 sps:$4 sm:$0xff]  }
 0x11c   :  { %3350 = vmatprep.subr.bf16.mxu0 %v4860_v42  ;;  %3678 = vmatprep.subr.bf16.mxu1 %v4863_v43  ;;  %v4955_v42 = vld [vmem:[%s6845_s1 + $0xacc] ss:$16 sps:$4 sm:$0xff]   ;;  %v4950_v43 = vld [vmem:[%s6845_s1 + $0xac0] ss:$16 sps:$4 sm:$0xff]  }
 0x11f   :  { %3351 = vmatpush1.bf16.msra.mxu0 %v4858_v44  ;;  %3679 = vmatpush1.bf16.msra.mxu1 %v4861_v45  ;;  %v4953_v44 = vld [vmem:[%s6845_s1 + $0xac8] ss:$16 sps:$4 sm:$0xff]   ;;  %v4958_v45 = vld [vmem:[%s6845_s1 + $0xae4] ss:$16 sps:$4 sm:$0xff]  }
 0x120   :  { %3352 = vmatprep.subr.bf16.mxu0 %v4866_v46  ;;  %3680 = vmatprep.subr.bf16.mxu1 %v4869_v47  ;;  %v4961_v46 = vld [vmem:[%s6845_s1 + $0xaec] ss:$16 sps:$4 sm:$0xff]   ;;  %v4956_v47 = vld [vmem:[%s6845_s1 + $0xae0] ss:$16 sps:$4 sm:$0xff]  }
 0x123   :  { %3353 = vmatpush1.bf16.msra.mxu0 %v4864_v48  ;;  %3681 = vmatpush1.bf16.msra.mxu1 %v4867_v49  ;;  %v4959_v48 = vld [vmem:[%s6845_s1 + $0xae8] ss:$16 sps:$4 sm:$0xff]   ;;  %v4964_v49 = vld [vmem:[%s6845_s1 + $0xb04] ss:$16 sps:$4 sm:$0xff]  }
 0x124   :  { %3354 = vmatprep.subr.bf16.mxu0 %v4872_v50  ;;  %3682 = vmatprep.subr.bf16.mxu1 %v4875_v51  ;;  %v4967_v50 = vld [vmem:[%s6845_s1 + $0xb0c] ss:$16 sps:$4 sm:$0xff]   ;;  %v4962_v51 = vld [vmem:[%s6845_s1 + $0xb00] ss:$16 sps:$4 sm:$0xff]  }
 0x127   :  { %3355 = vmatpush1.bf16.msra.mxu0 %v4870_v52  ;;  %3683 = vmatpush1.bf16.msra.mxu1 %v4873_v53  ;;  %v4965_v52 = vld [vmem:[%s6845_s1 + $0xb08] ss:$16 sps:$4 sm:$0xff]   ;;  %v4970_v53 = vld [vmem:[%s6845_s1 + $0xb24] ss:$16 sps:$4 sm:$0xff]  }
 0x128   :  { %3356 = vmatprep.subr.bf16.mxu0 %v4878_v54  ;;  %3684 = vmatprep.subr.bf16.mxu1 %v4881_v55  ;;  %v4973_v54 = vld [vmem:[%s6845_s1 + $0xb2c] ss:$16 sps:$4 sm:$0xff]   ;;  %v4968_v55 = vld [vmem:[%s6845_s1 + $0xb20] ss:$16 sps:$4 sm:$0xff]  }
 0x12b   :  { %3357 = vmatpush1.bf16.msra.mxu0 %v4876_v56  ;;  %3685 = vmatpush1.bf16.msra.mxu1 %v4879_v57  ;;  %v4971_v56 = vld [vmem:[%s6845_s1 + $0xb28] ss:$16 sps:$4 sm:$0xff]   ;;  %v4976_v57 = vld [vmem:[%s6845_s1 + $0xb44] ss:$16 sps:$4 sm:$0xff]  }
 0x12c   :  { %3358 = vmatprep.subr.bf16.mxu0 %v4884_v58  ;;  %3686 = vmatprep.subr.bf16.mxu1 %v4887_v59  ;;  %v4979_v58 = vld [vmem:[%s6845_s1 + $0xb4c] ss:$16 sps:$4 sm:$0xff]   ;;  %v4974_v59 = vld [vmem:[%s6845_s1 + $0xb40] ss:$16 sps:$4 sm:$0xff]  }
 0x12f   :  { %3359 = vmatpush1.bf16.msra.mxu0 %v4882_v60  ;;  %3687 = vmatpush1.bf16.msra.mxu1 %v4885_v61  ;;  %v4977_v60 = vld [vmem:[%s6845_s1 + $0xb48] ss:$16 sps:$4 sm:$0xff]   ;;  %v4982_v61 = vld [vmem:[%s6845_s1 + $0xb64] ss:$16 sps:$4 sm:$0xff]  }
 0x130   :  { %3360 = vmatprep.subr.bf16.mxu0 %v4890_v62  ;;  %3688 = vmatprep.subr.bf16.mxu1 %v4893_v63  ;;  %v4985_v62 = vld [vmem:[%s6845_s1 + $0xb6c] ss:$16 sps:$4 sm:$0xff]   ;;  %v4980_v63 = vld [vmem:[%s6845_s1 + $0xb60] ss:$16 sps:$4 sm:$0xff]  }
 0x133   :  { %3361 = vmatpush1.bf16.msra.mxu0 %v4888_v0  ;;  %3689 = vmatpush1.bf16.msra.mxu1 %v4891_v1  ;;  %v4983_v0 = vld [vmem:[%s6845_s1 + $0xb68] ss:$16 sps:$4 sm:$0xff]   ;;  %v4988_v1 = vld [vmem:[%s6845_s1 + $0xb84] ss:$16 sps:$4 sm:$0xff]  }
 0x134   :  { %3362 = vmatprep.subr.bf16.mxu0 %v4896_v2  ;;  %3690 = vmatprep.subr.bf16.mxu1 %v4899_v3  ;;  %v4991_v2 = vld [vmem:[%s6845_s1 + $0xb8c] ss:$16 sps:$4 sm:$0xff]   ;;  %v4986_v3 = vld [vmem:[%s6845_s1 + $0xb80] ss:$16 sps:$4 sm:$0xff]  }
 0x137   :  { %3363 = vmatpush1.bf16.msra.mxu0 %v4894_v4  ;;  %3691 = vmatpush1.bf16.msra.mxu1 %v4897_v5  ;;  %v4989_v4 = vld [vmem:[%s6845_s1 + $0xb88] ss:$16 sps:$4 sm:$0xff]   ;;  %v4994_v5 = vld [vmem:[%s6845_s1 + $0xba4] ss:$16 sps:$4 sm:$0xff]  }
 0x138   :  { %3364 = vmatprep.subr.bf16.mxu0 %v4902_v6  ;;  %3692 = vmatprep.subr.bf16.mxu1 %v4905_v7  ;;  %v4997_v6 = vld [vmem:[%s6845_s1 + $0xbac] ss:$16 sps:$4 sm:$0xff]   ;;  %v4992_v7 = vld [vmem:[%s6845_s1 + $0xba0] ss:$16 sps:$4 sm:$0xff]  }
 0x13b   :  { %3365 = vmatpush1.bf16.msra.mxu0 %v4900_v8  ;;  %3693 = vmatpush1.bf16.msra.mxu1 %v4903_v9  ;;  %v4995_v8 = vld [vmem:[%s6845_s1 + $0xba8] ss:$16 sps:$4 sm:$0xff]   ;;  %v5000_v9 = vld [vmem:[%s6845_s1 + $0xbc4] ss:$16 sps:$4 sm:$0xff]  }
 0x13c   :  { %3366 = vmatprep.subr.bf16.mxu0 %v4908_v10  ;;  %3694 = vmatprep.subr.bf16.mxu1 %v4911_v12  ;;  %v5003_v10 = vld [vmem:[%s6845_s1 + $0xbcc] ss:$16 sps:$4 sm:$0xff]   ;;  %v4998_v12 = vld [vmem:[%s6845_s1 + $0xbc0] ss:$16 sps:$4 sm:$0xff]  }
 0x13f   :  { %3367 = vmatpush1.bf16.msra.mxu0 %v4906_v13  ;;  %3695 = vmatpush1.bf16.msra.mxu1 %v4909_v15  ;;  %v5001_v13 = vld [vmem:[%s6845_s1 + $0xbc8] ss:$16 sps:$4 sm:$0xff]   ;;  %v5006_v15 = vld [vmem:[%s6845_s1 + $0xbe4] ss:$16 sps:$4 sm:$0xff]  }
 0x140   :  { %3377 = vmatprep.subr.bf16.mxu0 %v4916_v11  ;;  %3705 = vmatprep.subr.bf16.mxu1 %v4919_v17  ;;  %v5009_v11 = vld [vmem:[%s6845_s1 + $0xbec] ss:$16 sps:$4 sm:$0xff]   ;;  %v5004_v17 = vld [vmem:[%s6845_s1 + $0xbe0] ss:$16 sps:$4 sm:$0xff]  }
 0x142   :  { %3369 = vmatmul.mubr.bf16.vlgmr.msra.gmra.mrb[0].mxu0 %v3844_v14  ;;  %3697 = vmatmul.mubr.bf16.vlgmr.msra.gmra.mrb[0].mxu1 %v3844_v14  ;;  %v5007_v14 = vld [vmem:[%s6845_s1 + $0xbe8] ss:$16 sps:$4 sm:$0xff]  }
 0x143   :  { %3378 = vmatpush1.bf16.msra.mxu0 %v4914_v19  ;;  %3706 = vmatpush1.bf16.msra.mxu1 %v4917_v20  ;;  %v5014_v19 = vld [vmem:[%s6845_s1 + $0xc04] ss:$16 sps:$4 sm:$0xff]   ;;  %v5017_v20 = vld [vmem:[%s6845_s1 + $0xc0c] ss:$16 sps:$4 sm:$0xff]  }
 0x144   :  { %3379 = vmatprep.subr.bf16.mxu0 %v4922_v21  ;;  %3707 = vmatprep.subr.bf16.mxu1 %v4925_v16  ;;  %v3846_v21 = vcombine.low %v6234_v18, %v6234_v18  ;;  %v6437_v16 = vld [vmem:[%s6846_s0 + $0x30] sm:$0xff] }
 0x145   :  { %3409 = vmatprep.mubr.bf16.mxu0 %v3847_v22  ;;  %3737 = vmatprep.mubr.bf16.mxu1 %v3847_v22  ;;  %v5012_v22 = vld [vmem:[%s6845_s1 + $0xc00] ss:$16 sps:$4 sm:$0xff]   ;;  %v5020_v18 = vld [vmem:[%s6845_s1 + $0xc24] ss:$16 sps:$4 sm:$0xff]  }
 0x147   :  { %3380 = vmatpush1.bf16.msra.mxu0 %v4920_v23  ;;  %3708 = vmatpush1.bf16.msra.mxu1 %v4923_v24  ;;  %v5015_v23 = vld [vmem:[%s6845_s1 + $0xc08] ss:$16 sps:$4 sm:$0xff]   ;;  %v5023_v24 = vld [vmem:[%s6845_s1 + $0xc2c] ss:$16 sps:$4 sm:$0xff]  }
 0x148   :  { %3381 = vmatprep.subr.bf16.mxu0 %v4928_v25  ;;  %3709 = vmatprep.subr.bf16.mxu1 %v4931_v26  ;;  %v3849_v25 = vcombine.high %v6437_v16, %v6437_v16  ;;  %v5018_v26 = vld [vmem:[%s6845_s1 + $0xc20] ss:$16 sps:$4 sm:$0xff]  }
 0x14b   :  { %3382 = vmatpush1.bf16.msra.mxu0 %v4926_v27  ;;  %3710 = vmatpush1.bf16.msra.mxu1 %v4929_v28  ;;  %v5021_v27 = vld [vmem:[%s6845_s1 + $0xc28] ss:$16 sps:$4 sm:$0xff]   ;;  %v5026_v28 = vld [vmem:[%s6845_s1 + $0xc44] ss:$16 sps:$4 sm:$0xff]  }
 0x14c   :  { %3383 = vmatprep.subr.bf16.mxu0 %v4934_v29  ;;  %3711 = vmatprep.subr.bf16.mxu1 %v4937_v30  ;;  %v5029_v29 = vld [vmem:[%s6845_s1 + $0xc4c] ss:$16 sps:$4 sm:$0xff]   ;;  %v5024_v30 = vld [vmem:[%s6845_s1 + $0xc40] ss:$16 sps:$4 sm:$0xff]  }
 0x14f   :  { %3384 = vmatpush1.bf16.msra.mxu0 %v4932_v31  ;;  %3712 = vmatpush1.bf16.msra.mxu1 %v4935_v32  ;;  %v5027_v31 = vld [vmem:[%s6845_s1 + $0xc48] ss:$16 sps:$4 sm:$0xff]   ;;  %v5032_v32 = vld [vmem:[%s6845_s1 + $0xc64] ss:$16 sps:$4 sm:$0xff]  }
 0x150   :  { %3385 = vmatprep.subr.bf16.mxu0 %v4940_v33  ;;  %3713 = vmatprep.subr.bf16.mxu1 %v4943_v34  ;;  %v5035_v33 = vld [vmem:[%s6845_s1 + $0xc6c] ss:$16 sps:$4 sm:$0xff]   ;;  %v5030_v34 = vld [vmem:[%s6845_s1 + $0xc60] ss:$16 sps:$4 sm:$0xff]  }
 0x153   :  { %3386 = vmatpush1.bf16.msra.mxu0 %v4938_v35  ;;  %3714 = vmatpush1.bf16.msra.mxu1 %v4941_v36  ;;  %v5033_v35 = vld [vmem:[%s6845_s1 + $0xc68] ss:$16 sps:$4 sm:$0xff]   ;;  %v5038_v36 = vld [vmem:[%s6845_s1 + $0xc84] ss:$16 sps:$4 sm:$0xff]  }
 0x154   :  { %3387 = vmatprep.subr.bf16.mxu0 %v4946_v37  ;;  %3715 = vmatprep.subr.bf16.mxu1 %v4949_v38  ;;  %v5041_v37 = vld [vmem:[%s6845_s1 + $0xc8c] ss:$16 sps:$4 sm:$0xff]   ;;  %v5036_v38 = vld [vmem:[%s6845_s1 + $0xc80] ss:$16 sps:$4 sm:$0xff]  }
 0x157   :  { %3388 = vmatpush1.bf16.msra.mxu0 %v4944_v39  ;;  %3716 = vmatpush1.bf16.msra.mxu1 %v4947_v40  ;;  %v5039_v39 = vld [vmem:[%s6845_s1 + $0xc88] ss:$16 sps:$4 sm:$0xff]   ;;  %v5044_v40 = vld [vmem:[%s6845_s1 + $0xca4] ss:$16 sps:$4 sm:$0xff]  }
 0x158   :  { %3389 = vmatprep.subr.bf16.mxu0 %v4952_v41  ;;  %3717 = vmatprep.subr.bf16.mxu1 %v4955_v42  ;;  %v5047_v41 = vld [vmem:[%s6845_s1 + $0xcac] ss:$16 sps:$4 sm:$0xff]   ;;  %v5042_v42 = vld [vmem:[%s6845_s1 + $0xca0] ss:$16 sps:$4 sm:$0xff]  }
 0x15b   :  { %3390 = vmatpush1.bf16.msra.mxu0 %v4950_v43  ;;  %3718 = vmatpush1.bf16.msra.mxu1 %v4953_v44  ;;  %v5045_v43 = vld [vmem:[%s6845_s1 + $0xca8] ss:$16 sps:$4 sm:$0xff]   ;;  %v5050_v44 = vld [vmem:[%s6845_s1 + $0xcc4] ss:$16 sps:$4 sm:$0xff]  }
 0x15c   :  { %3391 = vmatprep.subr.bf16.mxu0 %v4958_v45  ;;  %3719 = vmatprep.subr.bf16.mxu1 %v4961_v46  ;;  %v5053_v45 = vld [vmem:[%s6845_s1 + $0xccc] ss:$16 sps:$4 sm:$0xff]   ;;  %v5048_v46 = vld [vmem:[%s6845_s1 + $0xcc0] ss:$16 sps:$4 sm:$0xff]  }
 0x15f   :  { %3392 = vmatpush1.bf16.msra.mxu0 %v4956_v47  ;;  %3720 = vmatpush1.bf16.msra.mxu1 %v4959_v48  ;;  %v5051_v47 = vld [vmem:[%s6845_s1 + $0xcc8] ss:$16 sps:$4 sm:$0xff]   ;;  %v5056_v48 = vld [vmem:[%s6845_s1 + $0xce4] ss:$16 sps:$4 sm:$0xff]  }
 0x160   :  { %3393 = vmatprep.subr.bf16.mxu0 %v4964_v49  ;;  %3721 = vmatprep.subr.bf16.mxu1 %v4967_v50  ;;  %v5059_v49 = vld [vmem:[%s6845_s1 + $0xcec] ss:$16 sps:$4 sm:$0xff]   ;;  %v5054_v50 = vld [vmem:[%s6845_s1 + $0xce0] ss:$16 sps:$4 sm:$0xff]  }
 0x163   :  { %3394 = vmatpush1.bf16.msra.mxu0 %v4962_v51  ;;  %3722 = vmatpush1.bf16.msra.mxu1 %v4965_v52  ;;  %v5057_v51 = vld [vmem:[%s6845_s1 + $0xce8] ss:$16 sps:$4 sm:$0xff]   ;;  %v5062_v52 = vld [vmem:[%s6845_s1 + $0xd04] ss:$16 sps:$4 sm:$0xff]  }
 0x164   :  { %3395 = vmatprep.subr.bf16.mxu0 %v4970_v53  ;;  %3723 = vmatprep.subr.bf16.mxu1 %v4973_v54  ;;  %v5065_v53 = vld [vmem:[%s6845_s1 + $0xd0c] ss:$16 sps:$4 sm:$0xff]   ;;  %v5060_v54 = vld [vmem:[%s6845_s1 + $0xd00] ss:$16 sps:$4 sm:$0xff]  }
 0x167   :  { %3396 = vmatpush1.bf16.msra.mxu0 %v4968_v55  ;;  %3724 = vmatpush1.bf16.msra.mxu1 %v4971_v56  ;;  %v5063_v55 = vld [vmem:[%s6845_s1 + $0xd08] ss:$16 sps:$4 sm:$0xff]   ;;  %v5068_v56 = vld [vmem:[%s6845_s1 + $0xd24] ss:$16 sps:$4 sm:$0xff]  }
 0x168   :  { %3397 = vmatprep.subr.bf16.mxu0 %v4976_v57  ;;  %3725 = vmatprep.subr.bf16.mxu1 %v4979_v58  ;;  %v5071_v57 = vld [vmem:[%s6845_s1 + $0xd2c] ss:$16 sps:$4 sm:$0xff]   ;;  %v5066_v58 = vld [vmem:[%s6845_s1 + $0xd20] ss:$16 sps:$4 sm:$0xff]  }
 0x16b   :  { %3398 = vmatpush1.bf16.msra.mxu0 %v4974_v59  ;;  %3726 = vmatpush1.bf16.msra.mxu1 %v4977_v60  ;;  %v5069_v59 = vld [vmem:[%s6845_s1 + $0xd28] ss:$16 sps:$4 sm:$0xff]   ;;  %v5074_v60 = vld [vmem:[%s6845_s1 + $0xd44] ss:$16 sps:$4 sm:$0xff]  }
 0x16c   :  { %3399 = vmatprep.subr.bf16.mxu0 %v4982_v61  ;;  %3727 = vmatprep.subr.bf16.mxu1 %v4985_v62  ;;  %v5077_v61 = vld [vmem:[%s6845_s1 + $0xd4c] ss:$16 sps:$4 sm:$0xff]   ;;  %v5072_v62 = vld [vmem:[%s6845_s1 + $0xd40] ss:$16 sps:$4 sm:$0xff]  }
 0x16f   :  { %3400 = vmatpush1.bf16.msra.mxu0 %v4980_v63  ;;  %3728 = vmatpush1.bf16.msra.mxu1 %v4983_v0  ;;  %v5075_v63 = vld [vmem:[%s6845_s1 + $0xd48] ss:$16 sps:$4 sm:$0xff]   ;;  %v5080_v0 = vld [vmem:[%s6845_s1 + $0xd64] ss:$16 sps:$4 sm:$0xff]  }
 0x170   :  { %3401 = vmatprep.subr.bf16.mxu0 %v4988_v1  ;;  %3729 = vmatprep.subr.bf16.mxu1 %v4991_v2  ;;  %v5083_v1 = vld [vmem:[%s6845_s1 + $0xd6c] ss:$16 sps:$4 sm:$0xff]   ;;  %v5078_v2 = vld [vmem:[%s6845_s1 + $0xd60] ss:$16 sps:$4 sm:$0xff]  }
 0x173   :  { %3402 = vmatpush1.bf16.msra.mxu0 %v4986_v3  ;;  %3730 = vmatpush1.bf16.msra.mxu1 %v4989_v4  ;;  %v5081_v3 = vld [vmem:[%s6845_s1 + $0xd68] ss:$16 sps:$4 sm:$0xff]   ;;  %v5086_v4 = vld [vmem:[%s6845_s1 + $0xd84] ss:$16 sps:$4 sm:$0xff]  }
 0x174   :  { %3403 = vmatprep.subr.bf16.mxu0 %v4994_v5  ;;  %3731 = vmatprep.subr.bf16.mxu1 %v4997_v6  ;;  %v5089_v5 = vld [vmem:[%s6845_s1 + $0xd8c] ss:$16 sps:$4 sm:$0xff]   ;;  %v5084_v6 = vld [vmem:[%s6845_s1 + $0xd80] ss:$16 sps:$4 sm:$0xff]  }
 0x177   :  { %3404 = vmatpush1.bf16.msra.mxu0 %v4992_v7  ;;  %3732 = vmatpush1.bf16.msra.mxu1 %v4995_v8  ;;  %v5087_v7 = vld [vmem:[%s6845_s1 + $0xd88] ss:$16 sps:$4 sm:$0xff]   ;;  %v5092_v8 = vld [vmem:[%s6845_s1 + $0xda4] ss:$16 sps:$4 sm:$0xff]  }
 0x178   :  { %3405 = vmatprep.subr.bf16.mxu0 %v5000_v9  ;;  %3733 = vmatprep.subr.bf16.mxu1 %v5003_v10  ;;  %v5095_v9 = vld [vmem:[%s6845_s1 + $0xdac] ss:$16 sps:$4 sm:$0xff]   ;;  %v5090_v10 = vld [vmem:[%s6845_s1 + $0xda0] ss:$16 sps:$4 sm:$0xff]  }
 0x17b   :  { %3406 = vmatpush1.bf16.msra.mxu0 %v4998_v12  ;;  %3734 = vmatpush1.bf16.msra.mxu1 %v5001_v13  ;;  %v5093_v12 = vld [vmem:[%s6845_s1 + $0xda8] ss:$16 sps:$4 sm:$0xff]   ;;  %v5098_v13 = vld [vmem:[%s6845_s1 + $0xdc4] ss:$16 sps:$4 sm:$0xff]  }
 0x17c   :  { %3407 = vmatprep.subr.bf16.mxu0 %v5006_v15  ;;  %3735 = vmatprep.subr.bf16.mxu1 %v5009_v11  ;;  %v5101_v15 = vld [vmem:[%s6845_s1 + $0xdcc] ss:$16 sps:$4 sm:$0xff]   ;;  %v5096_v11 = vld [vmem:[%s6845_s1 + $0xdc0] ss:$16 sps:$4 sm:$0xff]  }
 0x17f   :  { %3408 = vmatpush1.bf16.msra.mxu0 %v5004_v17  ;;  %3736 = vmatpush1.bf16.msra.mxu1 %v5007_v14  ;;  %v5099_v17 = vld [vmem:[%s6845_s1 + $0xdc8] ss:$16 sps:$4 sm:$0xff]   ;;  %v5104_v14 = vld [vmem:[%s6845_s1 + $0xde4] ss:$16 sps:$4 sm:$0xff]  }
 0x180   :  { %3418 = vmatprep.subr.bf16.mxu0 %v5014_v19  ;;  %3746 = vmatprep.subr.bf16.mxu1 %v5017_v20  ;;  %v5107_v19 = vld [vmem:[%s6845_s1 + $0xdec] ss:$16 sps:$4 sm:$0xff]   ;;  %v5102_v20 = vld [vmem:[%s6845_s1 + $0xde0] ss:$16 sps:$4 sm:$0xff]  }
 0x182   :  { %3410 = vmatmul.mubr.bf16.vlgmr.msra.gmra.mrb[0].mxu0 %v3846_v21  ;;  %3738 = vmatmul.mubr.bf16.vlgmr.msra.gmra.mrb[0].mxu1 %v3846_v21  ;;  %v5105_v21 = vld [vmem:[%s6845_s1 + $0xde8] ss:$16 sps:$4 sm:$0xff]  }
 0x183   :  { %3419 = vmatpush1.bf16.msra.mxu0 %v5012_v22  ;;  %3747 = vmatpush1.bf16.msra.mxu1 %v5015_v23  ;;  %v5112_v22 = vld [vmem:[%s6845_s1 + $0xe04] ss:$16 sps:$4 sm:$0xff]   ;;  %v5115_v23 = vld [vmem:[%s6845_s1 + $0xe0c] ss:$16 sps:$4 sm:$0xff]  }
 0x184   :  { %3420 = vmatprep.subr.bf16.mxu0 %v5020_v18  ;;  %3748 = vmatprep.subr.bf16.mxu1 %v5023_v24  ;;  %v3848_v18 = vcombine.low %v6437_v16, %v6437_v16  ;;  %v6638_v24 = vld [vmem:[%s6846_s0 + $0x38] sm:$0xff]  ;;  %v5118_v16 = vld [vmem:[%s6845_s1 + $0xe24] ss:$16 sps:$4 sm:$0xff]  }
 0x185   :  { %3450 = vmatprep.mubr.bf16.mxu0 %v3849_v25  ;;  %3778 = vmatprep.mubr.bf16.mxu1 %v3849_v25  ;;  %v5110_v25 = vld [vmem:[%s6845_s1 + $0xe00] ss:$16 sps:$4 sm:$0xff]  }
 0x187   :  { %3421 = vmatpush1.bf16.msra.mxu0 %v5018_v26  ;;  %3749 = vmatpush1.bf16.msra.mxu1 %v5021_v27  ;;  %v5113_v26 = vld [vmem:[%s6845_s1 + $0xe08] ss:$16 sps:$4 sm:$0xff]   ;;  %v5121_v27 = vld [vmem:[%s6845_s1 + $0xe2c] ss:$16 sps:$4 sm:$0xff]  }
 0x188   :  { %3422 = vmatprep.subr.bf16.mxu0 %v5026_v28  ;;  %3750 = vmatprep.subr.bf16.mxu1 %v5029_v29  ;;  %v3851_v28 = vcombine.high %v6638_v24, %v6638_v24  ;;  %v5116_v29 = vld [vmem:[%s6845_s1 + $0xe20] ss:$16 sps:$4 sm:$0xff]  }
 0x18b   :  { %3423 = vmatpush1.bf16.msra.mxu0 %v5024_v30  ;;  %3751 = vmatpush1.bf16.msra.mxu1 %v5027_v31  ;;  %v5119_v30 = vld [vmem:[%s6845_s1 + $0xe28] ss:$16 sps:$4 sm:$0xff]   ;;  %v5124_v31 = vld [vmem:[%s6845_s1 + $0xe44] ss:$16 sps:$4 sm:$0xff]  }
 0x18c   :  { %3424 = vmatprep.subr.bf16.mxu0 %v5032_v32  ;;  %3752 = vmatprep.subr.bf16.mxu1 %v5035_v33  ;;  %v5127_v32 = vld [vmem:[%s6845_s1 + $0xe4c] ss:$16 sps:$4 sm:$0xff]   ;;  %v5122_v33 = vld [vmem:[%s6845_s1 + $0xe40] ss:$16 sps:$4 sm:$0xff]  }
 0x18f   :  { %3425 = vmatpush1.bf16.msra.mxu0 %v5030_v34  ;;  %3753 = vmatpush1.bf16.msra.mxu1 %v5033_v35  ;;  %v5125_v34 = vld [vmem:[%s6845_s1 + $0xe48] ss:$16 sps:$4 sm:$0xff]   ;;  %v5130_v35 = vld [vmem:[%s6845_s1 + $0xe64] ss:$16 sps:$4 sm:$0xff]  }
 0x190   :  { %3426 = vmatprep.subr.bf16.mxu0 %v5038_v36  ;;  %3754 = vmatprep.subr.bf16.mxu1 %v5041_v37  ;;  %v5133_v36 = vld [vmem:[%s6845_s1 + $0xe6c] ss:$16 sps:$4 sm:$0xff]   ;;  %v5128_v37 = vld [vmem:[%s6845_s1 + $0xe60] ss:$16 sps:$4 sm:$0xff]  }
 0x193   :  { %3427 = vmatpush1.bf16.msra.mxu0 %v5036_v38  ;;  %3755 = vmatpush1.bf16.msra.mxu1 %v5039_v39  ;;  %v5131_v38 = vld [vmem:[%s6845_s1 + $0xe68] ss:$16 sps:$4 sm:$0xff]   ;;  %v5136_v39 = vld [vmem:[%s6845_s1 + $0xe84] ss:$16 sps:$4 sm:$0xff]  }
 0x194   :  { %3428 = vmatprep.subr.bf16.mxu0 %v5044_v40  ;;  %3756 = vmatprep.subr.bf16.mxu1 %v5047_v41  ;;  %v5139_v40 = vld [vmem:[%s6845_s1 + $0xe8c] ss:$16 sps:$4 sm:$0xff]   ;;  %v5134_v41 = vld [vmem:[%s6845_s1 + $0xe80] ss:$16 sps:$4 sm:$0xff]  }
 0x197   :  { %3429 = vmatpush1.bf16.msra.mxu0 %v5042_v42  ;;  %3757 = vmatpush1.bf16.msra.mxu1 %v5045_v43  ;;  %v5137_v42 = vld [vmem:[%s6845_s1 + $0xe88] ss:$16 sps:$4 sm:$0xff]   ;;  %v5142_v43 = vld [vmem:[%s6845_s1 + $0xea4] ss:$16 sps:$4 sm:$0xff]  }
 0x198   :  { %3430 = vmatprep.subr.bf16.mxu0 %v5050_v44  ;;  %3758 = vmatprep.subr.bf16.mxu1 %v5053_v45  ;;  %v5145_v44 = vld [vmem:[%s6845_s1 + $0xeac] ss:$16 sps:$4 sm:$0xff]   ;;  %v5140_v45 = vld [vmem:[%s6845_s1 + $0xea0] ss:$16 sps:$4 sm:$0xff]  }
 0x19b   :  { %3431 = vmatpush1.bf16.msra.mxu0 %v5048_v46  ;;  %3759 = vmatpush1.bf16.msra.mxu1 %v5051_v47  ;;  %v5143_v46 = vld [vmem:[%s6845_s1 + $0xea8] ss:$16 sps:$4 sm:$0xff]   ;;  %v5148_v47 = vld [vmem:[%s6845_s1 + $0xec4] ss:$16 sps:$4 sm:$0xff]  }
 0x19c   :  { %3432 = vmatprep.subr.bf16.mxu0 %v5056_v48  ;;  %3760 = vmatprep.subr.bf16.mxu1 %v5059_v49  ;;  %v5151_v48 = vld [vmem:[%s6845_s1 + $0xecc] ss:$16 sps:$4 sm:$0xff]   ;;  %v5146_v49 = vld [vmem:[%s6845_s1 + $0xec0] ss:$16 sps:$4 sm:$0xff]  }
 0x19f   :  { %3433 = vmatpush1.bf16.msra.mxu0 %v5054_v50  ;;  %3761 = vmatpush1.bf16.msra.mxu1 %v5057_v51  ;;  %v5149_v50 = vld [vmem:[%s6845_s1 + $0xec8] ss:$16 sps:$4 sm:$0xff]   ;;  %v5154_v51 = vld [vmem:[%s6845_s1 + $0xee4] ss:$16 sps:$4 sm:$0xff]  }
 0x1a0   :  { %3434 = vmatprep.subr.bf16.mxu0 %v5062_v52  ;;  %3762 = vmatprep.subr.bf16.mxu1 %v5065_v53  ;;  %v5157_v52 = vld [vmem:[%s6845_s1 + $0xeec] ss:$16 sps:$4 sm:$0xff]   ;;  %v5152_v53 = vld [vmem:[%s6845_s1 + $0xee0] ss:$16 sps:$4 sm:$0xff]  }
 0x1a3   :  { %3435 = vmatpush1.bf16.msra.mxu0 %v5060_v54  ;;  %3763 = vmatpush1.bf16.msra.mxu1 %v5063_v55  ;;  %v5155_v54 = vld [vmem:[%s6845_s1 + $0xee8] ss:$16 sps:$4 sm:$0xff]   ;;  %v5160_v55 = vld [vmem:[%s6845_s1 + $0xf04] ss:$16 sps:$4 sm:$0xff]  }
 0x1a4   :  { %3436 = vmatprep.subr.bf16.mxu0 %v5068_v56  ;;  %3764 = vmatprep.subr.bf16.mxu1 %v5071_v57  ;;  %v5163_v56 = vld [vmem:[%s6845_s1 + $0xf0c] ss:$16 sps:$4 sm:$0xff]   ;;  %v5158_v57 = vld [vmem:[%s6845_s1 + $0xf00] ss:$16 sps:$4 sm:$0xff]  }
 0x1a7   :  { %3437 = vmatpush1.bf16.msra.mxu0 %v5066_v58  ;;  %3765 = vmatpush1.bf16.msra.mxu1 %v5069_v59  ;;  %v5161_v58 = vld [vmem:[%s6845_s1 + $0xf08] ss:$16 sps:$4 sm:$0xff]   ;;  %v5166_v59 = vld [vmem:[%s6845_s1 + $0xf24] ss:$16 sps:$4 sm:$0xff]  }
 0x1a8   :  { %3438 = vmatprep.subr.bf16.mxu0 %v5074_v60  ;;  %3766 = vmatprep.subr.bf16.mxu1 %v5077_v61  ;;  %v5169_v60 = vld [vmem:[%s6845_s1 + $0xf2c] ss:$16 sps:$4 sm:$0xff]   ;;  %v5164_v61 = vld [vmem:[%s6845_s1 + $0xf20] ss:$16 sps:$4 sm:$0xff]  }
 0x1ab   :  { %3439 = vmatpush1.bf16.msra.mxu0 %v5072_v62  ;;  %3767 = vmatpush1.bf16.msra.mxu1 %v5075_v63  ;;  %v5167_v62 = vld [vmem:[%s6845_s1 + $0xf28] ss:$16 sps:$4 sm:$0xff]   ;;  %v5172_v63 = vld [vmem:[%s6845_s1 + $0xf44] ss:$16 sps:$4 sm:$0xff]  }
 0x1ac   :  { %3440 = vmatprep.subr.bf16.mxu0 %v5080_v0  ;;  %3768 = vmatprep.subr.bf16.mxu1 %v5083_v1  ;;  %v5175_v0 = vld [vmem:[%s6845_s1 + $0xf4c] ss:$16 sps:$4 sm:$0xff]   ;;  %v5170_v1 = vld [vmem:[%s6845_s1 + $0xf40] ss:$16 sps:$4 sm:$0xff]  }
 0x1af   :  { %3441 = vmatpush1.bf16.msra.mxu0 %v5078_v2  ;;  %3769 = vmatpush1.bf16.msra.mxu1 %v5081_v3  ;;  %v5173_v2 = vld [vmem:[%s6845_s1 + $0xf48] ss:$16 sps:$4 sm:$0xff]   ;;  %v5178_v3 = vld [vmem:[%s6845_s1 + $0xf64] ss:$16 sps:$4 sm:$0xff]  }
 0x1b0   :  { %3442 = vmatprep.subr.bf16.mxu0 %v5086_v4  ;;  %3770 = vmatprep.subr.bf16.mxu1 %v5089_v5  ;;  %v5181_v4 = vld [vmem:[%s6845_s1 + $0xf6c] ss:$16 sps:$4 sm:$0xff]   ;;  %v5176_v5 = vld [vmem:[%s6845_s1 + $0xf60] ss:$16 sps:$4 sm:$0xff]  }
 0x1b3   :  { %3443 = vmatpush1.bf16.msra.mxu0 %v5084_v6  ;;  %3771 = vmatpush1.bf16.msra.mxu1 %v5087_v7  ;;  %v5179_v6 = vld [vmem:[%s6845_s1 + $0xf68] ss:$16 sps:$4 sm:$0xff]   ;;  %v5184_v7 = vld [vmem:[%s6845_s1 + $0xf84] ss:$16 sps:$4 sm:$0xff]  }
 0x1b4   :  { %3444 = vmatprep.subr.bf16.mxu0 %v5092_v8  ;;  %3772 = vmatprep.subr.bf16.mxu1 %v5095_v9  ;;  %v5187_v8 = vld [vmem:[%s6845_s1 + $0xf8c] ss:$16 sps:$4 sm:$0xff]   ;;  %v5182_v9 = vld [vmem:[%s6845_s1 + $0xf80] ss:$16 sps:$4 sm:$0xff]  }
 0x1b7   :  { %3445 = vmatpush1.bf16.msra.mxu0 %v5090_v10  ;;  %3773 = vmatpush1.bf16.msra.mxu1 %v5093_v12  ;;  %v5185_v10 = vld [vmem:[%s6845_s1 + $0xf88] ss:$16 sps:$4 sm:$0xff]   ;;  %v5190_v12 = vld [vmem:[%s6845_s1 + $0xfa4] ss:$16 sps:$4 sm:$0xff]  }
 0x1b8   :  { %3446 = vmatprep.subr.bf16.mxu0 %v5098_v13  ;;  %3774 = vmatprep.subr.bf16.mxu1 %v5101_v15  ;;  %v5193_v13 = vld [vmem:[%s6845_s1 + $0xfac] ss:$16 sps:$4 sm:$0xff]   ;;  %v5188_v15 = vld [vmem:[%s6845_s1 + $0xfa0] ss:$16 sps:$4 sm:$0xff]  }
 0x1bb   :  { %3447 = vmatpush1.bf16.msra.mxu0 %v5096_v11  ;;  %3775 = vmatpush1.bf16.msra.mxu1 %v5099_v17  ;;  %v5191_v11 = vld [vmem:[%s6845_s1 + $0xfa8] ss:$16 sps:$4 sm:$0xff]   ;;  %v5196_v17 = vld [vmem:[%s6845_s1 + $0xfc4] ss:$16 sps:$4 sm:$0xff]  }
 0x1bc   :  { %3448 = vmatprep.subr.bf16.mxu0 %v5104_v14  ;;  %3776 = vmatprep.subr.bf16.mxu1 %v5107_v19  ;;  %v5199_v14 = vld [vmem:[%s6845_s1 + $0xfcc] ss:$16 sps:$4 sm:$0xff]   ;;  %v5194_v19 = vld [vmem:[%s6845_s1 + $0xfc0] ss:$16 sps:$4 sm:$0xff]  }
 0x1bf   :  { %3449 = vmatpush1.bf16.msra.mxu0 %v5102_v20  ;;  %3777 = vmatpush1.bf16.msra.mxu1 %v5105_v21  ;;  %v5197_v20 = vld [vmem:[%s6845_s1 + $0xfc8] ss:$16 sps:$4 sm:$0xff]   ;;  %v5202_v21 = vld [vmem:[%s6845_s1 + $0xfe4] ss:$16 sps:$4 sm:$0xff]  }
 0x1c0   :  { %3459 = vmatprep.subr.bf16.mxu0 %v5112_v22  ;;  %3787 = vmatprep.subr.bf16.mxu1 %v5115_v23  ;;  %v5205_v22 = vld [vmem:[%s6845_s1 + $0xfec] ss:$16 sps:$4 sm:$0xff]   ;;  %v5200_v23 = vld [vmem:[%s6845_s1 + $0xfe0] ss:$16 sps:$4 sm:$0xff]  }
 0x1c2   :  { %3451 = vmatmul.mubr.bf16.vlgmr.msra.gmra.mrb[0].mxu0 %v3848_v18  ;;  %3779 = vmatmul.mubr.bf16.vlgmr.msra.gmra.mrb[0].mxu1 %v3848_v18  ;;  %v5203_v18 = vld [vmem:[%s6845_s1 + $0xfe8] ss:$16 sps:$4 sm:$0xff]  }
 0x1c3   :  { %3460 = vmatpush1.bf16.msra.mxu0 %v5110_v25  ;;  %3788 = vmatpush1.bf16.msra.mxu1 %v5113_v26  ;;  %v3850_v25 = vcombine.low %v6638_v24, %v6638_v24  ;;  %v536_v26 = vlaneseq }
 0x1c4   :  { %3461 = vmatprep.subr.bf16.mxu0 %v5118_v16  ;;  %3789 = vmatprep.subr.bf16.mxu1 %v5121_v27 }
 0x1c5   :  { %3491 = vmatprep.mubr.bf16.mxu0 %v3851_v28  ;;  %3819 = vmatprep.mubr.bf16.mxu1 %v3851_v28  ;;  %v537_v16 = vshrl.u32 %v536_v26, 7 }
 0x1c7   :  { %3462 = vmatpush1.bf16.msra.mxu0 %v5116_v29  ;;  %3790 = vmatpush1.bf16.msra.mxu1 %v5119_v30  ;;  %v538_v27 = vsub.s32 0, %v537_v16  ;;  %v546_v28 = vsub.s32 2, %v537_v16  ;;  %v534_v29 = vld [vmem:[%s6847_s2] sm:$0xf]  ;;  %v542_v30 = vsub.s32 1, %v537_v16 }
 0x1c8   :  { %3463 = vmatprep.subr.bf16.mxu0 %v5124_v31  ;;  %3791 = vmatprep.subr.bf16.mxu1 %v5127_v32  ;;  %v550_v31 = vsub.s32 3, %v537_v16 }
 0x1c9   :  { %v539_v32 = vrot.slane %v534_v29, %v538_v27 }
 0x1cb   :  { %3464 = vmatpush1.bf16.msra.mxu0 %v5122_v33  ;;  %3792 = vmatpush1.bf16.msra.mxu1 %v5125_v34  ;;  %v547_v33 = vrot.slane %v534_v29, %v546_v28  ;;  %v543_v34 = vrot.slane %v534_v29, %v542_v30 }
 0x1cc   :  { %3465 = vmatprep.subr.bf16.mxu0 %v5130_v35  ;;  %3793 = vmatprep.subr.bf16.mxu1 %v5133_v36  ;;  %v551_v35 = vrot.slane %v534_v29, %v550_v31 }
 0x1cf   :  { %3466 = vmatpush1.bf16.msra.mxu0 %v5128_v37  ;;  %3794 = vmatpush1.bf16.msra.mxu1 %v5131_v38 }
 0x1d0   :  { %3467 = vmatprep.subr.bf16.mxu0 %v5136_v39  ;;  %3795 = vmatprep.subr.bf16.mxu1 %v5139_v40 }
 0x1d3   :  { %3468 = vmatpush1.bf16.msra.mxu0 %v5134_v41  ;;  %3796 = vmatpush1.bf16.msra.mxu1 %v5137_v42 }
 0x1d4   :  { %3469 = vmatprep.subr.bf16.mxu0 %v5142_v43  ;;  %3797 = vmatprep.subr.bf16.mxu1 %v5145_v44 }
 0x1d7   :  { %3470 = vmatpush1.bf16.msra.mxu0 %v5140_v45  ;;  %3798 = vmatpush1.bf16.msra.mxu1 %v5143_v46 }
 0x1d8   :  { %3471 = vmatprep.subr.bf16.mxu0 %v5148_v47  ;;  %3799 = vmatprep.subr.bf16.mxu1 %v5151_v48 }
 0x1db   :  { %3472 = vmatpush1.bf16.msra.mxu0 %v5146_v49  ;;  %3800 = vmatpush1.bf16.msra.mxu1 %v5149_v50 }
 0x1dc   :  { %3473 = vmatprep.subr.bf16.mxu0 %v5154_v51  ;;  %3801 = vmatprep.subr.bf16.mxu1 %v5157_v52 }
 0x1df   :  { %3474 = vmatpush1.bf16.msra.mxu0 %v5152_v53  ;;  %3802 = vmatpush1.bf16.msra.mxu1 %v5155_v54 }
 0x1e0   :  { %3475 = vmatprep.subr.bf16.mxu0 %v5160_v55  ;;  %3803 = vmatprep.subr.bf16.mxu1 %v5163_v56 }
 0x1e3   :  { %3476 = vmatpush1.bf16.msra.mxu0 %v5158_v57  ;;  %3804 = vmatpush1.bf16.msra.mxu1 %v5161_v58 }
 0x1e4   :  { %3477 = vmatprep.subr.bf16.mxu0 %v5166_v59  ;;  %3805 = vmatprep.subr.bf16.mxu1 %v5169_v60 }
 0x1e7   :  { %3478 = vmatpush1.bf16.msra.mxu0 %v5164_v61  ;;  %3806 = vmatpush1.bf16.msra.mxu1 %v5167_v62 }
 0x1e8   :  { %3479 = vmatprep.subr.bf16.mxu0 %v5172_v63  ;;  %3807 = vmatprep.subr.bf16.mxu1 %v5175_v0 }
 0x1eb   :  { %3480 = vmatpush1.bf16.msra.mxu0 %v5170_v1  ;;  %3808 = vmatpush1.bf16.msra.mxu1 %v5173_v2 }
 0x1ec   :  { %3481 = vmatprep.subr.bf16.mxu0 %v5178_v3  ;;  %3809 = vmatprep.subr.bf16.mxu1 %v5181_v4 }
 0x1ef   :  { %3482 = vmatpush1.bf16.msra.mxu0 %v5176_v5  ;;  %3810 = vmatpush1.bf16.msra.mxu1 %v5179_v6 }
 0x1f0   :  { %3483 = vmatprep.subr.bf16.mxu0 %v5184_v7  ;;  %3811 = vmatprep.subr.bf16.mxu1 %v5187_v8 }
 0x1f3   :  { %3484 = vmatpush1.bf16.msra.mxu0 %v5182_v9  ;;  %3812 = vmatpush1.bf16.msra.mxu1 %v5185_v10 }
 0x1f4   :  { %3485 = vmatprep.subr.bf16.mxu0 %v5190_v12  ;;  %3813 = vmatprep.subr.bf16.mxu1 %v5193_v13 }
 0x1f7   :  { %3486 = vmatpush1.bf16.msra.mxu0 %v5188_v15  ;;  %3814 = vmatpush1.bf16.msra.mxu1 %v5191_v11 }
 0x1f8   :  { %3487 = vmatprep.subr.bf16.mxu0 %v5196_v17  ;;  %3815 = vmatprep.subr.bf16.mxu1 %v5199_v14 }
 0x1fb   :  { %3488 = vmatpush1.bf16.msra.mxu0 %v5194_v19  ;;  %3816 = vmatpush1.bf16.msra.mxu1 %v5197_v20 }
 0x1fc   :  { %3489 = vmatprep.subr.bf16.mxu0 %v5202_v21  ;;  %3817 = vmatprep.subr.bf16.mxu1 %v5205_v22 }
 0x1ff   :  { %3490 = vmatpush1.bf16.msra.mxu0 %v5200_v23  ;;  %3818 = vmatpush1.bf16.msra.mxu1 %v5203_v18 }
 0x202   :  { %3492 = vmatmul.mubr.bf16.vlgmr.msra.gmra.mrb[0].mxu0 %v3850_v25  ;;  %3820 = vmatmul.mubr.bf16.vlgmr.msra.gmra.mrb[0].mxu1 %v3850_v25 }
 0x2d5   :  { %v3493_v36 = vpop.f32.mrb[0].mxu0  ;;  %v3821_v24 = vpop.f32.mrb[0].mxu1 }
 0x2d6   :  { %v4364_v37 = vadd.f32 %v3493_v36, %v539_v32  ;;  %v4366_v38 = vadd.f32 %v3821_v24, %v547_v33  ;;  %v3495_v39 = vpop.f32.mrb[1].mxu0  ;;  %v3823_v40 = vpop.f32.mrb[1].mxu1 }
 0x2d7   :  { %v4365_v41 = vadd.f32 %v3495_v39, %v543_v34  ;;  %v4367_v42 = vadd.f32 %v3823_v40, %v551_v35  ;;  %v3497_v43 = vpop.f32.mrb[2].mxu0  ;;  %v3825_v44 = vpop.f32.mrb[2].mxu1 }
 0x2d8   :  { %3828 = vst [vmem:[%s6848_s3] sm:$0xff] %v4364_v37  ;;  %3830 = vst [vmem:[%s6848_s3 + $0x10] sm:$0xff] %v4366_v38  ;;  %v3498_v45 = vpop.f32.mrb[3].mxu0  ;;  %v3826_v46 = vpop.f32.mrb[3].mxu1 }
 0x2d9   :  { %3829 = vst [vmem:[%s6848_s3 + $0x8] sm:$0xff] %v4365_v41  ;;  %3831 = vst [vmem:[%s6848_s3 + $0x18] sm:$0xff] %v4367_v42 }

</bundles_post_ra>
